<compile_context>
chip_gen: v7x
topology: tpu7x:2x2x1
jax: 0.10.0
libtpu: 0.0.40
codegen_flags: <defaults>
</compile_context>

<pallas_src>
import jax
import jax.numpy as jnp
from jax.experimental import pallas as pl
from jax.experimental.pallas import tpu as pltpu

FEAT_DIM = 2048   # ResNet-152 pooled feature dim (self.output_size)
HIDDEN = 512      # regressor hidden width (input_size)


def _fused_kernel(x_ref, wproj_ref, w1_ref, b1_ref, w2t_ref, b2_ref, out_ref):
    B = out_ref.shape[0]
    BHW = x_ref.shape[0]
    HW = BHW // B

    # ---- Backbone stand-in: 1x1 projection (MXU, bf16 in / f32 acc) -> ReLU -> GAP ----
    # x_ref is already channel-last, channel-padded, bf16 (host-prepared): one dot for
    # the whole batch, no per-step transpose/cast/concat.
    z = jnp.dot(x_ref[...], wproj_ref[...],
                preferred_element_type=jnp.float32)          # [B*HW, 2048] f32
    z = jnp.maximum(z, 0.0)
    # Global average pool as a single batched reduction (HW is sublane-aligned, so the
    # reshape is layout-preserving).
    feats = jnp.mean(z.reshape(B, HW, FEAT_DIM), axis=1)     # [B, 2048] f32

    # ---- Regression head ----
    # Linear(2048->512) on the MXU (bf16 operands, f32 accumulate), bias added in f32.
    h = jnp.dot(feats.astype(w1_ref.dtype), w1_ref[...],
                preferred_element_type=jnp.float32) + b1_ref[...]
    h = jnp.maximum(h, 0.0)   # ReLU; Dropout is identity at inference.
    # Linear(512->1) as a VPU multiply + lane reduce (avoids an N=1 MXU pass and a
    # pathological [512,1] VMEM operand); b2 comes from SMEM as a scalar.
    out_ref[...] = (jnp.sum(h * w2t_ref[...], axis=-1, keepdims=True)
                    + b2_ref[0, 0]).astype(out_ref.dtype)


def image_rater_forward_impl(x, w_proj, w1, b1, w2, b2):
    B, C, H, W = x.shape
    HW = H * W
    cpad = max(8, ((C + 7) // 8) * 8)   # derived, not hard-coded (works for any C)

    # Host-side layout prep (cheap XLA ops, done once per call):
    #   NCHW -> channel-last [B*HW, C], zero-pad channels to a sublane, cast to bf16.
    x_cl = jnp.transpose(x.reshape(B, C, HW), (0, 2, 1)).reshape(B * HW, C)
    x_p = jnp.pad(x_cl, ((0, 0), (0, cpad - C))).astype(jnp.bfloat16)
    wproj_p = jnp.pad(w_proj, ((0, cpad - C), (0, 0))).astype(jnp.bfloat16)
    w1_b = w1.astype(jnp.bfloat16)                      # bf16 MXU operand, f32 accumulate
    b1_r = b1.reshape(1, HIDDEN).astype(jnp.float32)
    w2t = w2.reshape(1, HIDDEN).astype(jnp.float32)     # transposed for the VPU reduce
    b2_r = b2.reshape(1, 1).astype(jnp.float32)

    return pl.pallas_call(
        _fused_kernel,
        out_shape=jax.ShapeDtypeStruct((B, 1), jnp.float32),
        grid=(1,),   # single step: everything (x, w_proj, w1, intermediates) fits VMEM
        in_specs=[
            pl.BlockSpec((B * HW, cpad), lambda i: (0, 0)),      # x, channel-last bf16
            pl.BlockSpec((cpad, FEAT_DIM), lambda i: (0, 0)),    # w_proj (full)
            pl.BlockSpec((FEAT_DIM, HIDDEN), lambda i: (0, 0)),  # w1 (full, 2 MiB bf16)
            pl.BlockSpec((1, HIDDEN), lambda i: (0, 0)),         # b1
            pl.BlockSpec((1, HIDDEN), lambda i: (0, 0)),         # w2^T
            pl.BlockSpec(memory_space=pltpu.MemorySpace.SMEM),   # b2 scalar
        ],
        out_specs=pl.BlockSpec((B, 1), lambda i: (0, 0)),
        compiler_params=pltpu.CompilerParams(
            # Total VMEM footprint is ~8 MiB (x + weights + z + pooled reshape copy),
            # well inside the default scoped limit on every generation (incl. v7x's
            # 64 MiB physical), so no vmem_limit override is needed.
            dimension_semantics=("arbitrary",),
        ),
    )(x_p, wproj_p, w1_b, b1_r, w2t, b2_r)


@jax.jit
def image_rater_forward(x, w_proj, w1, b1, w2, b2):
    # TODO(synk): the full pretrained ResNet-152 residual stack has no clean in-script
    # Pallas equivalent; the backbone is a deterministic stand-in (1x1-conv projection
    # -> ReLU -> global avg pool) producing the 2048-d pooled features the real
    # backbone (with fc = Identity) would emit.
    return image_rater_forward_impl(x, w_proj, w1, b1, w2, b2)   # [B, 1]


if __name__ == "__main__":
    key = jax.random.PRNGKey(0)
    kx, kp, k1, kb1, k2, kb2 = jax.random.split(key, 6)

    B, C, H, W = 2, 3, 16, 16
    x = jax.random.normal(kx, (B, C, H, W), jnp.float32)

    # Backbone stand-in projection weights (deterministic, synthetic).
    w_proj = 0.1 * jax.random.normal(kp, (C, FEAT_DIM), jnp.float32)

    # Regressor params, nn.Linear-style uniform(-1/sqrt(fan_in), 1/sqrt(fan_in)).
    lim1 = 1.0 / float(FEAT_DIM) ** 0.5
    w1 = jax.random.uniform(k1, (FEAT_DIM, HIDDEN), jnp.float32, -lim1, lim1)
    b1 = jax.random.uniform(kb1, (HIDDEN,), jnp.float32, -lim1, lim1)
    lim2 = 1.0 / float(HIDDEN) ** 0.5
    w2 = jax.random.uniform(k2, (HIDDEN, 1), jnp.float32, -lim2, lim2)
    b2 = jax.random.uniform(kb2, (1,), jnp.float32, -lim2, lim2)

    out = image_rater_forward(x, w_proj, w1, b1, w2, b2)
    out = jax.block_until_ready(out)
    assert out.shape == (B, 1) and out.dtype == jnp.float32

    print("KERNEL_OK")
</pallas_src>

<mosaic_0001>
module attributes {stable_mosaic.version = 11 : i64} {
  func.func @_fused_kernel(%arg0: i32, %arg1: memref<512x8xbf16, #tpu.memory_space<vmem>>, %arg2: memref<8x2048xbf16, #tpu.memory_space<vmem>>, %arg3: memref<2048x512xbf16, #tpu.memory_space<vmem>>, %arg4: memref<1x512xf32, #tpu.memory_space<vmem>>, %arg5: memref<1x512xf32, #tpu.memory_space<vmem>>, %arg6: memref<1x1xf32, #tpu.memory_space<smem>>, %arg7: memref<2x1xf32, #tpu.memory_space<vmem>>) attributes {dimension_semantics = [#tpu.dimension_semantics<arbitrary>], iteration_bounds = array<i64: 1>, scalar_prefetch = 0 : i64, scratch_operands = 0 : i64, tpu.core_type = #tpu.core_type<tc>, window_params = [{pipeline_mode = #tpu.pipeline_mode<synchronous>, transform_indices = @transform_0, window_bounds = array<i64: 512, 8>}, {pipeline_mode = #tpu.pipeline_mode<synchronous>, transform_indices = @transform_1, window_bounds = array<i64: 8, 2048>}, {pipeline_mode = #tpu.pipeline_mode<synchronous>, transform_indices = @transform_2, window_bounds = array<i64: 2048, 512>}, {pipeline_mode = #tpu.pipeline_mode<synchronous>, transform_indices = @transform_3, window_bounds = array<i64: 1, 512>}, {pipeline_mode = #tpu.pipeline_mode<synchronous>, transform_indices = @transform_4, window_bounds = array<i64: 1, 512>}, {transform_indices = @transform_5, window_bounds = array<i64: 1, 1>}, {pipeline_mode = #tpu.pipeline_mode<synchronous>, transform_indices = @transform_6, window_bounds = array<i64: 2, 1>}]} {
    %c0 = arith.constant 0 : index
    %c0_0 = arith.constant 0 : index
    %0 = vector.load %arg1[%c0, %c0_0] : memref<512x8xbf16, #tpu.memory_space<vmem>>, vector<512x8xbf16>
    %c0_1 = arith.constant 0 : index
    %c0_2 = arith.constant 0 : index
    %1 = vector.load %arg2[%c0_1, %c0_2] : memref<8x2048xbf16, #tpu.memory_space<vmem>>, vector<8x2048xbf16>
    %cst = arith.constant dense<0.000000e+00> : vector<512x2048xf32>
    %2 = tpu.matmul %0, %1, %cst {dimension_numbers = #tpu.dot_dimension_numbers<[1], [0], [0], [1], [0, 0, 1, 1], [], []>} : vector<512x8xbf16>, vector<8x2048xbf16>, vector<512x2048xf32> -> vector<512x2048xf32>
    %cst_3 = arith.constant 0.000000e+00 : f32
    %3 = vector.broadcast %cst_3 : f32 to vector<512x2048xf32>
    %4 = arith.maximumf %2, %3 : vector<512x2048xf32>
    %5 = vector.shape_cast %4 : vector<512x2048xf32> to vector<2x256x2048xf32>
    %cst_4 = arith.constant dense<0.000000e+00> : vector<2x2048xf32>
    %6 = vector.multi_reduction <add>, %5, %cst_4 [1] : vector<2x256x2048xf32> to vector<2x2048xf32>
    %cst_5 = arith.constant 2.560000e+02 : f32
    %7 = vector.broadcast %cst_5 : f32 to vector<2x2048xf32>
    %8 = arith.divf %6, %7 : vector<2x2048xf32>
    %9 = arith.truncf %8 : vector<2x2048xf32> to vector<2x2048xbf16>
    %c0_6 = arith.constant 0 : index
    %c0_7 = arith.constant 0 : index
    %10 = vector.load %arg3[%c0_6, %c0_7] : memref<2048x512xbf16, #tpu.memory_space<vmem>>, vector<2048x512xbf16>
    %cst_8 = arith.constant dense<0.000000e+00> : vector<2x512xf32>
    %11 = tpu.matmul %9, %10, %cst_8 {dimension_numbers = #tpu.dot_dimension_numbers<[1], [0], [0], [1], [0, 0, 1, 1], [], []>} : vector<2x2048xbf16>, vector<2048x512xbf16>, vector<2x512xf32> -> vector<2x512xf32>
    %c0_9 = arith.constant 0 : index
    %c0_10 = arith.constant 0 : index
    %12 = vector.load %arg4[%c0_9, %c0_10] : memref<1x512xf32, #tpu.memory_space<vmem>>, vector<1x512xf32>
    %13 = vector.broadcast %12 : vector<1x512xf32> to vector<2x512xf32>
    %14 = arith.addf %11, %13 : vector<2x512xf32>
    %cst_11 = arith.constant 0.000000e+00 : f32
    %15 = vector.broadcast %cst_11 : f32 to vector<2x512xf32>
    %16 = arith.maximumf %14, %15 : vector<2x512xf32>
    %c0_12 = arith.constant 0 : index
    %c0_13 = arith.constant 0 : index
    %17 = vector.load %arg5[%c0_12, %c0_13] : memref<1x512xf32, #tpu.memory_space<vmem>>, vector<1x512xf32>
    %18 = vector.broadcast %17 : vector<1x512xf32> to vector<2x512xf32>
    %19 = arith.mulf %16, %18 : vector<2x512xf32>
    %cst_14 = arith.constant dense<0.000000e+00> : vector<2xf32>
    %20 = vector.multi_reduction <add>, %19, %cst_14 [1] : vector<2x512xf32> to vector<2xf32>
    %21 = vector.shape_cast %20 : vector<2xf32> to vector<2x1xf32>
    %c0_15 = arith.constant 0 : index
    %c0_16 = arith.constant 0 : index
    %22 = memref.load %arg6[%c0_15, %c0_16] : memref<1x1xf32, #tpu.memory_space<smem>>
    %23 = vector.broadcast %22 : f32 to vector<2x1xf32>
    %24 = arith.addf %21, %23 : vector<2x1xf32>
    %c0_17 = arith.constant 0 : index
    %c0_18 = arith.constant 0 : index
    %25 = vector.load %arg7[%c0_17, %c0_18] : memref<2x1xf32, #tpu.memory_space<vmem>>, vector<2x1xf32>
    tpu.vector_store %arg7[%c0_17, %c0_18], %24 {strides = array<i32>} : memref<2x1xf32, #tpu.memory_space<vmem>>, vector<2x1xf32>,
    return
  }
  func.func @transform_0(%arg0: i32) -> (i32, i32) {
    %c0_i32 = arith.constant 0 : i32
    %c0_i32_0 = arith.constant 0 : i32
    %c0_i32_1 = arith.constant 0 : i32
    return %c0_i32, %c0_i32_0 : i32, i32
  }
  func.func @transform_1(%arg0: i32) -> (i32, i32) {
    %c0_i32 = arith.constant 0 : i32
    %c0_i32_0 = arith.constant 0 : i32
    %c0_i32_1 = arith.constant 0 : i32
    return %c0_i32, %c0_i32_0 : i32, i32
  }
  func.func @transform_2(%arg0: i32) -> (i32, i32) {
    %c0_i32 = arith.constant 0 : i32
    %c0_i32_0 = arith.constant 0 : i32
    %c0_i32_1 = arith.constant 0 : i32
    return %c0_i32, %c0_i32_0 : i32, i32
  }
  func.func @transform_3(%arg0: i32) -> (i32, i32) {
    %c0_i32 = arith.constant 0 : i32
    %c0_i32_0 = arith.constant 0 : i32
    %c0_i32_1 = arith.constant 0 : i32
    return %c0_i32, %c0_i32_0 : i32, i32
  }
  func.func @transform_4(%arg0: i32) -> (i32, i32) {
    %c0_i32 = arith.constant 0 : i32
    %c0_i32_0 = arith.constant 0 : i32
    %c0_i32_1 = arith.constant 0 : i32
    return %c0_i32, %c0_i32_0 : i32, i32
  }
  func.func @transform_5(%arg0: i32) -> (i32, i32) {
    %c0_i32 = arith.constant 0 : i32
    %c0_i32_0 = arith.constant 0 : i32
    %c0_i32_1 = arith.constant 0 : i32
    return %c0_i32, %c0_i32_0 : i32, i32
  }
  func.func @transform_6(%arg0: i32) -> (i32, i32) {
    %c0_i32 = arith.constant 0 : i32
    %c0_i32_0 = arith.constant 0 : i32
    %c0_i32_1 = arith.constant 0 : i32
    return %c0_i32, %c0_i32_0 : i32, i32
  }
}

</mosaic_0001>

<bundles_post_ra>
// kernel: image_rater_forward.1
= control target key start
LH: loop header
LB: loop body
LE: loop exit
PB: predicated region body
PF: predicated region fallthrough
CT: control target
= control target key end

     0   :  { %vm394_vm0 = vcmask 1043456   ;;  %v11240_v2 = vmov 0   ;;  %vm297_vm1 = vcmask 64512   ;;  %vm6138_vm2 = vcmask 1041409   ;;  %s13998_s1 = inlined_call_operand.vmem [shape: bf16[8,2048], index: 1, kind: input, shape index: {}]   ;;  %s13999_s0 = inlined_call_operand.vmem [shape: bf16[512,8], index: 0, kind: input, shape index: {}]   ;;  %s14000_s2 = inlined_call_operand.vmem [shape: bf16[2048,512], index: 2, kind: input, shape index: {}]   ;;  %s14001_s3 = inlined_call_operand.vmem [shape: f32[1,512], index: 3, kind: input, shape index: {}]   ;;  %s14002_s4 = inlined_call_operand.vmem [shape: f32[1,512], index: 4, kind: input, shape index: {}]   ;;  %s14003_s5 = inlined_call_operand.<no memory space> [shape: f32[1,1], index: 5, kind: input, shape index: {}]   ;;  %s14004_s6 = inlined_call_operand.vmem [shape: f32[2,1], index: 6, kind: output, shape index: {}]  }
   0x1   :  { %v89_v0 = vld [vmem:[%s13998_s1] sm:$0xff]  ;;  %v90_v1 = vld [vmem:[%s13998_s1 + $0x8] sm:$0xff]  ;;  %475 = vmatprep.mubr.bf16.mxu0 %v11240_v2  ;;  %828 = vmatprep.mubr.bf16.mxu1 %v11240_v2  ;;  %v91_v7 = vld [vmem:[%s13998_s1 + $0x10] sm:$0xff]  ;;  %vm9433_vm3 = vcmask 1041408   ;;  %vm9446_vm4 = vcmask 1024  }
   0x2   :  { %v9485_v3 = vcombine.high %v89_v0, %v89_v0  ;;  %v9487_v4 = vcombine.high %v90_v1, %v90_v1  ;;  %v9484_v5 = vcombine.low %v89_v0, %v89_v0  ;;  %v9486_v6 = vcombine.low %v90_v1, %v90_v1  ;;  %v92_v10 = vld [vmem:[%s13998_s1 + $0x18] sm:$0xff]  ;;  %v11297_v13 = vld [vmem:[%s13999_s0] sm:$0xff]   ;;  %v11312_v18 = vld [vmem:[%s13999_s0 + $0x8] sm:$0xff]  }
   0x3   :  { %v9489_v8 = vcombine.high %v91_v7, %v91_v7  ;;  %v9488_v9 = vcombine.low %v91_v7, %v91_v7  ;;  %v9491_v14 = vcombine.high %v92_v10, %v92_v10  ;;  %v9490_v15 = vcombine.low %v92_v10, %v92_v10  ;;  %v11323_v19 = vld [vmem:[%s13999_s0 + $0x10] sm:$0xff]   ;;  %v11334_v20 = vld [vmem:[%s13999_s0 + $0x18] sm:$0xff]   ;;  %v11345_v21 = vld [vmem:[%s13999_s0 + $0x20] sm:$0xff]  }
   0x4   :  { %9500 = vmatprep.subr.msk.bf16.mxu0 %vm394_vm0, %v9485_v3  ;;  %9533 = vmatprep.subr.msk.bf16.mxu1 %vm394_vm0, %v9487_v4  ;;  %v396_v11 = vsel %vm394_vm0, %v9484_v5, 0  ;;  %v402_v12 = vsel %vm394_vm0, %v9486_v6, 0  ;;  %v11356_v22 = vld [vmem:[%s13999_s0 + $0x28] sm:$0xff]   ;;  %v11367_v23 = vld [vmem:[%s13999_s0 + $0x30] sm:$0xff]   ;;  %v11378_v24 = vld [vmem:[%s13999_s0 + $0x38] sm:$0xff]  }
   0x5   :  { %444 = vmatpush1.bf16.msra.mxu0 %v396_v11  ;;  %797 = vmatpush1.bf16.msra.mxu1 %v402_v12  ;;  %v408_v16 = vsel %vm394_vm0, %v9488_v9, 0  ;;  %v414_v17 = vsel %vm394_vm0, %v9490_v15, 0  ;;  %v11389_v25 = vld [vmem:[%s13999_s0 + $0x40] sm:$0xff]   ;;  %v10354_v26 = vld [vmem:[%s13999_s0 + $0x48] sm:$0xff]   ;;  %v10355_v27 = vld [vmem:[%s13999_s0 + $0x50] sm:$0xff]  }
   0x6   :  { %9566 = vmatprep.subr.msk.bf16.mxu0 %vm394_vm0, %v9489_v8  ;;  %9599 = vmatprep.subr.msk.bf16.mxu1 %vm394_vm0, %v9491_v14  ;;  %v10356_v28 = vld [vmem:[%s13999_s0 + $0x58] sm:$0xff]   ;;  %v10357_v29 = vld [vmem:[%s13999_s0 + $0x60] sm:$0xff]   ;;  %v10358_v30 = vld [vmem:[%s13999_s0 + $0x68] sm:$0xff]  }
   0x7   :  { %v10359_v31 = vld [vmem:[%s13999_s0 + $0x70] sm:$0xff]   ;;  %v10360_v32 = vld [vmem:[%s13999_s0 + $0x78] sm:$0xff]   ;;  %v10361_v33 = vld [vmem:[%s13999_s0 + $0x80] sm:$0xff]  }
   0x8   :  { %9501 = vmatmul.mubr.msk.bf16.vlgmr.msra.gmra.mrb[0].mxu0 %vm297_vm1, %v11297_v13  ;;  %9534 = vmatmul.mubr.msk.bf16.vlgmr.msra.gmra.mrb[0].mxu1 %vm297_vm1, %v11297_v13  ;;  %v11456_v34 = vld [vmem:[%s13998_s1 + $0x20] sm:$0xff]  ;;  %v10362_v36 = vld [vmem:[%s13999_s0 + $0x88] sm:$0xff]   ;;  %v10363_v39 = vld [vmem:[%s13999_s0 + $0x90] sm:$0xff]  }
   0x9   :  { %1150 = vmatpush1.bf16.msra.mxu0 %v408_v16  ;;  %1503 = vmatpush1.bf16.msra.mxu1 %v414_v17  ;;  %v9493_v35 = vcombine.high %v11456_v34, %v11456_v34  ;;  %v11467_v37 = vld [vmem:[%s13998_s1 + $0x28] sm:$0xff]  ;;  %v10364_v40 = vld [vmem:[%s13999_s0 + $0x98] sm:$0xff]   ;;  %v10365_v41 = vld [vmem:[%s13999_s0 + $0xa0] sm:$0xff]  }
   0xa   :  { %485 = vmatprep.mubr.bf16.mxu0 %v11240_v2  ;;  %838 = vmatprep.mubr.bf16.mxu1 %v11240_v2  ;;  %v9495_v38 = vcombine.high %v11467_v37, %v11467_v37  ;;  %v10366_v42 = vld [vmem:[%s13999_s0 + $0xa8] sm:$0xff]   ;;  %v10367_v43 = vld [vmem:[%s13999_s0 + $0xb0] sm:$0xff]   ;;  %v10368_v44 = vld [vmem:[%s13999_s0 + $0xb8] sm:$0xff]  }
   0xb   :  { %9632 = vmatprep.subr.msk.bf16.mxu0 %vm394_vm0, %v9493_v35  ;;  %v10369_v45 = vld [vmem:[%s13999_s0 + $0xc0] sm:$0xff]   ;;  %v10370_v46 = vld [vmem:[%s13999_s0 + $0xc8] sm:$0xff]   ;;  %v10371_v47 = vld [vmem:[%s13999_s0 + $0xd0] sm:$0xff]  }
   0xc   :  { %9665 = vmatprep.subr.msk.bf16.mxu1 %vm394_vm0, %v9495_v38  ;;  %v10372_v53 = vld [vmem:[%s13999_s0 + $0xd8] sm:$0xff]   ;;  %v10373_v12 = vld [vmem:[%s13999_s0 + $0xe0] sm:$0xff]  }
  0x10   :  { %9502 = vmatmul.mubr.msk.bf16.gmra.mrb[4].mxu0 %vm297_vm1, %v11312_v18  ;;  %9535 = vmatmul.mubr.msk.bf16.gmra.mrb[4].mxu1 %vm297_vm1, %v11312_v18 }
  0x11   :  { %495 = vmatprep.mubr.bf16.mxu0 %v11240_v2  ;;  %848 = vmatprep.mubr.bf16.mxu1 %v11240_v2 }
  0x18   :  { %9503 = vmatmul.mubr.msk.bf16.gmra.mrb[8].mxu0 %vm297_vm1, %v11323_v19  ;;  %9536 = vmatmul.mubr.msk.bf16.gmra.mrb[8].mxu1 %vm297_vm1, %v11323_v19 }
  0x19   :  { %505 = vmatprep.mubr.bf16.mxu0 %v11240_v2  ;;  %858 = vmatprep.mubr.bf16.mxu1 %v11240_v2 }
  0x20   :  { %9504 = vmatmul.mubr.msk.bf16.gmra.mrb[12].mxu0 %vm297_vm1, %v11334_v20  ;;  %9537 = vmatmul.mubr.msk.bf16.gmra.mrb[12].mxu1 %vm297_vm1, %v11334_v20 }
  0x21   :  { %515 = vmatprep.mubr.bf16.mxu0 %v11240_v2  ;;  %868 = vmatprep.mubr.bf16.mxu1 %v11240_v2 }
  0x28   :  { %9505 = vmatmul.mubr.msk.bf16.gmra.mrb[16].mxu0 %vm297_vm1, %v11345_v21  ;;  %9538 = vmatmul.mubr.msk.bf16.gmra.mrb[16].mxu1 %vm297_vm1, %v11345_v21 }
  0x29   :  { %525 = vmatprep.mubr.bf16.mxu0 %v11240_v2  ;;  %878 = vmatprep.mubr.bf16.mxu1 %v11240_v2 }
  0x30   :  { %9506 = vmatmul.mubr.msk.bf16.gmra.mrb[20].mxu0 %vm297_vm1, %v11356_v22  ;;  %9539 = vmatmul.mubr.msk.bf16.gmra.mrb[20].mxu1 %vm297_vm1, %v11356_v22 }
  0x31   :  { %535 = vmatprep.mubr.bf16.mxu0 %v11240_v2  ;;  %888 = vmatprep.mubr.bf16.mxu1 %v11240_v2 }
  0x38   :  { %9507 = vmatmul.mubr.msk.bf16.gmra.mrb[24].mxu0 %vm297_vm1, %v11367_v23  ;;  %9540 = vmatmul.mubr.msk.bf16.gmra.mrb[24].mxu1 %vm297_vm1, %v11367_v23 }
  0x39   :  { %545 = vmatprep.mubr.bf16.mxu0 %v11240_v2  ;;  %898 = vmatprep.mubr.bf16.mxu1 %v11240_v2 }
  0x40   :  { %9508 = vmatmul.mubr.msk.bf16.gmra.mrb[28].mxu0 %vm297_vm1, %v11378_v24  ;;  %9541 = vmatmul.mubr.msk.bf16.gmra.mrb[28].mxu1 %vm297_vm1, %v11378_v24 }
  0x41   :  { %555 = vmatprep.mubr.bf16.mxu0 %v11240_v2  ;;  %908 = vmatprep.mubr.bf16.mxu1 %v11240_v2 }
  0x48   :  { %9509 = vmatmul.mubr.msk.bf16.gmra.mrb[32].mxu0 %vm297_vm1, %v11389_v25  ;;  %9542 = vmatmul.mubr.msk.bf16.gmra.mrb[32].mxu1 %vm297_vm1, %v11389_v25 }
  0x49   :  { %565 = vmatprep.mubr.bf16.mxu0 %v11240_v2  ;;  %918 = vmatprep.mubr.bf16.mxu1 %v11240_v2 }
  0x50   :  { %9510 = vmatmul.mubr.msk.bf16.gmra.mrb[36].mxu0 %vm297_vm1, %v10354_v26  ;;  %9543 = vmatmul.mubr.msk.bf16.gmra.mrb[36].mxu1 %vm297_vm1, %v10354_v26 }
  0x51   :  { %575 = vmatprep.mubr.bf16.mxu0 %v11240_v2  ;;  %928 = vmatprep.mubr.bf16.mxu1 %v11240_v2 }
  0x58   :  { %9511 = vmatmul.mubr.msk.bf16.gmra.mrb[40].mxu0 %vm297_vm1, %v10355_v27  ;;  %9544 = vmatmul.mubr.msk.bf16.gmra.mrb[40].mxu1 %vm297_vm1, %v10355_v27 }
  0x59   :  { %585 = vmatprep.mubr.bf16.mxu0 %v11240_v2  ;;  %938 = vmatprep.mubr.bf16.mxu1 %v11240_v2 }
  0x60   :  { %9512 = vmatmul.mubr.msk.bf16.gmra.mrb[44].mxu0 %vm297_vm1, %v10356_v28  ;;  %9545 = vmatmul.mubr.msk.bf16.gmra.mrb[44].mxu1 %vm297_vm1, %v10356_v28 }
  0x61   :  { %595 = vmatprep.mubr.bf16.mxu0 %v11240_v2  ;;  %948 = vmatprep.mubr.bf16.mxu1 %v11240_v2 }
  0x68   :  { %9513 = vmatmul.mubr.msk.bf16.gmra.mrb[48].mxu0 %vm297_vm1, %v10357_v29  ;;  %9546 = vmatmul.mubr.msk.bf16.gmra.mrb[48].mxu1 %vm297_vm1, %v10357_v29 }
  0x69   :  { %605 = vmatprep.mubr.bf16.mxu0 %v11240_v2  ;;  %958 = vmatprep.mubr.bf16.mxu1 %v11240_v2 }
  0x70   :  { %9514 = vmatmul.mubr.msk.bf16.gmra.mrb[52].mxu0 %vm297_vm1, %v10358_v30  ;;  %9547 = vmatmul.mubr.msk.bf16.gmra.mrb[52].mxu1 %vm297_vm1, %v10358_v30 }
  0x71   :  { %615 = vmatprep.mubr.bf16.mxu0 %v11240_v2  ;;  %968 = vmatprep.mubr.bf16.mxu1 %v11240_v2 }
  0x78   :  { %9515 = vmatmul.mubr.msk.bf16.gmra.mrb[56].mxu0 %vm297_vm1, %v10359_v31  ;;  %9548 = vmatmul.mubr.msk.bf16.gmra.mrb[56].mxu1 %vm297_vm1, %v10359_v31 }
  0x79   :  { %625 = vmatprep.mubr.bf16.mxu0 %v11240_v2  ;;  %978 = vmatprep.mubr.bf16.mxu1 %v11240_v2 }
  0x80   :  { %9516 = vmatmul.mubr.msk.bf16.gmra.mrb[60].mxu0 %vm297_vm1, %v10360_v32  ;;  %9549 = vmatmul.mubr.msk.bf16.gmra.mrb[60].mxu1 %vm297_vm1, %v10360_v32 }
  0x81   :  { %635 = vmatprep.mubr.bf16.mxu0 %v11240_v2  ;;  %988 = vmatprep.mubr.bf16.mxu1 %v11240_v2 }
  0x88   :  { %9517 = vmatmul.mubr.msk.bf16.gmra.mrb[64].mxu0 %vm297_vm1, %v10361_v33  ;;  %9550 = vmatmul.mubr.msk.bf16.gmra.mrb[64].mxu1 %vm297_vm1, %v10361_v33 }
  0x89   :  { %645 = vmatprep.mubr.bf16.mxu0 %v11240_v2  ;;  %998 = vmatprep.mubr.bf16.mxu1 %v11240_v2 }
  0x90   :  { %9518 = vmatmul.mubr.msk.bf16.gmra.mrb[68].mxu0 %vm297_vm1, %v10362_v36  ;;  %9551 = vmatmul.mubr.msk.bf16.gmra.mrb[68].mxu1 %vm297_vm1, %v10362_v36 }
  0x91   :  { %655 = vmatprep.mubr.bf16.mxu0 %v11240_v2  ;;  %1008 = vmatprep.mubr.bf16.mxu1 %v11240_v2 }
  0x98   :  { %9519 = vmatmul.mubr.msk.bf16.gmra.mrb[72].mxu0 %vm297_vm1, %v10363_v39  ;;  %9552 = vmatmul.mubr.msk.bf16.gmra.mrb[72].mxu1 %vm297_vm1, %v10363_v39 }
  0x99   :  { %665 = vmatprep.mubr.bf16.mxu0 %v11240_v2  ;;  %1018 = vmatprep.mubr.bf16.mxu1 %v11240_v2 }
  0xa0   :  { %9520 = vmatmul.mubr.msk.bf16.gmra.mrb[76].mxu0 %vm297_vm1, %v10364_v40  ;;  %9553 = vmatmul.mubr.msk.bf16.gmra.mrb[76].mxu1 %vm297_vm1, %v10364_v40 }
  0xa1   :  { %675 = vmatprep.mubr.bf16.mxu0 %v11240_v2  ;;  %1028 = vmatprep.mubr.bf16.mxu1 %v11240_v2 }
  0xa8   :  { %9521 = vmatmul.mubr.msk.bf16.gmra.mrb[80].mxu0 %vm297_vm1, %v10365_v41  ;;  %9554 = vmatmul.mubr.msk.bf16.gmra.mrb[80].mxu1 %vm297_vm1, %v10365_v41 }
  0xa9   :  { %685 = vmatprep.mubr.bf16.mxu0 %v11240_v2  ;;  %1038 = vmatprep.mubr.bf16.mxu1 %v11240_v2 }
  0xb0   :  { %9522 = vmatmul.mubr.msk.bf16.gmra.mrb[84].mxu0 %vm297_vm1, %v10366_v42  ;;  %9555 = vmatmul.mubr.msk.bf16.gmra.mrb[84].mxu1 %vm297_vm1, %v10366_v42 }
  0xb1   :  { %695 = vmatprep.mubr.bf16.mxu0 %v11240_v2  ;;  %1048 = vmatprep.mubr.bf16.mxu1 %v11240_v2 }
  0xb8   :  { %9523 = vmatmul.mubr.msk.bf16.gmra.mrb[88].mxu0 %vm297_vm1, %v10367_v43  ;;  %9556 = vmatmul.mubr.msk.bf16.gmra.mrb[88].mxu1 %vm297_vm1, %v10367_v43 }
  0xb9   :  { %705 = vmatprep.mubr.bf16.mxu0 %v11240_v2  ;;  %1058 = vmatprep.mubr.bf16.mxu1 %v11240_v2 }
  0xc0   :  { %9524 = vmatmul.mubr.msk.bf16.gmra.mrb[92].mxu0 %vm297_vm1, %v10368_v44  ;;  %9557 = vmatmul.mubr.msk.bf16.gmra.mrb[92].mxu1 %vm297_vm1, %v10368_v44 }
  0xc1   :  { %715 = vmatprep.mubr.bf16.mxu0 %v11240_v2  ;;  %1068 = vmatprep.mubr.bf16.mxu1 %v11240_v2 }
  0xc8   :  { %9525 = vmatmul.mubr.msk.bf16.gmra.mrb[96].mxu0 %vm297_vm1, %v10369_v45  ;;  %9558 = vmatmul.mubr.msk.bf16.gmra.mrb[96].mxu1 %vm297_vm1, %v10369_v45 }
  0xc9   :  { %725 = vmatprep.mubr.bf16.mxu0 %v11240_v2  ;;  %1078 = vmatprep.mubr.bf16.mxu1 %v11240_v2 }
  0xd0   :  { %9526 = vmatmul.mubr.msk.bf16.gmra.mrb[100].mxu0 %vm297_vm1, %v10370_v46  ;;  %9559 = vmatmul.mubr.msk.bf16.gmra.mrb[100].mxu1 %vm297_vm1, %v10370_v46 }
  0xd1   :  { %735 = vmatprep.mubr.bf16.mxu0 %v11240_v2  ;;  %1088 = vmatprep.mubr.bf16.mxu1 %v11240_v2 }
  0xd8   :  { %9527 = vmatmul.mubr.msk.bf16.gmra.mrb[104].mxu0 %vm297_vm1, %v10371_v47  ;;  %9560 = vmatmul.mubr.msk.bf16.gmra.mrb[104].mxu1 %vm297_vm1, %v10371_v47 }
  0xd9   :  { %745 = vmatprep.mubr.bf16.mxu0 %v11240_v2  ;;  %1098 = vmatprep.mubr.bf16.mxu1 %v11240_v2 }
  0xdb   :  { %v477_v48 = vpop.f32.mrb[0].mxu0  ;;  %v830_v49 = vpop.f32.mrb[0].mxu1 }
  0xdc   :  { %v479_v50 = vpop.f32.mrb[1].mxu0  ;;  %v3269_v51 = vmax.f32 %v830_v49, 0.0  ;;  %v832_v52 = vpop.f32.mrb[1].mxu1  ;;  %v3267_v57 = vmax.f32 %v477_v48, 0.0  ;;  %v10374_v48 = vld [vmem:[%s13999_s0 + $0xe8] sm:$0xff]  }
  0xdd   :  { %v481_v54 = vpop.f32.mrb[2].mxu0  ;;  %v3270_v55 = vmax.f32 %v832_v52, 0.0  ;;  %v834_v56 = vpop.f32.mrb[2].mxu1  ;;  %v3268_v62 = vmax.f32 %v479_v50, 0.0 }
  0xde   :  { %v3283_v58 = vmax.f32 %v481_v54, 0.0  ;;  %v483_v59 = vpop.f32.mrb[3].mxu0  ;;  %v3285_v60 = vmax.f32 %v834_v56, 0.0  ;;  %v836_v61 = vpop.f32.mrb[3].mxu1 }
  0xdf   :  { %v3284_v63 = vmax.f32 %v483_v59, 0.0  ;;  %v3286_v0 = vmax.f32 %v836_v61, 0.0 }
  0xe0   :  { %v4291_v1 = vadd.f32 %v3283_v58, %v3267_v57  ;;  %v4365_v3 = vadd.f32 %v3285_v60, %v3269_v51  ;;  %9528 = vmatmul.mubr.msk.bf16.gmra.mrb[108].mxu0 %vm297_vm1, %v10372_v53  ;;  %9561 = vmatmul.mubr.msk.bf16.gmra.mrb[108].mxu1 %vm297_vm1, %v10372_v53 }
  0xe1   :  { %v4328_v4 = vadd.f32 %v3284_v63, %v3268_v62  ;;  %v4402_v5 = vadd.f32 %v3286_v0, %v3270_v55  ;;  %755 = vmatprep.mubr.bf16.mxu0 %v11240_v2  ;;  %1108 = vmatprep.mubr.bf16.mxu1 %v11240_v2 }
  0xe3   :  { %v487_v6 = vpop.f32.mrb[4].mxu0  ;;  %v840_v7 = vpop.f32.mrb[4].mxu1 }
  0xe4   :  { %v3299_v8 = vmax.f32 %v487_v6, 0.0  ;;  %v3301_v9 = vmax.f32 %v840_v7, 0.0  ;;  %v489_v10 = vpop.f32.mrb[5].mxu0  ;;  %v842_v11 = vpop.f32.mrb[5].mxu1 }
  0xe5   :  { %v3300_v14 = vmax.f32 %v489_v10, 0.0  ;;  %v3302_v15 = vmax.f32 %v842_v11, 0.0  ;;  %v491_v16 = vpop.f32.mrb[6].mxu0  ;;  %v844_v17 = vpop.f32.mrb[6].mxu1  ;;  %v10375_v10 = vld [vmem:[%s13999_s0 + $0xf0] sm:$0xff]  }
  0xe6   :  { %v4292_v26 = vadd.f32 %v4291_v1, %v3299_v8  ;;  %v4366_v27 = vadd.f32 %v4365_v3, %v3301_v9  ;;  %v3315_v28 = vmax.f32 %v491_v16, 0.0  ;;  %v3317_v29 = vmax.f32 %v844_v17, 0.0  ;;  %v493_v30 = vpop.f32.mrb[7].mxu0  ;;  %v846_v31 = vpop.f32.mrb[7].mxu1 }
  0xe7   :  { %v4329_v32 = vadd.f32 %v4328_v4, %v3300_v14  ;;  %v4403_v33 = vadd.f32 %v4402_v5, %v3302_v15  ;;  %v3316_v35 = vmax.f32 %v493_v30, 0.0  ;;  %v3318_v36 = vmax.f32 %v846_v31, 0.0 }
  0xe8   :  { %v4293_v38 = vadd.f32 %v4292_v26, %v3315_v28  ;;  %v4367_v39 = vadd.f32 %v4366_v27, %v3317_v29  ;;  %9529 = vmatmul.mubr.msk.bf16.gmra.mrb[112].mxu0 %vm297_vm1, %v10373_v12  ;;  %9562 = vmatmul.mubr.msk.bf16.gmra.mrb[112].mxu1 %vm297_vm1, %v10373_v12 }
  0xe9   :  { %v4330_v40 = vadd.f32 %v4329_v32, %v3316_v35  ;;  %v4404_v41 = vadd.f32 %v4403_v33, %v3318_v36  ;;  %765 = vmatprep.mubr.bf16.mxu0 %v11240_v2  ;;  %1118 = vmatprep.mubr.bf16.mxu1 %v11240_v2 }
  0xeb   :  { %v497_v42 = vpop.f32.mrb[8].mxu0  ;;  %v850_v43 = vpop.f32.mrb[8].mxu1 }
  0xec   :  { %v3331_v44 = vmax.f32 %v497_v42, 0.0  ;;  %v3333_v45 = vmax.f32 %v850_v43, 0.0  ;;  %v499_v46 = vpop.f32.mrb[9].mxu0  ;;  %v852_v47 = vpop.f32.mrb[9].mxu1 }
  0xed   :  { %v3332_v49 = vmax.f32 %v499_v46, 0.0  ;;  %v3334_v50 = vmax.f32 %v852_v47, 0.0  ;;  %v501_v51 = vpop.f32.mrb[10].mxu0  ;;  %v854_v52 = vpop.f32.mrb[10].mxu1  ;;  %v10376_v46 = vld [vmem:[%s13999_s0 + $0xf8] sm:$0xff]  }
  0xee   :  { %v4294_v53 = vadd.f32 %v4293_v38, %v3331_v44  ;;  %v4368_v54 = vadd.f32 %v4367_v39, %v3333_v45  ;;  %v3347_v55 = vmax.f32 %v501_v51, 0.0  ;;  %v3349_v56 = vmax.f32 %v854_v52, 0.0  ;;  %v503_v57 = vpop.f32.mrb[11].mxu0  ;;  %v856_v58 = vpop.f32.mrb[11].mxu1 }
  0xef   :  { %v4331_v59 = vadd.f32 %v4330_v40, %v3332_v49  ;;  %v4405_v60 = vadd.f32 %v4404_v41, %v3334_v50  ;;  %v3348_v61 = vmax.f32 %v503_v57, 0.0  ;;  %v3350_v62 = vmax.f32 %v856_v58, 0.0 }
  0xf0   :  { %v4295_v63 = vadd.f32 %v4294_v53, %v3347_v55  ;;  %v4369_v0 = vadd.f32 %v4368_v54, %v3349_v56  ;;  %9530 = vmatmul.mubr.msk.bf16.gmra.mrb[116].mxu0 %vm297_vm1, %v10374_v48  ;;  %9563 = vmatmul.mubr.msk.bf16.gmra.mrb[116].mxu1 %vm297_vm1, %v10374_v48 }
  0xf1   :  { %v4332_v1 = vadd.f32 %v4331_v59, %v3348_v61  ;;  %v4406_v3 = vadd.f32 %v4405_v60, %v3350_v62  ;;  %775 = vmatprep.mubr.bf16.mxu0 %v11240_v2  ;;  %1128 = vmatprep.mubr.bf16.mxu1 %v11240_v2 }
  0xf3   :  { %v507_v4 = vpop.f32.mrb[12].mxu0  ;;  %v860_v5 = vpop.f32.mrb[12].mxu1 }
  0xf4   :  { %v3363_v6 = vmax.f32 %v507_v4, 0.0  ;;  %v3365_v7 = vmax.f32 %v860_v5, 0.0  ;;  %v509_v8 = vpop.f32.mrb[13].mxu0  ;;  %v862_v9 = vpop.f32.mrb[13].mxu1 }
  0xf5   :  { %v3364_v11 = vmax.f32 %v509_v8, 0.0  ;;  %v3366_v12 = vmax.f32 %v862_v9, 0.0  ;;  %v511_v14 = vpop.f32.mrb[14].mxu0  ;;  %v864_v15 = vpop.f32.mrb[14].mxu1 }
  0xf6   :  { %v4296_v16 = vadd.f32 %v4295_v63, %v3363_v6  ;;  %v4370_v17 = vadd.f32 %v4369_v0, %v3365_v7  ;;  %v3379_v26 = vmax.f32 %v511_v14, 0.0  ;;  %v3381_v27 = vmax.f32 %v864_v15, 0.0  ;;  %v513_v28 = vpop.f32.mrb[15].mxu0  ;;  %v866_v29 = vpop.f32.mrb[15].mxu1 }
  0xf7   :  { %v4333_v30 = vadd.f32 %v4332_v1, %v3364_v11  ;;  %v4407_v31 = vadd.f32 %v4406_v3, %v3366_v12  ;;  %v3380_v32 = vmax.f32 %v513_v28, 0.0  ;;  %v3382_v33 = vmax.f32 %v866_v29, 0.0 }
  0xf8   :  { %v4297_v35 = vadd.f32 %v4296_v16, %v3379_v26  ;;  %v4371_v36 = vadd.f32 %v4370_v17, %v3381_v27  ;;  %9531 = vmatmul.mubr.msk.bf16.gmra.mrb[120].mxu0 %vm297_vm1, %v10375_v10  ;;  %9564 = vmatmul.mubr.msk.bf16.gmra.mrb[120].mxu1 %vm297_vm1, %v10375_v10  ;;  %v9492_v63 = vcombine.low %v11456_v34, %v11456_v34 }
  0xf9   :  { %v4334_v38 = vadd.f32 %v4333_v30, %v3380_v32  ;;  %v4408_v39 = vadd.f32 %v4407_v31, %v3382_v33  ;;  %785 = vmatprep.mubr.bf16.mxu0 %v11240_v2  ;;  %1138 = vmatprep.mubr.bf16.mxu1 %v11240_v2  ;;  %v9494_v3 = vcombine.low %v11467_v37, %v11467_v37 }
  0xfa   :  { %v420_v34 = vsel %vm394_vm0, %v9492_v63, 0 }
  0xfb   :  { %v517_v40 = vpop.f32.mrb[16].mxu0  ;;  %v870_v41 = vpop.f32.mrb[16].mxu1  ;;  %v426_v15 = vsel %vm394_vm0, %v9494_v3, 0 }
  0xfc   :  { %v3395_v42 = vmax.f32 %v517_v40, 0.0  ;;  %v3397_v43 = vmax.f32 %v870_v41, 0.0  ;;  %v519_v44 = vpop.f32.mrb[17].mxu0  ;;  %v872_v45 = vpop.f32.mrb[17].mxu1 }
  0xfd   :  { %v3396_v47 = vmax.f32 %v519_v44, 0.0  ;;  %v3398_v48 = vmax.f32 %v872_v45, 0.0  ;;  %v521_v49 = vpop.f32.mrb[18].mxu0  ;;  %v874_v50 = vpop.f32.mrb[18].mxu1 }
  0xfe   :  { %v4298_v51 = vadd.f32 %v4297_v35, %v3395_v42  ;;  %v4372_v52 = vadd.f32 %v4371_v36, %v3397_v43  ;;  %v3411_v53 = vmax.f32 %v521_v49, 0.0  ;;  %v3413_v54 = vmax.f32 %v874_v50, 0.0  ;;  %v523_v55 = vpop.f32.mrb[19].mxu0  ;;  %v876_v56 = vpop.f32.mrb[19].mxu1 }
  0xff   :  { %v4335_v57 = vadd.f32 %v4334_v38, %v3396_v47  ;;  %v4409_v58 = vadd.f32 %v4408_v39, %v3398_v48  ;;  %v3412_v59 = vmax.f32 %v523_v55, 0.0  ;;  %v3414_v60 = vmax.f32 %v876_v56, 0.0 }
 0x100   :  { %v4299_v61 = vadd.f32 %v4298_v51, %v3411_v53  ;;  %v4373_v62 = vadd.f32 %v4372_v52, %v3413_v54  ;;  %9532 = vmatmul.mubr.msk.bf16.gmra.mrb[124].mxu0 %vm297_vm1, %v10376_v46  ;;  %9565 = vmatmul.mubr.msk.bf16.gmra.mrb[124].mxu1 %vm297_vm1, %v10376_v46 }
 0x101   :  { %v4336_v0 = vadd.f32 %v4335_v57, %v3412_v59  ;;  %v4410_v1 = vadd.f32 %v4409_v58, %v3414_v60  ;;  %1181 = vmatprep.mubr.bf16.mxu0 %v11240_v2  ;;  %1534 = vmatprep.mubr.bf16.mxu1 %v11240_v2 }
 0x103   :  { %v527_v4 = vpop.f32.mrb[20].mxu0  ;;  %v880_v5 = vpop.f32.mrb[20].mxu1 }
 0x104   :  { %v3427_v6 = vmax.f32 %v527_v4, 0.0  ;;  %v3429_v7 = vmax.f32 %v880_v5, 0.0  ;;  %v529_v8 = vpop.f32.mrb[21].mxu0  ;;  %v882_v9 = vpop.f32.mrb[21].mxu1 }
 0x105   :  { %v3428_v10 = vmax.f32 %v529_v8, 0.0  ;;  %v3430_v11 = vmax.f32 %v882_v9, 0.0  ;;  %v531_v12 = vpop.f32.mrb[22].mxu0  ;;  %v884_v14 = vpop.f32.mrb[22].mxu1 }
 0x106   :  { %v4300_v16 = vadd.f32 %v4299_v61, %v3427_v6  ;;  %v4374_v17 = vadd.f32 %v4373_v62, %v3429_v7  ;;  %v3443_v26 = vmax.f32 %v531_v12, 0.0  ;;  %v3445_v27 = vmax.f32 %v884_v14, 0.0  ;;  %v533_v28 = vpop.f32.mrb[23].mxu0  ;;  %v886_v37 = vpop.f32.mrb[23].mxu1 }
 0x107   :  { %v4337_v29 = vadd.f32 %v4336_v0, %v3428_v10  ;;  %v4411_v30 = vadd.f32 %v4410_v1, %v3430_v11  ;;  %v3444_v31 = vmax.f32 %v533_v28, 0.0  ;;  %v3446_v32 = vmax.f32 %v886_v37, 0.0 }
 0x108   :  { %v4301_v33 = vadd.f32 %v4300_v16, %v3443_v26  ;;  %v4375_v35 = vadd.f32 %v4374_v17, %v3445_v27  ;;  %9567 = vmatmul.mubr.msk.bf16.vlgmr.msra.gmra.mrb[128].mxu0 %vm297_vm1, %v11297_v13  ;;  %9600 = vmatmul.mubr.msk.bf16.vlgmr.msra.gmra.mrb[128].mxu1 %vm297_vm1, %v11297_v13 }
 0x109   :  { %v4338_v36 = vadd.f32 %v4337_v29, %v3444_v31  ;;  %v4412_v38 = vadd.f32 %v4411_v30, %v3446_v32  ;;  %1856 = vmatpush1.bf16.msra.mxu0 %v420_v34  ;;  %2209 = vmatpush1.bf16.msra.mxu1 %v426_v15 }
 0x10a   :  { %1191 = vmatprep.mubr.bf16.mxu0 %v11240_v2  ;;  %1544 = vmatprep.mubr.bf16.mxu1 %v11240_v2 }
 0x10b   :  { %v537_v39 = vpop.f32.mrb[24].mxu0  ;;  %v890_v40 = vpop.f32.mrb[24].mxu1 }
 0x10c   :  { %v3459_v41 = vmax.f32 %v537_v39, 0.0  ;;  %v3461_v42 = vmax.f32 %v890_v40, 0.0  ;;  %v539_v43 = vpop.f32.mrb[25].mxu0  ;;  %v892_v44 = vpop.f32.mrb[25].mxu1 }
 0x10d   :  { %v3460_v45 = vmax.f32 %v539_v43, 0.0  ;;  %v3462_v46 = vmax.f32 %v892_v44, 0.0  ;;  %v541_v47 = vpop.f32.mrb[26].mxu0  ;;  %v894_v48 = vpop.f32.mrb[26].mxu1 }
 0x10e   :  { %v4302_v49 = vadd.f32 %v4301_v33, %v3459_v41  ;;  %v4376_v13 = vadd.f32 %v4375_v35, %v3461_v42  ;;  %v3475_v50 = vmax.f32 %v541_v47, 0.0  ;;  %v3477_v51 = vmax.f32 %v894_v48, 0.0  ;;  %v543_v52 = vpop.f32.mrb[27].mxu0  ;;  %v896_v53 = vpop.f32.mrb[27].mxu1 }
 0x10f   :  { %v4339_v54 = vadd.f32 %v4338_v36, %v3460_v45  ;;  %v4413_v55 = vadd.f32 %v4412_v38, %v3462_v46  ;;  %v3476_v56 = vmax.f32 %v543_v52, 0.0  ;;  %v3478_v57 = vmax.f32 %v896_v53, 0.0 }
 0x110   :  { %v4303_v58 = vadd.f32 %v4302_v49, %v3475_v50  ;;  %v4377_v59 = vadd.f32 %v4376_v13, %v3477_v51  ;;  %9568 = vmatmul.mubr.msk.bf16.gmra.mrb[132].mxu0 %vm297_vm1, %v11312_v18  ;;  %9601 = vmatmul.mubr.msk.bf16.gmra.mrb[132].mxu1 %vm297_vm1, %v11312_v18 }
 0x111   :  { %v4340_v60 = vadd.f32 %v4339_v54, %v3476_v56  ;;  %v4414_v61 = vadd.f32 %v4413_v55, %v3478_v57  ;;  %1201 = vmatprep.mubr.bf16.mxu0 %v11240_v2  ;;  %1554 = vmatprep.mubr.bf16.mxu1 %v11240_v2 }
 0x113   :  { %v547_v62 = vpop.f32.mrb[28].mxu0  ;;  %v900_v63 = vpop.f32.mrb[28].mxu1 }
 0x114   :  { %v3491_v0 = vmax.f32 %v547_v62, 0.0  ;;  %v3493_v1 = vmax.f32 %v900_v63, 0.0  ;;  %v549_v3 = vpop.f32.mrb[29].mxu0  ;;  %v902_v4 = vpop.f32.mrb[29].mxu1 }
 0x115   :  { %v3492_v5 = vmax.f32 %v549_v3, 0.0  ;;  %v3494_v6 = vmax.f32 %v902_v4, 0.0  ;;  %v551_v7 = vpop.f32.mrb[30].mxu0  ;;  %v904_v8 = vpop.f32.mrb[30].mxu1 }
 0x116   :  { %v4304_v9 = vadd.f32 %v4303_v58, %v3491_v0  ;;  %v4378_v10 = vadd.f32 %v4377_v59, %v3493_v1  ;;  %v3507_v11 = vmax.f32 %v551_v7, 0.0  ;;  %v3509_v18 = vmax.f32 %v904_v8, 0.0  ;;  %v553_v12 = vpop.f32.mrb[31].mxu0  ;;  %v906_v14 = vpop.f32.mrb[31].mxu1 }
 0x117   :  { %v4341_v34 = vadd.f32 %v4340_v60, %v3492_v5  ;;  %v4415_v15 = vadd.f32 %v4414_v61, %v3494_v6  ;;  %v3508_v16 = vmax.f32 %v553_v12, 0.0  ;;  %v3510_v17 = vmax.f32 %v906_v14, 0.0 }
 0x118   :  { %v4305_v26 = vadd.f32 %v4304_v9, %v3507_v11  ;;  %v4379_v27 = vadd.f32 %v4378_v10, %v3509_v18  ;;  %9569 = vmatmul.mubr.msk.bf16.gmra.mrb[136].mxu0 %vm297_vm1, %v11323_v19  ;;  %9602 = vmatmul.mubr.msk.bf16.gmra.mrb[136].mxu1 %vm297_vm1, %v11323_v19 }
 0x119   :  { %v4342_v28 = vadd.f32 %v4341_v34, %v3508_v16  ;;  %v4416_v37 = vadd.f32 %v4415_v15, %v3510_v17  ;;  %1211 = vmatprep.mubr.bf16.mxu0 %v11240_v2  ;;  %1564 = vmatprep.mubr.bf16.mxu1 %v11240_v2 }
 0x11b   :  { %v557_v29 = vpop.f32.mrb[32].mxu0  ;;  %v910_v30 = vpop.f32.mrb[32].mxu1 }
 0x11c   :  { %v3523_v31 = vmax.f32 %v557_v29, 0.0  ;;  %v3525_v32 = vmax.f32 %v910_v30, 0.0  ;;  %v559_v33 = vpop.f32.mrb[33].mxu0  ;;  %v912_v35 = vpop.f32.mrb[33].mxu1 }
 0x11d   :  { %v3524_v36 = vmax.f32 %v559_v33, 0.0  ;;  %v3526_v38 = vmax.f32 %v912_v35, 0.0  ;;  %v561_v39 = vpop.f32.mrb[34].mxu0  ;;  %v914_v40 = vpop.f32.mrb[34].mxu1 }
 0x11e   :  { %v4306_v41 = vadd.f32 %v4305_v26, %v3523_v31  ;;  %v4380_v42 = vadd.f32 %v4379_v27, %v3525_v32  ;;  %v3539_v43 = vmax.f32 %v561_v39, 0.0  ;;  %v3541_v19 = vmax.f32 %v914_v40, 0.0  ;;  %v563_v44 = vpop.f32.mrb[35].mxu0  ;;  %v916_v45 = vpop.f32.mrb[35].mxu1 }
 0x11f   :  { %v4343_v46 = vadd.f32 %v4342_v28, %v3524_v36  ;;  %v4417_v47 = vadd.f32 %v4416_v37, %v3526_v38  ;;  %v3540_v48 = vmax.f32 %v563_v44, 0.0  ;;  %v3542_v49 = vmax.f32 %v916_v45, 0.0 }
 0x120   :  { %v4307_v13 = vadd.f32 %v4306_v41, %v3539_v43  ;;  %v4381_v50 = vadd.f32 %v4380_v42, %v3541_v19  ;;  %9570 = vmatmul.mubr.msk.bf16.gmra.mrb[140].mxu0 %vm297_vm1, %v11334_v20  ;;  %9603 = vmatmul.mubr.msk.bf16.gmra.mrb[140].mxu1 %vm297_vm1, %v11334_v20 }
 0x121   :  { %v4344_v51 = vadd.f32 %v4343_v46, %v3540_v48  ;;  %v4418_v52 = vadd.f32 %v4417_v47, %v3542_v49  ;;  %1221 = vmatprep.mubr.bf16.mxu0 %v11240_v2  ;;  %1574 = vmatprep.mubr.bf16.mxu1 %v11240_v2 }
 0x123   :  { %v567_v53 = vpop.f32.mrb[36].mxu0  ;;  %v920_v54 = vpop.f32.mrb[36].mxu1 }
 0x124   :  { %v3555_v55 = vmax.f32 %v567_v53, 0.0  ;;  %v3557_v56 = vmax.f32 %v920_v54, 0.0  ;;  %v569_v57 = vpop.f32.mrb[37].mxu0  ;;  %v922_v58 = vpop.f32.mrb[37].mxu1 }
 0x125   :  { %v3556_v59 = vmax.f32 %v569_v57, 0.0  ;;  %v3558_v60 = vmax.f32 %v922_v58, 0.0  ;;  %v571_v61 = vpop.f32.mrb[38].mxu0  ;;  %v924_v62 = vpop.f32.mrb[38].mxu1 }
 0x126   :  { %v4308_v63 = vadd.f32 %v4307_v13, %v3555_v55  ;;  %v4382_v0 = vadd.f32 %v4381_v50, %v3557_v56  ;;  %v3571_v1 = vmax.f32 %v571_v61, 0.0  ;;  %v3573_v20 = vmax.f32 %v924_v62, 0.0  ;;  %v573_v3 = vpop.f32.mrb[39].mxu0  ;;  %v926_v4 = vpop.f32.mrb[39].mxu1 }
 0x127   :  { %v4345_v5 = vadd.f32 %v4344_v51, %v3556_v59  ;;  %v4419_v6 = vadd.f32 %v4418_v52, %v3558_v60  ;;  %v3572_v7 = vmax.f32 %v573_v3, 0.0  ;;  %v3574_v8 = vmax.f32 %v926_v4, 0.0 }
 0x128   :  { %v4309_v9 = vadd.f32 %v4308_v63, %v3571_v1  ;;  %v4383_v10 = vadd.f32 %v4382_v0, %v3573_v20  ;;  %9571 = vmatmul.mubr.msk.bf16.gmra.mrb[144].mxu0 %vm297_vm1, %v11345_v21  ;;  %9604 = vmatmul.mubr.msk.bf16.gmra.mrb[144].mxu1 %vm297_vm1, %v11345_v21 }
 0x129   :  { %v4346_v11 = vadd.f32 %v4345_v5, %v3572_v7  ;;  %v4420_v18 = vadd.f32 %v4419_v6, %v3574_v8  ;;  %1231 = vmatprep.mubr.bf16.mxu0 %v11240_v2  ;;  %1584 = vmatprep.mubr.bf16.mxu1 %v11240_v2 }
 0x12b   :  { %v577_v12 = vpop.f32.mrb[40].mxu0  ;;  %v930_v14 = vpop.f32.mrb[40].mxu1 }
 0x12c   :  { %v3587_v34 = vmax.f32 %v577_v12, 0.0  ;;  %v3589_v15 = vmax.f32 %v930_v14, 0.0  ;;  %v579_v16 = vpop.f32.mrb[41].mxu0  ;;  %v932_v17 = vpop.f32.mrb[41].mxu1 }
 0x12d   :  { %v3588_v26 = vmax.f32 %v579_v16, 0.0  ;;  %v3590_v27 = vmax.f32 %v932_v17, 0.0  ;;  %v581_v28 = vpop.f32.mrb[42].mxu0  ;;  %v934_v37 = vpop.f32.mrb[42].mxu1 }
 0x12e   :  { %v4310_v29 = vadd.f32 %v4309_v9, %v3587_v34  ;;  %v4384_v30 = vadd.f32 %v4383_v10, %v3589_v15  ;;  %v3603_v31 = vmax.f32 %v581_v28, 0.0  ;;  %v3605_v21 = vmax.f32 %v934_v37, 0.0  ;;  %v583_v32 = vpop.f32.mrb[43].mxu0  ;;  %v936_v33 = vpop.f32.mrb[43].mxu1 }
 0x12f   :  { %v4347_v35 = vadd.f32 %v4346_v11, %v3588_v26  ;;  %v4421_v36 = vadd.f32 %v4420_v18, %v3590_v27  ;;  %v3604_v38 = vmax.f32 %v583_v32, 0.0  ;;  %v3606_v39 = vmax.f32 %v936_v33, 0.0 }
 0x130   :  { %v4311_v40 = vadd.f32 %v4310_v29, %v3603_v31  ;;  %v4385_v41 = vadd.f32 %v4384_v30, %v3605_v21  ;;  %9572 = vmatmul.mubr.msk.bf16.gmra.mrb[148].mxu0 %vm297_vm1, %v11356_v22  ;;  %9605 = vmatmul.mubr.msk.bf16.gmra.mrb[148].mxu1 %vm297_vm1, %v11356_v22 }
 0x131   :  { %v4348_v42 = vadd.f32 %v4347_v35, %v3604_v38  ;;  %v4422_v43 = vadd.f32 %v4421_v36, %v3606_v39  ;;  %1241 = vmatprep.mubr.bf16.mxu0 %v11240_v2  ;;  %1594 = vmatprep.mubr.bf16.mxu1 %v11240_v2 }
 0x133   :  { %v587_v19 = vpop.f32.mrb[44].mxu0  ;;  %v940_v44 = vpop.f32.mrb[44].mxu1 }
 0x134   :  { %v3619_v45 = vmax.f32 %v587_v19, 0.0  ;;  %v3621_v46 = vmax.f32 %v940_v44, 0.0  ;;  %v589_v47 = vpop.f32.mrb[45].mxu0  ;;  %v942_v48 = vpop.f32.mrb[45].mxu1 }
 0x135   :  { %v3620_v49 = vmax.f32 %v589_v47, 0.0  ;;  %v3622_v13 = vmax.f32 %v942_v48, 0.0  ;;  %v591_v50 = vpop.f32.mrb[46].mxu0  ;;  %v944_v51 = vpop.f32.mrb[46].mxu1 }
 0x136   :  { %v4312_v52 = vadd.f32 %v4311_v40, %v3619_v45  ;;  %v4386_v53 = vadd.f32 %v4385_v41, %v3621_v46  ;;  %v3635_v54 = vmax.f32 %v591_v50, 0.0  ;;  %v3637_v22 = vmax.f32 %v944_v51, 0.0  ;;  %v593_v55 = vpop.f32.mrb[47].mxu0  ;;  %v946_v56 = vpop.f32.mrb[47].mxu1 }
 0x137   :  { %v4349_v57 = vadd.f32 %v4348_v42, %v3620_v49  ;;  %v4423_v58 = vadd.f32 %v4422_v43, %v3622_v13  ;;  %v3636_v59 = vmax.f32 %v593_v55, 0.0  ;;  %v3638_v60 = vmax.f32 %v946_v56, 0.0 }
 0x138   :  { %v4313_v61 = vadd.f32 %v4312_v52, %v3635_v54  ;;  %v4387_v62 = vadd.f32 %v4386_v53, %v3637_v22  ;;  %9573 = vmatmul.mubr.msk.bf16.gmra.mrb[152].mxu0 %vm297_vm1, %v11367_v23  ;;  %9606 = vmatmul.mubr.msk.bf16.gmra.mrb[152].mxu1 %vm297_vm1, %v11367_v23 }
 0x139   :  { %v4350_v63 = vadd.f32 %v4349_v57, %v3636_v59  ;;  %v4424_v0 = vadd.f32 %v4423_v58, %v3638_v60  ;;  %1251 = vmatprep.mubr.bf16.mxu0 %v11240_v2  ;;  %1604 = vmatprep.mubr.bf16.mxu1 %v11240_v2 }
 0x13b   :  { %v597_v1 = vpop.f32.mrb[48].mxu0  ;;  %v950_v20 = vpop.f32.mrb[48].mxu1 }
 0x13c   :  { %v3651_v3 = vmax.f32 %v597_v1, 0.0  ;;  %v3653_v4 = vmax.f32 %v950_v20, 0.0  ;;  %v599_v5 = vpop.f32.mrb[49].mxu0  ;;  %v952_v6 = vpop.f32.mrb[49].mxu1 }
 0x13d   :  { %v3652_v7 = vmax.f32 %v599_v5, 0.0  ;;  %v3654_v8 = vmax.f32 %v952_v6, 0.0  ;;  %v601_v9 = vpop.f32.mrb[50].mxu0  ;;  %v954_v10 = vpop.f32.mrb[50].mxu1 }
 0x13e   :  { %v4314_v11 = vadd.f32 %v4313_v61, %v3651_v3  ;;  %v4388_v18 = vadd.f32 %v4387_v62, %v3653_v4  ;;  %v3667_v12 = vmax.f32 %v601_v9, 0.0  ;;  %v3669_v23 = vmax.f32 %v954_v10, 0.0  ;;  %v603_v14 = vpop.f32.mrb[51].mxu0  ;;  %v956_v34 = vpop.f32.mrb[51].mxu1 }
 0x13f   :  { %v4351_v15 = vadd.f32 %v4350_v63, %v3652_v7  ;;  %v4425_v16 = vadd.f32 %v4424_v0, %v3654_v8  ;;  %v3668_v17 = vmax.f32 %v603_v14, 0.0  ;;  %v3670_v26 = vmax.f32 %v956_v34, 0.0  ;;  %v11153_v8 = vld [vmem:[%s13999_s0 + $0x48] sm:$0xff]  }
 0x140   :  { %v4315_v27 = vadd.f32 %v4314_v11, %v3667_v12  ;;  %v4389_v28 = vadd.f32 %v4388_v18, %v3669_v23  ;;  %9574 = vmatmul.mubr.msk.bf16.gmra.mrb[156].mxu0 %vm297_vm1, %v11378_v24  ;;  %9607 = vmatmul.mubr.msk.bf16.gmra.mrb[156].mxu1 %vm297_vm1, %v11378_v24 }
 0x141   :  { %v4352_v37 = vadd.f32 %v4351_v15, %v3668_v17  ;;  %v4426_v29 = vadd.f32 %v4425_v16, %v3670_v26  ;;  %1261 = vmatprep.mubr.bf16.mxu0 %v11240_v2  ;;  %1614 = vmatprep.mubr.bf16.mxu1 %v11240_v2 }
 0x143   :  { %v607_v30 = vpop.f32.mrb[52].mxu0  ;;  %v960_v31 = vpop.f32.mrb[52].mxu1 }
 0x144   :  { %v3683_v21 = vmax.f32 %v607_v30, 0.0  ;;  %v3685_v32 = vmax.f32 %v960_v31, 0.0  ;;  %v609_v33 = vpop.f32.mrb[53].mxu0  ;;  %v962_v35 = vpop.f32.mrb[53].mxu1 }
 0x145   :  { %v3684_v36 = vmax.f32 %v609_v33, 0.0  ;;  %v3686_v38 = vmax.f32 %v962_v35, 0.0  ;;  %v611_v39 = vpop.f32.mrb[54].mxu0  ;;  %v964_v40 = vpop.f32.mrb[54].mxu1 }
 0x146   :  { %v4316_v41 = vadd.f32 %v4315_v27, %v3683_v21  ;;  %v4390_v42 = vadd.f32 %v4389_v28, %v3685_v32  ;;  %v3699_v43 = vmax.f32 %v611_v39, 0.0  ;;  %v3701_v24 = vmax.f32 %v964_v40, 0.0  ;;  %v613_v19 = vpop.f32.mrb[55].mxu0  ;;  %v966_v44 = vpop.f32.mrb[55].mxu1  ;;  %v11154_v39 = vld [vmem:[%s13999_s0 + $0x50] sm:$0xff]  }
 0x147   :  { %v4353_v45 = vadd.f32 %v4352_v37, %v3684_v36  ;;  %v4427_v46 = vadd.f32 %v4426_v29, %v3686_v38  ;;  %v3700_v47 = vmax.f32 %v613_v19, 0.0  ;;  %v3702_v48 = vmax.f32 %v966_v44, 0.0 }
 0x148   :  { %v4317_v49 = vadd.f32 %v4316_v41, %v3699_v43  ;;  %v4391_v13 = vadd.f32 %v4390_v42, %v3701_v24  ;;  %9575 = vmatmul.mubr.msk.bf16.gmra.mrb[160].mxu0 %vm297_vm1, %v11389_v25  ;;  %9608 = vmatmul.mubr.msk.bf16.gmra.mrb[160].mxu1 %vm297_vm1, %v11389_v25 }
 0x149   :  { %v4354_v50 = vadd.f32 %v4353_v45, %v3700_v47  ;;  %v4428_v51 = vadd.f32 %v4427_v46, %v3702_v48  ;;  %1271 = vmatprep.mubr.bf16.mxu0 %v11240_v2  ;;  %1624 = vmatprep.mubr.bf16.mxu1 %v11240_v2 }
 0x14b   :  { %v617_v52 = vpop.f32.mrb[56].mxu0  ;;  %v970_v53 = vpop.f32.mrb[56].mxu1 }
 0x14c   :  { %v3715_v54 = vmax.f32 %v617_v52, 0.0  ;;  %v3717_v22 = vmax.f32 %v970_v53, 0.0  ;;  %v619_v55 = vpop.f32.mrb[57].mxu0  ;;  %v972_v56 = vpop.f32.mrb[57].mxu1 }
 0x14d   :  { %v3716_v57 = vmax.f32 %v619_v55, 0.0  ;;  %v3718_v58 = vmax.f32 %v972_v56, 0.0  ;;  %v621_v59 = vpop.f32.mrb[58].mxu0  ;;  %v974_v60 = vpop.f32.mrb[58].mxu1  ;;  %v11155_v56 = vld [vmem:[%s13999_s0 + $0x58] sm:$0xff]  }
 0x14e   :  { %v4318_v61 = vadd.f32 %v4317_v49, %v3715_v54  ;;  %v4392_v62 = vadd.f32 %v4391_v13, %v3717_v22  ;;  %v3731_v63 = vmax.f32 %v621_v59, 0.0  ;;  %v3733_v25 = vmax.f32 %v974_v60, 0.0  ;;  %v623_v0 = vpop.f32.mrb[59].mxu0  ;;  %v976_v1 = vpop.f32.mrb[59].mxu1 }
 0x14f   :  { %v4355_v20 = vadd.f32 %v4354_v50, %v3716_v57  ;;  %v4429_v3 = vadd.f32 %v4428_v51, %v3718_v58  ;;  %v3732_v4 = vmax.f32 %v623_v0, 0.0  ;;  %v3734_v5 = vmax.f32 %v976_v1, 0.0 }
 0x150   :  { %v4319_v6 = vadd.f32 %v4318_v61, %v3731_v63  ;;  %v4393_v7 = vadd.f32 %v4392_v62, %v3733_v25  ;;  %9576 = vmatmul.mubr.msk.bf16.gmra.mrb[164].mxu0 %vm297_vm1, %v11153_v8  ;;  %9609 = vmatmul.mubr.msk.bf16.gmra.mrb[164].mxu1 %vm297_vm1, %v11153_v8 }
 0x151   :  { %v4356_v9 = vadd.f32 %v4355_v20, %v3732_v4  ;;  %v4430_v10 = vadd.f32 %v4429_v3, %v3734_v5  ;;  %1281 = vmatprep.mubr.bf16.mxu0 %v11240_v2  ;;  %1634 = vmatprep.mubr.bf16.mxu1 %v11240_v2 }
 0x153   :  { %v627_v11 = vpop.f32.mrb[60].mxu0  ;;  %v980_v18 = vpop.f32.mrb[60].mxu1 }
 0x154   :  { %v3747_v12 = vmax.f32 %v627_v11, 0.0  ;;  %v3749_v23 = vmax.f32 %v980_v18, 0.0  ;;  %v629_v14 = vpop.f32.mrb[61].mxu0  ;;  %v982_v34 = vpop.f32.mrb[61].mxu1 }
 0x155   :  { %v3748_v15 = vmax.f32 %v629_v14, 0.0  ;;  %v3750_v16 = vmax.f32 %v982_v34, 0.0  ;;  %v631_v17 = vpop.f32.mrb[62].mxu0  ;;  %v984_v26 = vpop.f32.mrb[62].mxu1 }
 0x156   :  { %v4320_v27 = vadd.f32 %v4319_v6, %v3747_v12  ;;  %v4394_v28 = vadd.f32 %v4393_v7, %v3749_v23  ;;  %v3763_v37 = vmax.f32 %v631_v17, 0.0  ;;  %v3765_v29 = vmax.f32 %v984_v26, 0.0  ;;  %v633_v30 = vpop.f32.mrb[63].mxu0  ;;  %v986_v31 = vpop.f32.mrb[63].mxu1  ;;  %v11156_v23 = vld [vmem:[%s13999_s0 + $0x60] sm:$0xff]  }
 0x157   :  { %v4357_v21 = vadd.f32 %v4356_v9, %v3748_v15  ;;  %v4431_v32 = vadd.f32 %v4430_v10, %v3750_v16  ;;  %v3764_v33 = vmax.f32 %v633_v30, 0.0  ;;  %v3766_v35 = vmax.f32 %v986_v31, 0.0 }
 0x158   :  { %v11641_v36 = vadd.f32 %v4320_v27, %v3763_v37  ;;  %v11643_v38 = vadd.f32 %v4394_v28, %v3765_v29  ;;  %9577 = vmatmul.mubr.msk.bf16.gmra.mrb[168].mxu0 %vm297_vm1, %v11154_v39  ;;  %9610 = vmatmul.mubr.msk.bf16.gmra.mrb[168].mxu1 %vm297_vm1, %v11154_v39 }
 0x159   :  { %v11650_v40 = vadd.f32 %v4357_v21, %v3764_v33  ;;  %v11652_v41 = vadd.f32 %v4431_v32, %v3766_v35  ;;  %1291 = vmatprep.mubr.bf16.mxu0 %v11240_v2  ;;  %1644 = vmatprep.mubr.bf16.mxu1 %v11240_v2 }
 0x15b   :  { %v637_v42 = vpop.f32.mrb[64].mxu0  ;;  %v990_v43 = vpop.f32.mrb[64].mxu1 }
 0x15c   :  { %v639_v24 = vpop.f32.mrb[65].mxu0  ;;  %v3781_v19 = vmax.f32 %v990_v43, 0.0  ;;  %v992_v44 = vpop.f32.mrb[65].mxu1  ;;  %v3779_v48 = vmax.f32 %v637_v42, 0.0 }
 0x15d   :  { %v641_v45 = vpop.f32.mrb[66].mxu0  ;;  %v3782_v46 = vmax.f32 %v992_v44, 0.0  ;;  %v994_v47 = vpop.f32.mrb[66].mxu1  ;;  %v3780_v52 = vmax.f32 %v639_v24, 0.0 }
 0x15e   :  { %v3795_v49 = vmax.f32 %v641_v45, 0.0  ;;  %v643_v13 = vpop.f32.mrb[67].mxu0  ;;  %v3797_v50 = vmax.f32 %v994_v47, 0.0  ;;  %v996_v51 = vpop.f32.mrb[67].mxu1 }
 0x15f   :  { %v3796_v53 = vmax.f32 %v643_v13, 0.0  ;;  %v3798_v54 = vmax.f32 %v996_v51, 0.0 }
 0x160   :  { %v4883_v22 = vadd.f32 %v3795_v49, %v3779_v48  ;;  %v4957_v55 = vadd.f32 %v3797_v50, %v3781_v19  ;;  %9578 = vmatmul.mubr.msk.bf16.gmra.mrb[172].mxu0 %vm297_vm1, %v11155_v56  ;;  %9611 = vmatmul.mubr.msk.bf16.gmra.mrb[172].mxu1 %vm297_vm1, %v11155_v56  ;;  %v11157_v49 = vld [vmem:[%s13999_s0 + $0x68] sm:$0xff]  }
 0x161   :  { %v4920_v57 = vadd.f32 %v3796_v53, %v3780_v52  ;;  %v4994_v58 = vadd.f32 %v3798_v54, %v3782_v46  ;;  %1301 = vmatprep.mubr.bf16.mxu0 %v11240_v2  ;;  %1654 = vmatprep.mubr.bf16.mxu1 %v11240_v2 }
 0x163   :  { %v647_v59 = vpop.f32.mrb[68].mxu0  ;;  %v1000_v60 = vpop.f32.mrb[68].mxu1 }
 0x164   :  { %v3811_v61 = vmax.f32 %v647_v59, 0.0  ;;  %v3813_v62 = vmax.f32 %v1000_v60, 0.0  ;;  %v649_v63 = vpop.f32.mrb[69].mxu0  ;;  %v1002_v25 = vpop.f32.mrb[69].mxu1 }
 0x165   :  { %v3812_v0 = vmax.f32 %v649_v63, 0.0  ;;  %v3814_v1 = vmax.f32 %v1002_v25, 0.0  ;;  %v651_v20 = vpop.f32.mrb[70].mxu0  ;;  %v1004_v3 = vpop.f32.mrb[70].mxu1 }
 0x166   :  { %v4884_v4 = vadd.f32 %v4883_v22, %v3811_v61  ;;  %v4958_v5 = vadd.f32 %v4957_v55, %v3813_v62  ;;  %v653_v6 = vpop.f32.mrb[71].mxu0  ;;  %v1006_v7 = vpop.f32.mrb[71].mxu1  ;;  %v3827_v10 = vmax.f32 %v651_v20, 0.0  ;;  %v3829_v11 = vmax.f32 %v1004_v3, 0.0 }
 0x167   :  { %v4921_v8 = vadd.f32 %v4920_v57, %v3812_v0  ;;  %v4995_v9 = vadd.f32 %v4994_v58, %v3814_v1  ;;  %v3828_v18 = vmax.f32 %v653_v6, 0.0  ;;  %v3830_v12 = vmax.f32 %v1006_v7, 0.0  ;;  %v11158_v7 = vld [vmem:[%s13999_s0 + $0x70] sm:$0xff]  }
 0x168   :  { %9579 = vmatmul.mubr.msk.bf16.gmra.mrb[176].mxu0 %vm297_vm1, %v11156_v23  ;;  %v4885_v14 = vadd.f32 %v4884_v4, %v3827_v10  ;;  %v4959_v34 = vadd.f32 %v4958_v5, %v3829_v11  ;;  %9612 = vmatmul.mubr.msk.bf16.gmra.mrb[176].mxu1 %vm297_vm1, %v11156_v23 }
 0x169   :  { %1311 = vmatprep.mubr.bf16.mxu0 %v11240_v2  ;;  %v4922_v15 = vadd.f32 %v4921_v8, %v3828_v18  ;;  %v4996_v16 = vadd.f32 %v4995_v9, %v3830_v12  ;;  %1664 = vmatprep.mubr.bf16.mxu1 %v11240_v2 }
 0x16b   :  { %v657_v17 = vpop.f32.mrb[72].mxu0  ;;  %v1010_v26 = vpop.f32.mrb[72].mxu1 }
 0x16c   :  { %v3843_v27 = vmax.f32 %v657_v17, 0.0  ;;  %v3845_v28 = vmax.f32 %v1010_v26, 0.0  ;;  %v659_v37 = vpop.f32.mrb[73].mxu0  ;;  %v1012_v29 = vpop.f32.mrb[73].mxu1 }
 0x16d   :  { %v3844_v30 = vmax.f32 %v659_v37, 0.0  ;;  %v3846_v31 = vmax.f32 %v1012_v29, 0.0  ;;  %v661_v21 = vpop.f32.mrb[74].mxu0  ;;  %v1014_v32 = vpop.f32.mrb[74].mxu1 }
 0x16e   :  { %v4886_v33 = vadd.f32 %v4885_v14, %v3843_v27  ;;  %v4960_v35 = vadd.f32 %v4959_v34, %v3845_v28  ;;  %v3859_v39 = vmax.f32 %v661_v21, 0.0  ;;  %v3861_v42 = vmax.f32 %v1014_v32, 0.0  ;;  %v663_v43 = vpop.f32.mrb[75].mxu0  ;;  %v1016_v24 = vpop.f32.mrb[75].mxu1 }
 0x16f   :  { %v4923_v19 = vadd.f32 %v4922_v15, %v3844_v30  ;;  %v4997_v44 = vadd.f32 %v4996_v16, %v3846_v31  ;;  %v3860_v45 = vmax.f32 %v663_v43, 0.0  ;;  %v3862_v46 = vmax.f32 %v1016_v24, 0.0 }
 0x170   :  { %v4887_v47 = vadd.f32 %v4886_v33, %v3859_v39  ;;  %v4961_v48 = vadd.f32 %v4960_v35, %v3861_v42  ;;  %9580 = vmatmul.mubr.msk.bf16.gmra.mrb[180].mxu0 %vm297_vm1, %v11157_v49  ;;  %9613 = vmatmul.mubr.msk.bf16.gmra.mrb[180].mxu1 %vm297_vm1, %v11157_v49  ;;  %v11159_v42 = vld [vmem:[%s13999_s0 + $0x78] sm:$0xff]  }
 0x171   :  { %v4924_v13 = vadd.f32 %v4923_v19, %v3860_v45  ;;  %v4998_v50 = vadd.f32 %v4997_v44, %v3862_v46  ;;  %1321 = vmatprep.mubr.bf16.mxu0 %v11240_v2  ;;  %1674 = vmatprep.mubr.bf16.mxu1 %v11240_v2 }
 0x173   :  { %v667_v51 = vpop.f32.mrb[76].mxu0  ;;  %v1020_v52 = vpop.f32.mrb[76].mxu1 }
 0x174   :  { %v3875_v53 = vmax.f32 %v667_v51, 0.0  ;;  %v3877_v54 = vmax.f32 %v1020_v52, 0.0  ;;  %v669_v22 = vpop.f32.mrb[77].mxu0  ;;  %v1022_v55 = vpop.f32.mrb[77].mxu1 }
 0x175   :  { %v3876_v56 = vmax.f32 %v669_v22, 0.0  ;;  %v3878_v57 = vmax.f32 %v1022_v55, 0.0  ;;  %v671_v58 = vpop.f32.mrb[78].mxu0  ;;  %v1024_v59 = vpop.f32.mrb[78].mxu1 }
 0x176   :  { %v4888_v60 = vadd.f32 %v4887_v47, %v3875_v53  ;;  %v4962_v61 = vadd.f32 %v4961_v48, %v3877_v54  ;;  %v3891_v62 = vmax.f32 %v671_v58, 0.0  ;;  %v3893_v63 = vmax.f32 %v1024_v59, 0.0  ;;  %v673_v25 = vpop.f32.mrb[79].mxu0  ;;  %v1026_v0 = vpop.f32.mrb[79].mxu1 }
 0x177   :  { %v4925_v1 = vadd.f32 %v4924_v13, %v3876_v56  ;;  %v4999_v20 = vadd.f32 %v4998_v50, %v3878_v57  ;;  %v3892_v3 = vmax.f32 %v673_v25, 0.0  ;;  %v3894_v4 = vmax.f32 %v1026_v0, 0.0 }
 0x178   :  { %v4889_v5 = vadd.f32 %v4888_v60, %v3891_v62  ;;  %v4963_v6 = vadd.f32 %v4962_v61, %v3893_v63  ;;  %9581 = vmatmul.mubr.msk.bf16.gmra.mrb[184].mxu0 %vm297_vm1, %v11158_v7  ;;  %9614 = vmatmul.mubr.msk.bf16.gmra.mrb[184].mxu1 %vm297_vm1, %v11158_v7  ;;  %v11160_v63 = vld [vmem:[%s13999_s0 + $0x80] sm:$0xff]  }
 0x179   :  { %v4926_v8 = vadd.f32 %v4925_v1, %v3892_v3  ;;  %v5000_v9 = vadd.f32 %v4999_v20, %v3894_v4  ;;  %1331 = vmatprep.mubr.bf16.mxu0 %v11240_v2  ;;  %1684 = vmatprep.mubr.bf16.mxu1 %v11240_v2  ;;  %v11700_v1 = vld [vmem:[%s13998_s1 + $0x30] sm:$0xff] }
 0x17a   :  { %v9497_v20 = vcombine.high %v11700_v1, %v11700_v1 }
 0x17b   :  { %v677_v10 = vpop.f32.mrb[80].mxu0  ;;  %v1030_v11 = vpop.f32.mrb[80].mxu1 }
 0x17c   :  { %v3907_v18 = vmax.f32 %v677_v10, 0.0  ;;  %v3909_v12 = vmax.f32 %v1030_v11, 0.0  ;;  %v679_v23 = vpop.f32.mrb[81].mxu0  ;;  %v1032_v14 = vpop.f32.mrb[81].mxu1  ;;  %9698 = vmatprep.subr.msk.bf16.mxu0 %vm394_vm0, %v9497_v20 }
 0x17d   :  { %v3908_v34 = vmax.f32 %v679_v23, 0.0  ;;  %v3910_v15 = vmax.f32 %v1032_v14, 0.0  ;;  %v681_v16 = vpop.f32.mrb[82].mxu0  ;;  %v1034_v17 = vpop.f32.mrb[82].mxu1 }
 0x17e   :  { %v4890_v26 = vadd.f32 %v4889_v5, %v3907_v18  ;;  %v4964_v27 = vadd.f32 %v4963_v6, %v3909_v12  ;;  %v3923_v28 = vmax.f32 %v681_v16, 0.0  ;;  %v3925_v37 = vmax.f32 %v1034_v17, 0.0  ;;  %v683_v29 = vpop.f32.mrb[83].mxu0  ;;  %v1036_v30 = vpop.f32.mrb[83].mxu1  ;;  %v11709_v17 = vld [vmem:[%s13998_s1 + $0x38] sm:$0xff] }
 0x17f   :  { %v4927_v31 = vadd.f32 %v4926_v8, %v3908_v34  ;;  %v5001_v21 = vadd.f32 %v5000_v9, %v3910_v15  ;;  %v3924_v32 = vmax.f32 %v683_v29, 0.0  ;;  %v3926_v33 = vmax.f32 %v1036_v30, 0.0 }
 0x180   :  { %v4891_v35 = vadd.f32 %v4890_v26, %v3923_v28  ;;  %v4965_v39 = vadd.f32 %v4964_v27, %v3925_v37  ;;  %9582 = vmatmul.mubr.msk.bf16.gmra.mrb[188].mxu0 %vm297_vm1, %v11159_v42  ;;  %9615 = vmatmul.mubr.msk.bf16.gmra.mrb[188].mxu1 %vm297_vm1, %v11159_v42 }
 0x181   :  { %v4928_v43 = vadd.f32 %v4927_v31, %v3924_v32  ;;  %v5002_v24 = vadd.f32 %v5001_v21, %v3926_v33  ;;  %1341 = vmatprep.mubr.bf16.mxu0 %v11240_v2  ;;  %1694 = vmatprep.mubr.bf16.mxu1 %v11240_v2  ;;  %v11161_v31 = vld [vmem:[%s13999_s0 + $0x88] sm:$0xff]   ;;  %v9499_v21 = vcombine.high %v11709_v17, %v11709_v17 }
 0x183   :  { %v687_v19 = vpop.f32.mrb[84].mxu0  ;;  %v1040_v44 = vpop.f32.mrb[84].mxu1  ;;  %9731 = vmatprep.subr.msk.bf16.mxu1 %vm394_vm0, %v9499_v21 }
 0x184   :  { %v3939_v45 = vmax.f32 %v687_v19, 0.0  ;;  %v3941_v46 = vmax.f32 %v1040_v44, 0.0  ;;  %v689_v47 = vpop.f32.mrb[85].mxu0  ;;  %v1042_v48 = vpop.f32.mrb[85].mxu1 }
 0x185   :  { %v3940_v49 = vmax.f32 %v689_v47, 0.0  ;;  %v3942_v13 = vmax.f32 %v1042_v48, 0.0  ;;  %v691_v50 = vpop.f32.mrb[86].mxu0  ;;  %v1044_v51 = vpop.f32.mrb[86].mxu1 }
 0x186   :  { %v4892_v52 = vadd.f32 %v4891_v35, %v3939_v45  ;;  %v4966_v53 = vadd.f32 %v4965_v39, %v3941_v46  ;;  %v3955_v54 = vmax.f32 %v691_v50, 0.0  ;;  %v3957_v22 = vmax.f32 %v1044_v51, 0.0  ;;  %v693_v55 = vpop.f32.mrb[87].mxu0  ;;  %v1046_v56 = vpop.f32.mrb[87].mxu1 }
 0x187   :  { %v4929_v57 = vadd.f32 %v4928_v43, %v3940_v49  ;;  %v5003_v58 = vadd.f32 %v5002_v24, %v3942_v13  ;;  %v3956_v59 = vmax.f32 %v693_v55, 0.0  ;;  %v3958_v60 = vmax.f32 %v1046_v56, 0.0 }
 0x188   :  { %v4893_v61 = vadd.f32 %v4892_v52, %v3955_v54  ;;  %v4967_v62 = vadd.f32 %v4966_v53, %v3957_v22  ;;  %9583 = vmatmul.mubr.msk.bf16.gmra.mrb[192].mxu0 %vm297_vm1, %v11160_v63  ;;  %9616 = vmatmul.mubr.msk.bf16.gmra.mrb[192].mxu1 %vm297_vm1, %v11160_v63 }
 0x189   :  { %v4930_v25 = vadd.f32 %v4929_v57, %v3956_v59  ;;  %v5004_v0 = vadd.f32 %v5003_v58, %v3958_v60  ;;  %1351 = vmatprep.mubr.bf16.mxu0 %v11240_v2  ;;  %1704 = vmatprep.mubr.bf16.mxu1 %v11240_v2  ;;  %v11162_v58 = vld [vmem:[%s13999_s0 + $0x90] sm:$0xff]  }
 0x18b   :  { %v697_v3 = vpop.f32.mrb[88].mxu0  ;;  %v1050_v4 = vpop.f32.mrb[88].mxu1 }
 0x18c   :  { %v3971_v5 = vmax.f32 %v697_v3, 0.0  ;;  %v3973_v6 = vmax.f32 %v1050_v4, 0.0  ;;  %v699_v7 = vpop.f32.mrb[89].mxu0  ;;  %v1052_v8 = vpop.f32.mrb[89].mxu1 }
 0x18d   :  { %v3972_v9 = vmax.f32 %v699_v7, 0.0  ;;  %v3974_v10 = vmax.f32 %v1052_v8, 0.0  ;;  %v701_v11 = vpop.f32.mrb[90].mxu0  ;;  %v1054_v18 = vpop.f32.mrb[90].mxu1 }
 0x18e   :  { %v4894_v12 = vadd.f32 %v4893_v61, %v3971_v5  ;;  %v4968_v23 = vadd.f32 %v4967_v62, %v3973_v6  ;;  %v3987_v14 = vmax.f32 %v701_v11, 0.0  ;;  %v3989_v34 = vmax.f32 %v1054_v18, 0.0  ;;  %v703_v15 = vpop.f32.mrb[91].mxu0  ;;  %v1056_v16 = vpop.f32.mrb[91].mxu1 }
 0x18f   :  { %v4931_v26 = vadd.f32 %v4930_v25, %v3972_v9  ;;  %v5005_v27 = vadd.f32 %v5004_v0, %v3974_v10  ;;  %v3988_v28 = vmax.f32 %v703_v15, 0.0  ;;  %v3990_v37 = vmax.f32 %v1056_v16, 0.0 }
 0x190   :  { %v4895_v29 = vadd.f32 %v4894_v12, %v3987_v14  ;;  %v4969_v30 = vadd.f32 %v4968_v23, %v3989_v34  ;;  %9584 = vmatmul.mubr.msk.bf16.gmra.mrb[196].mxu0 %vm297_vm1, %v11161_v31  ;;  %9617 = vmatmul.mubr.msk.bf16.gmra.mrb[196].mxu1 %vm297_vm1, %v11161_v31 }
 0x191   :  { %v4932_v32 = vadd.f32 %v4931_v26, %v3988_v28  ;;  %v5006_v33 = vadd.f32 %v5005_v27, %v3990_v37  ;;  %1361 = vmatprep.mubr.bf16.mxu0 %v11240_v2  ;;  %1714 = vmatprep.mubr.bf16.mxu1 %v11240_v2  ;;  %v11163_v26 = vld [vmem:[%s13999_s0 + $0x98] sm:$0xff]  }
 0x193   :  { %v707_v35 = vpop.f32.mrb[92].mxu0  ;;  %v1060_v39 = vpop.f32.mrb[92].mxu1 }
 0x194   :  { %v4003_v42 = vmax.f32 %v707_v35, 0.0  ;;  %v4005_v43 = vmax.f32 %v1060_v39, 0.0  ;;  %v709_v24 = vpop.f32.mrb[93].mxu0  ;;  %v1062_v19 = vpop.f32.mrb[93].mxu1 }
 0x195   :  { %v4004_v44 = vmax.f32 %v709_v24, 0.0  ;;  %v4006_v45 = vmax.f32 %v1062_v19, 0.0  ;;  %v711_v46 = vpop.f32.mrb[94].mxu0  ;;  %v1064_v47 = vpop.f32.mrb[94].mxu1 }
 0x196   :  { %v4896_v48 = vadd.f32 %v4895_v29, %v4003_v42  ;;  %v4970_v49 = vadd.f32 %v4969_v30, %v4005_v43  ;;  %v4019_v13 = vmax.f32 %v711_v46, 0.0  ;;  %v4021_v50 = vmax.f32 %v1064_v47, 0.0  ;;  %v713_v51 = vpop.f32.mrb[95].mxu0  ;;  %v1066_v52 = vpop.f32.mrb[95].mxu1 }
 0x197   :  { %v4933_v53 = vadd.f32 %v4932_v32, %v4004_v44  ;;  %v5007_v54 = vadd.f32 %v5006_v33, %v4006_v45  ;;  %v4020_v22 = vmax.f32 %v713_v51, 0.0  ;;  %v4022_v55 = vmax.f32 %v1066_v52, 0.0  ;;  %v11164_v52 = vld [vmem:[%s13999_s0 + $0xa0] sm:$0xff]  }
 0x198   :  { %v4897_v56 = vadd.f32 %v4896_v48, %v4019_v13  ;;  %v4971_v57 = vadd.f32 %v4970_v49, %v4021_v50  ;;  %9585 = vmatmul.mubr.msk.bf16.gmra.mrb[200].mxu0 %vm297_vm1, %v11162_v58  ;;  %9618 = vmatmul.mubr.msk.bf16.gmra.mrb[200].mxu1 %vm297_vm1, %v11162_v58 }
 0x199   :  { %v4934_v59 = vadd.f32 %v4933_v53, %v4020_v22  ;;  %v5008_v60 = vadd.f32 %v5007_v54, %v4022_v55  ;;  %1371 = vmatprep.mubr.bf16.mxu0 %v11240_v2  ;;  %1724 = vmatprep.mubr.bf16.mxu1 %v11240_v2 }
 0x19b   :  { %v717_v61 = vpop.f32.mrb[96].mxu0  ;;  %v1070_v62 = vpop.f32.mrb[96].mxu1 }
 0x19c   :  { %v4035_v63 = vmax.f32 %v717_v61, 0.0  ;;  %v4037_v25 = vmax.f32 %v1070_v62, 0.0  ;;  %v719_v0 = vpop.f32.mrb[97].mxu0  ;;  %v1072_v20 = vpop.f32.mrb[97].mxu1 }
 0x19d   :  { %v4036_v3 = vmax.f32 %v719_v0, 0.0  ;;  %v4038_v4 = vmax.f32 %v1072_v20, 0.0  ;;  %v721_v5 = vpop.f32.mrb[98].mxu0  ;;  %v1074_v6 = vpop.f32.mrb[98].mxu1 }
 0x19e   :  { %v4898_v7 = vadd.f32 %v4897_v56, %v4035_v63  ;;  %v4972_v8 = vadd.f32 %v4971_v57, %v4037_v25  ;;  %v4051_v9 = vmax.f32 %v721_v5, 0.0  ;;  %v4053_v10 = vmax.f32 %v1074_v6, 0.0  ;;  %v723_v11 = vpop.f32.mrb[99].mxu0  ;;  %v1076_v18 = vpop.f32.mrb[99].mxu1 }
 0x19f   :  { %v4935_v12 = vadd.f32 %v4934_v59, %v4036_v3  ;;  %v5009_v23 = vadd.f32 %v5008_v60, %v4038_v4  ;;  %v4052_v14 = vmax.f32 %v723_v11, 0.0  ;;  %v4054_v34 = vmax.f32 %v1076_v18, 0.0  ;;  %v11165_v18 = vld [vmem:[%s13999_s0 + $0xa8] sm:$0xff]  }
 0x1a0   :  { %v4899_v15 = vadd.f32 %v4898_v7, %v4051_v9  ;;  %v4973_v16 = vadd.f32 %v4972_v8, %v4053_v10  ;;  %9586 = vmatmul.mubr.msk.bf16.gmra.mrb[204].mxu0 %vm297_vm1, %v11163_v26  ;;  %9619 = vmatmul.mubr.msk.bf16.gmra.mrb[204].mxu1 %vm297_vm1, %v11163_v26 }
 0x1a1   :  { %v4936_v27 = vadd.f32 %v4935_v12, %v4052_v14  ;;  %v5010_v28 = vadd.f32 %v5009_v23, %v4054_v34  ;;  %1381 = vmatprep.mubr.bf16.mxu0 %v11240_v2  ;;  %1734 = vmatprep.mubr.bf16.mxu1 %v11240_v2 }
 0x1a3   :  { %v727_v37 = vpop.f32.mrb[100].mxu0  ;;  %v1080_v29 = vpop.f32.mrb[100].mxu1 }
 0x1a4   :  { %v4067_v30 = vmax.f32 %v727_v37, 0.0  ;;  %v4069_v31 = vmax.f32 %v1080_v29, 0.0  ;;  %v729_v21 = vpop.f32.mrb[101].mxu0  ;;  %v1082_v32 = vpop.f32.mrb[101].mxu1 }
 0x1a5   :  { %v4068_v33 = vmax.f32 %v729_v21, 0.0  ;;  %v4070_v35 = vmax.f32 %v1082_v32, 0.0  ;;  %v731_v39 = vpop.f32.mrb[102].mxu0  ;;  %v1084_v42 = vpop.f32.mrb[102].mxu1 }
 0x1a6   :  { %v4900_v43 = vadd.f32 %v4899_v15, %v4067_v30  ;;  %v4974_v24 = vadd.f32 %v4973_v16, %v4069_v31  ;;  %v4083_v19 = vmax.f32 %v731_v39, 0.0  ;;  %v4085_v44 = vmax.f32 %v1084_v42, 0.0  ;;  %v733_v45 = vpop.f32.mrb[103].mxu0  ;;  %v1086_v46 = vpop.f32.mrb[103].mxu1 }
 0x1a7   :  { %v4937_v47 = vadd.f32 %v4936_v27, %v4068_v33  ;;  %v5011_v48 = vadd.f32 %v5010_v28, %v4070_v35  ;;  %v4084_v49 = vmax.f32 %v733_v45, 0.0  ;;  %v4086_v13 = vmax.f32 %v1086_v46, 0.0  ;;  %v11166_v46 = vld [vmem:[%s13999_s0 + $0xb0] sm:$0xff]  }
 0x1a8   :  { %v4901_v50 = vadd.f32 %v4900_v43, %v4083_v19  ;;  %v4975_v51 = vadd.f32 %v4974_v24, %v4085_v44  ;;  %9587 = vmatmul.mubr.msk.bf16.gmra.mrb[208].mxu0 %vm297_vm1, %v11164_v52  ;;  %9620 = vmatmul.mubr.msk.bf16.gmra.mrb[208].mxu1 %vm297_vm1, %v11164_v52 }
 0x1a9   :  { %v4938_v53 = vadd.f32 %v4937_v47, %v4084_v49  ;;  %v5012_v54 = vadd.f32 %v5011_v48, %v4086_v13  ;;  %1391 = vmatprep.mubr.bf16.mxu0 %v11240_v2  ;;  %1744 = vmatprep.mubr.bf16.mxu1 %v11240_v2  ;;  %v4322_v47 = vrot.slane %v11641_v36, 4 }
 0x1ab   :  { %v737_v22 = vpop.f32.mrb[104].mxu0  ;;  %v1090_v55 = vpop.f32.mrb[104].mxu1 }
 0x1ac   :  { %v4099_v56 = vmax.f32 %v737_v22, 0.0  ;;  %v4101_v57 = vmax.f32 %v1090_v55, 0.0  ;;  %v739_v58 = vpop.f32.mrb[105].mxu0  ;;  %v1092_v59 = vpop.f32.mrb[105].mxu1  ;;  %v4323_v22 = vadd.f32 %v4322_v47, %v11641_v36  ;;  %v4396_v55 = vrot.slane %v11643_v38, 4 }
 0x1ad   :  { %v4100_v60 = vmax.f32 %v739_v58, 0.0  ;;  %v4102_v61 = vmax.f32 %v1092_v59, 0.0  ;;  %v741_v62 = vpop.f32.mrb[106].mxu0  ;;  %v1094_v63 = vpop.f32.mrb[106].mxu1  ;;  %v4433_v36 = vrot.slane %v11652_v41, 4 }
 0x1ae   :  { %v4902_v25 = vadd.f32 %v4901_v50, %v4099_v56  ;;  %v4976_v0 = vadd.f32 %v4975_v51, %v4101_v57  ;;  %v4115_v20 = vmax.f32 %v741_v62, 0.0  ;;  %v4117_v3 = vmax.f32 %v1094_v63, 0.0  ;;  %v743_v4 = vpop.f32.mrb[107].mxu0  ;;  %v1096_v5 = vpop.f32.mrb[107].mxu1 }
 0x1af   :  { %v4939_v6 = vadd.f32 %v4938_v53, %v4100_v60  ;;  %v5013_v7 = vadd.f32 %v5012_v54, %v4102_v61  ;;  %v4116_v8 = vmax.f32 %v743_v4, 0.0  ;;  %v4118_v9 = vmax.f32 %v1096_v5, 0.0 }
 0x1b0   :  { %v4903_v10 = vadd.f32 %v4902_v25, %v4115_v20  ;;  %v4977_v11 = vadd.f32 %v4976_v0, %v4117_v3  ;;  %9588 = vmatmul.mubr.msk.bf16.gmra.mrb[212].mxu0 %vm297_vm1, %v11165_v18  ;;  %9621 = vmatmul.mubr.msk.bf16.gmra.mrb[212].mxu1 %vm297_vm1, %v11165_v18 }
 0x1b1   :  { %v4940_v12 = vadd.f32 %v4939_v6, %v4116_v8  ;;  %v5014_v23 = vadd.f32 %v5013_v7, %v4118_v9  ;;  %1401 = vmatprep.mubr.bf16.mxu0 %v11240_v2  ;;  %1754 = vmatprep.mubr.bf16.mxu1 %v11240_v2  ;;  %v4359_v6 = vrot.slane %v11650_v40, 4  ;;  %v11167_v9 = vld [vmem:[%s13999_s0 + $0xb8] sm:$0xff]  }
 0x1b3   :  { %v747_v14 = vpop.f32.mrb[108].mxu0  ;;  %v1100_v34 = vpop.f32.mrb[108].mxu1 }
 0x1b4   :  { %v4131_v15 = vmax.f32 %v747_v14, 0.0  ;;  %v4133_v16 = vmax.f32 %v1100_v34, 0.0  ;;  %v749_v26 = vpop.f32.mrb[109].mxu0  ;;  %v1102_v27 = vpop.f32.mrb[109].mxu1  ;;  %v4360_v34 = vadd.f32 %v4359_v6, %v11650_v40 }
 0x1b5   :  { %v4132_v28 = vmax.f32 %v749_v26, 0.0  ;;  %v4134_v37 = vmax.f32 %v1102_v27, 0.0  ;;  %v751_v29 = vpop.f32.mrb[110].mxu0  ;;  %v1104_v30 = vpop.f32.mrb[110].mxu1 }
 0x1b6   :  { %v4904_v31 = vadd.f32 %v4903_v10, %v4131_v15  ;;  %v4978_v21 = vadd.f32 %v4977_v11, %v4133_v16  ;;  %v4147_v32 = vmax.f32 %v751_v29, 0.0  ;;  %v4149_v33 = vmax.f32 %v1104_v30, 0.0  ;;  %v753_v35 = vpop.f32.mrb[111].mxu0  ;;  %v1106_v39 = vpop.f32.mrb[111].mxu1 }
 0x1b7   :  { %v4941_v42 = vadd.f32 %v4940_v12, %v4132_v28  ;;  %v5015_v43 = vadd.f32 %v5014_v23, %v4134_v37  ;;  %v4148_v24 = vmax.f32 %v753_v35, 0.0  ;;  %v4150_v19 = vmax.f32 %v1106_v39, 0.0 }
 0x1b8   :  { %v4905_v44 = vadd.f32 %v4904_v31, %v4147_v32  ;;  %v4979_v45 = vadd.f32 %v4978_v21, %v4149_v33  ;;  %9589 = vmatmul.mubr.msk.bf16.gmra.mrb[216].mxu0 %vm297_vm1, %v11166_v46  ;;  %9622 = vmatmul.mubr.msk.bf16.gmra.mrb[216].mxu1 %vm297_vm1, %v11166_v46  ;;  %v4324_v10 = vrot.slane %v4323_v22, 2  ;;  %v4397_v11 = vadd.f32 %v4396_v55, %v11643_v38 }
 0x1b9   :  { %v4942_v48 = vadd.f32 %v4941_v42, %v4148_v24  ;;  %v5016_v49 = vadd.f32 %v5015_v43, %v4150_v19  ;;  %1411 = vmatprep.mubr.bf16.mxu0 %v11240_v2  ;;  %1764 = vmatprep.mubr.bf16.mxu1 %v11240_v2  ;;  %v4434_v15 = vadd.f32 %v4433_v36, %v11652_v41 }
 0x1ba   :  { %v4325_v37 = vadd.f32 %v4324_v10, %v4323_v22  ;;  %v4398_v38 = vrot.slane %v4397_v11, 2 }
 0x1bb   :  { %v757_v13 = vpop.f32.mrb[112].mxu0  ;;  %v1110_v50 = vpop.f32.mrb[112].mxu1 }
 0x1bc   :  { %v4163_v51 = vmax.f32 %v757_v13, 0.0  ;;  %v4165_v52 = vmax.f32 %v1110_v50, 0.0  ;;  %v759_v53 = vpop.f32.mrb[113].mxu0  ;;  %v1112_v54 = vpop.f32.mrb[113].mxu1  ;;  %v4399_v13 = vadd.f32 %v4398_v38, %v4397_v11 }
 0x1bd   :  { %v4164_v56 = vmax.f32 %v759_v53, 0.0  ;;  %v4166_v57 = vmax.f32 %v1112_v54, 0.0  ;;  %v761_v58 = vpop.f32.mrb[114].mxu0  ;;  %v1114_v59 = vpop.f32.mrb[114].mxu1 }
 0x1be   :  { %v4906_v60 = vadd.f32 %v4905_v44, %v4163_v51  ;;  %v4980_v61 = vadd.f32 %v4979_v45, %v4165_v52  ;;  %v4179_v62 = vmax.f32 %v761_v58, 0.0  ;;  %v4181_v63 = vmax.f32 %v1114_v59, 0.0  ;;  %v763_v25 = vpop.f32.mrb[115].mxu0  ;;  %v1116_v0 = vpop.f32.mrb[115].mxu1 }
 0x1bf   :  { %v4943_v20 = vadd.f32 %v4942_v48, %v4164_v56  ;;  %v5017_v3 = vadd.f32 %v5016_v49, %v4166_v57  ;;  %v4180_v4 = vmax.f32 %v763_v25, 0.0  ;;  %v4182_v5 = vmax.f32 %v1116_v0, 0.0  ;;  %v11168_v48 = vld [vmem:[%s13999_s0 + $0xc0] sm:$0xff]  }
 0x1c0   :  { %v4907_v7 = vadd.f32 %v4906_v60, %v4179_v62  ;;  %v4981_v8 = vadd.f32 %v4980_v61, %v4181_v63  ;;  %9590 = vmatmul.mubr.msk.bf16.gmra.mrb[220].mxu0 %vm297_vm1, %v11167_v9  ;;  %9623 = vmatmul.mubr.msk.bf16.gmra.mrb[220].mxu1 %vm297_vm1, %v11167_v9  ;;  %v4361_v44 = vrot.slane %v4360_v34, 2  ;;  %v4435_v45 = vrot.slane %v4434_v15, 2 }
 0x1c1   :  { %v4944_v18 = vadd.f32 %v4943_v20, %v4180_v4  ;;  %v5018_v12 = vadd.f32 %v5017_v3, %v4182_v5  ;;  %1421 = vmatprep.mubr.bf16.mxu0 %v11240_v2  ;;  %1774 = vmatprep.mubr.bf16.mxu1 %v11240_v2  ;;  %v4326_v49 = vrot.slane %v4325_v37, 1  ;;  %v4400_v60 = vrot.slane %v4399_v13, 1 }
 0x1c2   :  { %v4362_v54 = vadd.f32 %v4361_v44, %v4360_v34  ;;  %v4436_v22 = vadd.f32 %v4435_v45, %v4434_v15 }
 0x1c3   :  { %v767_v23 = vpop.f32.mrb[116].mxu0  ;;  %v1120_v14 = vpop.f32.mrb[116].mxu1  ;;  %v4327_v59 = vadd.f32 %v4326_v49, %v4325_v37  ;;  %v4401_v34 = vadd.f32 %v4400_v60, %v4399_v13 }
 0x1c4   :  { %v4195_v16 = vmax.f32 %v767_v23, 0.0  ;;  %v4197_v26 = vmax.f32 %v1120_v14, 0.0  ;;  %v769_v27 = vpop.f32.mrb[117].mxu0  ;;  %v1122_v28 = vpop.f32.mrb[117].mxu1  ;;  %v4363_v10 = vrot.slane %v4362_v54, 1  ;;  %v4437_v11 = vrot.slane %v4436_v22, 1 }
 0x1c5   :  { %v4196_v29 = vmax.f32 %v769_v27, 0.0  ;;  %v4198_v30 = vmax.f32 %v1122_v28, 0.0  ;;  %v771_v31 = vpop.f32.mrb[118].mxu0  ;;  %v1124_v21 = vpop.f32.mrb[118].mxu1  ;;  %v11169_v23 = vld [vmem:[%s13999_s0 + $0xc8] sm:$0xff]   ;;  %v5476_v14 = vmul.f32 0.00390625, %v4327_v59 }
 0x1c6   :  { %v4908_v32 = vadd.f32 %v4907_v7, %v4195_v16  ;;  %v4982_v33 = vadd.f32 %v4981_v8, %v4197_v26  ;;  %v4211_v35 = vmax.f32 %v771_v31, 0.0  ;;  %v4213_v39 = vmax.f32 %v1124_v21, 0.0  ;;  %v773_v42 = vpop.f32.mrb[119].mxu0  ;;  %v1126_v43 = vpop.f32.mrb[119].mxu1 }
 0x1c7   :  { %v4945_v24 = vadd.f32 %v4944_v18, %v4196_v29  ;;  %v5019_v40 = vadd.f32 %v5018_v12, %v4198_v30  ;;  %v4212_v19 = vmax.f32 %v773_v42, 0.0  ;;  %v4214_v41 = vmax.f32 %v1126_v43, 0.0 }
 0x1c8   :  { %v4909_v46 = vadd.f32 %v4908_v32, %v4211_v35  ;;  %v4983_v47 = vadd.f32 %v4982_v33, %v4213_v39  ;;  %9591 = vmatmul.mubr.msk.bf16.gmra.mrb[224].mxu0 %vm297_vm1, %v11168_v48  ;;  %9624 = vmatmul.mubr.msk.bf16.gmra.mrb[224].mxu1 %vm297_vm1, %v11168_v48  ;;  %v4364_v30 = vadd.f32 %v4363_v10, %v4362_v54  ;;  %v11785_v32 = vmul.f32 0.00390625, %v4401_v34 }
 0x1c9   :  { %v4946_v50 = vadd.f32 %v4945_v24, %v4212_v19  ;;  %v5020_v51 = vadd.f32 %v5019_v40, %v4214_v41  ;;  %1431 = vmatprep.mubr.bf16.mxu0 %v11240_v2  ;;  %1784 = vmatprep.mubr.bf16.mxu1 %v11240_v2  ;;  %v4438_v31 = vadd.f32 %v4437_v11, %v4436_v22 }
 0x1ca   :  { %v5508_v21 = vpack.c.bf16 %v5476_v14, %v5476_v14 }
 0x1cb   :  { %v777_v52 = vpop.f32.mrb[120].mxu0  ;;  %v1130_v53 = vpop.f32.mrb[120].mxu1 }
 0x1cc   :  { %v4227_v55 = vmax.f32 %v777_v52, 0.0  ;;  %v4229_v56 = vmax.f32 %v1130_v53, 0.0  ;;  %v779_v57 = vpop.f32.mrb[121].mxu0  ;;  %v1132_v58 = vpop.f32.mrb[121].mxu1  ;;  %v5510_v53 = vpack.c.bf16 %v11785_v32, %v11785_v32 }
 0x1cd   :  { %v4228_v61 = vmax.f32 %v779_v57, 0.0  ;;  %v4230_v62 = vmax.f32 %v1132_v58, 0.0  ;;  %v781_v63 = vpop.f32.mrb[122].mxu0  ;;  %v1134_v25 = vpop.f32.mrb[122].mxu1 }
 0x1ce   :  { %v4910_v0 = vadd.f32 %v4909_v46, %v4227_v55  ;;  %v4984_v20 = vadd.f32 %v4983_v47, %v4229_v56  ;;  %v4243_v3 = vmax.f32 %v781_v63, 0.0  ;;  %v4245_v4 = vmax.f32 %v1134_v25, 0.0  ;;  %v783_v5 = vpop.f32.mrb[123].mxu0  ;;  %v1136_v6 = vpop.f32.mrb[123].mxu1 }
 0x1cf   :  { %v4947_v36 = vadd.f32 %v4946_v50, %v4228_v61  ;;  %v5021_v7 = vadd.f32 %v5020_v51, %v4230_v62  ;;  %v4244_v8 = vmax.f32 %v783_v5, 0.0  ;;  %v4246_v9 = vmax.f32 %v1136_v6, 0.0  ;;  %v11170_v50 = vld [vmem:[%s13999_s0 + $0xd0] sm:$0xff]  }
 0x1d0   :  { %v4911_v18 = vadd.f32 %v4910_v0, %v4243_v3  ;;  %v4985_v12 = vadd.f32 %v4984_v20, %v4245_v4  ;;  %9592 = vmatmul.mubr.msk.bf16.gmra.mrb[228].mxu0 %vm297_vm1, %v11169_v23  ;;  %9625 = vmatmul.mubr.msk.bf16.gmra.mrb[228].mxu1 %vm297_vm1, %v11169_v23  ;;  %v11796_v55 = vmul.f32 0.00390625, %v4364_v30  ;;  %v11798_v56 = vunpack.c.l.b16 %v5508_v21 }
 0x1d1   :  { %v4948_v15 = vadd.f32 %v4947_v36, %v4244_v8  ;;  %v5022_v16 = vadd.f32 %v5021_v7, %v4246_v9  ;;  %1441 = vmatprep.mubr.bf16.mxu0 %v11240_v2  ;;  %1794 = vmatprep.mubr.bf16.mxu1 %v11240_v2  ;;  %v11800_v61 = vmul.f32 0.00390625, %v4438_v31  ;;  %v6108_v32 = vunpack.c.l.b16 %v5510_v53 }
 0x1d3   :  { %v787_v26 = vpop.f32.mrb[124].mxu0  ;;  %v1140_v27 = vpop.f32.mrb[124].mxu1 }
 0x1d4   :  { %v4259_v28 = vmax.f32 %v787_v26, 0.0  ;;  %v4261_v37 = vmax.f32 %v1140_v27, 0.0  ;;  %v789_v38 = vpop.f32.mrb[125].mxu0  ;;  %v1142_v29 = vpop.f32.mrb[125].mxu1 }
 0x1d5   :  { %v4260_v33 = vmax.f32 %v789_v38, 0.0  ;;  %v4262_v35 = vmax.f32 %v1142_v29, 0.0  ;;  %v791_v39 = vpop.f32.mrb[126].mxu0  ;;  %v1144_v42 = vpop.f32.mrb[126].mxu1  ;;  %v11171_v38 = vld [vmem:[%s13999_s0 + $0xd8] sm:$0xff]  }
 0x1d6   :  { %v4912_v43 = vadd.f32 %v4911_v18, %v4259_v28  ;;  %v4986_v24 = vadd.f32 %v4985_v12, %v4261_v37  ;;  %v4275_v40 = vmax.f32 %v791_v39, 0.0  ;;  %v4277_v19 = vmax.f32 %v1144_v42, 0.0  ;;  %v793_v41 = vpop.f32.mrb[127].mxu0  ;;  %v1146_v44 = vpop.f32.mrb[127].mxu1 }
 0x1d7   :  { %v4949_v45 = vadd.f32 %v4948_v15, %v4260_v33  ;;  %v5023_v46 = vadd.f32 %v5022_v16, %v4262_v35  ;;  %v4276_v47 = vmax.f32 %v793_v41, 0.0  ;;  %v4278_v48 = vmax.f32 %v1146_v44, 0.0 }
 0x1d8   :  { %v4913_v49 = vadd.f32 %v4912_v43, %v4275_v40  ;;  %v4987_v13 = vadd.f32 %v4986_v24, %v4277_v19  ;;  %9593 = vmatmul.mubr.msk.bf16.gmra.mrb[232].mxu0 %vm297_vm1, %v11170_v50  ;;  %9626 = vmatmul.mubr.msk.bf16.gmra.mrb[232].mxu1 %vm297_vm1, %v11170_v50  ;;  %v5509_v40 = vpack.c.bf16 %v11796_v55, %v11796_v55 }
 0x1d9   :  { %v4950_v51 = vadd.f32 %v4949_v45, %v4276_v47  ;;  %v5024_v52 = vadd.f32 %v5023_v46, %v4278_v48  ;;  %1451 = vmatprep.mubr.bf16.mxu0 %v11240_v2  ;;  %1804 = vmatprep.mubr.bf16.mxu1 %v11240_v2  ;;  %v5511_v19 = vpack.c.bf16 %v11800_v61, %v11800_v61 }
 0x1da   :  { %v4914_v54 = vrot.slane %v4913_v49, 4  ;;  %v4988_v22 = vrot.slane %v4987_v13, 4 }
 0x1db   :  { %v4951_v57 = vrot.slane %v4950_v51, 4  ;;  %v5025_v58 = vrot.slane %v5024_v52, 4  ;;  %v1183_v59 = vpop.f32.mrb[128].mxu0  ;;  %v1536_v60 = vpop.f32.mrb[128].mxu1 }
 0x1dc   :  { %v4915_v62 = vadd.f32 %v4914_v54, %v4913_v49  ;;  %v4989_v63 = vadd.f32 %v4988_v22, %v4987_v13  ;;  %v3271_v25 = vmax.f32 %v1183_v59, 0.0  ;;  %v1185_v0 = vpop.f32.mrb[129].mxu0  ;;  %v3273_v20 = vmax.f32 %v1536_v60, 0.0  ;;  %v1538_v3 = vpop.f32.mrb[129].mxu1 }
 0x1dd   :  { %v4952_v4 = vadd.f32 %v4951_v57, %v4950_v51  ;;  %v5026_v5 = vadd.f32 %v5025_v58, %v5024_v52  ;;  %v3272_v6 = vmax.f32 %v1185_v0, 0.0  ;;  %v1187_v36 = vpop.f32.mrb[130].mxu0  ;;  %v3274_v7 = vmax.f32 %v1538_v3, 0.0  ;;  %v1540_v8 = vpop.f32.mrb[130].mxu1 }
 0x1de   :  { %v4916_v9 = vrot.slane %v4915_v62, 2  ;;  %v4990_v10 = vrot.slane %v4989_v63, 2  ;;  %v3287_v11 = vmax.f32 %v1187_v36, 0.0  ;;  %v1189_v18 = vpop.f32.mrb[131].mxu0  ;;  %v3289_v12 = vmax.f32 %v1540_v8, 0.0  ;;  %v1542_v23 = vpop.f32.mrb[131].mxu1 }
 0x1df   :  { %v4953_v14 = vrot.slane %v4952_v4, 2  ;;  %v5027_v34 = vrot.slane %v5026_v5, 2  ;;  %v3288_v15 = vmax.f32 %v1189_v18, 0.0  ;;  %v3290_v16 = vmax.f32 %v1542_v23, 0.0 }
 0x1e0   :  { %v4917_v26 = vadd.f32 %v4916_v9, %v4915_v62  ;;  %v4991_v27 = vadd.f32 %v4990_v10, %v4989_v63  ;;  %v4439_v28 = vadd.f32 %v3287_v11, %v3271_v25  ;;  %v4513_v37 = vadd.f32 %v3289_v12, %v3273_v20  ;;  %9594 = vmatmul.mubr.msk.bf16.gmra.mrb[236].mxu0 %vm297_vm1, %v11171_v38 }
 0x1e1   :  { %v4954_v29 = vadd.f32 %v4953_v14, %v4952_v4  ;;  %v5028_v30 = vadd.f32 %v5027_v34, %v5026_v5  ;;  %v4476_v31 = vadd.f32 %v3288_v15, %v3272_v6  ;;  %v4550_v21 = vadd.f32 %v3290_v16, %v3274_v7  ;;  %9627 = vmatmul.mubr.msk.bf16.gmra.mrb[236].mxu1 %vm297_vm1, %v11171_v38  ;;  %v11172_v4 = vld [vmem:[%s13999_s0 + $0xe0] sm:$0xff]  }
 0x1e2   :  { %v4918_v33 = vrot.slane %v4917_v26, 1  ;;  %v4992_v35 = vrot.slane %v4991_v27, 1  ;;  %1461 = vmatprep.mubr.bf16.mxu0 %v11240_v2  ;;  %1814 = vmatprep.mubr.bf16.mxu1 %v11240_v2 }
 0x1e3   :  { %v4955_v39 = vrot.slane %v4954_v29, 1  ;;  %v5029_v42 = vrot.slane %v5028_v30, 1  ;;  %v1193_v43 = vpop.f32.mrb[132].mxu0  ;;  %v1546_v24 = vpop.f32.mrb[132].mxu1 }
 0x1e4   :  { %v4919_v41 = vadd.f32 %v4918_v33, %v4917_v26  ;;  %v4993_v44 = vadd.f32 %v4992_v35, %v4991_v27  ;;  %v3303_v45 = vmax.f32 %v1193_v43, 0.0  ;;  %v3305_v46 = vmax.f32 %v1546_v24, 0.0  ;;  %v1195_v47 = vpop.f32.mrb[133].mxu0  ;;  %v1548_v48 = vpop.f32.mrb[133].mxu1 }
 0x1e5   :  { %v3304_v49 = vmax.f32 %v1195_v47, 0.0  ;;  %v3306_v13 = vmax.f32 %v1548_v48, 0.0  ;;  %v1197_v50 = vpop.f32.mrb[134].mxu0  ;;  %v1550_v51 = vpop.f32.mrb[134].mxu1  ;;  %v4956_v52 = vadd.f32 %v4955_v39, %v4954_v29  ;;  %v5030_v53 = vadd.f32 %v5029_v42, %v5028_v30  ;;  %v11173_v47 = vld [vmem:[%s13999_s0 + $0xe8] sm:$0xff]  }
 0x1e6   :  { %v5492_v54 = vmul.f32 0.00390625, %v4919_v41  ;;  %v5494_v22 = vmul.f32 0.00390625, %v4993_v44  ;;  %v4440_v57 = vadd.f32 %v4439_v28, %v3303_v45  ;;  %v4514_v58 = vadd.f32 %v4513_v37, %v3305_v46  ;;  %v1199_v55 = vpop.f32.mrb[135].mxu0  ;;  %v1552_v59 = vpop.f32.mrb[135].mxu1 }
 0x1e7   :  { %v4477_v60 = vadd.f32 %v4476_v31, %v3304_v49  ;;  %v4551_v61 = vadd.f32 %v4550_v21, %v3306_v13  ;;  %v3319_v62 = vmax.f32 %v1197_v50, 0.0  ;;  %v3321_v63 = vmax.f32 %v1550_v51, 0.0 }
 0x1e8   :  { %v5524_v25 = vpack.c.bf16 %v5492_v54, %v5492_v54  ;;  %v5526_v0 = vpack.c.bf16 %v5494_v22, %v5494_v22  ;;  %v3320_v20 = vmax.f32 %v1199_v55, 0.0  ;;  %v3322_v3 = vmax.f32 %v1552_v59, 0.0  ;;  %9595 = vmatmul.mubr.msk.bf16.gmra.mrb[240].mxu0 %vm297_vm1, %v11172_v4 }
 0x1e9   :  { %v4441_v5 = vadd.f32 %v4440_v57, %v3319_v62  ;;  %v4515_v6 = vadd.f32 %v4514_v58, %v3321_v63  ;;  %9628 = vmatmul.mubr.msk.bf16.gmra.mrb[240].mxu1 %vm297_vm1, %v11172_v4  ;;  %1471 = vmatprep.mubr.bf16.mxu0 %v11240_v2  ;;  %v5493_v36 = vmul.f32 0.00390625, %v4956_v52  ;;  %v5495_v7 = vmul.f32 0.00390625, %v5030_v53 }
 0x1ea   :  { %v6122_v8 = vunpack.c.l.b16 %v5524_v25  ;;  %v6124_v9 = vunpack.c.l.b16 %v5526_v0  ;;  %v4478_v10 = vadd.f32 %v4477_v60, %v3320_v20  ;;  %v4552_v11 = vadd.f32 %v4551_v61, %v3322_v3  ;;  %1824 = vmatprep.mubr.bf16.mxu1 %v11240_v2 }
 0x1eb   :  { %v1203_v18 = vpop.f32.mrb[136].mxu0  ;;  %v1556_v12 = vpop.f32.mrb[136].mxu1  ;;  %v5525_v23 = vpack.c.bf16 %v5493_v36, %v5493_v36  ;;  %v5527_v14 = vpack.c.bf16 %v5495_v7, %v5495_v7  ;;  %v6107_v31 = vunpack.c.l.b16 %v5509_v40  ;;  %v6109_v21 = vunpack.c.l.b16 %v5511_v19 }
 0x1ec   :  { %v11822_v34 = vsel %vm6138_vm2, %v6122_v8, %v11798_v56  ;;  %v11825_v15 = vsel %vm6138_vm2, %v6124_v9, %v6108_v32  ;;  %v3335_v16 = vmax.f32 %v1203_v18, 0.0  ;;  %v3337_v26 = vmax.f32 %v1556_v12, 0.0  ;;  %v1205_v27 = vpop.f32.mrb[137].mxu0  ;;  %v1558_v28 = vpop.f32.mrb[137].mxu1  ;;  %v11174_v8 = vld [vmem:[%s13999_s0 + $0xf0] sm:$0xff]  }
 0x1ed   :  { %v3336_v37 = vmax.f32 %v1205_v27, 0.0  ;;  %v3338_v38 = vmax.f32 %v1558_v28, 0.0  ;;  %v1207_v29 = vpop.f32.mrb[138].mxu0  ;;  %v1560_v30 = vpop.f32.mrb[138].mxu1  ;;  %v6123_v40 = vunpack.c.l.b16 %v5525_v23  ;;  %v6125_v19 = vunpack.c.l.b16 %v5527_v14 }
 0x1ee   :  { %v4442_v33 = vadd.f32 %v4441_v5, %v3335_v16  ;;  %v4516_v35 = vadd.f32 %v4515_v6, %v3337_v26  ;;  %v3351_v39 = vmax.f32 %v1207_v29, 0.0  ;;  %v3353_v42 = vmax.f32 %v1560_v30, 0.0  ;;  %v1209_v43 = vpop.f32.mrb[139].mxu0  ;;  %v1562_v56 = vpop.f32.mrb[139].mxu1 }
 0x1ef   :  { %v4479_v24 = vadd.f32 %v4478_v10, %v3336_v37  ;;  %v4553_v41 = vadd.f32 %v4552_v11, %v3338_v38  ;;  %v3352_v32 = vmax.f32 %v1209_v43, 0.0  ;;  %v3354_v44 = vmax.f32 %v1562_v56, 0.0 }
 0x1f0   :  { %v4443_v45 = vadd.f32 %v4442_v33, %v3351_v39  ;;  %v4517_v46 = vadd.f32 %v4516_v35, %v3353_v42  ;;  %9596 = vmatmul.mubr.msk.bf16.gmra.mrb[244].mxu0 %vm297_vm1, %v11173_v47  ;;  %v11835_v13 = vsel %vm6138_vm2, %v6123_v40, %v6107_v31  ;;  %v11838_v50 = vsel %vm6138_vm2, %v6125_v19, %v6109_v21 }
 0x1f1   :  { %v4480_v48 = vadd.f32 %v4479_v24, %v3352_v32  ;;  %v4554_v49 = vadd.f32 %v4553_v41, %v3354_v44  ;;  %9629 = vmatmul.mubr.msk.bf16.gmra.mrb[244].mxu1 %vm297_vm1, %v11173_v47  ;;  %1481 = vmatprep.mubr.bf16.mxu0 %v11240_v2  ;;  %v11175_v41 = vld [vmem:[%s13999_s0 + $0xf8] sm:$0xff]   ;;  %v9496_v32 = vcombine.low %v11700_v1, %v11700_v1 }
 0x1f2   :  { %1834 = vmatprep.mubr.bf16.mxu1 %v11240_v2 }
 0x1f3   :  { %v1213_v51 = vpop.f32.mrb[140].mxu0  ;;  %v1566_v52 = vpop.f32.mrb[140].mxu1 }
 0x1f4   :  { %v3367_v53 = vmax.f32 %v1213_v51, 0.0  ;;  %v3369_v54 = vmax.f32 %v1566_v52, 0.0  ;;  %v1215_v22 = vpop.f32.mrb[141].mxu0  ;;  %v1568_v57 = vpop.f32.mrb[141].mxu1 }
 0x1f5   :  { %v3368_v58 = vmax.f32 %v1215_v22, 0.0  ;;  %v3370_v55 = vmax.f32 %v1568_v57, 0.0  ;;  %v1217_v59 = vpop.f32.mrb[142].mxu0  ;;  %v1570_v60 = vpop.f32.mrb[142].mxu1  ;;  %v432_v22 = vsel %vm394_vm0, %v9496_v32, 0 }
 0x1f6   :  { %v4444_v61 = vadd.f32 %v4443_v45, %v3367_v53  ;;  %v4518_v62 = vadd.f32 %v4517_v46, %v3369_v54  ;;  %v3383_v63 = vmax.f32 %v1217_v59, 0.0  ;;  %v3385_v25 = vmax.f32 %v1570_v60, 0.0  ;;  %v1219_v0 = vpop.f32.mrb[143].mxu0  ;;  %v1572_v20 = vpop.f32.mrb[143].mxu1 }
 0x1f7   :  { %v4481_v3 = vadd.f32 %v4480_v48, %v3368_v58  ;;  %v4555_v4 = vadd.f32 %v4554_v49, %v3370_v55  ;;  %v3384_v5 = vmax.f32 %v1219_v0, 0.0  ;;  %v3386_v6 = vmax.f32 %v1572_v20, 0.0 }
 0x1f8   :  { %v4445_v36 = vadd.f32 %v4444_v61, %v3383_v63  ;;  %v4519_v7 = vadd.f32 %v4518_v62, %v3385_v25  ;;  %9597 = vmatmul.mubr.msk.bf16.gmra.mrb[248].mxu0 %vm297_vm1, %v11174_v8  ;;  %v9498_v46 = vcombine.low %v11709_v17, %v11709_v17 }
 0x1f9   :  { %v4482_v9 = vadd.f32 %v4481_v3, %v3384_v5  ;;  %v4556_v10 = vadd.f32 %v4555_v4, %v3386_v6  ;;  %9630 = vmatmul.mubr.msk.bf16.gmra.mrb[248].mxu1 %vm297_vm1, %v11174_v8  ;;  %1491 = vmatprep.mubr.bf16.mxu0 %v11240_v2  ;;  %v11176_v4 = vld [vmem:[%s13999_s0] sm:$0xff]  }
 0x1fa   :  { %1844 = vmatprep.mubr.bf16.mxu1 %v11240_v2  ;;  %v438_v57 = vsel %vm394_vm0, %v9498_v46, 0 }
 0x1fb   :  { %v1223_v11 = vpop.f32.mrb[144].mxu0  ;;  %v1576_v18 = vpop.f32.mrb[144].mxu1 }
 0x1fc   :  { %v3399_v12 = vmax.f32 %v1223_v11, 0.0  ;;  %v3401_v23 = vmax.f32 %v1576_v18, 0.0  ;;  %v1225_v14 = vpop.f32.mrb[145].mxu0  ;;  %v1578_v16 = vpop.f32.mrb[145].mxu1 }
 0x1fd   :  { %v3400_v26 = vmax.f32 %v1225_v14, 0.0  ;;  %v3402_v27 = vmax.f32 %v1578_v16, 0.0  ;;  %v1227_v28 = vpop.f32.mrb[146].mxu0  ;;  %v1580_v37 = vpop.f32.mrb[146].mxu1 }
 0x1fe   :  { %v4446_v38 = vadd.f32 %v4445_v36, %v3399_v12  ;;  %v4520_v29 = vadd.f32 %v4519_v7, %v3401_v23  ;;  %v3415_v30 = vmax.f32 %v1227_v28, 0.0  ;;  %v3417_v31 = vmax.f32 %v1580_v37, 0.0  ;;  %v1229_v21 = vpop.f32.mrb[147].mxu0  ;;  %v1582_v33 = vpop.f32.mrb[147].mxu1 }
 0x1ff   :  { %v4483_v35 = vadd.f32 %v4482_v9, %v3400_v26  ;;  %v4557_v39 = vadd.f32 %v4556_v10, %v3402_v27  ;;  %v3416_v42 = vmax.f32 %v1229_v21, 0.0  ;;  %v3418_v43 = vmax.f32 %v1582_v33, 0.0 }
 0x200   :  { %v4447_v56 = vadd.f32 %v4446_v38, %v3415_v30  ;;  %v4521_v24 = vadd.f32 %v4520_v29, %v3417_v31  ;;  %9598 = vmatmul.mubr.msk.bf16.gmra.mrb[252].mxu0 %vm297_vm1, %v11175_v41 }
 0x201   :  { %v4484_v44 = vadd.f32 %v4483_v35, %v3416_v42  ;;  %v4558_v45 = vadd.f32 %v4557_v39, %v3418_v43  ;;  %9631 = vmatmul.mubr.msk.bf16.gmra.mrb[252].mxu1 %vm297_vm1, %v11175_v41  ;;  %1887 = vmatprep.mubr.bf16.mxu0 %v11240_v2  ;;  %v11177_v39 = vld [vmem:[%s13999_s0 + $0x8] sm:$0xff]  }
 0x202   :  { %2240 = vmatprep.mubr.bf16.mxu1 %v11240_v2 }
 0x203   :  { %v1233_v47 = vpop.f32.mrb[148].mxu0  ;;  %v1586_v40 = vpop.f32.mrb[148].mxu1 }
 0x204   :  { %v3431_v19 = vmax.f32 %v1233_v47, 0.0  ;;  %v3433_v48 = vmax.f32 %v1586_v40, 0.0  ;;  %v1235_v49 = vpop.f32.mrb[149].mxu0  ;;  %v1588_v51 = vpop.f32.mrb[149].mxu1 }
 0x205   :  { %v3432_v52 = vmax.f32 %v1235_v49, 0.0  ;;  %v3434_v53 = vmax.f32 %v1588_v51, 0.0  ;;  %v1237_v1 = vpop.f32.mrb[150].mxu0  ;;  %v1590_v54 = vpop.f32.mrb[150].mxu1 }
 0x206   :  { %v4448_v58 = vadd.f32 %v4447_v56, %v3431_v19  ;;  %v4522_v55 = vadd.f32 %v4521_v24, %v3433_v48  ;;  %v3447_v59 = vmax.f32 %v1237_v1, 0.0  ;;  %v3449_v17 = vmax.f32 %v1590_v54, 0.0  ;;  %v1239_v60 = vpop.f32.mrb[151].mxu0  ;;  %v1592_v61 = vpop.f32.mrb[151].mxu1 }
 0x207   :  { %v4485_v62 = vadd.f32 %v4484_v44, %v3432_v52  ;;  %v4559_v63 = vadd.f32 %v4558_v45, %v3434_v53  ;;  %v3448_v25 = vmax.f32 %v1239_v60, 0.0  ;;  %v3450_v0 = vmax.f32 %v1592_v61, 0.0 }
 0x208   :  { %v4449_v20 = vadd.f32 %v4448_v58, %v3447_v59  ;;  %v4523_v3 = vadd.f32 %v4522_v55, %v3449_v17  ;;  %9633 = vmatmul.mubr.msk.bf16.vlgmr.msra.gmra.mrb[0].mxu0 %vm297_vm1, %v11176_v4  ;;  %v11178_v17 = vld [vmem:[%s13999_s0 + $0x10] sm:$0xff]  }
 0x209   :  { %v4486_v5 = vadd.f32 %v4485_v62, %v3448_v25  ;;  %v4560_v6 = vadd.f32 %v4559_v63, %v3450_v0  ;;  %9666 = vmatmul.mubr.msk.bf16.vlgmr.msra.gmra.mrb[0].mxu1 %vm297_vm1, %v11176_v4  ;;  %2562 = vmatpush1.bf16.msra.mxu0 %v432_v22 }
 0x20a   :  { %2915 = vmatpush1.bf16.msra.mxu1 %v438_v57  ;;  %1897 = vmatprep.mubr.bf16.mxu0 %v11240_v2 }
 0x20b   :  { %v1243_v36 = vpop.f32.mrb[152].mxu0  ;;  %v1596_v7 = vpop.f32.mrb[152].mxu1  ;;  %2250 = vmatprep.mubr.bf16.mxu1 %v11240_v2 }
 0x20c   :  { %v3463_v8 = vmax.f32 %v1243_v36, 0.0  ;;  %v3465_v9 = vmax.f32 %v1596_v7, 0.0  ;;  %v1245_v10 = vpop.f32.mrb[153].mxu0  ;;  %v1598_v11 = vpop.f32.mrb[153].mxu1 }
 0x20d   :  { %v3464_v18 = vmax.f32 %v1245_v10, 0.0  ;;  %v3466_v12 = vmax.f32 %v1598_v11, 0.0  ;;  %v1247_v23 = vpop.f32.mrb[154].mxu0  ;;  %v1600_v14 = vpop.f32.mrb[154].mxu1 }
 0x20e   :  { %v4450_v16 = vadd.f32 %v4449_v20, %v3463_v8  ;;  %v4524_v26 = vadd.f32 %v4523_v3, %v3465_v9  ;;  %v3479_v27 = vmax.f32 %v1247_v23, 0.0  ;;  %v3481_v28 = vmax.f32 %v1600_v14, 0.0  ;;  %v1249_v37 = vpop.f32.mrb[155].mxu0  ;;  %v1602_v38 = vpop.f32.mrb[155].mxu1 }
 0x20f   :  { %v4487_v29 = vadd.f32 %v4486_v5, %v3464_v18  ;;  %v4561_v30 = vadd.f32 %v4560_v6, %v3466_v12  ;;  %v3480_v31 = vmax.f32 %v1249_v37, 0.0  ;;  %v3482_v21 = vmax.f32 %v1602_v38, 0.0 }
 0x210   :  { %v4451_v33 = vadd.f32 %v4450_v16, %v3479_v27  ;;  %v4525_v35 = vadd.f32 %v4524_v26, %v3481_v28  ;;  %9634 = vmatmul.mubr.msk.bf16.gmra.mrb[4].mxu0 %vm297_vm1, %v11177_v39  ;;  %v11179_v28 = vld [vmem:[%s13999_s0 + $0x18] sm:$0xff]  }
 0x211   :  { %v4488_v42 = vadd.f32 %v4487_v29, %v3480_v31  ;;  %v4562_v43 = vadd.f32 %v4561_v30, %v3482_v21  ;;  %9667 = vmatmul.mubr.msk.bf16.gmra.mrb[4].mxu1 %vm297_vm1, %v11177_v39  ;;  %1907 = vmatprep.mubr.bf16.mxu0 %v11240_v2 }
 0x212   :  { %2260 = vmatprep.mubr.bf16.mxu1 %v11240_v2 }
 0x213   :  { %v1253_v56 = vpop.f32.mrb[156].mxu0  ;;  %v1606_v24 = vpop.f32.mrb[156].mxu1 }
 0x214   :  { %v3495_v41 = vmax.f32 %v1253_v56, 0.0  ;;  %v3497_v32 = vmax.f32 %v1606_v24, 0.0  ;;  %v1255_v44 = vpop.f32.mrb[157].mxu0  ;;  %v1608_v45 = vpop.f32.mrb[157].mxu1 }
 0x215   :  { %v3496_v46 = vmax.f32 %v1255_v44, 0.0  ;;  %v3498_v47 = vmax.f32 %v1608_v45, 0.0  ;;  %v1257_v40 = vpop.f32.mrb[158].mxu0  ;;  %v1610_v19 = vpop.f32.mrb[158].mxu1 }
 0x216   :  { %v4452_v48 = vadd.f32 %v4451_v33, %v3495_v41  ;;  %v4526_v49 = vadd.f32 %v4525_v35, %v3497_v32  ;;  %v3511_v51 = vmax.f32 %v1257_v40, 0.0  ;;  %v3513_v52 = vmax.f32 %v1610_v19, 0.0  ;;  %v1259_v53 = vpop.f32.mrb[159].mxu0  ;;  %v1612_v1 = vpop.f32.mrb[159].mxu1 }
 0x217   :  { %v4489_v54 = vadd.f32 %v4488_v42, %v3496_v46  ;;  %v4563_v22 = vadd.f32 %v4562_v43, %v3498_v47  ;;  %v3512_v57 = vmax.f32 %v1259_v53, 0.0  ;;  %v3514_v58 = vmax.f32 %v1612_v1, 0.0 }
 0x218   :  { %v4453_v55 = vadd.f32 %v4452_v48, %v3511_v51  ;;  %v4527_v59 = vadd.f32 %v4526_v49, %v3513_v52  ;;  %9635 = vmatmul.mubr.msk.bf16.gmra.mrb[8].mxu0 %vm297_vm1, %v11178_v17  ;;  %v11180_v52 = vld [vmem:[%s13999_s0 + $0x20] sm:$0xff]  }
 0x219   :  { %v4490_v60 = vadd.f32 %v4489_v54, %v3512_v57  ;;  %v4564_v61 = vadd.f32 %v4563_v22, %v3514_v58  ;;  %9668 = vmatmul.mubr.msk.bf16.gmra.mrb[8].mxu1 %vm297_vm1, %v11178_v17  ;;  %1917 = vmatprep.mubr.bf16.mxu0 %v11240_v2 }
 0x21a   :  { %2270 = vmatprep.mubr.bf16.mxu1 %v11240_v2 }
 0x21b   :  { %v1263_v62 = vpop.f32.mrb[160].mxu0  ;;  %v1616_v63 = vpop.f32.mrb[160].mxu1 }
 0x21c   :  { %v3527_v25 = vmax.f32 %v1263_v62, 0.0  ;;  %v3529_v0 = vmax.f32 %v1616_v63, 0.0  ;;  %v1265_v20 = vpop.f32.mrb[161].mxu0  ;;  %v1618_v3 = vpop.f32.mrb[161].mxu1 }
 0x21d   :  { %v3528_v4 = vmax.f32 %v1265_v20, 0.0  ;;  %v3530_v5 = vmax.f32 %v1618_v3, 0.0  ;;  %v1267_v6 = vpop.f32.mrb[162].mxu0  ;;  %v1620_v36 = vpop.f32.mrb[162].mxu1 }
 0x21e   :  { %v4454_v7 = vadd.f32 %v4453_v55, %v3527_v25  ;;  %v4528_v8 = vadd.f32 %v4527_v59, %v3529_v0  ;;  %v3543_v9 = vmax.f32 %v1267_v6, 0.0  ;;  %v3545_v10 = vmax.f32 %v1620_v36, 0.0  ;;  %v1269_v11 = vpop.f32.mrb[163].mxu0  ;;  %v1622_v18 = vpop.f32.mrb[163].mxu1 }
 0x21f   :  { %v4491_v12 = vadd.f32 %v4490_v60, %v3528_v4  ;;  %v4565_v23 = vadd.f32 %v4564_v61, %v3530_v5  ;;  %v3544_v14 = vmax.f32 %v1269_v11, 0.0  ;;  %v3546_v16 = vmax.f32 %v1622_v18, 0.0 }
 0x220   :  { %v4455_v26 = vadd.f32 %v4454_v7, %v3543_v9  ;;  %v4529_v27 = vadd.f32 %v4528_v8, %v3545_v10  ;;  %9636 = vmatmul.mubr.msk.bf16.gmra.mrb[12].mxu0 %vm297_vm1, %v11179_v28  ;;  %v11181_v10 = vld [vmem:[%s13999_s0 + $0x28] sm:$0xff]  }
 0x221   :  { %v4492_v37 = vadd.f32 %v4491_v12, %v3544_v14  ;;  %v4566_v38 = vadd.f32 %v4565_v23, %v3546_v16  ;;  %9669 = vmatmul.mubr.msk.bf16.gmra.mrb[12].mxu1 %vm297_vm1, %v11179_v28  ;;  %1927 = vmatprep.mubr.bf16.mxu0 %v11240_v2 }
 0x222   :  { %2280 = vmatprep.mubr.bf16.mxu1 %v11240_v2 }
 0x223   :  { %v1273_v29 = vpop.f32.mrb[164].mxu0  ;;  %v1626_v30 = vpop.f32.mrb[164].mxu1 }
 0x224   :  { %v3559_v31 = vmax.f32 %v1273_v29, 0.0  ;;  %v3561_v21 = vmax.f32 %v1626_v30, 0.0  ;;  %v1275_v33 = vpop.f32.mrb[165].mxu0  ;;  %v1628_v35 = vpop.f32.mrb[165].mxu1 }
 0x225   :  { %v3560_v39 = vmax.f32 %v1275_v33, 0.0  ;;  %v3562_v42 = vmax.f32 %v1628_v35, 0.0  ;;  %v1277_v43 = vpop.f32.mrb[166].mxu0  ;;  %v1630_v56 = vpop.f32.mrb[166].mxu1 }
 0x226   :  { %v4456_v24 = vadd.f32 %v4455_v26, %v3559_v31  ;;  %v4530_v41 = vadd.f32 %v4529_v27, %v3561_v21  ;;  %v3575_v32 = vmax.f32 %v1277_v43, 0.0  ;;  %v3577_v44 = vmax.f32 %v1630_v56, 0.0  ;;  %v1279_v45 = vpop.f32.mrb[167].mxu0  ;;  %v1632_v46 = vpop.f32.mrb[167].mxu1 }
 0x227   :  { %v4493_v47 = vadd.f32 %v4492_v37, %v3560_v39  ;;  %v4567_v40 = vadd.f32 %v4566_v38, %v3562_v42  ;;  %v3576_v19 = vmax.f32 %v1279_v45, 0.0  ;;  %v3578_v48 = vmax.f32 %v1632_v46, 0.0 }
 0x228   :  { %v4457_v49 = vadd.f32 %v4456_v24, %v3575_v32  ;;  %v4531_v51 = vadd.f32 %v4530_v41, %v3577_v44  ;;  %9637 = vmatmul.mubr.msk.bf16.gmra.mrb[16].mxu0 %vm297_vm1, %v11180_v52  ;;  %v11182_v32 = vld [vmem:[%s13999_s0 + $0x30] sm:$0xff]  }
 0x229   :  { %v4494_v53 = vadd.f32 %v4493_v47, %v3576_v19  ;;  %v4568_v1 = vadd.f32 %v4567_v40, %v3578_v48  ;;  %9670 = vmatmul.mubr.msk.bf16.gmra.mrb[16].mxu1 %vm297_vm1, %v11180_v52  ;;  %1937 = vmatprep.mubr.bf16.mxu0 %v11240_v2 }
 0x22a   :  { %2290 = vmatprep.mubr.bf16.mxu1 %v11240_v2 }
 0x22b   :  { %v1283_v54 = vpop.f32.mrb[168].mxu0  ;;  %v1636_v22 = vpop.f32.mrb[168].mxu1 }
 0x22c   :  { %v3591_v57 = vmax.f32 %v1283_v54, 0.0  ;;  %v3593_v58 = vmax.f32 %v1636_v22, 0.0  ;;  %v1285_v55 = vpop.f32.mrb[169].mxu0  ;;  %v1638_v59 = vpop.f32.mrb[169].mxu1 }
 0x22d   :  { %v3592_v17 = vmax.f32 %v1285_v55, 0.0  ;;  %v3594_v60 = vmax.f32 %v1638_v59, 0.0  ;;  %v1287_v61 = vpop.f32.mrb[170].mxu0  ;;  %v1640_v62 = vpop.f32.mrb[170].mxu1 }
 0x22e   :  { %v4458_v63 = vadd.f32 %v4457_v49, %v3591_v57  ;;  %v4532_v25 = vadd.f32 %v4531_v51, %v3593_v58  ;;  %v3607_v0 = vmax.f32 %v1287_v61, 0.0  ;;  %v3609_v20 = vmax.f32 %v1640_v62, 0.0  ;;  %v1289_v3 = vpop.f32.mrb[171].mxu0  ;;  %v1642_v4 = vpop.f32.mrb[171].mxu1 }
 0x22f   :  { %v4495_v5 = vadd.f32 %v4494_v53, %v3592_v17  ;;  %v4569_v6 = vadd.f32 %v4568_v1, %v3594_v60  ;;  %v3608_v36 = vmax.f32 %v1289_v3, 0.0  ;;  %v3610_v7 = vmax.f32 %v1642_v4, 0.0 }
 0x230   :  { %v4459_v8 = vadd.f32 %v4458_v63, %v3607_v0  ;;  %v4533_v9 = vadd.f32 %v4532_v25, %v3609_v20  ;;  %9638 = vmatmul.mubr.msk.bf16.gmra.mrb[20].mxu0 %vm297_vm1, %v11181_v10  ;;  %v11183_v0 = vld [vmem:[%s13999_s0 + $0x38] sm:$0xff]  }
 0x231   :  { %v4496_v11 = vadd.f32 %v4495_v5, %v3608_v36  ;;  %v4570_v18 = vadd.f32 %v4569_v6, %v3610_v7  ;;  %9671 = vmatmul.mubr.msk.bf16.gmra.mrb[20].mxu1 %vm297_vm1, %v11181_v10  ;;  %1947 = vmatprep.mubr.bf16.mxu0 %v11240_v2 }
 0x232   :  { %2300 = vmatprep.mubr.bf16.mxu1 %v11240_v2 }
 0x233   :  { %v1293_v12 = vpop.f32.mrb[172].mxu0  ;;  %v1646_v14 = vpop.f32.mrb[172].mxu1 }
 0x234   :  { %v3623_v23 = vmax.f32 %v1293_v12, 0.0  ;;  %v1295_v16 = vpop.f32.mrb[173].mxu0  ;;  %v3625_v26 = vmax.f32 %v1646_v14, 0.0  ;;  %v1648_v28 = vpop.f32.mrb[173].mxu1 }
 0x235   :  { %v3624_v27 = vmax.f32 %v1295_v16, 0.0  ;;  %v1297_v37 = vpop.f32.mrb[174].mxu0  ;;  %v3626_v29 = vmax.f32 %v1648_v28, 0.0  ;;  %v1650_v31 = vpop.f32.mrb[174].mxu1 }
 0x236   :  { %v4460_v38 = vadd.f32 %v4459_v8, %v3623_v23  ;;  %v3639_v30 = vmax.f32 %v1297_v37, 0.0  ;;  %v1299_v21 = vpop.f32.mrb[175].mxu0  ;;  %v4534_v33 = vadd.f32 %v4533_v9, %v3625_v26  ;;  %v3641_v39 = vmax.f32 %v1650_v31, 0.0  ;;  %v1652_v43 = vpop.f32.mrb[175].mxu1 }
 0x237   :  { %v4497_v35 = vadd.f32 %v4496_v11, %v3624_v27  ;;  %v3640_v42 = vmax.f32 %v1299_v21, 0.0  ;;  %v4571_v56 = vadd.f32 %v4570_v18, %v3626_v29  ;;  %v3642_v41 = vmax.f32 %v1652_v43, 0.0  ;;  %v11184_v21 = vld [vmem:[%s13999_s0 + $0x40] sm:$0xff]  }
 0x238   :  { %v4461_v24 = vadd.f32 %v4460_v38, %v3639_v30  ;;  %9639 = vmatmul.mubr.msk.bf16.gmra.mrb[24].mxu0 %vm297_vm1, %v11182_v32  ;;  %v4535_v44 = vadd.f32 %v4534_v33, %v3641_v39 }
 0x239   :  { %v4498_v45 = vadd.f32 %v4497_v35, %v3640_v42  ;;  %9672 = vmatmul.mubr.msk.bf16.gmra.mrb[24].mxu1 %vm297_vm1, %v11182_v32  ;;  %1957 = vmatprep.mubr.bf16.mxu0 %v11240_v2  ;;  %v4572_v46 = vadd.f32 %v4571_v56, %v3642_v41 }
 0x23a   :  { %2310 = vmatprep.mubr.bf16.mxu1 %v11240_v2 }
 0x23b   :  { %v1303_v47 = vpop.f32.mrb[176].mxu0  ;;  %v1656_v19 = vpop.f32.mrb[176].mxu1 }
 0x23c   :  { %v3655_v40 = vmax.f32 %v1303_v47, 0.0  ;;  %v1305_v48 = vpop.f32.mrb[177].mxu0  ;;  %v3657_v49 = vmax.f32 %v1656_v19, 0.0  ;;  %v1658_v52 = vpop.f32.mrb[177].mxu1 }
 0x23d   :  { %v3656_v51 = vmax.f32 %v1305_v48, 0.0  ;;  %v1307_v53 = vpop.f32.mrb[178].mxu0  ;;  %v3658_v54 = vmax.f32 %v1658_v52, 0.0  ;;  %v1660_v57 = vpop.f32.mrb[178].mxu1 }
 0x23e   :  { %v4462_v1 = vadd.f32 %v4461_v24, %v3655_v40  ;;  %v3671_v22 = vmax.f32 %v1307_v53, 0.0  ;;  %v1309_v58 = vpop.f32.mrb[179].mxu0  ;;  %v4536_v55 = vadd.f32 %v4535_v44, %v3657_v49  ;;  %v3673_v17 = vmax.f32 %v1660_v57, 0.0  ;;  %v1662_v61 = vpop.f32.mrb[179].mxu1 }
 0x23f   :  { %v4499_v59 = vadd.f32 %v4498_v45, %v3656_v51  ;;  %v3672_v60 = vmax.f32 %v1309_v58, 0.0  ;;  %v4573_v62 = vadd.f32 %v4572_v46, %v3658_v54  ;;  %v3674_v25 = vmax.f32 %v1662_v61, 0.0  ;;  %v11185_v58 = vld [vmem:[%s13999_s0 + $0x48] sm:$0xff]  }
 0x240   :  { %v4463_v63 = vadd.f32 %v4462_v1, %v3671_v22  ;;  %9640 = vmatmul.mubr.msk.bf16.gmra.mrb[28].mxu0 %vm297_vm1, %v11183_v0  ;;  %v4537_v20 = vadd.f32 %v4536_v55, %v3673_v17 }
 0x241   :  { %v4500_v3 = vadd.f32 %v4499_v59, %v3672_v60  ;;  %9673 = vmatmul.mubr.msk.bf16.gmra.mrb[28].mxu1 %vm297_vm1, %v11183_v0  ;;  %1967 = vmatprep.mubr.bf16.mxu0 %v11240_v2  ;;  %v4574_v4 = vadd.f32 %v4573_v62, %v3674_v25 }
 0x242   :  { %2320 = vmatprep.mubr.bf16.mxu1 %v11240_v2 }
 0x243   :  { %v1313_v5 = vpop.f32.mrb[180].mxu0  ;;  %v1666_v36 = vpop.f32.mrb[180].mxu1 }
 0x244   :  { %v3687_v6 = vmax.f32 %v1313_v5, 0.0  ;;  %v1315_v7 = vpop.f32.mrb[181].mxu0  ;;  %v3689_v8 = vmax.f32 %v1666_v36, 0.0  ;;  %v1668_v10 = vpop.f32.mrb[181].mxu1 }
 0x245   :  { %v3688_v9 = vmax.f32 %v1315_v7, 0.0  ;;  %v1317_v11 = vpop.f32.mrb[182].mxu0  ;;  %v3690_v12 = vmax.f32 %v1668_v10, 0.0  ;;  %v1670_v14 = vpop.f32.mrb[182].mxu1 }
 0x246   :  { %v4464_v18 = vadd.f32 %v4463_v63, %v3687_v6  ;;  %v3703_v23 = vmax.f32 %v1317_v11, 0.0  ;;  %v1319_v16 = vpop.f32.mrb[183].mxu0  ;;  %v4538_v26 = vadd.f32 %v4537_v20, %v3689_v8  ;;  %v3705_v28 = vmax.f32 %v1670_v14, 0.0  ;;  %v1672_v38 = vpop.f32.mrb[183].mxu1 }
 0x247   :  { %v4501_v27 = vadd.f32 %v4500_v3, %v3688_v9  ;;  %v3704_v37 = vmax.f32 %v1319_v16, 0.0  ;;  %v4575_v29 = vadd.f32 %v4574_v4, %v3690_v12  ;;  %v3706_v31 = vmax.f32 %v1672_v38, 0.0  ;;  %v11186_v16 = vld [vmem:[%s13999_s0 + $0x50] sm:$0xff]  }
 0x248   :  { %v4465_v30 = vadd.f32 %v4464_v18, %v3703_v23  ;;  %9641 = vmatmul.mubr.msk.bf16.gmra.mrb[32].mxu0 %vm297_vm1, %v11184_v21  ;;  %v4539_v33 = vadd.f32 %v4538_v26, %v3705_v28 }
 0x249   :  { %v4502_v35 = vadd.f32 %v4501_v27, %v3704_v37  ;;  %9674 = vmatmul.mubr.msk.bf16.gmra.mrb[32].mxu1 %vm297_vm1, %v11184_v21  ;;  %1977 = vmatprep.mubr.bf16.mxu0 %v11240_v2  ;;  %v4576_v39 = vadd.f32 %v4575_v29, %v3706_v31 }
 0x24a   :  { %2330 = vmatprep.mubr.bf16.mxu1 %v11240_v2 }
 0x24b   :  { %v1323_v42 = vpop.f32.mrb[184].mxu0  ;;  %v1676_v56 = vpop.f32.mrb[184].mxu1 }
 0x24c   :  { %v3719_v43 = vmax.f32 %v1323_v42, 0.0  ;;  %v1325_v24 = vpop.f32.mrb[185].mxu0  ;;  %v3721_v41 = vmax.f32 %v1676_v56, 0.0  ;;  %v1678_v44 = vpop.f32.mrb[185].mxu1 }
 0x24d   :  { %v3720_v32 = vmax.f32 %v1325_v24, 0.0  ;;  %v1327_v45 = vpop.f32.mrb[186].mxu0  ;;  %v3722_v47 = vmax.f32 %v1678_v44, 0.0  ;;  %v1680_v19 = vpop.f32.mrb[186].mxu1 }
 0x24e   :  { %v4466_v46 = vadd.f32 %v4465_v30, %v3719_v43  ;;  %v3735_v40 = vmax.f32 %v1327_v45, 0.0  ;;  %v1329_v48 = vpop.f32.mrb[187].mxu0  ;;  %v4540_v49 = vadd.f32 %v4539_v33, %v3721_v41  ;;  %v3737_v52 = vmax.f32 %v1680_v19, 0.0  ;;  %v1682_v1 = vpop.f32.mrb[187].mxu1 }
 0x24f   :  { %v4503_v51 = vadd.f32 %v4502_v35, %v3720_v32  ;;  %v3736_v53 = vmax.f32 %v1329_v48, 0.0  ;;  %v4577_v54 = vadd.f32 %v4576_v39, %v3722_v47  ;;  %v3738_v57 = vmax.f32 %v1682_v1, 0.0 }
 0x250   :  { %v4467_v22 = vadd.f32 %v4466_v46, %v3735_v40  ;;  %9642 = vmatmul.mubr.msk.bf16.gmra.mrb[36].mxu0 %vm297_vm1, %v11185_v58  ;;  %v4541_v55 = vadd.f32 %v4540_v49, %v3737_v52  ;;  %v11187_v46 = vld [vmem:[%s13999_s0 + $0x58] sm:$0xff]  }
 0x251   :  { %v4504_v59 = vadd.f32 %v4503_v51, %v3736_v53  ;;  %9675 = vmatmul.mubr.msk.bf16.gmra.mrb[36].mxu1 %vm297_vm1, %v11185_v58  ;;  %1987 = vmatprep.mubr.bf16.mxu0 %v11240_v2  ;;  %v4578_v17 = vadd.f32 %v4577_v54, %v3738_v57 }
 0x252   :  { %2340 = vmatprep.mubr.bf16.mxu1 %v11240_v2 }
 0x253   :  { %v1333_v60 = vpop.f32.mrb[188].mxu0  ;;  %v1686_v62 = vpop.f32.mrb[188].mxu1 }
 0x254   :  { %v3751_v61 = vmax.f32 %v1333_v60, 0.0  ;;  %v1335_v63 = vpop.f32.mrb[189].mxu0  ;;  %v3753_v25 = vmax.f32 %v1686_v62, 0.0  ;;  %v1688_v20 = vpop.f32.mrb[189].mxu1 }
 0x255   :  { %v3752_v0 = vmax.f32 %v1335_v63, 0.0  ;;  %v1337_v3 = vpop.f32.mrb[190].mxu0  ;;  %v3754_v5 = vmax.f32 %v1688_v20, 0.0  ;;  %v1690_v36 = vpop.f32.mrb[190].mxu1 }
 0x256   :  { %v4468_v4 = vadd.f32 %v4467_v22, %v3751_v61  ;;  %v3767_v6 = vmax.f32 %v1337_v3, 0.0  ;;  %v1339_v7 = vpop.f32.mrb[191].mxu0  ;;  %v4542_v8 = vadd.f32 %v4541_v55, %v3753_v25  ;;  %v3769_v10 = vmax.f32 %v1690_v36, 0.0  ;;  %v1692_v18 = vpop.f32.mrb[191].mxu1  ;;  %v11188_v3 = vld [vmem:[%s13999_s0 + $0x60] sm:$0xff]  }
 0x257   :  { %v4505_v9 = vadd.f32 %v4504_v59, %v3752_v0  ;;  %v3768_v11 = vmax.f32 %v1339_v7, 0.0  ;;  %v4579_v12 = vadd.f32 %v4578_v17, %v3754_v5  ;;  %v3770_v14 = vmax.f32 %v1692_v18, 0.0 }
 0x258   :  { %v11930_v23 = vadd.f32 %v4468_v4, %v3767_v6  ;;  %9643 = vmatmul.mubr.msk.bf16.gmra.mrb[40].mxu0 %vm297_vm1, %v11186_v16  ;;  %v11936_v26 = vadd.f32 %v4542_v8, %v3769_v10 }
 0x259   :  { %v11938_v27 = vadd.f32 %v4505_v9, %v3768_v11  ;;  %9676 = vmatmul.mubr.msk.bf16.gmra.mrb[40].mxu1 %vm297_vm1, %v11186_v16  ;;  %1997 = vmatprep.mubr.bf16.mxu0 %v11240_v2  ;;  %v11942_v28 = vadd.f32 %v4579_v12, %v3770_v14 }
 0x25a   :  { %2350 = vmatprep.mubr.bf16.mxu1 %v11240_v2 }
 0x25b   :  { %v1343_v37 = vpop.f32.mrb[192].mxu0  ;;  %v1696_v29 = vpop.f32.mrb[192].mxu1 }
 0x25c   :  { %v1345_v38 = vpop.f32.mrb[193].mxu0  ;;  %v3785_v30 = vmax.f32 %v1696_v29, 0.0  ;;  %v1698_v21 = vpop.f32.mrb[193].mxu1  ;;  %v3783_v33 = vmax.f32 %v1343_v37, 0.0 }
 0x25d   :  { %v1347_v31 = vpop.f32.mrb[194].mxu0  ;;  %v3786_v39 = vmax.f32 %v1698_v21, 0.0  ;;  %v1700_v43 = vpop.f32.mrb[194].mxu1  ;;  %v3784_v56 = vmax.f32 %v1345_v38, 0.0 }
 0x25e   :  { %v3799_v35 = vmax.f32 %v1347_v31, 0.0  ;;  %v1349_v42 = vpop.f32.mrb[195].mxu0  ;;  %v3801_v41 = vmax.f32 %v1700_v43, 0.0  ;;  %v1702_v32 = vpop.f32.mrb[195].mxu1 }
 0x25f   :  { %v3800_v24 = vmax.f32 %v1349_v42, 0.0  ;;  %v3802_v45 = vmax.f32 %v1702_v32, 0.0 }
 0x260   :  { %v5031_v44 = vadd.f32 %v3799_v35, %v3783_v33  ;;  %9644 = vmatmul.mubr.msk.bf16.gmra.mrb[44].mxu0 %vm297_vm1, %v11187_v46  ;;  %v5105_v40 = vadd.f32 %v3801_v41, %v3785_v30 }
 0x261   :  { %v5068_v47 = vadd.f32 %v3800_v24, %v3784_v56  ;;  %9677 = vmatmul.mubr.msk.bf16.gmra.mrb[44].mxu1 %vm297_vm1, %v11187_v46  ;;  %v5142_v19 = vadd.f32 %v3802_v45, %v3786_v39  ;;  %2007 = vmatprep.mubr.bf16.mxu0 %v11240_v2  ;;  %v11189_v24 = vld [vmem:[%s13999_s0 + $0x68] sm:$0xff]  }
 0x262   :  { %2360 = vmatprep.mubr.bf16.mxu1 %v11240_v2 }
 0x263   :  { %v1353_v48 = vpop.f32.mrb[196].mxu0  ;;  %v1706_v51 = vpop.f32.mrb[196].mxu1 }
 0x264   :  { %v3815_v49 = vmax.f32 %v1353_v48, 0.0  ;;  %v1355_v52 = vpop.f32.mrb[197].mxu0  ;;  %v3817_v53 = vmax.f32 %v1706_v51, 0.0  ;;  %v1708_v54 = vpop.f32.mrb[197].mxu1 }
 0x265   :  { %v3816_v1 = vmax.f32 %v1355_v52, 0.0  ;;  %v1357_v22 = vpop.f32.mrb[198].mxu0  ;;  %v3818_v58 = vmax.f32 %v1708_v54, 0.0  ;;  %v1710_v59 = vpop.f32.mrb[198].mxu1 }
 0x266   :  { %v5032_v57 = vadd.f32 %v5031_v44, %v3815_v49  ;;  %v3831_v55 = vmax.f32 %v1357_v22, 0.0  ;;  %v1359_v17 = vpop.f32.mrb[199].mxu0  ;;  %v5106_v60 = vadd.f32 %v5105_v40, %v3817_v53  ;;  %v3833_v62 = vmax.f32 %v1710_v59, 0.0  ;;  %v1712_v63 = vpop.f32.mrb[199].mxu1 }
 0x267   :  { %v5069_v61 = vadd.f32 %v5068_v47, %v3816_v1  ;;  %v5143_v25 = vadd.f32 %v5142_v19, %v3818_v58  ;;  %v3832_v20 = vmax.f32 %v1359_v17, 0.0  ;;  %v3834_v5 = vmax.f32 %v1712_v63, 0.0  ;;  %v11190_v63 = vld [vmem:[%s13999_s0 + $0x70] sm:$0xff]  }
 0x268   :  { %v5033_v0 = vadd.f32 %v5032_v57, %v3831_v55  ;;  %9645 = vmatmul.mubr.msk.bf16.gmra.mrb[48].mxu0 %vm297_vm1, %v11188_v3  ;;  %v5107_v4 = vadd.f32 %v5106_v60, %v3833_v62 }
 0x269   :  { %9678 = vmatmul.mubr.msk.bf16.gmra.mrb[48].mxu1 %vm297_vm1, %v11188_v3  ;;  %2017 = vmatprep.mubr.bf16.mxu0 %v11240_v2  ;;  %v5070_v6 = vadd.f32 %v5069_v61, %v3832_v20  ;;  %v5144_v36 = vadd.f32 %v5143_v25, %v3834_v5 }
 0x26a   :  { %2370 = vmatprep.mubr.bf16.mxu1 %v11240_v2 }
 0x26b   :  { %v1363_v7 = vpop.f32.mrb[200].mxu0  ;;  %v1716_v9 = vpop.f32.mrb[200].mxu1 }
 0x26c   :  { %v3847_v8 = vmax.f32 %v1363_v7, 0.0  ;;  %v1365_v10 = vpop.f32.mrb[201].mxu0  ;;  %v3849_v11 = vmax.f32 %v1716_v9, 0.0  ;;  %v1718_v12 = vpop.f32.mrb[201].mxu1 }
 0x26d   :  { %v3848_v18 = vmax.f32 %v1365_v10, 0.0  ;;  %v1367_v14 = vpop.f32.mrb[202].mxu0  ;;  %v3850_v37 = vmax.f32 %v1718_v12, 0.0  ;;  %v1720_v29 = vpop.f32.mrb[202].mxu1 }
 0x26e   :  { %v5034_v16 = vadd.f32 %v5033_v0, %v3847_v8  ;;  %v3863_v38 = vmax.f32 %v1367_v14, 0.0  ;;  %v1369_v30 = vpop.f32.mrb[203].mxu0  ;;  %v5108_v31 = vadd.f32 %v5107_v4, %v3849_v11  ;;  %v3865_v33 = vmax.f32 %v1720_v29, 0.0  ;;  %v1722_v39 = vpop.f32.mrb[203].mxu1 }
 0x26f   :  { %v5071_v21 = vadd.f32 %v5070_v6, %v3848_v18  ;;  %v3864_v35 = vmax.f32 %v1369_v30, 0.0  ;;  %v5145_v42 = vadd.f32 %v5144_v36, %v3850_v37  ;;  %v3866_v56 = vmax.f32 %v1722_v39, 0.0 }
 0x270   :  { %v5035_v43 = vadd.f32 %v5034_v16, %v3863_v38  ;;  %9646 = vmatmul.mubr.msk.bf16.gmra.mrb[52].mxu0 %vm297_vm1, %v11189_v24  ;;  %v5109_v41 = vadd.f32 %v5108_v31, %v3865_v33 }
 0x271   :  { %v5072_v32 = vadd.f32 %v5071_v21, %v3864_v35  ;;  %9679 = vmatmul.mubr.msk.bf16.gmra.mrb[52].mxu1 %vm297_vm1, %v11189_v24  ;;  %2027 = vmatprep.mubr.bf16.mxu0 %v11240_v2  ;;  %v5146_v44 = vadd.f32 %v5145_v42, %v3866_v56  ;;  %v11191_v35 = vld [vmem:[%s13999_s0 + $0x78] sm:$0xff]  }
 0x272   :  { %2380 = vmatprep.mubr.bf16.mxu1 %v11240_v2 }
 0x273   :  { %v1373_v45 = vpop.f32.mrb[204].mxu0  ;;  %v1726_v47 = vpop.f32.mrb[204].mxu1 }
 0x274   :  { %v3879_v46 = vmax.f32 %v1373_v45, 0.0  ;;  %v1375_v40 = vpop.f32.mrb[205].mxu0  ;;  %v3881_v19 = vmax.f32 %v1726_v47, 0.0  ;;  %v1728_v49 = vpop.f32.mrb[205].mxu1 }
 0x275   :  { %v3880_v48 = vmax.f32 %v1375_v40, 0.0  ;;  %v1377_v51 = vpop.f32.mrb[206].mxu0  ;;  %v3882_v53 = vmax.f32 %v1728_v49, 0.0  ;;  %v1730_v54 = vpop.f32.mrb[206].mxu1 }
 0x276   :  { %v5036_v52 = vadd.f32 %v5035_v43, %v3879_v46  ;;  %v3895_v1 = vmax.f32 %v1377_v51, 0.0  ;;  %v1379_v22 = vpop.f32.mrb[207].mxu0  ;;  %v5110_v57 = vadd.f32 %v5109_v41, %v3881_v19  ;;  %v3897_v55 = vmax.f32 %v1730_v54, 0.0  ;;  %v1732_v17 = vpop.f32.mrb[207].mxu1 }
 0x277   :  { %v5073_v58 = vadd.f32 %v5072_v32, %v3880_v48  ;;  %v3896_v59 = vmax.f32 %v1379_v22, 0.0  ;;  %v5147_v60 = vadd.f32 %v5146_v44, %v3882_v53  ;;  %v3898_v62 = vmax.f32 %v1732_v17, 0.0 }
 0x278   :  { %v5037_v61 = vadd.f32 %v5036_v52, %v3895_v1  ;;  %9647 = vmatmul.mubr.msk.bf16.gmra.mrb[56].mxu0 %vm297_vm1, %v11190_v63  ;;  %v5111_v25 = vadd.f32 %v5110_v57, %v3897_v55 }
 0x279   :  { %v5074_v0 = vadd.f32 %v5073_v58, %v3896_v59  ;;  %9680 = vmatmul.mubr.msk.bf16.gmra.mrb[56].mxu1 %vm297_vm1, %v11190_v63  ;;  %2037 = vmatprep.mubr.bf16.mxu0 %v11240_v2  ;;  %v5148_v20 = vadd.f32 %v5147_v60, %v3898_v62  ;;  %v11192_v59 = vld [vmem:[%s13999_s0 + $0x80] sm:$0xff]  }
 0x27a   :  { %2390 = vmatprep.mubr.bf16.mxu1 %v11240_v2 }
 0x27b   :  { %v1383_v3 = vpop.f32.mrb[208].mxu0  ;;  %v1736_v5 = vpop.f32.mrb[208].mxu1 }
 0x27c   :  { %v3911_v4 = vmax.f32 %v1383_v3, 0.0  ;;  %v1385_v6 = vpop.f32.mrb[209].mxu0  ;;  %v3913_v36 = vmax.f32 %v1736_v5, 0.0  ;;  %v1738_v8 = vpop.f32.mrb[209].mxu1 }
 0x27d   :  { %v3912_v7 = vmax.f32 %v1385_v6, 0.0  ;;  %v1387_v9 = vpop.f32.mrb[210].mxu0  ;;  %v3914_v11 = vmax.f32 %v1738_v8, 0.0  ;;  %v1740_v12 = vpop.f32.mrb[210].mxu1 }
 0x27e   :  { %v5038_v10 = vadd.f32 %v5037_v61, %v3911_v4  ;;  %v3927_v18 = vmax.f32 %v1387_v9, 0.0  ;;  %v1389_v14 = vpop.f32.mrb[211].mxu0  ;;  %v5112_v16 = vadd.f32 %v5111_v25, %v3913_v36  ;;  %v3929_v38 = vmax.f32 %v1740_v12, 0.0  ;;  %v1742_v30 = vpop.f32.mrb[211].mxu1 }
 0x27f   :  { %v5075_v37 = vadd.f32 %v5074_v0, %v3912_v7  ;;  %v3928_v29 = vmax.f32 %v1389_v14, 0.0  ;;  %v5149_v31 = vadd.f32 %v5148_v20, %v3914_v11  ;;  %v3930_v33 = vmax.f32 %v1742_v30, 0.0  ;;  %v10387_v20 = vld [vmem:[%s14000_s2 + $0x4] ss:$16 sps:$4 sm:$0xff]   ;;  %v11193_v30 = vld [vmem:[%s13999_s0 + $0x88] sm:$0xff]  }
 0x280   :  { %v5039_v21 = vadd.f32 %v5038_v10, %v3927_v18  ;;  %9648 = vmatmul.mubr.msk.bf16.gmra.mrb[60].mxu0 %vm297_vm1, %v11191_v35  ;;  %v5113_v39 = vadd.f32 %v5112_v16, %v3929_v38  ;;  %8747 = vmatprep.subr.bf16.mxu0 %v10387_v20 }
 0x281   :  { %v5076_v42 = vadd.f32 %v5075_v37, %v3928_v29  ;;  %9681 = vmatmul.mubr.msk.bf16.gmra.mrb[60].mxu1 %vm297_vm1, %v11191_v35  ;;  %2047 = vmatprep.mubr.bf16.mxu0 %v11240_v2  ;;  %v5150_v43 = vadd.f32 %v5149_v31, %v3930_v33  ;;  %v10390_v31 = vld [vmem:[%s14000_s2 + $0xc] ss:$16 sps:$4 sm:$0xff]  }
 0x282   :  { %2400 = vmatprep.mubr.bf16.mxu1 %v11240_v2  ;;  %9075 = vmatprep.subr.bf16.mxu1 %v10390_v31 }
 0x283   :  { %v1393_v56 = vpop.f32.mrb[212].mxu0  ;;  %v1746_v41 = vpop.f32.mrb[212].mxu1 }
 0x284   :  { %v3943_v24 = vmax.f32 %v1393_v56, 0.0  ;;  %v1395_v32 = vpop.f32.mrb[213].mxu0  ;;  %v3945_v44 = vmax.f32 %v1746_v41, 0.0  ;;  %v1748_v46 = vpop.f32.mrb[213].mxu1 }
 0x285   :  { %v3944_v45 = vmax.f32 %v1395_v32, 0.0  ;;  %v1397_v47 = vpop.f32.mrb[214].mxu0  ;;  %v3946_v19 = vmax.f32 %v1748_v46, 0.0  ;;  %v1750_v49 = vpop.f32.mrb[214].mxu1 }
 0x286   :  { %v5040_v40 = vadd.f32 %v5039_v21, %v3943_v24  ;;  %v3959_v48 = vmax.f32 %v1397_v47, 0.0  ;;  %v1399_v51 = vpop.f32.mrb[215].mxu0  ;;  %v5114_v52 = vadd.f32 %v5113_v39, %v3945_v44  ;;  %v3961_v1 = vmax.f32 %v1750_v49, 0.0  ;;  %v1752_v22 = vpop.f32.mrb[215].mxu1 }
 0x287   :  { %v5077_v53 = vadd.f32 %v5076_v42, %v3944_v45  ;;  %v3960_v54 = vmax.f32 %v1399_v51, 0.0  ;;  %v5151_v57 = vadd.f32 %v5150_v43, %v3946_v19  ;;  %v3962_v55 = vmax.f32 %v1752_v22, 0.0 }
 0x288   :  { %v5041_v58 = vadd.f32 %v5040_v40, %v3959_v48  ;;  %9649 = vmatmul.mubr.msk.bf16.gmra.mrb[64].mxu0 %vm297_vm1, %v11192_v59  ;;  %v5115_v17 = vadd.f32 %v5114_v52, %v3961_v1 }
 0x289   :  { %v5078_v60 = vadd.f32 %v5077_v53, %v3960_v54  ;;  %9682 = vmatmul.mubr.msk.bf16.gmra.mrb[64].mxu1 %vm297_vm1, %v11192_v59  ;;  %2057 = vmatprep.mubr.bf16.mxu0 %v11240_v2  ;;  %v5152_v61 = vadd.f32 %v5151_v57, %v3962_v55  ;;  %v11194_v57 = vld [vmem:[%s13999_s0 + $0x90] sm:$0xff]  }
 0x28a   :  { %2410 = vmatprep.mubr.bf16.mxu1 %v11240_v2 }
 0x28b   :  { %v1403_v62 = vpop.f32.mrb[216].mxu0  ;;  %v1756_v25 = vpop.f32.mrb[216].mxu1 }
 0x28c   :  { %v3975_v63 = vmax.f32 %v1403_v62, 0.0  ;;  %v1405_v0 = vpop.f32.mrb[217].mxu0  ;;  %v3977_v3 = vmax.f32 %v1756_v25, 0.0  ;;  %v1758_v5 = vpop.f32.mrb[217].mxu1 }
 0x28d   :  { %v3976_v4 = vmax.f32 %v1405_v0, 0.0  ;;  %v1407_v6 = vpop.f32.mrb[218].mxu0  ;;  %v3978_v7 = vmax.f32 %v1758_v5, 0.0  ;;  %v1760_v9 = vpop.f32.mrb[218].mxu1 }
 0x28e   :  { %v5042_v36 = vadd.f32 %v5041_v58, %v3975_v63  ;;  %v3991_v8 = vmax.f32 %v1407_v6, 0.0  ;;  %v1409_v10 = vpop.f32.mrb[219].mxu0  ;;  %v5116_v11 = vadd.f32 %v5115_v17, %v3977_v3  ;;  %v3993_v12 = vmax.f32 %v1760_v9, 0.0  ;;  %v1762_v16 = vpop.f32.mrb[219].mxu1 }
 0x28f   :  { %v5079_v18 = vadd.f32 %v5078_v60, %v3976_v4  ;;  %v3992_v14 = vmax.f32 %v1409_v10, 0.0  ;;  %v5153_v37 = vadd.f32 %v5152_v61, %v3978_v7  ;;  %v3994_v29 = vmax.f32 %v1762_v16, 0.0  ;;  %v11195_v16 = vld [vmem:[%s13999_s0 + $0x98] sm:$0xff]  }
 0x290   :  { %v5043_v38 = vadd.f32 %v5042_v36, %v3991_v8  ;;  %9650 = vmatmul.mubr.msk.bf16.gmra.mrb[68].mxu0 %vm297_vm1, %v11193_v30  ;;  %v5117_v21 = vadd.f32 %v5116_v11, %v3993_v12 }
 0x291   :  { %v5080_v33 = vadd.f32 %v5079_v18, %v3992_v14  ;;  %9683 = vmatmul.mubr.msk.bf16.gmra.mrb[68].mxu1 %vm297_vm1, %v11193_v30  ;;  %2067 = vmatprep.mubr.bf16.mxu0 %v11240_v2  ;;  %v5154_v35 = vadd.f32 %v5153_v37, %v3994_v29 }
 0x292   :  { %2420 = vmatprep.mubr.bf16.mxu1 %v11240_v2 }
 0x293   :  { %v1413_v39 = vpop.f32.mrb[220].mxu0  ;;  %v1766_v43 = vpop.f32.mrb[220].mxu1 }
 0x294   :  { %v4007_v42 = vmax.f32 %v1413_v39, 0.0  ;;  %v1415_v56 = vpop.f32.mrb[221].mxu0  ;;  %v4009_v24 = vmax.f32 %v1766_v43, 0.0  ;;  %v1768_v32 = vpop.f32.mrb[221].mxu1 }
 0x295   :  { %v4008_v41 = vmax.f32 %v1415_v56, 0.0  ;;  %v1417_v44 = vpop.f32.mrb[222].mxu0  ;;  %v4010_v46 = vmax.f32 %v1768_v32, 0.0  ;;  %v1770_v40 = vpop.f32.mrb[222].mxu1 }
 0x296   :  { %v5044_v45 = vadd.f32 %v5043_v38, %v4007_v42  ;;  %v4023_v47 = vmax.f32 %v1417_v44, 0.0  ;;  %v1419_v19 = vpop.f32.mrb[223].mxu0  ;;  %v5118_v48 = vadd.f32 %v5117_v21, %v4009_v24  ;;  %v4025_v51 = vmax.f32 %v1770_v40, 0.0  ;;  %v1772_v53 = vpop.f32.mrb[223].mxu1 }
 0x297   :  { %v5081_v49 = vadd.f32 %v5080_v33, %v4008_v41  ;;  %v4024_v52 = vmax.f32 %v1419_v19, 0.0  ;;  %v5155_v1 = vadd.f32 %v5154_v35, %v4010_v46  ;;  %v4026_v22 = vmax.f32 %v1772_v53, 0.0 }
 0x298   :  { %v5045_v54 = vadd.f32 %v5044_v45, %v4023_v47  ;;  %9651 = vmatmul.mubr.msk.bf16.gmra.mrb[72].mxu0 %vm297_vm1, %v11194_v57  ;;  %v5119_v58 = vadd.f32 %v5118_v48, %v4025_v51 }
 0x299   :  { %v5082_v55 = vadd.f32 %v5081_v49, %v4024_v52  ;;  %9684 = vmatmul.mubr.msk.bf16.gmra.mrb[72].mxu1 %vm297_vm1, %v11194_v57  ;;  %2077 = vmatprep.mubr.bf16.mxu0 %v11240_v2  ;;  %v5156_v59 = vadd.f32 %v5155_v1, %v4026_v22  ;;  %v11196_v52 = vld [vmem:[%s13999_s0 + $0xa0] sm:$0xff]  }
 0x29a   :  { %2430 = vmatprep.mubr.bf16.mxu1 %v11240_v2 }
 0x29b   :  { %v1423_v17 = vpop.f32.mrb[224].mxu0  ;;  %v1776_v61 = vpop.f32.mrb[224].mxu1 }
 0x29c   :  { %v4039_v60 = vmax.f32 %v1423_v17, 0.0  ;;  %v1425_v62 = vpop.f32.mrb[225].mxu0  ;;  %v4041_v63 = vmax.f32 %v1776_v61, 0.0  ;;  %v1778_v0 = vpop.f32.mrb[225].mxu1 }
 0x29d   :  { %v4040_v25 = vmax.f32 %v1425_v62, 0.0  ;;  %v1427_v20 = vpop.f32.mrb[226].mxu0  ;;  %v4042_v4 = vmax.f32 %v1778_v0, 0.0  ;;  %v1780_v6 = vpop.f32.mrb[226].mxu1 }
 0x29e   :  { %v5046_v3 = vadd.f32 %v5045_v54, %v4039_v60  ;;  %v4055_v5 = vmax.f32 %v1427_v20, 0.0  ;;  %v1429_v36 = vpop.f32.mrb[227].mxu0  ;;  %v5120_v7 = vadd.f32 %v5119_v58, %v4041_v63  ;;  %v4057_v9 = vmax.f32 %v1780_v6, 0.0  ;;  %v1782_v11 = vpop.f32.mrb[227].mxu1 }
 0x29f   :  { %v5083_v8 = vadd.f32 %v5082_v55, %v4040_v25  ;;  %v4056_v10 = vmax.f32 %v1429_v36, 0.0  ;;  %v5157_v18 = vadd.f32 %v5156_v59, %v4042_v4  ;;  %v4058_v14 = vmax.f32 %v1782_v11, 0.0 }
 0x2a0   :  { %v5047_v12 = vadd.f32 %v5046_v3, %v4055_v5  ;;  %9652 = vmatmul.mubr.msk.bf16.gmra.mrb[76].mxu0 %vm297_vm1, %v11195_v16  ;;  %v5121_v37 = vadd.f32 %v5120_v7, %v4057_v9 }
 0x2a1   :  { %v5084_v38 = vadd.f32 %v5083_v8, %v4056_v10  ;;  %9685 = vmatmul.mubr.msk.bf16.gmra.mrb[76].mxu1 %vm297_vm1, %v11195_v16  ;;  %2087 = vmatprep.mubr.bf16.mxu0 %v11240_v2  ;;  %v5158_v29 = vadd.f32 %v5157_v18, %v4058_v14  ;;  %v11197_v10 = vld [vmem:[%s13999_s0 + $0xa8] sm:$0xff]  }
 0x2a2   :  { %2440 = vmatprep.mubr.bf16.mxu1 %v11240_v2 }
 0x2a3   :  { %v1433_v30 = vpop.f32.mrb[228].mxu0  ;;  %v1786_v21 = vpop.f32.mrb[228].mxu1 }
 0x2a4   :  { %v4071_v31 = vmax.f32 %v1433_v30, 0.0  ;;  %v1435_v33 = vpop.f32.mrb[229].mxu0  ;;  %v4073_v35 = vmax.f32 %v1786_v21, 0.0  ;;  %v1788_v42 = vpop.f32.mrb[229].mxu1 }
 0x2a5   :  { %v4072_v39 = vmax.f32 %v1435_v33, 0.0  ;;  %v1437_v43 = vpop.f32.mrb[230].mxu0  ;;  %v4074_v24 = vmax.f32 %v1788_v42, 0.0  ;;  %v1790_v32 = vpop.f32.mrb[230].mxu1 }
 0x2a6   :  { %v5048_v56 = vadd.f32 %v5047_v12, %v4071_v31  ;;  %v4087_v41 = vmax.f32 %v1437_v43, 0.0  ;;  %v1439_v44 = vpop.f32.mrb[231].mxu0  ;;  %v5122_v45 = vadd.f32 %v5121_v37, %v4073_v35  ;;  %v4089_v47 = vmax.f32 %v1790_v32, 0.0  ;;  %v1792_v19 = vpop.f32.mrb[231].mxu1 }
 0x2a7   :  { %v5085_v46 = vadd.f32 %v5084_v38, %v4072_v39  ;;  %v4088_v40 = vmax.f32 %v1439_v44, 0.0  ;;  %v5159_v48 = vadd.f32 %v5158_v29, %v4074_v24  ;;  %v4090_v51 = vmax.f32 %v1792_v19, 0.0 }
 0x2a8   :  { %v5049_v49 = vadd.f32 %v5048_v56, %v4087_v41  ;;  %9653 = vmatmul.mubr.msk.bf16.gmra.mrb[80].mxu0 %vm297_vm1, %v11196_v52  ;;  %v5123_v53 = vadd.f32 %v5122_v45, %v4089_v47 }
 0x2a9   :  { %v5086_v1 = vadd.f32 %v5085_v46, %v4088_v40  ;;  %9686 = vmatmul.mubr.msk.bf16.gmra.mrb[80].mxu1 %vm297_vm1, %v11196_v52  ;;  %2097 = vmatprep.mubr.bf16.mxu0 %v11240_v2  ;;  %v5160_v54 = vadd.f32 %v5159_v48, %v4090_v51  ;;  %v11198_v40 = vld [vmem:[%s13999_s0 + $0xb0] sm:$0xff]  }
 0x2aa   :  { %2450 = vmatprep.mubr.bf16.mxu1 %v11240_v2 }
 0x2ab   :  { %v1443_v22 = vpop.f32.mrb[232].mxu0  ;;  %v1796_v58 = vpop.f32.mrb[232].mxu1 }
 0x2ac   :  { %v4103_v57 = vmax.f32 %v1443_v22, 0.0  ;;  %v1445_v55 = vpop.f32.mrb[233].mxu0  ;;  %v4105_v59 = vmax.f32 %v1796_v58, 0.0  ;;  %v1798_v60 = vpop.f32.mrb[233].mxu1 }
 0x2ad   :  { %v4104_v17 = vmax.f32 %v1445_v55, 0.0  ;;  %v1447_v61 = vpop.f32.mrb[234].mxu0  ;;  %v4106_v63 = vmax.f32 %v1798_v60, 0.0  ;;  %v1800_v0 = vpop.f32.mrb[234].mxu1 }
 0x2ae   :  { %v5050_v62 = vadd.f32 %v5049_v49, %v4103_v57  ;;  %v4119_v25 = vmax.f32 %v1447_v61, 0.0  ;;  %v1449_v20 = vpop.f32.mrb[235].mxu0  ;;  %v5124_v3 = vadd.f32 %v5123_v53, %v4105_v59  ;;  %v4121_v5 = vmax.f32 %v1800_v0, 0.0  ;;  %v1802_v36 = vpop.f32.mrb[235].mxu1 }
 0x2af   :  { %v5087_v4 = vadd.f32 %v5086_v1, %v4104_v17  ;;  %v4120_v6 = vmax.f32 %v1449_v20, 0.0  ;;  %v5161_v7 = vadd.f32 %v5160_v54, %v4106_v63  ;;  %v4122_v9 = vmax.f32 %v1802_v36, 0.0  ;;  %v11199_v36 = vld [vmem:[%s13999_s0 + $0xb8] sm:$0xff]  }
 0x2b0   :  { %v5051_v8 = vadd.f32 %v5050_v62, %v4119_v25  ;;  %9654 = vmatmul.mubr.msk.bf16.gmra.mrb[84].mxu0 %vm297_vm1, %v11197_v10  ;;  %v5125_v11 = vadd.f32 %v5124_v3, %v4121_v5  ;;  %v4470_v3 = vrot.slane %v11930_v23, 4 }
 0x2b1   :  { %v5088_v18 = vadd.f32 %v5087_v4, %v4120_v6  ;;  %9687 = vmatmul.mubr.msk.bf16.gmra.mrb[84].mxu1 %vm297_vm1, %v11197_v10  ;;  %2107 = vmatprep.mubr.bf16.mxu0 %v11240_v2  ;;  %v5162_v12 = vadd.f32 %v5161_v7, %v4122_v9  ;;  %v4544_v7 = vrot.slane %v11936_v26, 4  ;;  %v4507_v10 = vrot.slane %v11938_v27, 4 }
 0x2b2   :  { %2460 = vmatprep.mubr.bf16.mxu1 %v11240_v2 }
 0x2b3   :  { %v1453_v14 = vpop.f32.mrb[236].mxu0 }
 0x2b4   :  { %v4135_v16 = vmax.f32 %v1453_v14, 0.0  ;;  %v1806_v37 = vpop.f32.mrb[236].mxu1  ;;  %v1455_v38 = vpop.f32.mrb[237].mxu0 }
 0x2b5   :  { %v4137_v29 = vmax.f32 %v1806_v37, 0.0  ;;  %v4136_v30 = vmax.f32 %v1455_v38, 0.0  ;;  %v1808_v31 = vpop.f32.mrb[237].mxu1  ;;  %v1457_v21 = vpop.f32.mrb[238].mxu0  ;;  %v4545_v38 = vadd.f32 %v4544_v7, %v11936_v26 }
 0x2b6   :  { %v5052_v33 = vadd.f32 %v5051_v8, %v4135_v16  ;;  %v4138_v35 = vmax.f32 %v1808_v31, 0.0  ;;  %v4151_v39 = vmax.f32 %v1457_v21, 0.0  ;;  %v1810_v42 = vpop.f32.mrb[238].mxu1  ;;  %v1459_v43 = vpop.f32.mrb[239].mxu0 }
 0x2b7   :  { %v5126_v56 = vadd.f32 %v5125_v11, %v4137_v29  ;;  %v5089_v24 = vadd.f32 %v5088_v18, %v4136_v30  ;;  %v4153_v41 = vmax.f32 %v1810_v42, 0.0  ;;  %v4152_v32 = vmax.f32 %v1459_v43, 0.0  ;;  %v1812_v44 = vpop.f32.mrb[239].mxu1 }
 0x2b8   :  { %v5163_v45 = vadd.f32 %v5162_v12, %v4138_v35  ;;  %v5053_v46 = vadd.f32 %v5052_v33, %v4151_v39  ;;  %v4154_v47 = vmax.f32 %v1812_v44, 0.0  ;;  %9655 = vmatmul.mubr.msk.bf16.gmra.mrb[88].mxu0 %vm297_vm1, %v11198_v40  ;;  %v4471_v12 = vadd.f32 %v4470_v3, %v11930_v23 }
 0x2b9   :  { %v5127_v19 = vadd.f32 %v5126_v56, %v4153_v41  ;;  %v5090_v48 = vadd.f32 %v5089_v24, %v4152_v32  ;;  %9688 = vmatmul.mubr.msk.bf16.gmra.mrb[88].mxu1 %vm297_vm1, %v11198_v40  ;;  %2117 = vmatprep.mubr.bf16.mxu0 %v11240_v2  ;;  %v4508_v33 = vadd.f32 %v4507_v10, %v11938_v27  ;;  %v11200_v40 = vld [vmem:[%s13999_s0 + $0xc0] sm:$0xff]   ;;  %v4546_v27 = vrot.slane %v4545_v38, 2 }
 0x2ba   :  { %v5164_v49 = vadd.f32 %v5163_v45, %v4154_v47  ;;  %2470 = vmatprep.mubr.bf16.mxu1 %v11240_v2  ;;  %v4472_v45 = vrot.slane %v4471_v12, 2 }
 0x2bb   :  { %v1463_v51 = vpop.f32.mrb[240].mxu0 }
 0x2bc   :  { %v4167_v52 = vmax.f32 %v1463_v51, 0.0  ;;  %v1816_v53 = vpop.f32.mrb[240].mxu1  ;;  %v1465_v1 = vpop.f32.mrb[241].mxu0  ;;  %v4509_v51 = vrot.slane %v4508_v33, 2 }
 0x2bd   :  { %v4169_v54 = vmax.f32 %v1816_v53, 0.0  ;;  %v4168_v22 = vmax.f32 %v1465_v1, 0.0  ;;  %v1818_v57 = vpop.f32.mrb[241].mxu1  ;;  %v1467_v58 = vpop.f32.mrb[242].mxu0  ;;  %v4473_v1 = vadd.f32 %v4472_v45, %v4471_v12 }
 0x2be   :  { %v5054_v55 = vadd.f32 %v5053_v46, %v4167_v52  ;;  %v4170_v59 = vmax.f32 %v1818_v57, 0.0  ;;  %v4183_v17 = vmax.f32 %v1467_v58, 0.0  ;;  %v1820_v60 = vpop.f32.mrb[242].mxu1  ;;  %v1469_v61 = vpop.f32.mrb[243].mxu0  ;;  %v4547_v58 = vadd.f32 %v4546_v27, %v4545_v38 }
 0x2bf   :  { %v5128_v62 = vadd.f32 %v5127_v19, %v4169_v54  ;;  %v5091_v63 = vadd.f32 %v5090_v48, %v4168_v22  ;;  %v4185_v25 = vmax.f32 %v1820_v60, 0.0  ;;  %v4184_v0 = vmax.f32 %v1469_v61, 0.0  ;;  %v1822_v20 = vpop.f32.mrb[243].mxu1 }
 0x2c0   :  { %v5165_v4 = vadd.f32 %v5164_v49, %v4170_v59  ;;  %v5055_v5 = vadd.f32 %v5054_v55, %v4183_v17  ;;  %v4186_v6 = vmax.f32 %v1822_v20, 0.0  ;;  %9656 = vmatmul.mubr.msk.bf16.gmra.mrb[92].mxu0 %vm297_vm1, %v11199_v36  ;;  %v4581_v19 = vrot.slane %v11942_v28, 4 }
 0x2c1   :  { %v5129_v8 = vadd.f32 %v5128_v62, %v4185_v25  ;;  %v5092_v9 = vadd.f32 %v5091_v63, %v4184_v0  ;;  %9689 = vmatmul.mubr.msk.bf16.gmra.mrb[92].mxu1 %vm297_vm1, %v11199_v36  ;;  %2127 = vmatprep.mubr.bf16.mxu0 %v11240_v2  ;;  %v4510_v62 = vadd.f32 %v4509_v51, %v4508_v33 }
 0x2c2   :  { %v5166_v11 = vadd.f32 %v5165_v4, %v4186_v6  ;;  %2480 = vmatprep.mubr.bf16.mxu1 %v11240_v2  ;;  %v4582_v55 = vadd.f32 %v4581_v19, %v11942_v28  ;;  %v11201_v28 = vld [vmem:[%s13999_s0 + $0xc8] sm:$0xff]  }
 0x2c3   :  { %v1473_v18 = vpop.f32.mrb[244].mxu0 }
 0x2c4   :  { %v4199_v14 = vmax.f32 %v1473_v18, 0.0  ;;  %v1826_v16 = vpop.f32.mrb[244].mxu1  ;;  %v1475_v37 = vpop.f32.mrb[245].mxu0  ;;  %v4548_v18 = vrot.slane %v4547_v58, 1  ;;  %v4583_v12 = vrot.slane %v4582_v55, 2 }
 0x2c5   :  { %v4201_v29 = vmax.f32 %v1826_v16, 0.0  ;;  %v4200_v30 = vmax.f32 %v1475_v37, 0.0  ;;  %v1828_v31 = vpop.f32.mrb[245].mxu1  ;;  %v1477_v21 = vpop.f32.mrb[246].mxu0  ;;  %v4511_v37 = vrot.slane %v4510_v62, 1 }
 0x2c6   :  { %v5056_v35 = vadd.f32 %v5055_v5, %v4199_v14  ;;  %v4202_v39 = vmax.f32 %v1828_v31, 0.0  ;;  %v4215_v42 = vmax.f32 %v1477_v21, 0.0  ;;  %v1830_v43 = vpop.f32.mrb[246].mxu1  ;;  %v1479_v56 = vpop.f32.mrb[247].mxu0 }
 0x2c7   :  { %v5130_v24 = vadd.f32 %v5129_v8, %v4201_v29  ;;  %v5093_v41 = vadd.f32 %v5092_v9, %v4200_v30  ;;  %v4217_v32 = vmax.f32 %v1830_v43, 0.0  ;;  %v4216_v23 = vmax.f32 %v1479_v56, 0.0  ;;  %v1832_v44 = vpop.f32.mrb[247].mxu1 }
 0x2c8   :  { %v5167_v46 = vadd.f32 %v5166_v11, %v4202_v39  ;;  %v5057_v47 = vadd.f32 %v5056_v35, %v4215_v42  ;;  %v4218_v26 = vmax.f32 %v1832_v44, 0.0  ;;  %9657 = vmatmul.mubr.msk.bf16.gmra.mrb[96].mxu0 %vm297_vm1, %v11200_v40  ;;  %v4474_v8 = vrot.slane %v4473_v1, 1 }
 0x2c9   :  { %v5131_v48 = vadd.f32 %v5130_v24, %v4217_v32  ;;  %v5094_v49 = vadd.f32 %v5093_v41, %v4216_v23  ;;  %9690 = vmatmul.mubr.msk.bf16.gmra.mrb[96].mxu1 %vm297_vm1, %v11200_v40  ;;  %2137 = vmatprep.mubr.bf16.mxu0 %v11240_v2  ;;  %v4549_v35 = vadd.f32 %v4548_v18, %v4547_v58 }
 0x2ca   :  { %v5168_v52 = vadd.f32 %v5167_v46, %v4218_v26  ;;  %2490 = vmatprep.mubr.bf16.mxu1 %v11240_v2  ;;  %v4475_v30 = vadd.f32 %v4474_v8, %v4473_v1  ;;  %v12064_v39 = vadd.f32 %v4583_v12, %v4582_v55  ;;  %v4512_v46 = vadd.f32 %v4511_v37, %v4510_v62 }
 0x2cb   :  { %v1483_v53 = vpop.f32.mrb[248].mxu0 }
 0x2cc   :  { %v4231_v54 = vmax.f32 %v1483_v53, 0.0  ;;  %v1836_v22 = vpop.f32.mrb[248].mxu1  ;;  %v1485_v57 = vpop.f32.mrb[249].mxu0  ;;  %v11202_v53 = vld [vmem:[%s13999_s0 + $0xd0] sm:$0xff]   ;;  %v4585_v1 = vrot.slane %v12064_v39, 1 }
 0x2cd   :  { %v4233_v59 = vmax.f32 %v1836_v22, 0.0  ;;  %v4232_v17 = vmax.f32 %v1485_v57, 0.0  ;;  %v1838_v60 = vpop.f32.mrb[249].mxu1  ;;  %v1487_v61 = vpop.f32.mrb[250].mxu0  ;;  %v12073_v57 = vmul.f32 0.00390625, %v4549_v35 }
 0x2ce   :  { %v5058_v63 = vadd.f32 %v5057_v47, %v4231_v54  ;;  %v4234_v25 = vmax.f32 %v1838_v60, 0.0  ;;  %v4247_v0 = vmax.f32 %v1487_v61, 0.0  ;;  %v1840_v20 = vpop.f32.mrb[250].mxu1  ;;  %v1489_v3 = vpop.f32.mrb[251].mxu0 }
 0x2cf   :  { %v5132_v4 = vadd.f32 %v5131_v48, %v4233_v59  ;;  %v5095_v5 = vadd.f32 %v5094_v49, %v4232_v17  ;;  %v4249_v6 = vmax.f32 %v1840_v20, 0.0  ;;  %v4248_v36 = vmax.f32 %v1489_v3, 0.0  ;;  %v1842_v7 = vpop.f32.mrb[251].mxu1 }
 0x2d0   :  { %v5169_v9 = vadd.f32 %v5168_v52, %v4234_v25  ;;  %v5059_v10 = vadd.f32 %v5058_v63, %v4247_v0  ;;  %v4250_v11 = vmax.f32 %v1842_v7, 0.0  ;;  %9658 = vmatmul.mubr.msk.bf16.gmra.mrb[100].mxu0 %vm297_vm1, %v11201_v28  ;;  %v5480_v48 = vmul.f32 0.00390625, %v4475_v30 }
 0x2d1   :  { %v5133_v14 = vadd.f32 %v5132_v4, %v4249_v6  ;;  %v5096_v16 = vadd.f32 %v5095_v5, %v4248_v36  ;;  %9691 = vmatmul.mubr.msk.bf16.gmra.mrb[100].mxu1 %vm297_vm1, %v11201_v28  ;;  %2147 = vmatprep.mubr.bf16.mxu0 %v11240_v2  ;;  %v12076_v59 = vmul.f32 0.00390625, %v4512_v46 }
 0x2d2   :  { %v5170_v38 = vadd.f32 %v5169_v9, %v4250_v11  ;;  %2500 = vmatprep.mubr.bf16.mxu1 %v11240_v2  ;;  %v5512_v62 = vpack.c.bf16 %v5480_v48, %v5480_v48 }
 0x2d3   :  { %v1493_v29 = vpop.f32.mrb[252].mxu0 }
 0x2d4   :  { %v4263_v31 = vmax.f32 %v1493_v29, 0.0  ;;  %v1846_v21 = vpop.f32.mrb[252].mxu1  ;;  %v1495_v33 = vpop.f32.mrb[253].mxu0 }
 0x2d5   :  { %v4265_v42 = vmax.f32 %v1846_v21, 0.0  ;;  %v4264_v43 = vmax.f32 %v1495_v33, 0.0  ;;  %v1848_v56 = vpop.f32.mrb[253].mxu1  ;;  %v1497_v24 = vpop.f32.mrb[254].mxu0  ;;  %v11203_v21 = vld [vmem:[%s13999_s0 + $0xd8] sm:$0xff]  }
 0x2d6   :  { %v5060_v41 = vadd.f32 %v5059_v10, %v4263_v31  ;;  %v4266_v32 = vmax.f32 %v1848_v56, 0.0  ;;  %v4279_v23 = vmax.f32 %v1497_v24, 0.0  ;;  %v1850_v44 = vpop.f32.mrb[254].mxu1  ;;  %v1499_v45 = vpop.f32.mrb[255].mxu0 }
 0x2d7   :  { %v5134_v47 = vadd.f32 %v5133_v14, %v4265_v42  ;;  %v5097_v26 = vadd.f32 %v5096_v16, %v4264_v43  ;;  %v4281_v40 = vmax.f32 %v1850_v44, 0.0  ;;  %v4280_v27 = vmax.f32 %v1499_v45, 0.0  ;;  %v1852_v19 = vpop.f32.mrb[255].mxu1 }
 0x2d8   :  { %v5171_v49 = vadd.f32 %v5170_v38, %v4266_v32  ;;  %v5061_v51 = vadd.f32 %v5060_v41, %v4279_v23  ;;  %v4282_v52 = vmax.f32 %v1852_v19, 0.0  ;;  %9659 = vmatmul.mubr.msk.bf16.gmra.mrb[104].mxu0 %vm297_vm1, %v11202_v53  ;;  %v5514_v41 = vpack.c.bf16 %v12073_v57, %v12073_v57 }
 0x2d9   :  { %v5135_v54 = vadd.f32 %v5134_v47, %v4281_v40  ;;  %v5098_v22 = vadd.f32 %v5097_v26, %v4280_v27  ;;  %9692 = vmatmul.mubr.msk.bf16.gmra.mrb[104].mxu1 %vm297_vm1, %v11202_v53  ;;  %2157 = vmatprep.mubr.bf16.mxu0 %v11240_v2  ;;  %v6110_v45 = vunpack.c.l.b16 %v5512_v62  ;;  %v4586_v40 = vadd.f32 %v4585_v1, %v12064_v39 }
 0x2da   :  { %v5062_v58 = vrot.slane %v5061_v51, 4  ;;  %v5172_v55 = vadd.f32 %v5171_v49, %v4282_v52  ;;  %2510 = vmatprep.mubr.bf16.mxu1 %v11240_v2  ;;  %v5513_v52 = vpack.c.bf16 %v12076_v59, %v12076_v59 }
 0x2db   :  { %v5136_v17 = vrot.slane %v5135_v54, 4  ;;  %v5099_v60 = vrot.slane %v5098_v22, 4  ;;  %v1889_v61 = vpop.f32.mrb[0].mxu0 }
 0x2dc   :  { %v5063_v63 = vadd.f32 %v5062_v58, %v5061_v51  ;;  %v5173_v25 = vrot.slane %v5172_v55, 4  ;;  %v1891_v0 = vpop.f32.mrb[1].mxu0  ;;  %v2242_v20 = vpop.f32.mrb[0].mxu1  ;;  %v3275_v3 = vmax.f32 %v1889_v61, 0.0 }
 0x2dd   :  { %v5137_v4 = vadd.f32 %v5136_v17, %v5135_v54  ;;  %v5100_v5 = vadd.f32 %v5099_v60, %v5098_v22  ;;  %v1893_v6 = vpop.f32.mrb[2].mxu0  ;;  %v2244_v36 = vpop.f32.mrb[1].mxu1  ;;  %v3277_v7 = vmax.f32 %v2242_v20, 0.0  ;;  %v3276_v8 = vmax.f32 %v1891_v0, 0.0 }
 0x2de   :  { %v5064_v9 = vrot.slane %v5063_v63, 2  ;;  %v5174_v10 = vadd.f32 %v5173_v25, %v5172_v55  ;;  %v1895_v11 = vpop.f32.mrb[3].mxu0  ;;  %v2246_v28 = vpop.f32.mrb[2].mxu1  ;;  %v3291_v18 = vmax.f32 %v1893_v6, 0.0  ;;  %v3278_v12 = vmax.f32 %v2244_v36, 0.0  ;;  %v11204_v36 = vld [vmem:[%s13999_s0 + $0xe0] sm:$0xff]  }
 0x2df   :  { %v5138_v14 = vrot.slane %v5137_v4, 2  ;;  %v5101_v16 = vrot.slane %v5100_v5, 2  ;;  %v2248_v37 = vpop.f32.mrb[3].mxu1  ;;  %v3293_v38 = vmax.f32 %v2246_v28, 0.0  ;;  %v3292_v29 = vmax.f32 %v1895_v11, 0.0 }
 0x2e0   :  { %v5065_v30 = vadd.f32 %v5064_v9, %v5063_v63  ;;  %v5175_v31 = vrot.slane %v5174_v10, 2  ;;  %9660 = vmatmul.mubr.msk.bf16.gmra.mrb[108].mxu0 %vm297_vm1, %v11203_v21  ;;  %v4587_v33 = vadd.f32 %v3291_v18, %v3275_v3  ;;  %v3294_v35 = vmax.f32 %v2248_v37, 0.0 }
 0x2e1   :  { %v5139_v42 = vadd.f32 %v5138_v14, %v5137_v4  ;;  %v5102_v43 = vadd.f32 %v5101_v16, %v5100_v5  ;;  %9693 = vmatmul.mubr.msk.bf16.gmra.mrb[108].mxu1 %vm297_vm1, %v11203_v21  ;;  %v4661_v56 = vadd.f32 %v3293_v38, %v3277_v7  ;;  %v4624_v24 = vadd.f32 %v3292_v29, %v3276_v8 }
 0x2e2   :  { %v5066_v32 = vrot.slane %v5065_v30, 1  ;;  %v5176_v23 = vadd.f32 %v5175_v31, %v5174_v10  ;;  %v4698_v44 = vadd.f32 %v3294_v35, %v3278_v12  ;;  %2167 = vmatprep.mubr.bf16.mxu0 %v11240_v2  ;;  %2520 = vmatprep.mubr.bf16.mxu1 %v11240_v2  ;;  %v5483_v12 = vmul.f32 0.00390625, %v4586_v40 }
 0x2e3   :  { %v5140_v46 = vrot.slane %v5139_v42, 1  ;;  %v5103_v47 = vrot.slane %v5102_v43, 1  ;;  %v1899_v26 = vpop.f32.mrb[4].mxu0  ;;  %v6112_v14 = vunpack.c.l.b16 %v5514_v41  ;;  %v6111_v35 = vunpack.c.l.b16 %v5513_v52 }
 0x2e4   :  { %v5067_v27 = vadd.f32 %v5066_v32, %v5065_v30  ;;  %v5177_v19 = vrot.slane %v5176_v23, 1  ;;  %v3307_v48 = vmax.f32 %v1899_v26, 0.0  ;;  %v2252_v49 = vpop.f32.mrb[4].mxu1  ;;  %v1901_v51 = vpop.f32.mrb[5].mxu0 }
 0x2e5   :  { %v5141_v53 = vadd.f32 %v5140_v46, %v5139_v42  ;;  %v3309_v54 = vmax.f32 %v2252_v49, 0.0  ;;  %v3308_v22 = vmax.f32 %v1901_v51, 0.0  ;;  %v2254_v57 = vpop.f32.mrb[5].mxu1  ;;  %v1903_v58 = vpop.f32.mrb[6].mxu0  ;;  %v5104_v55 = vadd.f32 %v5103_v47, %v5102_v43 }
 0x2e6   :  { %v5496_v17 = vmul.f32 0.00390625, %v5067_v27  ;;  %v4588_v60 = vadd.f32 %v4587_v33, %v3307_v48  ;;  %v3310_v61 = vmax.f32 %v2254_v57, 0.0  ;;  %v3323_v62 = vmax.f32 %v1903_v58, 0.0  ;;  %v2256_v63 = vpop.f32.mrb[6].mxu1  ;;  %v1905_v39 = vpop.f32.mrb[7].mxu0 }
 0x2e7   :  { %v5498_v1 = vmul.f32 0.00390625, %v5141_v53  ;;  %v4662_v25 = vadd.f32 %v4661_v56, %v3309_v54  ;;  %v4625_v0 = vadd.f32 %v4624_v24, %v3308_v22  ;;  %v3325_v20 = vmax.f32 %v2256_v63, 0.0  ;;  %v2258_v3 = vpop.f32.mrb[7].mxu1  ;;  %v11205_v54 = vld [vmem:[%s13999_s0 + $0xe8] sm:$0xff]  }
 0x2e8   :  { %v5528_v4 = vpack.c.bf16 %v5496_v17, %v5496_v17  ;;  %v4699_v5 = vadd.f32 %v4698_v44, %v3310_v61  ;;  %v4589_v59 = vadd.f32 %v4588_v60, %v3323_v62  ;;  %v3324_v6 = vmax.f32 %v1905_v39, 0.0  ;;  %9661 = vmatmul.mubr.msk.bf16.gmra.mrb[112].mxu0 %vm297_vm1, %v11204_v36 }
 0x2e9   :  { %v5530_v7 = vpack.c.bf16 %v5498_v1, %v5498_v1  ;;  %v4663_v8 = vadd.f32 %v4662_v25, %v3325_v20  ;;  %v3326_v9 = vmax.f32 %v2258_v3, 0.0  ;;  %9694 = vmatmul.mubr.msk.bf16.gmra.mrb[112].mxu1 %vm297_vm1, %v11204_v36  ;;  %2177 = vmatprep.mubr.bf16.mxu0 %v11240_v2  ;;  %v5497_v10 = vmul.f32 0.00390625, %v5104_v55 }
 0x2ea   :  { %v6126_v11 = vunpack.c.l.b16 %v5528_v4  ;;  %v4626_v28 = vadd.f32 %v4625_v0, %v3324_v6  ;;  %2530 = vmatprep.mubr.bf16.mxu1 %v11240_v2  ;;  %v5178_v18 = vadd.f32 %v5177_v19, %v5176_v23 }
 0x2eb   :  { %v6128_v16 = vunpack.c.l.b16 %v5530_v7  ;;  %v4700_v37 = vadd.f32 %v4699_v5, %v3326_v9  ;;  %v1909_v38 = vpop.f32.mrb[8].mxu0  ;;  %v5529_v33 = vpack.c.bf16 %v5497_v10, %v5497_v10 }
 0x2ec   :  { %v12098_v29 = vsel %vm6138_vm2, %v6126_v11, %v6110_v45  ;;  %v3339_v30 = vmax.f32 %v1909_v38, 0.0  ;;  %v2262_v31 = vpop.f32.mrb[8].mxu1  ;;  %v1911_v21 = vpop.f32.mrb[9].mxu0  ;;  %v5499_v23 = vmul.f32 0.00390625, %v5178_v18  ;;  %v5515_v45 = vpack.c.bf16 %v5483_v12, %v5483_v12 }
 0x2ed   :  { %v12101_v42 = vsel %vm6138_vm2, %v6128_v16, %v6112_v14  ;;  %v3341_v43 = vmax.f32 %v2262_v31, 0.0  ;;  %v3340_v56 = vmax.f32 %v1911_v21, 0.0  ;;  %v2264_v24 = vpop.f32.mrb[9].mxu1  ;;  %v1913_v32 = vpop.f32.mrb[10].mxu0  ;;  %v6127_v22 = vunpack.c.l.b16 %v5529_v33 }
 0x2ee   :  { %v4590_v41 = vadd.f32 %v4589_v59, %v3339_v30  ;;  %v3342_v44 = vmax.f32 %v2264_v24, 0.0  ;;  %v3355_v46 = vmax.f32 %v1913_v32, 0.0  ;;  %v2266_v47 = vpop.f32.mrb[10].mxu1  ;;  %v1915_v26 = vpop.f32.mrb[11].mxu0  ;;  %v5531_v55 = vpack.c.bf16 %v5499_v23, %v5499_v23 }
 0x2ef   :  { %v4664_v40 = vadd.f32 %v4663_v8, %v3341_v43  ;;  %v4627_v27 = vadd.f32 %v4626_v28, %v3340_v56  ;;  %v3357_v19 = vmax.f32 %v2266_v47, 0.0  ;;  %v3356_v48 = vmax.f32 %v1915_v26, 0.0  ;;  %v2268_v49 = vpop.f32.mrb[11].mxu1 }
 0x2f0   :  { %v4701_v51 = vadd.f32 %v4700_v37, %v3342_v44  ;;  %v4591_v52 = vadd.f32 %v4590_v41, %v3355_v46  ;;  %v3358_v53 = vmax.f32 %v2268_v49, 0.0  ;;  %9662 = vmatmul.mubr.msk.bf16.gmra.mrb[116].mxu0 %vm297_vm1, %v11205_v54  ;;  %v12111_v60 = vsel %vm6138_vm2, %v6127_v22, %v6111_v35  ;;  %v11206_v37 = vld [vmem:[%s13999_s0 + $0xf0] sm:$0xff]  }
 0x2f1   :  { %v4665_v57 = vadd.f32 %v4664_v40, %v3357_v19  ;;  %v4628_v58 = vadd.f32 %v4627_v27, %v3356_v48  ;;  %9695 = vmatmul.mubr.msk.bf16.gmra.mrb[116].mxu1 %vm297_vm1, %v11205_v54  ;;  %2187 = vmatprep.mubr.bf16.mxu0 %v11240_v2  ;;  %v6113_v62 = vunpack.c.l.b16 %v5515_v45  ;;  %v6129_v63 = vunpack.c.l.b16 %v5531_v55  ;;  %v10385_v55 = vld [vmem:[%s14000_s2] ss:$16 sps:$4 sm:$0xff]  }
 0x2f2   :  { %v4702_v17 = vadd.f32 %v4701_v51, %v3358_v53  ;;  %2540 = vmatprep.mubr.bf16.mxu1 %v11240_v2  ;;  %v11207_v53 = vld [vmem:[%s13999_s0 + $0xf8] sm:$0xff]  }
 0x2f3   :  { %v1919_v61 = vpop.f32.mrb[12].mxu0  ;;  %v12114_v5 = vsel %vm6138_vm2, %v6129_v63, %v6113_v62  ;;  %v10388_v63 = vld [vmem:[%s14000_s2 + $0x8] ss:$16 sps:$4 sm:$0xff]  }
 0x2f4   :  { %v3371_v39 = vmax.f32 %v1919_v61, 0.0  ;;  %v2272_v1 = vpop.f32.mrb[12].mxu1  ;;  %v1921_v25 = vpop.f32.mrb[13].mxu0 }
 0x2f5   :  { %v3373_v0 = vmax.f32 %v2272_v1, 0.0  ;;  %v3372_v20 = vmax.f32 %v1921_v25, 0.0  ;;  %v2274_v3 = vpop.f32.mrb[13].mxu1  ;;  %v1923_v4 = vpop.f32.mrb[14].mxu0 }
 0x2f6   :  { %v4592_v59 = vadd.f32 %v4591_v52, %v3371_v39  ;;  %v3374_v6 = vmax.f32 %v2274_v3, 0.0  ;;  %v3387_v36 = vmax.f32 %v1923_v4, 0.0  ;;  %v2276_v7 = vpop.f32.mrb[14].mxu1  ;;  %v1925_v8 = vpop.f32.mrb[15].mxu0 }
 0x2f7   :  { %v4666_v9 = vadd.f32 %v4665_v57, %v3373_v0  ;;  %v4629_v10 = vadd.f32 %v4628_v58, %v3372_v20  ;;  %v3389_v11 = vmax.f32 %v2276_v7, 0.0  ;;  %v3388_v28 = vmax.f32 %v1925_v8, 0.0  ;;  %v2278_v18 = vpop.f32.mrb[15].mxu1  ;;  %v10393_v20 = vld [vmem:[%s14000_s2 + $0x24] ss:$16 sps:$4 sm:$0xff]  }
 0x2f8   :  { %v4703_v12 = vadd.f32 %v4702_v17, %v3374_v6  ;;  %v4593_v14 = vadd.f32 %v4592_v59, %v3387_v36  ;;  %v3390_v16 = vmax.f32 %v2278_v18, 0.0  ;;  %9663 = vmatmul.mubr.msk.bf16.gmra.mrb[120].mxu0 %vm297_vm1, %v11206_v37  ;;  %v10396_v7 = vld [vmem:[%s14000_s2 + $0x2c] ss:$16 sps:$4 sm:$0xff]   ;;  %v10391_v18 = vld [vmem:[%s14000_s2 + $0x20] ss:$16 sps:$4 sm:$0xff]  }
 0x2f9   :  { %v4667_v38 = vadd.f32 %v4666_v9, %v3389_v11  ;;  %v4630_v30 = vadd.f32 %v4629_v10, %v3388_v28  ;;  %9696 = vmatmul.mubr.msk.bf16.gmra.mrb[120].mxu1 %vm297_vm1, %v11206_v37  ;;  %2197 = vmatprep.mubr.bf16.mxu0 %v11240_v2  ;;  %v11208_v37 = vld [vmem:[%s13999_s0] sm:$0xff]  }
 0x2fa   :  { %v4704_v31 = vadd.f32 %v4703_v12, %v3390_v16  ;;  %2550 = vmatprep.mubr.bf16.mxu1 %v11240_v2 }
 0x2fb   :  { %v1929_v21 = vpop.f32.mrb[16].mxu0 }
 0x2fc   :  { %v3403_v33 = vmax.f32 %v1929_v21, 0.0  ;;  %v2282_v35 = vpop.f32.mrb[16].mxu1  ;;  %v1931_v43 = vpop.f32.mrb[17].mxu0 }
 0x2fd   :  { %v3405_v56 = vmax.f32 %v2282_v35, 0.0  ;;  %v3404_v24 = vmax.f32 %v1931_v43, 0.0  ;;  %v2284_v32 = vpop.f32.mrb[17].mxu1  ;;  %v1933_v23 = vpop.f32.mrb[18].mxu0  ;;  %v10402_v35 = vld [vmem:[%s14000_s2 + $0x4c] ss:$16 sps:$4 sm:$0xff]  }
 0x2fe   :  { %v4594_v41 = vadd.f32 %v4593_v14, %v3403_v33  ;;  %v3406_v44 = vmax.f32 %v2284_v32, 0.0  ;;  %v3419_v46 = vmax.f32 %v1933_v23, 0.0  ;;  %v2286_v47 = vpop.f32.mrb[18].mxu1  ;;  %v1935_v26 = vpop.f32.mrb[19].mxu0  ;;  %v10399_v33 = vld [vmem:[%s14000_s2 + $0x44] ss:$16 sps:$4 sm:$0xff]  }
 0x2ff   :  { %v4668_v45 = vadd.f32 %v4667_v38, %v3405_v56  ;;  %v4631_v40 = vadd.f32 %v4630_v30, %v3404_v24  ;;  %v3421_v27 = vmax.f32 %v2286_v47, 0.0  ;;  %v3420_v19 = vmax.f32 %v1935_v26, 0.0  ;;  %v2288_v48 = vpop.f32.mrb[19].mxu1  ;;  %v10394_v38 = vld [vmem:[%s14000_s2 + $0x28] ss:$16 sps:$4 sm:$0xff]  }
 0x300   :  { %v4705_v49 = vadd.f32 %v4704_v31, %v3406_v44  ;;  %v4595_v51 = vadd.f32 %v4594_v41, %v3419_v46  ;;  %v3422_v52 = vmax.f32 %v2288_v48, 0.0  ;;  %9664 = vmatmul.mubr.msk.bf16.gmra.mrb[124].mxu0 %vm297_vm1, %v11207_v53  ;;  %v10397_v23 = vld [vmem:[%s14000_s2 + $0x40] ss:$16 sps:$4 sm:$0xff]   ;;  %v10400_v26 = vld [vmem:[%s14000_s2 + $0x48] ss:$16 sps:$4 sm:$0xff]  }
 0x301   :  { %v4669_v54 = vadd.f32 %v4668_v45, %v3421_v27  ;;  %v4632_v22 = vadd.f32 %v4631_v40, %v3420_v19  ;;  %9697 = vmatmul.mubr.msk.bf16.gmra.mrb[124].mxu1 %vm297_vm1, %v11207_v53  ;;  %2593 = vmatprep.mubr.bf16.mxu0 %v11240_v2 }
 0x302   :  { %v4706_v57 = vadd.f32 %v4705_v49, %v3422_v52  ;;  %2946 = vmatprep.mubr.bf16.mxu1 %v11240_v2 }
 0x303   :  { %v1939_v58 = vpop.f32.mrb[20].mxu0 }
 0x304   :  { %v3435_v17 = vmax.f32 %v1939_v58, 0.0  ;;  %v2292_v61 = vpop.f32.mrb[20].mxu1  ;;  %v1941_v62 = vpop.f32.mrb[21].mxu0 }
 0x305   :  { %v3437_v39 = vmax.f32 %v2292_v61, 0.0  ;;  %v3436_v1 = vmax.f32 %v1941_v62, 0.0  ;;  %v2294_v25 = vpop.f32.mrb[21].mxu1  ;;  %v1943_v0 = vpop.f32.mrb[22].mxu0  ;;  %v10403_v61 = vld [vmem:[%s14000_s2 + $0x60] ss:$16 sps:$4 sm:$0xff]  }
 0x306   :  { %v4596_v3 = vadd.f32 %v4595_v51, %v3435_v17  ;;  %v3438_v4 = vmax.f32 %v2294_v25, 0.0  ;;  %v3451_v59 = vmax.f32 %v1943_v0, 0.0  ;;  %v2296_v6 = vpop.f32.mrb[22].mxu1  ;;  %v1945_v36 = vpop.f32.mrb[23].mxu0  ;;  %v11209_v17 = vld [vmem:[%s13999_s0 + $0x8] sm:$0xff]  }
 0x307   :  { %v4670_v8 = vadd.f32 %v4669_v54, %v3437_v39  ;;  %v4633_v9 = vadd.f32 %v4632_v22, %v3436_v1  ;;  %v3453_v10 = vmax.f32 %v2296_v6, 0.0  ;;  %v3452_v11 = vmax.f32 %v1945_v36, 0.0  ;;  %v2298_v28 = vpop.f32.mrb[23].mxu1  ;;  %v10405_v22 = vld [vmem:[%s14000_s2 + $0x64] ss:$16 sps:$4 sm:$0xff]  }
 0x308   :  { %v4707_v12 = vadd.f32 %v4706_v57, %v3438_v4  ;;  %v4597_v14 = vadd.f32 %v4596_v3, %v3451_v59  ;;  %v3454_v16 = vmax.f32 %v2298_v28, 0.0  ;;  %9699 = vmatmul.mubr.msk.bf16.vlgmr.msra.gmra.mrb[128].mxu0 %vm297_vm1, %v11208_v37  ;;  %v10408_v62 = vld [vmem:[%s14000_s2 + $0x6c] ss:$16 sps:$4 sm:$0xff]   ;;  %v10406_v1 = vld [vmem:[%s14000_s2 + $0x68] ss:$16 sps:$4 sm:$0xff]  }
 0x309   :  { %v4671_v30 = vadd.f32 %v4670_v8, %v3453_v10  ;;  %v4634_v31 = vadd.f32 %v4633_v9, %v3452_v11  ;;  %9732 = vmatmul.mubr.msk.bf16.vlgmr.msra.gmra.mrb[128].mxu1 %vm297_vm1, %v11208_v37  ;;  %8748 = vmatpush1.bf16.msra.mxu0 %v10385_v55  ;;  %v10411_v25 = vld [vmem:[%s14000_s2 + $0x84] ss:$16 sps:$4 sm:$0xff]   ;;  %v10409_v36 = vld [vmem:[%s14000_s2 + $0x80] ss:$16 sps:$4 sm:$0xff]   ;;  %v10412_v11 = vld [vmem:[%s14000_s2 + $0x88] ss:$16 sps:$4 sm:$0xff]  }
 0x30a   :  { %v4708_v21 = vadd.f32 %v4707_v12, %v3454_v16  ;;  %9076 = vmatpush1.bf16.msra.mxu1 %v10388_v63  ;;  %2603 = vmatprep.mubr.bf16.mxu0 %v11240_v2  ;;  %v10417_v28 = vld [vmem:[%s14000_s2 + $0xa4] ss:$16 sps:$4 sm:$0xff]  }
 0x30b   :  { %v1949_v43 = vpop.f32.mrb[24].mxu0  ;;  %2956 = vmatprep.mubr.bf16.mxu1 %v11240_v2  ;;  %8749 = vmatprep.subr.bf16.mxu0 %v10393_v20  ;;  %v10414_v20 = vld [vmem:[%s14000_s2 + $0x8c] ss:$16 sps:$4 sm:$0xff]  }
 0x30c   :  { %v3467_v56 = vmax.f32 %v1949_v43, 0.0  ;;  %v2302_v24 = vpop.f32.mrb[24].mxu1  ;;  %v1951_v32 = vpop.f32.mrb[25].mxu0  ;;  %9077 = vmatprep.subr.bf16.mxu1 %v10396_v7 }
 0x30d   :  { %v3469_v41 = vmax.f32 %v2302_v24, 0.0  ;;  %v3468_v44 = vmax.f32 %v1951_v32, 0.0  ;;  %v2304_v46 = vpop.f32.mrb[25].mxu1  ;;  %v1953_v47 = vpop.f32.mrb[26].mxu0  ;;  %8750 = vmatpush1.bf16.msra.mxu0 %v10391_v18  ;;  %v11210_v32 = vld [vmem:[%s13999_s0 + $0x10] sm:$0xff]  }
 0x30e   :  { %v4598_v45 = vadd.f32 %v4597_v14, %v3467_v56  ;;  %v3470_v40 = vmax.f32 %v2304_v46, 0.0  ;;  %v3483_v27 = vmax.f32 %v1953_v47, 0.0  ;;  %v2306_v19 = vpop.f32.mrb[26].mxu1  ;;  %v1955_v48 = vpop.f32.mrb[27].mxu0  ;;  %9078 = vmatpush1.bf16.msra.mxu1 %v10394_v38  ;;  %8751 = vmatprep.subr.bf16.mxu0 %v10399_v33  ;;  %v10420_v38 = vld [vmem:[%s14000_s2 + $0xac] ss:$16 sps:$4 sm:$0xff]  }
 0x30f   :  { %v4672_v49 = vadd.f32 %v4671_v30, %v3469_v41  ;;  %v4635_v51 = vadd.f32 %v4634_v31, %v3468_v44  ;;  %v3485_v52 = vmax.f32 %v2306_v19, 0.0  ;;  %v3484_v53 = vmax.f32 %v1955_v48, 0.0  ;;  %v2308_v54 = vpop.f32.mrb[27].mxu1  ;;  %9079 = vmatprep.subr.bf16.mxu1 %v10402_v35  ;;  %v10418_v46 = vld [vmem:[%s14000_s2 + $0xa8] ss:$16 sps:$4 sm:$0xff]  }
 0x310   :  { %v4709_v57 = vadd.f32 %v4708_v21, %v3470_v40  ;;  %v4599_v58 = vadd.f32 %v4598_v45, %v3483_v27  ;;  %v3486_v55 = vmax.f32 %v2308_v54, 0.0  ;;  %9700 = vmatmul.mubr.msk.bf16.gmra.mrb[132].mxu0 %vm297_vm1, %v11209_v17  ;;  %v10426_v45 = vld [vmem:[%s14000_s2 + $0xcc] ss:$16 sps:$4 sm:$0xff]  }
 0x311   :  { %v4673_v63 = vadd.f32 %v4672_v49, %v3485_v52  ;;  %v4636_v39 = vadd.f32 %v4635_v51, %v3484_v53  ;;  %9733 = vmatmul.mubr.msk.bf16.gmra.mrb[132].mxu1 %vm297_vm1, %v11209_v17  ;;  %2613 = vmatprep.mubr.bf16.mxu0 %v11240_v2  ;;  %v10421_v49 = vld [vmem:[%s14000_s2 + $0xc0] ss:$16 sps:$4 sm:$0xff]  }
 0x312   :  { %v4710_v0 = vadd.f32 %v4709_v57, %v3486_v55  ;;  %2966 = vmatprep.mubr.bf16.mxu1 %v11240_v2  ;;  %8752 = vmatpush1.bf16.msra.mxu0 %v10397_v23  ;;  %v10415_v23 = vld [vmem:[%s14000_s2 + $0xa0] ss:$16 sps:$4 sm:$0xff]  }
 0x313   :  { %v1959_v3 = vpop.f32.mrb[28].mxu0  ;;  %9080 = vmatpush1.bf16.msra.mxu1 %v10400_v26  ;;  %8753 = vmatprep.subr.bf16.mxu0 %v10405_v22  ;;  %v10423_v26 = vld [vmem:[%s14000_s2 + $0xc4] ss:$16 sps:$4 sm:$0xff]   ;;  %v10424_v22 = vld [vmem:[%s14000_s2 + $0xc8] ss:$16 sps:$4 sm:$0xff]  }
 0x314   :  { %v3499_v4 = vmax.f32 %v1959_v3, 0.0  ;;  %v2312_v59 = vpop.f32.mrb[28].mxu1  ;;  %v1961_v6 = vpop.f32.mrb[29].mxu0  ;;  %9081 = vmatprep.subr.bf16.mxu1 %v10408_v62 }
 0x315   :  { %v3501_v7 = vmax.f32 %v2312_v59, 0.0  ;;  %v3500_v8 = vmax.f32 %v1961_v6, 0.0  ;;  %v2314_v9 = vpop.f32.mrb[29].mxu1  ;;  %v1963_v10 = vpop.f32.mrb[30].mxu0  ;;  %v11211_v59 = vld [vmem:[%s13999_s0 + $0x18] sm:$0xff]  }
 0x316   :  { %v4600_v18 = vadd.f32 %v4599_v58, %v3499_v4  ;;  %v3502_v12 = vmax.f32 %v2314_v9, 0.0  ;;  %v3515_v14 = vmax.f32 %v1963_v10, 0.0  ;;  %v2316_v16 = vpop.f32.mrb[30].mxu1  ;;  %v1965_v37 = vpop.f32.mrb[31].mxu0  ;;  %8754 = vmatpush1.bf16.msra.mxu0 %v10403_v61  ;;  %v10427_v6 = vld [vmem:[%s14000_s2 + $0xe0] ss:$16 sps:$4 sm:$0xff]  }
 0x317   :  { %v4674_v30 = vadd.f32 %v4673_v63, %v3501_v7  ;;  %v4637_v31 = vadd.f32 %v4636_v39, %v3500_v8  ;;  %v3517_v21 = vmax.f32 %v2316_v16, 0.0  ;;  %v3516_v33 = vmax.f32 %v1965_v37, 0.0  ;;  %v2318_v35 = vpop.f32.mrb[31].mxu1  ;;  %9082 = vmatpush1.bf16.msra.mxu1 %v10406_v1  ;;  %8755 = vmatprep.subr.bf16.mxu0 %v10411_v25  ;;  %v10430_v9 = vld [vmem:[%s14000_s2 + $0xe8] ss:$16 sps:$4 sm:$0xff]  }
 0x318   :  { %v4711_v43 = vadd.f32 %v4710_v0, %v3502_v12  ;;  %v4601_v56 = vadd.f32 %v4600_v18, %v3515_v14  ;;  %v3518_v24 = vmax.f32 %v2318_v35, 0.0  ;;  %9701 = vmatmul.mubr.msk.bf16.gmra.mrb[136].mxu0 %vm297_vm1, %v11210_v32  ;;  %9083 = vmatprep.subr.bf16.mxu1 %v10414_v20  ;;  %v10429_v0 = vld [vmem:[%s14000_s2 + $0xe4] ss:$16 sps:$4 sm:$0xff]   ;;  %v10433_v37 = vld [vmem:[%s14000_s2 + $0x100] ss:$16 sps:$4 sm:$0xff]  }
 0x319   :  { %v4675_v41 = vadd.f32 %v4674_v30, %v3517_v21  ;;  %v4638_v44 = vadd.f32 %v4637_v31, %v3516_v33  ;;  %9734 = vmatmul.mubr.msk.bf16.gmra.mrb[136].mxu1 %vm297_vm1, %v11210_v32  ;;  %2623 = vmatprep.mubr.bf16.mxu0 %v11240_v2  ;;  %v10435_v10 = vld [vmem:[%s14000_s2 + $0x104] ss:$16 sps:$4 sm:$0xff]   ;;  %v10436_v33 = vld [vmem:[%s14000_s2 + $0x108] ss:$16 sps:$4 sm:$0xff]  }
 0x31a   :  { %v4712_v47 = vadd.f32 %v4711_v43, %v3518_v24  ;;  %2976 = vmatprep.mubr.bf16.mxu1 %v11240_v2  ;;  %8756 = vmatpush1.bf16.msra.mxu0 %v10409_v36  ;;  %v10432_v36 = vld [vmem:[%s14000_s2 + $0xec] ss:$16 sps:$4 sm:$0xff]   ;;  %v10441_v35 = vld [vmem:[%s14000_s2 + $0x124] ss:$16 sps:$4 sm:$0xff]  }
 0x31b   :  { %v1969_v40 = vpop.f32.mrb[32].mxu0  ;;  %9084 = vmatpush1.bf16.msra.mxu1 %v10412_v11  ;;  %8757 = vmatprep.subr.bf16.mxu0 %v10417_v28  ;;  %v10438_v28 = vld [vmem:[%s14000_s2 + $0x10c] ss:$16 sps:$4 sm:$0xff]  }
 0x31c   :  { %v3531_v27 = vmax.f32 %v1969_v40, 0.0  ;;  %v2322_v19 = vpop.f32.mrb[32].mxu1  ;;  %v1971_v48 = vpop.f32.mrb[33].mxu0  ;;  %9085 = vmatprep.subr.bf16.mxu1 %v10420_v38 }
 0x31d   :  { %v3533_v51 = vmax.f32 %v2322_v19, 0.0  ;;  %v3532_v52 = vmax.f32 %v1971_v48, 0.0  ;;  %v2324_v53 = vpop.f32.mrb[33].mxu1  ;;  %v1973_v54 = vpop.f32.mrb[34].mxu0  ;;  %v11212_v48 = vld [vmem:[%s13999_s0 + $0x20] sm:$0xff]  }
 0x31e   :  { %v4602_v57 = vadd.f32 %v4601_v56, %v3531_v27  ;;  %v3534_v58 = vmax.f32 %v2324_v53, 0.0  ;;  %v3547_v55 = vmax.f32 %v1973_v54, 0.0  ;;  %v2326_v17 = vpop.f32.mrb[34].mxu1  ;;  %v1975_v61 = vpop.f32.mrb[35].mxu0  ;;  %8758 = vmatpush1.bf16.msra.mxu0 %v10415_v23  ;;  %v10442_v54 = vld [vmem:[%s14000_s2 + $0x128] ss:$16 sps:$4 sm:$0xff]  }
 0x31f   :  { %v4676_v62 = vadd.f32 %v4675_v41, %v3533_v51  ;;  %v4639_v63 = vadd.f32 %v4638_v44, %v3532_v52  ;;  %v3549_v39 = vmax.f32 %v2326_v17, 0.0  ;;  %v3548_v1 = vmax.f32 %v1975_v61, 0.0  ;;  %v2328_v25 = vpop.f32.mrb[35].mxu1  ;;  %9086 = vmatpush1.bf16.msra.mxu1 %v10418_v46  ;;  %8759 = vmatprep.subr.bf16.mxu0 %v10423_v26  ;;  %v10444_v41 = vld [vmem:[%s14000_s2 + $0x12c] ss:$16 sps:$4 sm:$0xff]  }
 0x320   :  { %v4713_v20 = vadd.f32 %v4712_v47, %v3534_v58  ;;  %v4603_v3 = vadd.f32 %v4602_v57, %v3547_v55  ;;  %v3550_v4 = vmax.f32 %v2328_v25, 0.0  ;;  %9702 = vmatmul.mubr.msk.bf16.gmra.mrb[140].mxu0 %vm297_vm1, %v11211_v59  ;;  %9087 = vmatprep.subr.bf16.mxu1 %v10426_v45  ;;  %v10445_v61 = vld [vmem:[%s14000_s2 + $0x140] ss:$16 sps:$4 sm:$0xff]  }
 0x321   :  { %v4677_v7 = vadd.f32 %v4676_v62, %v3549_v39  ;;  %v4640_v8 = vadd.f32 %v4639_v63, %v3548_v1  ;;  %9735 = vmatmul.mubr.msk.bf16.gmra.mrb[140].mxu1 %vm297_vm1, %v11211_v59  ;;  %2633 = vmatprep.mubr.bf16.mxu0 %v11240_v2 }
 0x322   :  { %v4714_v11 = vadd.f32 %v4713_v20, %v3550_v4  ;;  %2986 = vmatprep.mubr.bf16.mxu1 %v11240_v2  ;;  %8760 = vmatpush1.bf16.msra.mxu0 %v10421_v49  ;;  %v10439_v49 = vld [vmem:[%s14000_s2 + $0x120] ss:$16 sps:$4 sm:$0xff]  }
 0x323   :  { %v1979_v18 = vpop.f32.mrb[36].mxu0  ;;  %9088 = vmatpush1.bf16.msra.mxu1 %v10424_v22  ;;  %8761 = vmatprep.subr.bf16.mxu0 %v10429_v0  ;;  %v10447_v22 = vld [vmem:[%s14000_s2 + $0x144] ss:$16 sps:$4 sm:$0xff]  }
 0x324   :  { %v3563_v12 = vmax.f32 %v1979_v18, 0.0  ;;  %v2332_v14 = vpop.f32.mrb[36].mxu1  ;;  %v1981_v16 = vpop.f32.mrb[37].mxu0  ;;  %9089 = vmatprep.subr.bf16.mxu1 %v10432_v36  ;;  %v11213_v18 = vld [vmem:[%s13999_s0 + $0x28] sm:$0xff]  }
 0x325   :  { %v3565_v38 = vmax.f32 %v2332_v14, 0.0  ;;  %v3564_v30 = vmax.f32 %v1981_v16, 0.0  ;;  %v2334_v31 = vpop.f32.mrb[37].mxu1  ;;  %v1983_v21 = vpop.f32.mrb[38].mxu0 }
 0x326   :  { %v4604_v43 = vadd.f32 %v4603_v3, %v3563_v12  ;;  %v3566_v56 = vmax.f32 %v2334_v31, 0.0  ;;  %v3579_v24 = vmax.f32 %v1983_v21, 0.0  ;;  %v2336_v32 = vpop.f32.mrb[38].mxu1  ;;  %v1985_v23 = vpop.f32.mrb[39].mxu0  ;;  %8762 = vmatpush1.bf16.msra.mxu0 %v10427_v6  ;;  %v10450_v12 = vld [vmem:[%s14000_s2 + $0x14c] ss:$16 sps:$4 sm:$0xff]  }
 0x327   :  { %v4678_v44 = vadd.f32 %v4677_v7, %v3565_v38  ;;  %v4641_v46 = vadd.f32 %v4640_v8, %v3564_v30  ;;  %v3581_v47 = vmax.f32 %v2336_v32, 0.0  ;;  %v3580_v26 = vmax.f32 %v1985_v23, 0.0  ;;  %v2338_v45 = vpop.f32.mrb[39].mxu1  ;;  %9090 = vmatpush1.bf16.msra.mxu1 %v10430_v9  ;;  %8763 = vmatprep.subr.bf16.mxu0 %v10435_v10  ;;  %v10448_v9 = vld [vmem:[%s14000_s2 + $0x148] ss:$16 sps:$4 sm:$0xff]  }
 0x328   :  { %v4715_v40 = vadd.f32 %v4714_v11, %v3566_v56  ;;  %v4605_v27 = vadd.f32 %v4604_v43, %v3579_v24  ;;  %v3582_v19 = vmax.f32 %v2338_v45, 0.0  ;;  %9703 = vmatmul.mubr.msk.bf16.gmra.mrb[144].mxu0 %vm297_vm1, %v11212_v48  ;;  %9091 = vmatprep.subr.bf16.mxu1 %v10438_v28 }
 0x329   :  { %v4679_v51 = vadd.f32 %v4678_v44, %v3581_v47  ;;  %v4642_v52 = vadd.f32 %v4641_v46, %v3580_v26  ;;  %9736 = vmatmul.mubr.msk.bf16.gmra.mrb[144].mxu1 %vm297_vm1, %v11212_v48  ;;  %2643 = vmatprep.mubr.bf16.mxu0 %v11240_v2 }
 0x32a   :  { %v4716_v53 = vadd.f32 %v4715_v40, %v3582_v19  ;;  %2996 = vmatprep.mubr.bf16.mxu1 %v11240_v2  ;;  %8764 = vmatpush1.bf16.msra.mxu0 %v10433_v37 }
 0x32b   :  { %v1989_v57 = vpop.f32.mrb[40].mxu0  ;;  %9092 = vmatpush1.bf16.msra.mxu1 %v10436_v33  ;;  %8765 = vmatprep.subr.bf16.mxu0 %v10441_v35 }
 0x32c   :  { %v3595_v58 = vmax.f32 %v1989_v57, 0.0  ;;  %v2342_v55 = vpop.f32.mrb[40].mxu1  ;;  %v1991_v17 = vpop.f32.mrb[41].mxu0  ;;  %9093 = vmatprep.subr.bf16.mxu1 %v10444_v41 }
 0x32d   :  { %v3597_v62 = vmax.f32 %v2342_v55, 0.0  ;;  %v3596_v63 = vmax.f32 %v1991_v17, 0.0  ;;  %v2344_v39 = vpop.f32.mrb[41].mxu1  ;;  %v1993_v1 = vpop.f32.mrb[42].mxu0 }
 0x32e   :  { %v4606_v25 = vadd.f32 %v4605_v27, %v3595_v58  ;;  %v3598_v0 = vmax.f32 %v2344_v39, 0.0  ;;  %v3611_v20 = vmax.f32 %v1993_v1, 0.0  ;;  %v2346_v3 = vpop.f32.mrb[42].mxu1  ;;  %v1995_v4 = vpop.f32.mrb[43].mxu0  ;;  %8766 = vmatpush1.bf16.msra.mxu0 %v10439_v49  ;;  %v11214_v49 = vld [vmem:[%s13999_s0 + $0x30] sm:$0xff]  }
 0x32f   :  { %v4680_v59 = vadd.f32 %v4679_v51, %v3597_v62  ;;  %v4643_v6 = vadd.f32 %v4642_v52, %v3596_v63  ;;  %v3613_v36 = vmax.f32 %v2346_v3, 0.0  ;;  %v3612_v7 = vmax.f32 %v1995_v4, 0.0  ;;  %v2348_v8 = vpop.f32.mrb[43].mxu1  ;;  %9094 = vmatpush1.bf16.msra.mxu1 %v10442_v54  ;;  %8767 = vmatprep.subr.bf16.mxu0 %v10447_v22  ;;  %v10451_v54 = vld [vmem:[%s14000_s2 + $0x160] ss:$16 sps:$4 sm:$0xff]  }
 0x330   :  { %v4717_v10 = vadd.f32 %v4716_v53, %v3598_v0  ;;  %v4607_v11 = vadd.f32 %v4606_v25, %v3611_v20  ;;  %v3614_v28 = vmax.f32 %v2348_v8, 0.0  ;;  %9704 = vmatmul.mubr.msk.bf16.gmra.mrb[148].mxu0 %vm297_vm1, %v11213_v18  ;;  %9095 = vmatprep.subr.bf16.mxu1 %v10450_v12  ;;  %v10453_v22 = vld [vmem:[%s14000_s2 + $0x164] ss:$16 sps:$4 sm:$0xff]   ;;  %v10454_v8 = vld [vmem:[%s14000_s2 + $0x168] ss:$16 sps:$4 sm:$0xff]  }
 0x331   :  { %v4681_v14 = vadd.f32 %v4680_v59, %v3613_v36  ;;  %v4644_v16 = vadd.f32 %v4643_v6, %v3612_v7  ;;  %9737 = vmatmul.mubr.msk.bf16.gmra.mrb[148].mxu1 %vm297_vm1, %v11213_v18  ;;  %2653 = vmatprep.mubr.bf16.mxu0 %v11240_v2  ;;  %v10456_v18 = vld [vmem:[%s14000_s2 + $0x16c] ss:$16 sps:$4 sm:$0xff]  }
 0x332   :  { %v4718_v37 = vadd.f32 %v4717_v10, %v3614_v28  ;;  %3006 = vmatprep.mubr.bf16.mxu1 %v11240_v2  ;;  %8768 = vmatpush1.bf16.msra.mxu0 %v10445_v61  ;;  %v11215_v28 = vld [vmem:[%s13999_s0 + $0x38] sm:$0xff]  }
 0x333   :  { %v1999_v38 = vpop.f32.mrb[44].mxu0  ;;  %9096 = vmatpush1.bf16.msra.mxu1 %v10448_v9  ;;  %8769 = vmatprep.subr.bf16.mxu0 %v10453_v22 }
 0x334   :  { %v3627_v30 = vmax.f32 %v1999_v38, 0.0  ;;  %v2352_v31 = vpop.f32.mrb[44].mxu1  ;;  %v2001_v21 = vpop.f32.mrb[45].mxu0  ;;  %9097 = vmatprep.subr.bf16.mxu1 %v10456_v18 }
 0x335   :  { %v3629_v33 = vmax.f32 %v2352_v31, 0.0  ;;  %v3628_v35 = vmax.f32 %v2001_v21, 0.0  ;;  %v2354_v43 = vpop.f32.mrb[45].mxu1  ;;  %v2003_v56 = vpop.f32.mrb[46].mxu0 }
 0x336   :  { %v4608_v24 = vadd.f32 %v4607_v11, %v3627_v30  ;;  %v3630_v32 = vmax.f32 %v2354_v43, 0.0  ;;  %v3643_v23 = vmax.f32 %v2003_v56, 0.0  ;;  %v2356_v41 = vpop.f32.mrb[46].mxu1  ;;  %v2005_v44 = vpop.f32.mrb[47].mxu0  ;;  %8770 = vmatpush1.bf16.msra.mxu0 %v10451_v54  ;;  %v10459_v54 = vld [vmem:[%s14000_s2 + $0x184] ss:$16 sps:$4 sm:$0xff]  }
 0x337   :  { %v4682_v46 = vadd.f32 %v4681_v14, %v3629_v33  ;;  %v4645_v47 = vadd.f32 %v4644_v16, %v3628_v35  ;;  %v3645_v26 = vmax.f32 %v2356_v41, 0.0  ;;  %v3644_v45 = vmax.f32 %v2005_v44, 0.0  ;;  %v2358_v40 = vpop.f32.mrb[47].mxu1  ;;  %9098 = vmatpush1.bf16.msra.mxu1 %v10454_v8  ;;  %8771 = vmatprep.subr.bf16.mxu0 %v10459_v54 }
 0x338   :  { %v4719_v27 = vadd.f32 %v4718_v37, %v3630_v32  ;;  %v4609_v19 = vadd.f32 %v4608_v24, %v3643_v23  ;;  %v3646_v48 = vmax.f32 %v2358_v40, 0.0  ;;  %9705 = vmatmul.mubr.msk.bf16.gmra.mrb[152].mxu0 %vm297_vm1, %v11214_v49 }
 0x339   :  { %v4683_v51 = vadd.f32 %v4682_v46, %v3645_v26  ;;  %v4646_v52 = vadd.f32 %v4645_v47, %v3644_v45  ;;  %9738 = vmatmul.mubr.msk.bf16.gmra.mrb[152].mxu1 %vm297_vm1, %v11214_v49  ;;  %2663 = vmatprep.mubr.bf16.mxu0 %v11240_v2 }
 0x33a   :  { %v4720_v53 = vadd.f32 %v4719_v27, %v3646_v48  ;;  %3016 = vmatprep.mubr.bf16.mxu1 %v11240_v2  ;;  %v11216_v48 = vld [vmem:[%s13999_s0 + $0x40] sm:$0xff]  }
 0x33b   :  { %v2009_v57 = vpop.f32.mrb[48].mxu0 }
 0x33c   :  { %v3659_v58 = vmax.f32 %v2009_v57, 0.0  ;;  %v2362_v55 = vpop.f32.mrb[48].mxu1  ;;  %v2011_v17 = vpop.f32.mrb[49].mxu0 }
 0x33d   :  { %v3661_v61 = vmax.f32 %v2362_v55, 0.0  ;;  %v3660_v62 = vmax.f32 %v2011_v17, 0.0  ;;  %v2364_v63 = vpop.f32.mrb[49].mxu1  ;;  %v2013_v39 = vpop.f32.mrb[50].mxu0 }
 0x33e   :  { %v4610_v1 = vadd.f32 %v4609_v19, %v3659_v58  ;;  %v3662_v25 = vmax.f32 %v2364_v63, 0.0  ;;  %v3675_v0 = vmax.f32 %v2013_v39, 0.0  ;;  %v2366_v20 = vpop.f32.mrb[50].mxu1  ;;  %v2015_v3 = vpop.f32.mrb[51].mxu0 }
 0x33f   :  { %v4684_v4 = vadd.f32 %v4683_v51, %v3661_v61  ;;  %v4647_v59 = vadd.f32 %v4646_v52, %v3660_v62  ;;  %v3677_v6 = vmax.f32 %v2366_v20, 0.0  ;;  %v3676_v36 = vmax.f32 %v2015_v3, 0.0  ;;  %v2368_v7 = vpop.f32.mrb[51].mxu1 }
 0x340   :  { %v4721_v9 = vadd.f32 %v4720_v53, %v3662_v25  ;;  %v4611_v10 = vadd.f32 %v4610_v1, %v3675_v0  ;;  %v3678_v11 = vmax.f32 %v2368_v7, 0.0  ;;  %9706 = vmatmul.mubr.msk.bf16.gmra.mrb[156].mxu0 %vm297_vm1, %v11215_v28  ;;  %v10457_v53 = vld [vmem:[%s14000_s2 + $0x180] ss:$16 sps:$4 sm:$0xff]   ;;  %v10460_v7 = vld [vmem:[%s14000_s2 + $0x188] ss:$16 sps:$4 sm:$0xff]  }
 0x341   :  { %v4685_v12 = vadd.f32 %v4684_v4, %v3677_v6  ;;  %v4648_v14 = vadd.f32 %v4647_v59, %v3676_v36  ;;  %9739 = vmatmul.mubr.msk.bf16.gmra.mrb[156].mxu1 %vm297_vm1, %v11215_v28  ;;  %2673 = vmatprep.mubr.bf16.mxu0 %v11240_v2  ;;  %v10462_v28 = vld [vmem:[%s14000_s2 + $0x18c] ss:$16 sps:$4 sm:$0xff]  }
 0x342   :  { %v4722_v16 = vadd.f32 %v4721_v9, %v3678_v11  ;;  %3026 = vmatprep.mubr.bf16.mxu1 %v11240_v2  ;;  %8772 = vmatpush1.bf16.msra.mxu0 %v10457_v53  ;;  %v11217_v11 = vld [vmem:[%s13999_s0 + $0x48] sm:$0xff]  }
 0x343   :  { %v2019_v37 = vpop.f32.mrb[52].mxu0  ;;  %9099 = vmatprep.subr.bf16.mxu1 %v10462_v28 }
 0x344   :  { %v3691_v38 = vmax.f32 %v2019_v37, 0.0  ;;  %v2372_v30 = vpop.f32.mrb[52].mxu1  ;;  %v2021_v31 = vpop.f32.mrb[53].mxu0  ;;  %9100 = vmatpush1.bf16.msra.mxu1 %v10460_v7 }
 0x345   :  { %v3693_v21 = vmax.f32 %v2372_v30, 0.0  ;;  %v3692_v33 = vmax.f32 %v2021_v31, 0.0  ;;  %v2374_v35 = vpop.f32.mrb[53].mxu1  ;;  %v2023_v43 = vpop.f32.mrb[54].mxu0 }
 0x346   :  { %v4612_v56 = vadd.f32 %v4611_v10, %v3691_v38  ;;  %v3694_v24 = vmax.f32 %v2374_v35, 0.0  ;;  %v3707_v32 = vmax.f32 %v2023_v43, 0.0  ;;  %v2376_v23 = vpop.f32.mrb[54].mxu1  ;;  %v2025_v41 = vpop.f32.mrb[55].mxu0 }
 0x347   :  { %v4686_v44 = vadd.f32 %v4685_v12, %v3693_v21  ;;  %v4649_v46 = vadd.f32 %v4648_v14, %v3692_v33  ;;  %v3709_v47 = vmax.f32 %v2376_v23, 0.0  ;;  %v3708_v26 = vmax.f32 %v2025_v41, 0.0  ;;  %v2378_v45 = vpop.f32.mrb[55].mxu1 }
 0x348   :  { %v4723_v40 = vadd.f32 %v4722_v16, %v3694_v24  ;;  %v4613_v27 = vadd.f32 %v4612_v56, %v3707_v32  ;;  %v3710_v19 = vmax.f32 %v2378_v45, 0.0  ;;  %9707 = vmatmul.mubr.msk.bf16.gmra.mrb[160].mxu0 %vm297_vm1, %v11216_v48 }
 0x349   :  { %v4687_v49 = vadd.f32 %v4686_v44, %v3709_v47  ;;  %v4650_v51 = vadd.f32 %v4649_v46, %v3708_v26  ;;  %9740 = vmatmul.mubr.msk.bf16.gmra.mrb[160].mxu1 %vm297_vm1, %v11216_v48  ;;  %2683 = vmatprep.mubr.bf16.mxu0 %v11240_v2 }
 0x34a   :  { %v4724_v52 = vadd.f32 %v4723_v40, %v3710_v19  ;;  %3036 = vmatprep.mubr.bf16.mxu1 %v11240_v2  ;;  %v11218_v19 = vld [vmem:[%s13999_s0 + $0x50] sm:$0xff]  }
 0x34b   :  { %v2029_v22 = vpop.f32.mrb[56].mxu0 }
 0x34c   :  { %v3723_v57 = vmax.f32 %v2029_v22, 0.0  ;;  %v2382_v58 = vpop.f32.mrb[56].mxu1  ;;  %v2031_v55 = vpop.f32.mrb[57].mxu0 }
 0x34d   :  { %v3725_v17 = vmax.f32 %v2382_v58, 0.0  ;;  %v3724_v61 = vmax.f32 %v2031_v55, 0.0  ;;  %v2384_v62 = vpop.f32.mrb[57].mxu1  ;;  %v2033_v63 = vpop.f32.mrb[58].mxu0 }
 0x34e   :  { %v4614_v39 = vadd.f32 %v4613_v27, %v3723_v57  ;;  %v3726_v1 = vmax.f32 %v2384_v62, 0.0  ;;  %v3739_v25 = vmax.f32 %v2033_v63, 0.0  ;;  %v2386_v0 = vpop.f32.mrb[58].mxu1  ;;  %v2035_v20 = vpop.f32.mrb[59].mxu0 }
 0x34f   :  { %v4688_v3 = vadd.f32 %v4687_v49, %v3725_v17  ;;  %v4651_v4 = vadd.f32 %v4650_v51, %v3724_v61  ;;  %v3741_v59 = vmax.f32 %v2386_v0, 0.0  ;;  %v3740_v6 = vmax.f32 %v2035_v20, 0.0  ;;  %v2388_v36 = vpop.f32.mrb[59].mxu1 }
 0x350   :  { %v4725_v8 = vadd.f32 %v4724_v52, %v3726_v1  ;;  %v4615_v9 = vadd.f32 %v4614_v39, %v3739_v25  ;;  %v3742_v10 = vmax.f32 %v2388_v36, 0.0  ;;  %9708 = vmatmul.mubr.msk.bf16.gmra.mrb[164].mxu0 %vm297_vm1, %v11217_v11 }
 0x351   :  { %v4689_v18 = vadd.f32 %v4688_v3, %v3741_v59  ;;  %v4652_v12 = vadd.f32 %v4651_v4, %v3740_v6  ;;  %9741 = vmatmul.mubr.msk.bf16.gmra.mrb[164].mxu1 %vm297_vm1, %v11217_v11  ;;  %2693 = vmatprep.mubr.bf16.mxu0 %v11240_v2  ;;  %v11219_v4 = vld [vmem:[%s13999_s0 + $0x58] sm:$0xff]  }
 0x352   :  { %v4726_v14 = vadd.f32 %v4725_v8, %v3742_v10  ;;  %3046 = vmatprep.mubr.bf16.mxu1 %v11240_v2 }
 0x353   :  { %v2039_v16 = vpop.f32.mrb[60].mxu0 }
 0x354   :  { %v3755_v37 = vmax.f32 %v2039_v16, 0.0  ;;  %v2392_v38 = vpop.f32.mrb[60].mxu1  ;;  %v2041_v30 = vpop.f32.mrb[61].mxu0 }
 0x355   :  { %v3757_v31 = vmax.f32 %v2392_v38, 0.0  ;;  %v3756_v21 = vmax.f32 %v2041_v30, 0.0  ;;  %v2394_v33 = vpop.f32.mrb[61].mxu1  ;;  %v2043_v35 = vpop.f32.mrb[62].mxu0 }
 0x356   :  { %v4616_v43 = vadd.f32 %v4615_v9, %v3755_v37  ;;  %v3758_v56 = vmax.f32 %v2394_v33, 0.0  ;;  %v3771_v24 = vmax.f32 %v2043_v35, 0.0  ;;  %v2396_v32 = vpop.f32.mrb[62].mxu1  ;;  %v2045_v23 = vpop.f32.mrb[63].mxu0 }
 0x357   :  { %v4690_v41 = vadd.f32 %v4689_v18, %v3757_v31  ;;  %v4653_v44 = vadd.f32 %v4652_v12, %v3756_v21  ;;  %v3773_v46 = vmax.f32 %v2396_v32, 0.0  ;;  %v3772_v47 = vmax.f32 %v2045_v23, 0.0  ;;  %v2398_v26 = vpop.f32.mrb[63].mxu1 }
 0x358   :  { %v4727_v45 = vadd.f32 %v4726_v14, %v3758_v56  ;;  %v12350_v40 = vadd.f32 %v4616_v43, %v3771_v24  ;;  %v3774_v27 = vmax.f32 %v2398_v26, 0.0  ;;  %9709 = vmatmul.mubr.msk.bf16.gmra.mrb[168].mxu0 %vm297_vm1, %v11218_v19  ;;  %v11220_v43 = vld [vmem:[%s13999_s0 + $0x60] sm:$0xff]  }
 0x359   :  { %v12356_v48 = vadd.f32 %v4690_v41, %v3773_v46  ;;  %v12358_v49 = vadd.f32 %v4653_v44, %v3772_v47  ;;  %9742 = vmatmul.mubr.msk.bf16.gmra.mrb[168].mxu1 %vm297_vm1, %v11218_v19  ;;  %2703 = vmatprep.mubr.bf16.mxu0 %v11240_v2 }
 0x35a   :  { %v12362_v51 = vadd.f32 %v4727_v45, %v3774_v27  ;;  %3056 = vmatprep.mubr.bf16.mxu1 %v11240_v2 }
 0x35b   :  { %v2049_v52 = vpop.f32.mrb[64].mxu0 }
 0x35c   :  { %v2051_v53 = vpop.f32.mrb[65].mxu0  ;;  %v2402_v54 = vpop.f32.mrb[64].mxu1  ;;  %v3787_v55 = vmax.f32 %v2049_v52, 0.0 }
 0x35d   :  { %v3789_v22 = vmax.f32 %v2402_v54, 0.0  ;;  %v2053_v57 = vpop.f32.mrb[66].mxu0  ;;  %v2404_v58 = vpop.f32.mrb[65].mxu1  ;;  %v3788_v39 = vmax.f32 %v2051_v53, 0.0 }
 0x35e   :  { %v3803_v17 = vmax.f32 %v2053_v57, 0.0  ;;  %v3790_v61 = vmax.f32 %v2404_v58, 0.0  ;;  %v2055_v62 = vpop.f32.mrb[67].mxu0  ;;  %v2406_v63 = vpop.f32.mrb[66].mxu1 }
 0x35f   :  { %v3804_v1 = vmax.f32 %v2055_v62, 0.0  ;;  %v3805_v25 = vmax.f32 %v2406_v63, 0.0  ;;  %v2408_v0 = vpop.f32.mrb[67].mxu1 }
 0x360   :  { %v5179_v20 = vadd.f32 %v3803_v17, %v3787_v55  ;;  %v3806_v3 = vmax.f32 %v2408_v0, 0.0  ;;  %9710 = vmatmul.mubr.msk.bf16.gmra.mrb[172].mxu0 %vm297_vm1, %v11219_v4  ;;  %v10465_v0 = vld [vmem:[%s14000_s2 + $0x1a4] ss:$16 sps:$4 sm:$0xff]  }
 0x361   :  { %v5216_v59 = vadd.f32 %v3804_v1, %v3788_v39  ;;  %v5253_v6 = vadd.f32 %v3805_v25, %v3789_v22  ;;  %9743 = vmatmul.mubr.msk.bf16.gmra.mrb[172].mxu1 %vm297_vm1, %v11219_v4  ;;  %2713 = vmatprep.mubr.bf16.mxu0 %v11240_v2 }
 0x362   :  { %v5290_v36 = vadd.f32 %v3806_v3, %v3790_v61  ;;  %3066 = vmatprep.mubr.bf16.mxu1 %v11240_v2  ;;  %v10463_v61 = vld [vmem:[%s14000_s2 + $0x1a0] ss:$16 sps:$4 sm:$0xff]   ;;  %8773 = vmatprep.subr.bf16.mxu0 %v10465_v0 }
 0x363   :  { %v2059_v7 = vpop.f32.mrb[68].mxu0  ;;  %8774 = vmatpush1.bf16.msra.mxu0 %v10463_v61 }
 0x364   :  { %v3819_v8 = vmax.f32 %v2059_v7, 0.0  ;;  %v2412_v9 = vpop.f32.mrb[68].mxu1  ;;  %v2061_v10 = vpop.f32.mrb[69].mxu0 }
 0x365   :  { %v3821_v11 = vmax.f32 %v2412_v9, 0.0  ;;  %v3820_v28 = vmax.f32 %v2061_v10, 0.0  ;;  %v2414_v18 = vpop.f32.mrb[69].mxu1  ;;  %v2063_v12 = vpop.f32.mrb[70].mxu0  ;;  %v10471_v9 = vld [vmem:[%s14000_s2 + $0x1c4] ss:$16 sps:$4 sm:$0xff]  }
 0x366   :  { %v5180_v14 = vadd.f32 %v5179_v20, %v3819_v8  ;;  %v3822_v16 = vmax.f32 %v2414_v18, 0.0  ;;  %v2416_v37 = vpop.f32.mrb[70].mxu1  ;;  %v2065_v38 = vpop.f32.mrb[71].mxu0  ;;  %v3835_v35 = vmax.f32 %v2063_v12, 0.0  ;;  %v10469_v18 = vld [vmem:[%s14000_s2 + $0x1c0] ss:$16 sps:$4 sm:$0xff]   ;;  %8775 = vmatprep.subr.bf16.mxu0 %v10471_v9 }
 0x367   :  { %v5254_v30 = vadd.f32 %v5253_v6, %v3821_v11  ;;  %v5217_v31 = vadd.f32 %v5216_v59, %v3820_v28  ;;  %v2418_v21 = vpop.f32.mrb[71].mxu1  ;;  %v3837_v56 = vmax.f32 %v2416_v37, 0.0  ;;  %v3836_v24 = vmax.f32 %v2065_v38, 0.0  ;;  %v11221_v59 = vld [vmem:[%s13999_s0 + $0x68] sm:$0xff]   ;;  %8776 = vmatpush1.bf16.msra.mxu0 %v10469_v18 }
 0x368   :  { %v5291_v33 = vadd.f32 %v5290_v36, %v3822_v16  ;;  %9711 = vmatmul.mubr.msk.bf16.gmra.mrb[176].mxu0 %vm297_vm1, %v11220_v43  ;;  %v3838_v32 = vmax.f32 %v2418_v21, 0.0  ;;  %v5181_v23 = vadd.f32 %v5180_v14, %v3835_v35  ;;  %v10466_v6 = vld [vmem:[%s14000_s2 + $0x1a8] ss:$16 sps:$4 sm:$0xff]   ;;  %v10468_v36 = vld [vmem:[%s14000_s2 + $0x1ac] ss:$16 sps:$4 sm:$0xff]  }
 0x369   :  { %9744 = vmatmul.mubr.msk.bf16.gmra.mrb[176].mxu1 %vm297_vm1, %v11220_v43  ;;  %2723 = vmatprep.mubr.bf16.mxu0 %v11240_v2  ;;  %v5255_v41 = vadd.f32 %v5254_v30, %v3837_v56  ;;  %v5218_v44 = vadd.f32 %v5217_v31, %v3836_v24  ;;  %v10474_v11 = vld [vmem:[%s14000_s2 + $0x1cc] ss:$16 sps:$4 sm:$0xff]   ;;  %v10472_v37 = vld [vmem:[%s14000_s2 + $0x1c8] ss:$16 sps:$4 sm:$0xff]  }
 0x36a   :  { %3076 = vmatprep.mubr.bf16.mxu1 %v11240_v2  ;;  %v5292_v46 = vadd.f32 %v5291_v33, %v3838_v32  ;;  %9101 = vmatprep.subr.bf16.mxu1 %v10468_v36  ;;  %v10480_v18 = vld [vmem:[%s14000_s2 + $0x1ec] ss:$16 sps:$4 sm:$0xff]  }
 0x36b   :  { %v2069_v47 = vpop.f32.mrb[72].mxu0  ;;  %9102 = vmatpush1.bf16.msra.mxu1 %v10466_v6 }
 0x36c   :  { %v3851_v26 = vmax.f32 %v2069_v47, 0.0  ;;  %v2422_v45 = vpop.f32.mrb[72].mxu1  ;;  %v2071_v27 = vpop.f32.mrb[73].mxu0  ;;  %9103 = vmatprep.subr.bf16.mxu1 %v10474_v11 }
 0x36d   :  { %v3853_v19 = vmax.f32 %v2422_v45, 0.0  ;;  %v3852_v52 = vmax.f32 %v2071_v27, 0.0  ;;  %v2424_v53 = vpop.f32.mrb[73].mxu1  ;;  %v2073_v54 = vpop.f32.mrb[74].mxu0  ;;  %v11222_v27 = vld [vmem:[%s13999_s0 + $0x70] sm:$0xff]  }
 0x36e   :  { %v5182_v22 = vadd.f32 %v5181_v23, %v3851_v26  ;;  %v3854_v57 = vmax.f32 %v2424_v53, 0.0  ;;  %v3867_v58 = vmax.f32 %v2073_v54, 0.0  ;;  %v2426_v55 = vpop.f32.mrb[74].mxu1  ;;  %v2075_v17 = vpop.f32.mrb[75].mxu0  ;;  %v10475_v54 = vld [vmem:[%s14000_s2 + $0x1e0] ss:$16 sps:$4 sm:$0xff]  }
 0x36f   :  { %v5256_v62 = vadd.f32 %v5255_v41, %v3853_v19  ;;  %v5219_v63 = vadd.f32 %v5218_v44, %v3852_v52  ;;  %v3869_v39 = vmax.f32 %v2426_v55, 0.0  ;;  %v3868_v1 = vmax.f32 %v2075_v17, 0.0  ;;  %v2428_v25 = vpop.f32.mrb[75].mxu1  ;;  %9104 = vmatpush1.bf16.msra.mxu1 %v10472_v37 }
 0x370   :  { %v5293_v20 = vadd.f32 %v5292_v46, %v3854_v57  ;;  %v5183_v3 = vadd.f32 %v5182_v22, %v3867_v58  ;;  %v3870_v4 = vmax.f32 %v2428_v25, 0.0  ;;  %9712 = vmatmul.mubr.msk.bf16.gmra.mrb[180].mxu0 %vm297_vm1, %v11221_v59  ;;  %v10477_v22 = vld [vmem:[%s14000_s2 + $0x1e4] ss:$16 sps:$4 sm:$0xff]   ;;  %9105 = vmatprep.subr.bf16.mxu1 %v10480_v18 }
 0x371   :  { %v5257_v7 = vadd.f32 %v5256_v62, %v3869_v39  ;;  %v5220_v8 = vadd.f32 %v5219_v63, %v3868_v1  ;;  %9745 = vmatmul.mubr.msk.bf16.gmra.mrb[180].mxu1 %vm297_vm1, %v11221_v59  ;;  %2733 = vmatprep.mubr.bf16.mxu0 %v11240_v2 }
 0x372   :  { %v5294_v10 = vadd.f32 %v5293_v20, %v3870_v4  ;;  %3086 = vmatprep.mubr.bf16.mxu1 %v11240_v2  ;;  %8777 = vmatprep.subr.bf16.mxu0 %v10477_v22 }
 0x373   :  { %v2079_v28 = vpop.f32.mrb[76].mxu0  ;;  %8778 = vmatpush1.bf16.msra.mxu0 %v10475_v54 }
 0x374   :  { %v3883_v12 = vmax.f32 %v2079_v28, 0.0  ;;  %v2432_v14 = vpop.f32.mrb[76].mxu1  ;;  %v2081_v16 = vpop.f32.mrb[77].mxu0  ;;  %v11223_v28 = vld [vmem:[%s13999_s0 + $0x78] sm:$0xff]  }
 0x375   :  { %v3885_v38 = vmax.f32 %v2432_v14, 0.0  ;;  %v3884_v30 = vmax.f32 %v2081_v16, 0.0  ;;  %v2434_v31 = vpop.f32.mrb[77].mxu1  ;;  %v2083_v21 = vpop.f32.mrb[78].mxu0 }
 0x376   :  { %v5184_v33 = vadd.f32 %v5183_v3, %v3883_v12  ;;  %v3886_v35 = vmax.f32 %v2434_v31, 0.0  ;;  %v3899_v43 = vmax.f32 %v2083_v21, 0.0  ;;  %v2436_v56 = vpop.f32.mrb[78].mxu1  ;;  %v2085_v24 = vpop.f32.mrb[79].mxu0 }
 0x377   :  { %v5258_v32 = vadd.f32 %v5257_v7, %v3885_v38  ;;  %v5221_v23 = vadd.f32 %v5220_v8, %v3884_v30  ;;  %v3901_v41 = vmax.f32 %v2436_v56, 0.0  ;;  %v3900_v44 = vmax.f32 %v2085_v24, 0.0  ;;  %v2438_v46 = vpop.f32.mrb[79].mxu1  ;;  %v10478_v8 = vld [vmem:[%s14000_s2 + $0x1e8] ss:$16 sps:$4 sm:$0xff]  }
 0x378   :  { %v5295_v47 = vadd.f32 %v5294_v10, %v3886_v35  ;;  %v5185_v26 = vadd.f32 %v5184_v33, %v3899_v43  ;;  %v3902_v45 = vmax.f32 %v2438_v46, 0.0  ;;  %9713 = vmatmul.mubr.msk.bf16.gmra.mrb[184].mxu0 %vm297_vm1, %v11222_v27  ;;  %9106 = vmatpush1.bf16.msra.mxu1 %v10478_v8 }
 0x379   :  { %v5259_v19 = vadd.f32 %v5258_v32, %v3901_v41  ;;  %v5222_v52 = vadd.f32 %v5221_v23, %v3900_v44  ;;  %9746 = vmatmul.mubr.msk.bf16.gmra.mrb[184].mxu1 %vm297_vm1, %v11222_v27  ;;  %2743 = vmatprep.mubr.bf16.mxu0 %v11240_v2 }
 0x37a   :  { %v5296_v53 = vadd.f32 %v5295_v47, %v3902_v45  ;;  %3096 = vmatprep.mubr.bf16.mxu1 %v11240_v2 }
 0x37b   :  { %v2089_v57 = vpop.f32.mrb[80].mxu0 }
 0x37c   :  { %v3915_v58 = vmax.f32 %v2089_v57, 0.0  ;;  %v2442_v55 = vpop.f32.mrb[80].mxu1  ;;  %v2091_v17 = vpop.f32.mrb[81].mxu0 }
 0x37d   :  { %v3917_v61 = vmax.f32 %v2442_v55, 0.0  ;;  %v3916_v62 = vmax.f32 %v2091_v17, 0.0  ;;  %v2444_v63 = vpop.f32.mrb[81].mxu1  ;;  %v2093_v39 = vpop.f32.mrb[82].mxu0  ;;  %v10486_v17 = vld [vmem:[%s14000_s2 + $0x20c] ss:$16 sps:$4 sm:$0xff]  }
 0x37e   :  { %v5186_v1 = vadd.f32 %v5185_v26, %v3915_v58  ;;  %v3918_v25 = vmax.f32 %v2444_v63, 0.0  ;;  %v3931_v0 = vmax.f32 %v2093_v39, 0.0  ;;  %v2446_v20 = vpop.f32.mrb[82].mxu1  ;;  %v2095_v3 = vpop.f32.mrb[83].mxu0  ;;  %v10483_v58 = vld [vmem:[%s14000_s2 + $0x204] ss:$16 sps:$4 sm:$0xff]   ;;  %9116 = vmatprep.subr.bf16.mxu1 %v10486_v17 }
 0x37f   :  { %v5260_v4 = vadd.f32 %v5259_v19, %v3917_v61  ;;  %v5223_v59 = vadd.f32 %v5222_v52, %v3916_v62  ;;  %v3933_v6 = vmax.f32 %v2446_v20, 0.0  ;;  %v3932_v36 = vmax.f32 %v2095_v3, 0.0  ;;  %v2448_v7 = vpop.f32.mrb[83].mxu1  ;;  %8788 = vmatprep.subr.bf16.mxu0 %v10483_v58 }
 0x380   :  { %v5297_v9 = vadd.f32 %v5296_v53, %v3918_v25  ;;  %v5187_v10 = vadd.f32 %v5186_v1, %v3931_v0  ;;  %v3934_v11 = vmax.f32 %v2448_v7, 0.0  ;;  %9714 = vmatmul.mubr.msk.bf16.gmra.mrb[188].mxu0 %vm297_vm1, %v11223_v28  ;;  %v11224_v53 = vld [vmem:[%s13999_s0 + $0x80] sm:$0xff]  }
 0x381   :  { %v5261_v12 = vadd.f32 %v5260_v4, %v3933_v6  ;;  %v5224_v14 = vadd.f32 %v5223_v59, %v3932_v36  ;;  %9747 = vmatmul.mubr.msk.bf16.gmra.mrb[188].mxu1 %vm297_vm1, %v11223_v28  ;;  %2753 = vmatprep.mubr.bf16.mxu0 %v11240_v2 }
 0x382   :  { %v5298_v16 = vadd.f32 %v5297_v9, %v3934_v11  ;;  %3106 = vmatprep.mubr.bf16.mxu1 %v11240_v2 }
 0x383   :  { %v2099_v37 = vpop.f32.mrb[84].mxu0 }
 0x384   :  { %v3947_v38 = vmax.f32 %v2099_v37, 0.0  ;;  %v2452_v30 = vpop.f32.mrb[84].mxu1  ;;  %v2101_v31 = vpop.f32.mrb[85].mxu0 }
 0x385   :  { %v3949_v21 = vmax.f32 %v2452_v30, 0.0  ;;  %v3948_v33 = vmax.f32 %v2101_v31, 0.0  ;;  %v2454_v35 = vpop.f32.mrb[85].mxu1  ;;  %v2103_v43 = vpop.f32.mrb[86].mxu0 }
 0x386   :  { %v5188_v56 = vadd.f32 %v5187_v10, %v3947_v38  ;;  %v3950_v24 = vmax.f32 %v2454_v35, 0.0  ;;  %v3963_v32 = vmax.f32 %v2103_v43, 0.0  ;;  %v2456_v23 = vpop.f32.mrb[86].mxu1  ;;  %v2105_v41 = vpop.f32.mrb[87].mxu0 }
 0x387   :  { %v5262_v44 = vadd.f32 %v5261_v12, %v3949_v21  ;;  %v5225_v46 = vadd.f32 %v5224_v14, %v3948_v33  ;;  %v3965_v47 = vmax.f32 %v2456_v23, 0.0  ;;  %v3964_v26 = vmax.f32 %v2105_v41, 0.0  ;;  %v2458_v45 = vpop.f32.mrb[87].mxu1  ;;  %v11225_v12 = vld [vmem:[%s13999_s0 + $0x88] sm:$0xff]  }
 0x388   :  { %v5299_v27 = vadd.f32 %v5298_v16, %v3950_v24  ;;  %v5189_v19 = vadd.f32 %v5188_v56, %v3963_v32  ;;  %v3966_v52 = vmax.f32 %v2458_v45, 0.0  ;;  %9715 = vmatmul.mubr.msk.bf16.gmra.mrb[192].mxu0 %vm297_vm1, %v11224_v53 }
 0x389   :  { %v5263_v54 = vadd.f32 %v5262_v44, %v3965_v47  ;;  %v5226_v22 = vadd.f32 %v5225_v46, %v3964_v26  ;;  %9748 = vmatmul.mubr.msk.bf16.gmra.mrb[192].mxu1 %vm297_vm1, %v11224_v53  ;;  %2763 = vmatprep.mubr.bf16.mxu0 %v11240_v2 }
 0x38a   :  { %v5300_v57 = vadd.f32 %v5299_v27, %v3966_v52  ;;  %3116 = vmatprep.mubr.bf16.mxu1 %v11240_v2 }
 0x38b   :  { %v2109_v55 = vpop.f32.mrb[88].mxu0 }
 0x38c   :  { %v3979_v61 = vmax.f32 %v2109_v55, 0.0  ;;  %v2462_v62 = vpop.f32.mrb[88].mxu1  ;;  %v2111_v63 = vpop.f32.mrb[89].mxu0 }
 0x38d   :  { %v3981_v39 = vmax.f32 %v2462_v62, 0.0  ;;  %v3980_v1 = vmax.f32 %v2111_v63, 0.0  ;;  %v2464_v25 = vpop.f32.mrb[89].mxu1  ;;  %v2113_v0 = vpop.f32.mrb[90].mxu0 }
 0x38e   :  { %v5190_v20 = vadd.f32 %v5189_v19, %v3979_v61  ;;  %v3982_v3 = vmax.f32 %v2464_v25, 0.0  ;;  %v3995_v4 = vmax.f32 %v2113_v0, 0.0  ;;  %v2466_v59 = vpop.f32.mrb[90].mxu1  ;;  %v2115_v6 = vpop.f32.mrb[91].mxu0 }
 0x38f   :  { %v5264_v36 = vadd.f32 %v5263_v54, %v3981_v39  ;;  %v5227_v7 = vadd.f32 %v5226_v22, %v3980_v1  ;;  %v3997_v8 = vmax.f32 %v2466_v59, 0.0  ;;  %v3996_v9 = vmax.f32 %v2115_v6, 0.0  ;;  %v2468_v10 = vpop.f32.mrb[91].mxu1  ;;  %v11226_v54 = vld [vmem:[%s13999_s0 + $0x90] sm:$0xff]  }
 0x390   :  { %v5301_v11 = vadd.f32 %v5300_v57, %v3982_v3  ;;  %v5191_v28 = vadd.f32 %v5190_v20, %v3995_v4  ;;  %v3998_v18 = vmax.f32 %v2468_v10, 0.0  ;;  %9716 = vmatmul.mubr.msk.bf16.gmra.mrb[196].mxu0 %vm297_vm1, %v11225_v12 }
 0x391   :  { %v5265_v14 = vadd.f32 %v5264_v36, %v3997_v8  ;;  %v5228_v16 = vadd.f32 %v5227_v7, %v3996_v9  ;;  %9749 = vmatmul.mubr.msk.bf16.gmra.mrb[196].mxu1 %vm297_vm1, %v11225_v12  ;;  %2773 = vmatprep.mubr.bf16.mxu0 %v11240_v2 }
 0x392   :  { %v5302_v37 = vadd.f32 %v5301_v11, %v3998_v18  ;;  %3126 = vmatprep.mubr.bf16.mxu1 %v11240_v2  ;;  %v11227_v18 = vld [vmem:[%s13999_s0 + $0x98] sm:$0xff]  }
 0x393   :  { %v2119_v38 = vpop.f32.mrb[92].mxu0 }
 0x394   :  { %v4011_v30 = vmax.f32 %v2119_v38, 0.0  ;;  %v2472_v31 = vpop.f32.mrb[92].mxu1  ;;  %v2121_v21 = vpop.f32.mrb[93].mxu0 }
 0x395   :  { %v4013_v33 = vmax.f32 %v2472_v31, 0.0  ;;  %v4012_v35 = vmax.f32 %v2121_v21, 0.0  ;;  %v2474_v43 = vpop.f32.mrb[93].mxu1  ;;  %v2123_v56 = vpop.f32.mrb[94].mxu0 }
 0x396   :  { %v5192_v24 = vadd.f32 %v5191_v28, %v4011_v30  ;;  %v4014_v32 = vmax.f32 %v2474_v43, 0.0  ;;  %v4027_v23 = vmax.f32 %v2123_v56, 0.0  ;;  %v2476_v41 = vpop.f32.mrb[94].mxu1  ;;  %v2125_v44 = vpop.f32.mrb[95].mxu0 }
 0x397   :  { %v5266_v46 = vadd.f32 %v5265_v14, %v4013_v33  ;;  %v5229_v47 = vadd.f32 %v5228_v16, %v4012_v35  ;;  %v4029_v26 = vmax.f32 %v2476_v41, 0.0  ;;  %v4028_v45 = vmax.f32 %v2125_v44, 0.0  ;;  %v2478_v27 = vpop.f32.mrb[95].mxu1 }
 0x398   :  { %v5303_v19 = vadd.f32 %v5302_v37, %v4014_v32  ;;  %v5193_v52 = vadd.f32 %v5192_v24, %v4027_v23  ;;  %v4030_v53 = vmax.f32 %v2478_v27, 0.0  ;;  %9717 = vmatmul.mubr.msk.bf16.gmra.mrb[200].mxu0 %vm297_vm1, %v11226_v54 }
 0x399   :  { %v5267_v22 = vadd.f32 %v5266_v46, %v4029_v26  ;;  %v5230_v57 = vadd.f32 %v5229_v47, %v4028_v45  ;;  %9750 = vmatmul.mubr.msk.bf16.gmra.mrb[200].mxu1 %vm297_vm1, %v11226_v54  ;;  %2783 = vmatprep.mubr.bf16.mxu0 %v11240_v2 }
 0x39a   :  { %v5304_v58 = vadd.f32 %v5303_v19, %v4030_v53  ;;  %3136 = vmatprep.mubr.bf16.mxu1 %v11240_v2  ;;  %v11228_v53 = vld [vmem:[%s13999_s0 + $0xa0] sm:$0xff]  }
 0x39b   :  { %v2129_v55 = vpop.f32.mrb[96].mxu0 }
 0x39c   :  { %v4043_v17 = vmax.f32 %v2129_v55, 0.0  ;;  %v2482_v61 = vpop.f32.mrb[96].mxu1  ;;  %v2131_v62 = vpop.f32.mrb[97].mxu0 }
 0x39d   :  { %v4045_v63 = vmax.f32 %v2482_v61, 0.0  ;;  %v4044_v39 = vmax.f32 %v2131_v62, 0.0  ;;  %v2484_v1 = vpop.f32.mrb[97].mxu1  ;;  %v2133_v25 = vpop.f32.mrb[98].mxu0 }
 0x39e   :  { %v5194_v0 = vadd.f32 %v5193_v52, %v4043_v17  ;;  %v4046_v20 = vmax.f32 %v2484_v1, 0.0  ;;  %v4059_v3 = vmax.f32 %v2133_v25, 0.0  ;;  %v2486_v4 = vpop.f32.mrb[98].mxu1  ;;  %v2135_v59 = vpop.f32.mrb[99].mxu0 }
 0x39f   :  { %v5268_v6 = vadd.f32 %v5267_v22, %v4045_v63  ;;  %v5231_v36 = vadd.f32 %v5230_v57, %v4044_v39  ;;  %v4061_v7 = vmax.f32 %v2486_v4, 0.0  ;;  %v4060_v8 = vmax.f32 %v2135_v59, 0.0  ;;  %v2488_v9 = vpop.f32.mrb[99].mxu1 }
 0x3a0   :  { %v5305_v10 = vadd.f32 %v5304_v58, %v4046_v20  ;;  %v5195_v11 = vadd.f32 %v5194_v0, %v4059_v3  ;;  %v4062_v28 = vmax.f32 %v2488_v9, 0.0  ;;  %9718 = vmatmul.mubr.msk.bf16.gmra.mrb[204].mxu0 %vm297_vm1, %v11227_v18 }
 0x3a1   :  { %v5269_v12 = vadd.f32 %v5268_v6, %v4061_v7  ;;  %v5232_v14 = vadd.f32 %v5231_v36, %v4060_v8  ;;  %9751 = vmatmul.mubr.msk.bf16.gmra.mrb[204].mxu1 %vm297_vm1, %v11227_v18  ;;  %2793 = vmatprep.mubr.bf16.mxu0 %v11240_v2 }
 0x3a2   :  { %v5306_v16 = vadd.f32 %v5305_v10, %v4062_v28  ;;  %3146 = vmatprep.mubr.bf16.mxu1 %v11240_v2  ;;  %v11229_v28 = vld [vmem:[%s13999_s0 + $0xa8] sm:$0xff]  }
 0x3a3   :  { %v2139_v37 = vpop.f32.mrb[100].mxu0 }
 0x3a4   :  { %v4075_v38 = vmax.f32 %v2139_v37, 0.0  ;;  %v2492_v30 = vpop.f32.mrb[100].mxu1  ;;  %v2141_v31 = vpop.f32.mrb[101].mxu0 }
 0x3a5   :  { %v4077_v21 = vmax.f32 %v2492_v30, 0.0  ;;  %v4076_v33 = vmax.f32 %v2141_v31, 0.0  ;;  %v2494_v35 = vpop.f32.mrb[101].mxu1  ;;  %v2143_v43 = vpop.f32.mrb[102].mxu0 }
 0x3a6   :  { %v5196_v56 = vadd.f32 %v5195_v11, %v4075_v38  ;;  %v4078_v24 = vmax.f32 %v2494_v35, 0.0  ;;  %v4091_v32 = vmax.f32 %v2143_v43, 0.0  ;;  %v2496_v23 = vpop.f32.mrb[102].mxu1  ;;  %v2145_v41 = vpop.f32.mrb[103].mxu0 }
 0x3a7   :  { %v5270_v44 = vadd.f32 %v5269_v12, %v4077_v21  ;;  %v5233_v46 = vadd.f32 %v5232_v14, %v4076_v33  ;;  %v4093_v47 = vmax.f32 %v2496_v23, 0.0  ;;  %v4092_v26 = vmax.f32 %v2145_v41, 0.0  ;;  %v2498_v45 = vpop.f32.mrb[103].mxu1 }
 0x3a8   :  { %v5307_v27 = vadd.f32 %v5306_v16, %v4078_v24  ;;  %v5197_v19 = vadd.f32 %v5196_v56, %v4091_v32  ;;  %v4094_v52 = vmax.f32 %v2498_v45, 0.0  ;;  %9719 = vmatmul.mubr.msk.bf16.gmra.mrb[208].mxu0 %vm297_vm1, %v11228_v53 }
 0x3a9   :  { %v5271_v54 = vadd.f32 %v5270_v44, %v4093_v47  ;;  %v5234_v22 = vadd.f32 %v5233_v46, %v4092_v26  ;;  %9752 = vmatmul.mubr.msk.bf16.gmra.mrb[208].mxu1 %vm297_vm1, %v11228_v53  ;;  %2803 = vmatprep.mubr.bf16.mxu0 %v11240_v2 }
 0x3aa   :  { %v5308_v57 = vadd.f32 %v5307_v27, %v4094_v52  ;;  %3156 = vmatprep.mubr.bf16.mxu1 %v11240_v2  ;;  %v11230_v52 = vld [vmem:[%s13999_s0 + $0xb0] sm:$0xff]  }
 0x3ab   :  { %v2149_v58 = vpop.f32.mrb[104].mxu0 }
 0x3ac   :  { %v4107_v55 = vmax.f32 %v2149_v58, 0.0  ;;  %v2502_v17 = vpop.f32.mrb[104].mxu1  ;;  %v2151_v61 = vpop.f32.mrb[105].mxu0 }
 0x3ad   :  { %v4109_v62 = vmax.f32 %v2502_v17, 0.0  ;;  %v4108_v63 = vmax.f32 %v2151_v61, 0.0  ;;  %v2504_v39 = vpop.f32.mrb[105].mxu1  ;;  %v2153_v1 = vpop.f32.mrb[106].mxu0  ;;  %v4618_v61 = vrot.slane %v12350_v40, 4 }
 0x3ae   :  { %v5198_v25 = vadd.f32 %v5197_v19, %v4107_v55  ;;  %v4110_v0 = vmax.f32 %v2504_v39, 0.0  ;;  %v4123_v20 = vmax.f32 %v2153_v1, 0.0  ;;  %v2506_v3 = vpop.f32.mrb[106].mxu1  ;;  %v2155_v4 = vpop.f32.mrb[107].mxu0 }
 0x3af   :  { %v5272_v59 = vadd.f32 %v5271_v54, %v4109_v62  ;;  %v5235_v6 = vadd.f32 %v5234_v22, %v4108_v63  ;;  %v4125_v36 = vmax.f32 %v2506_v3, 0.0  ;;  %v4124_v7 = vmax.f32 %v2155_v4, 0.0  ;;  %v2508_v8 = vpop.f32.mrb[107].mxu1 }
 0x3b0   :  { %v5309_v9 = vadd.f32 %v5308_v57, %v4110_v0  ;;  %v5199_v10 = vadd.f32 %v5198_v25, %v4123_v20  ;;  %v4126_v11 = vmax.f32 %v2508_v8, 0.0  ;;  %9720 = vmatmul.mubr.msk.bf16.gmra.mrb[212].mxu0 %vm297_vm1, %v11229_v28 }
 0x3b1   :  { %v5273_v18 = vadd.f32 %v5272_v59, %v4125_v36  ;;  %v5236_v12 = vadd.f32 %v5235_v6, %v4124_v7  ;;  %9753 = vmatmul.mubr.msk.bf16.gmra.mrb[212].mxu1 %vm297_vm1, %v11229_v28  ;;  %2813 = vmatprep.mubr.bf16.mxu0 %v11240_v2 }
 0x3b2   :  { %v5310_v14 = vadd.f32 %v5309_v9, %v4126_v11  ;;  %3166 = vmatprep.mubr.bf16.mxu1 %v11240_v2  ;;  %v4692_v9 = vrot.slane %v12356_v48, 4 }
 0x3b3   :  { %v2159_v16 = vpop.f32.mrb[108].mxu0 }
 0x3b4   :  { %v4139_v37 = vmax.f32 %v2159_v16, 0.0  ;;  %v2512_v38 = vpop.f32.mrb[108].mxu1  ;;  %v2161_v30 = vpop.f32.mrb[109].mxu0 }
 0x3b5   :  { %v4141_v31 = vmax.f32 %v2512_v38, 0.0  ;;  %v4140_v21 = vmax.f32 %v2161_v30, 0.0  ;;  %v2514_v33 = vpop.f32.mrb[109].mxu1  ;;  %v2163_v35 = vpop.f32.mrb[110].mxu0  ;;  %v4729_v38 = vrot.slane %v12362_v51, 4 }
 0x3b6   :  { %v5200_v43 = vadd.f32 %v5199_v10, %v4139_v37  ;;  %v4142_v56 = vmax.f32 %v2514_v33, 0.0  ;;  %v4155_v24 = vmax.f32 %v2163_v35, 0.0  ;;  %v2516_v32 = vpop.f32.mrb[110].mxu1  ;;  %v2165_v23 = vpop.f32.mrb[111].mxu0 }
 0x3b7   :  { %v5274_v41 = vadd.f32 %v5273_v18, %v4141_v31  ;;  %v5237_v44 = vadd.f32 %v5236_v12, %v4140_v21  ;;  %v4157_v46 = vmax.f32 %v2516_v32, 0.0  ;;  %v4156_v47 = vmax.f32 %v2165_v23, 0.0  ;;  %v2518_v26 = vpop.f32.mrb[111].mxu1  ;;  %v11231_v18 = vld [vmem:[%s13999_s0 + $0xb8] sm:$0xff]  }
 0x3b8   :  { %v5311_v45 = vadd.f32 %v5310_v14, %v4142_v56  ;;  %v5201_v27 = vadd.f32 %v5200_v43, %v4155_v24  ;;  %v4158_v19 = vmax.f32 %v2518_v26, 0.0  ;;  %9721 = vmatmul.mubr.msk.bf16.gmra.mrb[216].mxu0 %vm297_vm1, %v11230_v52  ;;  %v4619_v12 = vadd.f32 %v4618_v61, %v12350_v40 }
 0x3b9   :  { %v5275_v53 = vadd.f32 %v5274_v41, %v4157_v46  ;;  %v5238_v54 = vadd.f32 %v5237_v44, %v4156_v47  ;;  %9754 = vmatmul.mubr.msk.bf16.gmra.mrb[216].mxu1 %vm297_vm1, %v11230_v52  ;;  %2823 = vmatprep.mubr.bf16.mxu0 %v11240_v2  ;;  %v4655_v14 = vrot.slane %v12358_v49, 4  ;;  %v4693_v21 = vadd.f32 %v4692_v9, %v12356_v48 }
 0x3ba   :  { %v5312_v22 = vadd.f32 %v5311_v45, %v4158_v19  ;;  %3176 = vmatprep.mubr.bf16.mxu1 %v11240_v2  ;;  %v4620_v40 = vrot.slane %v4619_v12, 2  ;;  %v4730_v44 = vadd.f32 %v4729_v38, %v12362_v51 }
 0x3bb   :  { %v2169_v57 = vpop.f32.mrb[112].mxu0  ;;  %v4656_v56 = vadd.f32 %v4655_v14, %v12358_v49 }
 0x3bc   :  { %v4171_v58 = vmax.f32 %v2169_v57, 0.0  ;;  %v2522_v55 = vpop.f32.mrb[112].mxu1  ;;  %v2171_v17 = vpop.f32.mrb[113].mxu0  ;;  %v4621_v51 = vadd.f32 %v4620_v40, %v4619_v12 }
 0x3bd   :  { %v4173_v62 = vmax.f32 %v2522_v55, 0.0  ;;  %v4172_v63 = vmax.f32 %v2171_v17, 0.0  ;;  %v2524_v39 = vpop.f32.mrb[113].mxu1  ;;  %v2173_v1 = vpop.f32.mrb[114].mxu0  ;;  %v11232_v55 = vld [vmem:[%s13999_s0 + $0xc0] sm:$0xff]   ;;  %v4657_v17 = vrot.slane %v4656_v56, 2 }
 0x3be   :  { %v5202_v25 = vadd.f32 %v5201_v27, %v4171_v58  ;;  %v4174_v0 = vmax.f32 %v2524_v39, 0.0  ;;  %v4187_v20 = vmax.f32 %v2173_v1, 0.0  ;;  %v2526_v3 = vpop.f32.mrb[114].mxu1  ;;  %v2175_v4 = vpop.f32.mrb[115].mxu0 }
 0x3bf   :  { %v5276_v59 = vadd.f32 %v5275_v53, %v4173_v62  ;;  %v5239_v6 = vadd.f32 %v5238_v54, %v4172_v63  ;;  %v4189_v36 = vmax.f32 %v2526_v3, 0.0  ;;  %v4188_v7 = vmax.f32 %v2175_v4, 0.0  ;;  %v2528_v8 = vpop.f32.mrb[115].mxu1 }
 0x3c0   :  { %v5313_v10 = vadd.f32 %v5312_v22, %v4174_v0  ;;  %v5203_v11 = vadd.f32 %v5202_v25, %v4187_v20  ;;  %v4190_v28 = vmax.f32 %v2528_v8, 0.0  ;;  %9722 = vmatmul.mubr.msk.bf16.gmra.mrb[220].mxu0 %vm297_vm1, %v11231_v18  ;;  %v4694_v22 = vrot.slane %v4693_v21, 2 }
 0x3c1   :  { %v5277_v16 = vadd.f32 %v5276_v59, %v4189_v36  ;;  %v5240_v37 = vadd.f32 %v5239_v6, %v4188_v7  ;;  %9755 = vmatmul.mubr.msk.bf16.gmra.mrb[220].mxu1 %vm297_vm1, %v11231_v18  ;;  %2833 = vmatprep.mubr.bf16.mxu0 %v11240_v2  ;;  %v4731_v63 = vrot.slane %v4730_v44, 2  ;;  %v4622_v4 = vrot.slane %v4621_v51, 1 }
 0x3c2   :  { %v5314_v30 = vadd.f32 %v5313_v10, %v4190_v28  ;;  %3186 = vmatprep.mubr.bf16.mxu1 %v11240_v2  ;;  %v4695_v25 = vadd.f32 %v4694_v22, %v4693_v21  ;;  %v4658_v59 = vadd.f32 %v4657_v17, %v4656_v56 }
 0x3c3   :  { %v2179_v31 = vpop.f32.mrb[116].mxu0  ;;  %v4732_v9 = vadd.f32 %v4731_v63, %v4730_v44  ;;  %v4623_v40 = vadd.f32 %v4622_v4, %v4621_v51 }
 0x3c4   :  { %v4203_v33 = vmax.f32 %v2179_v31, 0.0  ;;  %v2532_v35 = vpop.f32.mrb[116].mxu1  ;;  %v2181_v43 = vpop.f32.mrb[117].mxu0  ;;  %v4696_v31 = vrot.slane %v4695_v25, 1  ;;  %v4659_v56 = vrot.slane %v4658_v59, 1 }
 0x3c5   :  { %v4205_v24 = vmax.f32 %v2532_v35, 0.0  ;;  %v4204_v32 = vmax.f32 %v2181_v43, 0.0  ;;  %v2534_v23 = vpop.f32.mrb[117].mxu1  ;;  %v2183_v41 = vpop.f32.mrb[118].mxu0  ;;  %v11233_v43 = vld [vmem:[%s13999_s0 + $0xc8] sm:$0xff]  }
 0x3c6   :  { %v5204_v46 = vadd.f32 %v5203_v11, %v4203_v33  ;;  %v4206_v47 = vmax.f32 %v2534_v23, 0.0  ;;  %v4219_v26 = vmax.f32 %v2183_v41, 0.0  ;;  %v2536_v45 = vpop.f32.mrb[118].mxu1  ;;  %v2185_v27 = vpop.f32.mrb[119].mxu0  ;;  %v4733_v23 = vrot.slane %v4732_v9, 1 }
 0x3c7   :  { %v5278_v19 = vadd.f32 %v5277_v16, %v4205_v24  ;;  %v5241_v52 = vadd.f32 %v5240_v37, %v4204_v32  ;;  %v4221_v48 = vmax.f32 %v2536_v45, 0.0  ;;  %v4220_v53 = vmax.f32 %v2185_v27, 0.0  ;;  %v2538_v54 = vpop.f32.mrb[119].mxu1 }
 0x3c8   :  { %v5315_v57 = vadd.f32 %v5314_v30, %v4206_v47  ;;  %v5205_v58 = vadd.f32 %v5204_v46, %v4219_v26  ;;  %v4222_v49 = vmax.f32 %v2538_v54, 0.0  ;;  %9723 = vmatmul.mubr.msk.bf16.gmra.mrb[224].mxu0 %vm297_vm1, %v11232_v55  ;;  %v4697_v46 = vadd.f32 %v4696_v31, %v4695_v25 }
 0x3c9   :  { %v5279_v61 = vadd.f32 %v5278_v19, %v4221_v48  ;;  %v5242_v62 = vadd.f32 %v5241_v52, %v4220_v53  ;;  %9756 = vmatmul.mubr.msk.bf16.gmra.mrb[224].mxu1 %vm297_vm1, %v11232_v55  ;;  %2843 = vmatprep.mubr.bf16.mxu0 %v11240_v2  ;;  %v12520_v27 = vmul.f32 0.00390625, %v4623_v40  ;;  %v4660_v19 = vadd.f32 %v4659_v56, %v4658_v59 }
 0x3ca   :  { %v5316_v39 = vadd.f32 %v5315_v57, %v4222_v49  ;;  %3196 = vmatprep.mubr.bf16.mxu1 %v11240_v2  ;;  %v4734_v22 = vadd.f32 %v4733_v23, %v4732_v9 }
 0x3cb   :  { %v2189_v1 = vpop.f32.mrb[120].mxu0 }
 0x3cc   :  { %v4235_v0 = vmax.f32 %v2189_v1, 0.0  ;;  %v2542_v20 = vpop.f32.mrb[120].mxu1  ;;  %v2191_v3 = vpop.f32.mrb[121].mxu0  ;;  %v12522_v1 = vmul.f32 0.00390625, %v4697_v46  ;;  %v12535_v9 = vmul.f32 0.00390625, %v4734_v22 }
 0x3cd   :  { %v4237_v6 = vmax.f32 %v2542_v20, 0.0  ;;  %v4236_v36 = vmax.f32 %v2191_v3, 0.0  ;;  %v2544_v7 = vpop.f32.mrb[121].mxu1  ;;  %v2193_v8 = vpop.f32.mrb[122].mxu0  ;;  %v11234_v3 = vld [vmem:[%s13999_s0 + $0xd0] sm:$0xff]  }
 0x3ce   :  { %v5206_v10 = vadd.f32 %v5205_v58, %v4235_v0  ;;  %v4238_v11 = vmax.f32 %v2544_v7, 0.0  ;;  %v4251_v28 = vmax.f32 %v2193_v8, 0.0  ;;  %v2546_v18 = vpop.f32.mrb[122].mxu1  ;;  %v2195_v12 = vpop.f32.mrb[123].mxu0  ;;  %v5516_v8 = vpack.c.bf16 %v12520_v27, %v12520_v27 }
 0x3cf   :  { %v5280_v14 = vadd.f32 %v5279_v61, %v4237_v6  ;;  %v5243_v16 = vadd.f32 %v5242_v62, %v4236_v36  ;;  %v4253_v37 = vmax.f32 %v2546_v18, 0.0  ;;  %v4252_v38 = vmax.f32 %v2195_v12, 0.0  ;;  %v2548_v30 = vpop.f32.mrb[123].mxu1 }
 0x3d0   :  { %v5317_v21 = vadd.f32 %v5316_v39, %v4238_v11  ;;  %v5207_v33 = vadd.f32 %v5206_v10, %v4251_v28  ;;  %v4254_v35 = vmax.f32 %v2548_v30, 0.0  ;;  %9724 = vmatmul.mubr.msk.bf16.gmra.mrb[228].mxu0 %vm297_vm1, %v11233_v43  ;;  %v12530_v6 = vmul.f32 0.00390625, %v4660_v19 }
 0x3d1   :  { %v5281_v24 = vadd.f32 %v5280_v14, %v4253_v37  ;;  %v5244_v32 = vadd.f32 %v5243_v16, %v4252_v38  ;;  %9757 = vmatmul.mubr.msk.bf16.gmra.mrb[228].mxu1 %vm297_vm1, %v11233_v43  ;;  %2853 = vmatprep.mubr.bf16.mxu0 %v11240_v2  ;;  %v5518_v18 = vpack.c.bf16 %v12522_v1, %v12522_v1 }
 0x3d2   :  { %v5318_v41 = vadd.f32 %v5317_v21, %v4254_v35  ;;  %3206 = vmatprep.mubr.bf16.mxu1 %v11240_v2  ;;  %v5519_v1 = vpack.c.bf16 %v12535_v9, %v12535_v9 }
 0x3d3   :  { %v2199_v44 = vpop.f32.mrb[124].mxu0 }
 0x3d4   :  { %v4267_v47 = vmax.f32 %v2199_v44, 0.0  ;;  %v2552_v26 = vpop.f32.mrb[124].mxu1  ;;  %v2201_v45 = vpop.f32.mrb[125].mxu0 }
 0x3d5   :  { %v4269_v52 = vmax.f32 %v2552_v26, 0.0  ;;  %v4268_v48 = vmax.f32 %v2201_v45, 0.0  ;;  %v2554_v53 = vpop.f32.mrb[125].mxu1  ;;  %v2203_v54 = vpop.f32.mrb[126].mxu0 }
 0x3d6   :  { %v5208_v57 = vadd.f32 %v5207_v33, %v4267_v47  ;;  %v4270_v58 = vmax.f32 %v2554_v53, 0.0  ;;  %v4283_v49 = vmax.f32 %v2203_v54, 0.0  ;;  %v2556_v55 = vpop.f32.mrb[126].mxu1  ;;  %v2205_v51 = vpop.f32.mrb[127].mxu0  ;;  %v11235_v53 = vld [vmem:[%s13999_s0 + $0xd8] sm:$0xff]  }
 0x3d7   :  { %v5282_v17 = vadd.f32 %v5281_v24, %v4269_v52  ;;  %v5245_v61 = vadd.f32 %v5244_v32, %v4268_v48  ;;  %v4285_v62 = vmax.f32 %v2556_v55, 0.0  ;;  %v4284_v63 = vmax.f32 %v2205_v51, 0.0  ;;  %v2558_v39 = vpop.f32.mrb[127].mxu1 }
 0x3d8   :  { %v5319_v25 = vadd.f32 %v5318_v41, %v4270_v58  ;;  %v5209_v0 = vadd.f32 %v5208_v57, %v4283_v49  ;;  %v4286_v20 = vmax.f32 %v2558_v39, 0.0  ;;  %9725 = vmatmul.mubr.msk.bf16.gmra.mrb[232].mxu0 %vm297_vm1, %v11234_v3  ;;  %v6114_v49 = vunpack.c.l.b16 %v5516_v8 }
 0x3d9   :  { %v5283_v4 = vadd.f32 %v5282_v17, %v4285_v62  ;;  %v5246_v59 = vadd.f32 %v5245_v61, %v4284_v63  ;;  %9758 = vmatmul.mubr.msk.bf16.gmra.mrb[232].mxu1 %vm297_vm1, %v11234_v3  ;;  %2863 = vmatprep.mubr.bf16.mxu0 %v11240_v2  ;;  %v5517_v39 = vpack.c.bf16 %v12530_v6, %v12530_v6 }
 0x3da   :  { %v5210_v36 = vrot.slane %v5209_v0, 4  ;;  %v5320_v7 = vadd.f32 %v5319_v25, %v4286_v20  ;;  %3216 = vmatprep.mubr.bf16.mxu1 %v11240_v2  ;;  %v6116_v25 = vunpack.c.l.b16 %v5518_v18 }
 0x3db   :  { %v5284_v10 = vrot.slane %v5283_v4, 4  ;;  %v5247_v11 = vrot.slane %v5246_v59, 4  ;;  %v2595_v28 = vpop.f32.mrb[128].mxu0 }
 0x3dc   :  { %v5211_v12 = vadd.f32 %v5210_v36, %v5209_v0  ;;  %v5321_v14 = vrot.slane %v5320_v7, 4  ;;  %v3279_v16 = vmax.f32 %v2595_v28, 0.0  ;;  %v2597_v37 = vpop.f32.mrb[129].mxu0  ;;  %v2948_v38 = vpop.f32.mrb[128].mxu1 }
 0x3dd   :  { %v5285_v30 = vadd.f32 %v5284_v10, %v5283_v4  ;;  %v5248_v31 = vadd.f32 %v5247_v11, %v5246_v59  ;;  %v3280_v21 = vmax.f32 %v2597_v37, 0.0  ;;  %v3281_v33 = vmax.f32 %v2948_v38, 0.0  ;;  %v2599_v35 = vpop.f32.mrb[130].mxu0  ;;  %v2950_v43 = vpop.f32.mrb[129].mxu1 }
 0x3de   :  { %v5212_v40 = vrot.slane %v5211_v12, 2  ;;  %v5322_v56 = vadd.f32 %v5321_v14, %v5320_v7  ;;  %v3295_v24 = vmax.f32 %v2599_v35, 0.0  ;;  %v3282_v32 = vmax.f32 %v2950_v43, 0.0  ;;  %v2601_v23 = vpop.f32.mrb[131].mxu0  ;;  %v2952_v41 = vpop.f32.mrb[130].mxu1 }
 0x3df   :  { %v5286_v44 = vrot.slane %v5285_v30, 2  ;;  %v5249_v46 = vrot.slane %v5248_v31, 2  ;;  %v3296_v47 = vmax.f32 %v2601_v23, 0.0  ;;  %v3297_v26 = vmax.f32 %v2952_v41, 0.0  ;;  %v2954_v45 = vpop.f32.mrb[131].mxu1 }
 0x3e0   :  { %v5213_v27 = vadd.f32 %v5212_v40, %v5211_v12  ;;  %v5323_v19 = vrot.slane %v5322_v56, 2  ;;  %v4735_v52 = vadd.f32 %v3295_v24, %v3279_v16  ;;  %v3298_v48 = vmax.f32 %v2954_v45, 0.0  ;;  %9726 = vmatmul.mubr.msk.bf16.gmra.mrb[236].mxu0 %vm297_vm1, %v11235_v53 }
 0x3e1   :  { %v5287_v54 = vadd.f32 %v5286_v44, %v5285_v30  ;;  %v5250_v22 = vadd.f32 %v5249_v46, %v5248_v31  ;;  %v4772_v57 = vadd.f32 %v3296_v47, %v3280_v21  ;;  %v4809_v58 = vadd.f32 %v3297_v26, %v3281_v33  ;;  %9759 = vmatmul.mubr.msk.bf16.gmra.mrb[236].mxu1 %vm297_vm1, %v11235_v53 }
 0x3e2   :  { %v5214_v55 = vrot.slane %v5213_v27, 1  ;;  %v5324_v51 = vadd.f32 %v5323_v19, %v5322_v56  ;;  %v4846_v17 = vadd.f32 %v3298_v48, %v3282_v32  ;;  %2873 = vmatprep.mubr.bf16.mxu0 %v11240_v2  ;;  %3226 = vmatprep.mubr.bf16.mxu1 %v11240_v2  ;;  %v11236_v56 = vld [vmem:[%s13999_s0 + $0xe0] sm:$0xff]  }
 0x3e3   :  { %v5288_v61 = vrot.slane %v5287_v54, 1  ;;  %v5251_v62 = vrot.slane %v5250_v22, 1  ;;  %v2605_v63 = vpop.f32.mrb[132].mxu0 }
 0x3e4   :  { %v5215_v0 = vadd.f32 %v5214_v55, %v5213_v27  ;;  %v5325_v20 = vrot.slane %v5324_v51, 1  ;;  %v3311_v3 = vmax.f32 %v2605_v63, 0.0  ;;  %v2958_v4 = vpop.f32.mrb[132].mxu1  ;;  %v2607_v59 = vpop.f32.mrb[133].mxu0 }
 0x3e5   :  { %v5289_v36 = vadd.f32 %v5288_v61, %v5287_v54  ;;  %v5252_v7 = vadd.f32 %v5251_v62, %v5250_v22  ;;  %v3313_v8 = vmax.f32 %v2958_v4, 0.0  ;;  %v3312_v10 = vmax.f32 %v2607_v59, 0.0  ;;  %v2960_v11 = vpop.f32.mrb[133].mxu1  ;;  %v2609_v28 = vpop.f32.mrb[134].mxu0 }
 0x3e6   :  { %v5500_v12 = vmul.f32 0.00390625, %v5215_v0  ;;  %v5326_v14 = vadd.f32 %v5325_v20, %v5324_v51  ;;  %v4736_v16 = vadd.f32 %v4735_v52, %v3311_v3  ;;  %v3314_v37 = vmax.f32 %v2960_v11, 0.0  ;;  %v2962_v6 = vpop.f32.mrb[134].mxu1  ;;  %v2611_v38 = vpop.f32.mrb[135].mxu0 }
 0x3e7   :  { %v5502_v30 = vmul.f32 0.00390625, %v5289_v36  ;;  %v5501_v9 = vmul.f32 0.00390625, %v5252_v7  ;;  %v4810_v18 = vadd.f32 %v4809_v58, %v3313_v8  ;;  %v4773_v31 = vadd.f32 %v4772_v57, %v3312_v10  ;;  %v2964_v21 = vpop.f32.mrb[135].mxu1 }
 0x3e8   :  { %v5532_v33 = vpack.c.bf16 %v5500_v12, %v5500_v12  ;;  %v5503_v35 = vmul.f32 0.00390625, %v5326_v14  ;;  %v4847_v43 = vadd.f32 %v4846_v17, %v3314_v37  ;;  %v3327_v40 = vmax.f32 %v2609_v28, 0.0  ;;  %9727 = vmatmul.mubr.msk.bf16.gmra.mrb[240].mxu0 %vm297_vm1, %v11236_v56  ;;  %v11237_v14 = vld [vmem:[%s13999_s0 + $0xe8] sm:$0xff]  }
 0x3e9   :  { %v5534_v24 = vpack.c.bf16 %v5502_v30, %v5502_v30  ;;  %v3329_v32 = vmax.f32 %v2962_v6, 0.0  ;;  %v3328_v23 = vmax.f32 %v2611_v38, 0.0  ;;  %v3330_v41 = vmax.f32 %v2964_v21, 0.0  ;;  %9760 = vmatmul.mubr.msk.bf16.gmra.mrb[240].mxu1 %vm297_vm1, %v11236_v56  ;;  %2883 = vmatprep.mubr.bf16.mxu0 %v11240_v2 }
 0x3ea   :  { %v6130_v44 = vunpack.c.l.b16 %v5532_v33  ;;  %v4737_v46 = vadd.f32 %v4736_v16, %v3327_v40  ;;  %3236 = vmatprep.mubr.bf16.mxu1 %v11240_v2  ;;  %v5533_v47 = vpack.c.bf16 %v5501_v9, %v5501_v9  ;;  %v5535_v26 = vpack.c.bf16 %v5503_v35, %v5503_v35 }
 0x3eb   :  { %v6132_v45 = vunpack.c.l.b16 %v5534_v24  ;;  %v4811_v27 = vadd.f32 %v4810_v18, %v3329_v32  ;;  %v4774_v19 = vadd.f32 %v4773_v31, %v3328_v23  ;;  %v4848_v52 = vadd.f32 %v4847_v43, %v3330_v41  ;;  %v2615_v48 = vpop.f32.mrb[136].mxu0 }
 0x3ec   :  { %v12558_v53 = vsel %vm6138_vm2, %v6130_v44, %v6114_v49  ;;  %v3343_v54 = vmax.f32 %v2615_v48, 0.0  ;;  %v2968_v22 = vpop.f32.mrb[136].mxu1  ;;  %v2617_v57 = vpop.f32.mrb[137].mxu0  ;;  %v6115_v58 = vunpack.c.l.b16 %v5517_v39  ;;  %v6131_v55 = vunpack.c.l.b16 %v5533_v47 }
 0x3ed   :  { %v12561_v51 = vsel %vm6138_vm2, %v6132_v45, %v6116_v25  ;;  %v3345_v17 = vmax.f32 %v2968_v22, 0.0  ;;  %v3344_v61 = vmax.f32 %v2617_v57, 0.0  ;;  %v2970_v62 = vpop.f32.mrb[137].mxu1  ;;  %v2619_v63 = vpop.f32.mrb[138].mxu0  ;;  %v6117_v0 = vunpack.c.l.b16 %v5519_v1 }
 0x3ee   :  { %v4738_v20 = vadd.f32 %v4737_v46, %v3343_v54  ;;  %v3346_v3 = vmax.f32 %v2970_v62, 0.0  ;;  %v3359_v4 = vmax.f32 %v2619_v63, 0.0  ;;  %v2972_v59 = vpop.f32.mrb[138].mxu1  ;;  %v2621_v36 = vpop.f32.mrb[139].mxu0  ;;  %v6133_v49 = vunpack.c.l.b16 %v5535_v26 }
 0x3ef   :  { %v4812_v7 = vadd.f32 %v4811_v27, %v3345_v17  ;;  %v4775_v8 = vadd.f32 %v4774_v19, %v3344_v61  ;;  %v3361_v10 = vmax.f32 %v2972_v59, 0.0  ;;  %v3360_v11 = vmax.f32 %v2621_v36, 0.0  ;;  %v2974_v39 = vpop.f32.mrb[139].mxu1 }
 0x3f0   :  { %v4849_v28 = vadd.f32 %v4848_v52, %v3346_v3  ;;  %v4739_v12 = vadd.f32 %v4738_v20, %v3359_v4  ;;  %v3362_v25 = vmax.f32 %v2974_v39, 0.0  ;;  %9728 = vmatmul.mubr.msk.bf16.gmra.mrb[244].mxu0 %vm297_vm1, %v11237_v14  ;;  %v12568_v1 = vsel %vm6138_vm2, %v6131_v55, %v6115_v58  ;;  %v11238_v52 = vld [vmem:[%s13999_s0 + $0xf0] sm:$0xff]  }
 0x3f1   :  { %v4813_v16 = vadd.f32 %v4812_v7, %v3361_v10  ;;  %v4776_v37 = vadd.f32 %v4775_v8, %v3360_v11  ;;  %9761 = vmatmul.mubr.msk.bf16.gmra.mrb[244].mxu1 %vm297_vm1, %v11237_v14  ;;  %2893 = vmatprep.mubr.bf16.mxu0 %v11240_v2  ;;  %v12574_v38 = vsel %vm6138_vm2, %v6133_v49, %v6117_v0 }
 0x3f2   :  { %v4850_v6 = vadd.f32 %v4849_v28, %v3362_v25  ;;  %3246 = vmatprep.mubr.bf16.mxu1 %v11240_v2  ;;  %v6156_v49 = vpack.c.b16 %v11835_v13, %v11835_v13  ;;  %v11239_v25 = vld [vmem:[%s13999_s0 + $0xf8] sm:$0xff]  }
 0x3f3   :  { %v2625_v30 = vpop.f32.mrb[140].mxu0 }
 0x3f4   :  { %v3375_v9 = vmax.f32 %v2625_v30, 0.0  ;;  %v2978_v18 = vpop.f32.mrb[140].mxu1  ;;  %v2627_v31 = vpop.f32.mrb[141].mxu0 }
 0x3f5   :  { %v3377_v21 = vmax.f32 %v2978_v18, 0.0  ;;  %v3376_v33 = vmax.f32 %v2627_v31, 0.0  ;;  %v2980_v35 = vpop.f32.mrb[141].mxu1  ;;  %v2629_v43 = vpop.f32.mrb[142].mxu0 }
 0x3f6   :  { %v4740_v40 = vadd.f32 %v4739_v12, %v3375_v9  ;;  %v3378_v56 = vmax.f32 %v2980_v35, 0.0  ;;  %v3391_v24 = vmax.f32 %v2629_v43, 0.0  ;;  %v2982_v32 = vpop.f32.mrb[142].mxu1  ;;  %v2631_v23 = vpop.f32.mrb[143].mxu0  ;;  %v10481_v35 = vld [vmem:[%s14000_s2 + $0x200] ss:$16 sps:$4 sm:$0xff]   ;;  %v6155_v43 = vpack.c.b16 %v11822_v34, %v11822_v34 }
 0x3f7   :  { %v4814_v41 = vadd.f32 %v4813_v16, %v3377_v21  ;;  %v4777_v44 = vadd.f32 %v4776_v37, %v3376_v33  ;;  %v3393_v46 = vmax.f32 %v2982_v32, 0.0  ;;  %v3392_v47 = vmax.f32 %v2631_v23, 0.0  ;;  %v2984_v26 = vpop.f32.mrb[143].mxu1 }
 0x3f8   :  { %v4851_v45 = vadd.f32 %v4850_v6, %v3378_v56  ;;  %v4741_v27 = vadd.f32 %v4740_v40, %v3391_v24  ;;  %v3394_v19 = vmax.f32 %v2984_v26, 0.0  ;;  %9729 = vmatmul.mubr.msk.bf16.gmra.mrb[248].mxu0 %vm297_vm1, %v11238_v52 }
 0x3f9   :  { %v4815_v48 = vadd.f32 %v4814_v41, %v3393_v46  ;;  %v4778_v54 = vadd.f32 %v4777_v44, %v3392_v47  ;;  %9762 = vmatmul.mubr.msk.bf16.gmra.mrb[248].mxu1 %vm297_vm1, %v11238_v52  ;;  %2903 = vmatprep.mubr.bf16.mxu0 %v11240_v2  ;;  %v10484_v41 = vld [vmem:[%s14000_s2 + $0x208] ss:$16 sps:$4 sm:$0xff]  }
 0x3fa   :  { %v4852_v22 = vadd.f32 %v4851_v45, %v3394_v19  ;;  %3256 = vmatprep.mubr.bf16.mxu1 %v11240_v2 }
 0x3fb   :  { %v2635_v57 = vpop.f32.mrb[144].mxu0 }
 0x3fc   :  { %v3407_v58 = vmax.f32 %v2635_v57, 0.0  ;;  %v2988_v55 = vpop.f32.mrb[144].mxu1  ;;  %v2637_v17 = vpop.f32.mrb[145].mxu0 }
 0x3fd   :  { %v3409_v61 = vmax.f32 %v2988_v55, 0.0  ;;  %v3408_v62 = vmax.f32 %v2637_v17, 0.0  ;;  %v2990_v63 = vpop.f32.mrb[145].mxu1  ;;  %v2639_v0 = vpop.f32.mrb[146].mxu0  ;;  %v10490_v17 = vld [vmem:[%s14000_s2 + $0x228] ss:$16 sps:$4 sm:$0xff]  }
 0x3fe   :  { %v4742_v20 = vadd.f32 %v4741_v27, %v3407_v58  ;;  %v3410_v3 = vmax.f32 %v2990_v63, 0.0  ;;  %v3423_v4 = vmax.f32 %v2639_v0, 0.0  ;;  %v2992_v59 = vpop.f32.mrb[146].mxu1  ;;  %v2641_v36 = vpop.f32.mrb[147].mxu0  ;;  %v10489_v27 = vld [vmem:[%s14000_s2 + $0x224] ss:$16 sps:$4 sm:$0xff]  }
 0x3ff   :  { %v4816_v7 = vadd.f32 %v4815_v48, %v3409_v61  ;;  %v4779_v8 = vadd.f32 %v4778_v54, %v3408_v62  ;;  %v3425_v10 = vmax.f32 %v2992_v59, 0.0  ;;  %v3424_v2 = vmax.f32 %v2641_v36, 0.0  ;;  %v2994_v11 = vpop.f32.mrb[147].mxu1  ;;  %v10492_v54 = vld [vmem:[%s14000_s2 + $0x22c] ss:$16 sps:$4 sm:$0xff]  }
 0x400   :  { %v4853_v39 = vadd.f32 %v4852_v22, %v3410_v3  ;;  %v4743_v28 = vadd.f32 %v4742_v20, %v3423_v4  ;;  %v3426_v12 = vmax.f32 %v2994_v11, 0.0  ;;  %9730 = vmatmul.mubr.msk.bf16.gmra.mrb[252].mxu0 %vm297_vm1, %v11239_v25  ;;  %v6158_v48 = vpack.c.b16 %v11838_v50, %v11838_v50  ;;  %v10487_v58 = vld [vmem:[%s14000_s2 + $0x220] ss:$16 sps:$4 sm:$0xff]   ;;  %v10495_v50 = vld [vmem:[%s14000_s2 + $0x244] ss:$16 sps:$4 sm:$0xff]  }
 0x401   :  { %v4817_v14 = vadd.f32 %v4816_v7, %v3425_v10  ;;  %v4780_v16 = vadd.f32 %v4779_v8, %v3424_v2  ;;  %9763 = vmatmul.mubr.msk.bf16.gmra.mrb[252].mxu1 %vm297_vm1, %v11239_v25  ;;  %8779 = vmatprep.mubr.bf16.mxu0 %v6156_v49  ;;  %v10498_v62 = vld [vmem:[%s14000_s2 + $0x24c] ss:$16 sps:$4 sm:$0xff]   ;;  %v10493_v3 = vld [vmem:[%s14000_s2 + $0x240] ss:$16 sps:$4 sm:$0xff]   ;;  %v10496_v7 = vld [vmem:[%s14000_s2 + $0x248] ss:$16 sps:$4 sm:$0xff]  }
 0x402   :  { %v4854_v13 = vadd.f32 %v4853_v39, %v3426_v12  ;;  %9107 = vmatprep.mubr.bf16.mxu1 %v6156_v49 }
 0x403   :  { %v2645_v37 = vpop.f32.mrb[148].mxu0 }
 0x404   :  { %v3439_v6 = vmax.f32 %v2645_v37, 0.0  ;;  %v2998_v30 = vpop.f32.mrb[148].mxu1  ;;  %v2647_v9 = vpop.f32.mrb[149].mxu0  ;;  %v10504_v37 = vld [vmem:[%s14000_s2 + $0x26c] ss:$16 sps:$4 sm:$0xff]  }
 0x405   :  { %v3441_v18 = vmax.f32 %v2998_v30, 0.0  ;;  %v3440_v31 = vmax.f32 %v2647_v9, 0.0  ;;  %v3000_v21 = vpop.f32.mrb[149].mxu1  ;;  %v2649_v33 = vpop.f32.mrb[150].mxu0 }
 0x406   :  { %v4744_v40 = vadd.f32 %v4743_v28, %v3439_v6  ;;  %v3442_v56 = vmax.f32 %v3000_v21, 0.0  ;;  %v3455_v24 = vmax.f32 %v2649_v33, 0.0  ;;  %v3002_v32 = vpop.f32.mrb[150].mxu1  ;;  %v2651_v23 = vpop.f32.mrb[151].mxu0  ;;  %v10501_v28 = vld [vmem:[%s14000_s2 + $0x264] ss:$16 sps:$4 sm:$0xff]  }
 0x407   :  { %v4818_v44 = vadd.f32 %v4817_v14, %v3441_v18  ;;  %v4781_v46 = vadd.f32 %v4780_v16, %v3440_v31  ;;  %v3457_v47 = vmax.f32 %v3002_v32, 0.0  ;;  %v3456_v26 = vmax.f32 %v2651_v23, 0.0  ;;  %v3004_v45 = vpop.f32.mrb[151].mxu1  ;;  %v10499_v21 = vld [vmem:[%s14000_s2 + $0x260] ss:$16 sps:$4 sm:$0xff]  }
 0x408   :  { %v4855_v19 = vadd.f32 %v4854_v13, %v3442_v56  ;;  %v4745_v34 = vadd.f32 %v4744_v40, %v3455_v24  ;;  %v3458_v52 = vmax.f32 %v3004_v45, 0.0  ;;  %8780 = vmatmul.mubr.bf16.vlgmr.msra.gmra.mrb[0].mxu0 %v6155_v43  ;;  %v10510_v56 = vld [vmem:[%s14000_s2 + $0x28c] ss:$16 sps:$4 sm:$0xff]   ;;  %v10508_v45 = vld [vmem:[%s14000_s2 + $0x288] ss:$16 sps:$4 sm:$0xff]  }
 0x409   :  { %v4819_v22 = vadd.f32 %v4818_v44, %v3457_v47  ;;  %v4782_v57 = vadd.f32 %v4781_v46, %v3456_v26  ;;  %8789 = vmatpush1.bf16.msra.mxu0 %v10481_v35  ;;  %9108 = vmatmul.mubr.bf16.vlgmr.msra.gmra.mrb[0].mxu1 %v6155_v43  ;;  %v10502_v35 = vld [vmem:[%s14000_s2 + $0x268] ss:$16 sps:$4 sm:$0xff]   ;;  %v10507_v43 = vld [vmem:[%s14000_s2 + $0x284] ss:$16 sps:$4 sm:$0xff]  }
 0x40a   :  { %v4856_v55 = vadd.f32 %v4855_v19, %v3458_v52  ;;  %9117 = vmatpush1.bf16.msra.mxu1 %v10484_v41  ;;  %8820 = vmatprep.mubr.bf16.mxu0 %v6158_v48  ;;  %v10505_v41 = vld [vmem:[%s14000_s2 + $0x280] ss:$16 sps:$4 sm:$0xff]  }
 0x40b   :  { %9148 = vmatprep.mubr.bf16.mxu1 %v6158_v48  ;;  %v2655_v61 = vpop.f32.mrb[152].mxu0  ;;  %8790 = vmatprep.subr.bf16.mxu0 %v10489_v27 }
 0x40c   :  { %v3471_v63 = vmax.f32 %v2655_v61, 0.0  ;;  %v3008_v0 = vpop.f32.mrb[152].mxu1  ;;  %9118 = vmatprep.subr.bf16.mxu1 %v10492_v54  ;;  %v2657_v20 = vpop.f32.mrb[153].mxu0  ;;  %v10513_v54 = vld [vmem:[%s14000_s2 + $0x2a4] ss:$16 sps:$4 sm:$0xff]  }
 0x40d   :  { %v3473_v4 = vmax.f32 %v3008_v0, 0.0  ;;  %v3472_v59 = vmax.f32 %v2657_v20, 0.0  ;;  %v3010_v36 = vpop.f32.mrb[153].mxu1  ;;  %8791 = vmatpush1.bf16.msra.mxu0 %v10487_v58  ;;  %v2659_v49 = vpop.f32.mrb[154].mxu0 }
 0x40e   :  { %v4746_v8 = vadd.f32 %v4745_v34, %v3471_v63  ;;  %v3474_v10 = vmax.f32 %v3010_v36, 0.0  ;;  %9119 = vmatpush1.bf16.msra.mxu1 %v10490_v17  ;;  %v3487_v2 = vmax.f32 %v2659_v49, 0.0  ;;  %v3012_v11 = vpop.f32.mrb[154].mxu1  ;;  %v2661_v39 = vpop.f32.mrb[155].mxu0  ;;  %8792 = vmatprep.subr.bf16.mxu0 %v10495_v50  ;;  %v10516_v50 = vld [vmem:[%s14000_s2 + $0x2ac] ss:$16 sps:$4 sm:$0xff]  }
 0x40f   :  { %v4820_v12 = vadd.f32 %v4819_v22, %v3473_v4  ;;  %v4783_v25 = vadd.f32 %v4782_v57, %v3472_v59  ;;  %v3489_v14 = vmax.f32 %v3012_v11, 0.0  ;;  %v3488_v16 = vmax.f32 %v2661_v39, 0.0  ;;  %v3014_v13 = vpop.f32.mrb[155].mxu1  ;;  %9120 = vmatprep.subr.bf16.mxu1 %v10498_v62  ;;  %v10514_v59 = vld [vmem:[%s14000_s2 + $0x2a8] ss:$16 sps:$4 sm:$0xff]  }
 0x410   :  { %v4857_v6 = vadd.f32 %v4856_v55, %v3474_v10  ;;  %v4747_v30 = vadd.f32 %v4746_v8, %v3487_v2  ;;  %v3490_v9 = vmax.f32 %v3014_v13, 0.0  ;;  %v10519_v36 = vld [vmem:[%s14000_s2 + $0x2c4] ss:$16 sps:$4 sm:$0xff]   ;;  %v10517_v11 = vld [vmem:[%s14000_s2 + $0x2c0] ss:$16 sps:$4 sm:$0xff]  }
 0x411   :  { %v4821_v18 = vadd.f32 %v4820_v12, %v3489_v14  ;;  %v4784_v31 = vadd.f32 %v4783_v25, %v3488_v16  ;;  %8793 = vmatpush1.bf16.msra.mxu0 %v10493_v3  ;;  %v10511_v3 = vld [vmem:[%s14000_s2 + $0x2a0] ss:$16 sps:$4 sm:$0xff]   ;;  %v10520_v14 = vld [vmem:[%s14000_s2 + $0x2c8] ss:$16 sps:$4 sm:$0xff]  }
 0x412   :  { %v4858_v33 = vadd.f32 %v4857_v6, %v3490_v9  ;;  %9121 = vmatpush1.bf16.msra.mxu1 %v10496_v7  ;;  %8794 = vmatprep.subr.bf16.mxu0 %v10501_v28  ;;  %v10522_v7 = vld [vmem:[%s14000_s2 + $0x2cc] ss:$16 sps:$4 sm:$0xff]   ;;  %v10525_v9 = vld [vmem:[%s14000_s2 + $0x2e4] ss:$16 sps:$4 sm:$0xff]  }
 0x413   :  { %v2665_v40 = vpop.f32.mrb[156].mxu0  ;;  %9122 = vmatprep.subr.bf16.mxu1 %v10504_v37 }
 0x414   :  { %v3503_v24 = vmax.f32 %v2665_v40, 0.0  ;;  %v3018_v32 = vpop.f32.mrb[156].mxu1  ;;  %v2667_v23 = vpop.f32.mrb[157].mxu0 }
 0x415   :  { %v3505_v44 = vmax.f32 %v3018_v32, 0.0  ;;  %v3504_v46 = vmax.f32 %v2667_v23, 0.0  ;;  %v3020_v47 = vpop.f32.mrb[157].mxu1  ;;  %8795 = vmatpush1.bf16.msra.mxu0 %v10499_v21  ;;  %v2669_v26 = vpop.f32.mrb[158].mxu0 }
 0x416   :  { %v4748_v27 = vadd.f32 %v4747_v30, %v3503_v24  ;;  %v3506_v19 = vmax.f32 %v3020_v47, 0.0  ;;  %9123 = vmatpush1.bf16.msra.mxu1 %v10502_v35  ;;  %v3519_v34 = vmax.f32 %v2669_v26, 0.0  ;;  %v3022_v52 = vpop.f32.mrb[158].mxu1  ;;  %v2671_v48 = vpop.f32.mrb[159].mxu0  ;;  %8796 = vmatprep.subr.bf16.mxu0 %v10507_v43  ;;  %v10528_v43 = vld [vmem:[%s14000_s2 + $0x2ec] ss:$16 sps:$4 sm:$0xff]  }
 0x417   :  { %v4822_v22 = vadd.f32 %v4821_v18, %v3505_v44  ;;  %v4785_v57 = vadd.f32 %v4784_v31, %v3504_v46  ;;  %v3521_v58 = vmax.f32 %v3022_v52, 0.0  ;;  %v3520_v55 = vmax.f32 %v2671_v48, 0.0  ;;  %v3024_v17 = vpop.f32.mrb[159].mxu1  ;;  %9124 = vmatprep.subr.bf16.mxu1 %v10510_v56  ;;  %v10526_v46 = vld [vmem:[%s14000_s2 + $0x2e8] ss:$16 sps:$4 sm:$0xff]  }
 0x418   :  { %v4859_v61 = vadd.f32 %v4858_v33, %v3506_v19  ;;  %v4749_v62 = vadd.f32 %v4748_v27, %v3519_v34  ;;  %v3522_v63 = vmax.f32 %v3024_v17, 0.0  ;;  %v10531_v47 = vld [vmem:[%s14000_s2 + $0x304] ss:$16 sps:$4 sm:$0xff]   ;;  %v10529_v52 = vld [vmem:[%s14000_s2 + $0x300] ss:$16 sps:$4 sm:$0xff]  }
 0x419   :  { %v4823_v0 = vadd.f32 %v4822_v22, %v3521_v58  ;;  %v4786_v20 = vadd.f32 %v4785_v57, %v3520_v55  ;;  %8797 = vmatpush1.bf16.msra.mxu0 %v10505_v41  ;;  %v10523_v41 = vld [vmem:[%s14000_s2 + $0x2e0] ss:$16 sps:$4 sm:$0xff]   ;;  %v10532_v58 = vld [vmem:[%s14000_s2 + $0x308] ss:$16 sps:$4 sm:$0xff]  }
 0x41a   :  { %v4860_v4 = vadd.f32 %v4859_v61, %v3522_v63  ;;  %9125 = vmatpush1.bf16.msra.mxu1 %v10508_v45  ;;  %8798 = vmatprep.subr.bf16.mxu0 %v10513_v54  ;;  %v10534_v45 = vld [vmem:[%s14000_s2 + $0x30c] ss:$16 sps:$4 sm:$0xff]   ;;  %v10537_v63 = vld [vmem:[%s14000_s2 + $0x324] ss:$16 sps:$4 sm:$0xff]  }
 0x41b   :  { %v2675_v49 = vpop.f32.mrb[160].mxu0  ;;  %9126 = vmatprep.subr.bf16.mxu1 %v10516_v50 }
 0x41c   :  { %v3535_v8 = vmax.f32 %v2675_v49, 0.0  ;;  %v3028_v10 = vpop.f32.mrb[160].mxu1  ;;  %v2677_v2 = vpop.f32.mrb[161].mxu0 }
 0x41d   :  { %v3537_v39 = vmax.f32 %v3028_v10, 0.0  ;;  %v3536_v28 = vmax.f32 %v2677_v2, 0.0  ;;  %v3030_v12 = vpop.f32.mrb[161].mxu1  ;;  %8799 = vmatpush1.bf16.msra.mxu0 %v10511_v3  ;;  %v2679_v25 = vpop.f32.mrb[162].mxu0 }
 0x41e   :  { %v4750_v16 = vadd.f32 %v4749_v62, %v3535_v8  ;;  %v3538_v13 = vmax.f32 %v3030_v12, 0.0  ;;  %9127 = vmatpush1.bf16.msra.mxu1 %v10514_v59  ;;  %v3551_v37 = vmax.f32 %v2679_v25, 0.0  ;;  %v3032_v6 = vpop.f32.mrb[162].mxu1  ;;  %v2681_v30 = vpop.f32.mrb[163].mxu0  ;;  %8800 = vmatprep.subr.bf16.mxu0 %v10519_v36  ;;  %v10540_v36 = vld [vmem:[%s14000_s2 + $0x32c] ss:$16 sps:$4 sm:$0xff]  }
 0x41f   :  { %v4824_v18 = vadd.f32 %v4823_v0, %v3537_v39  ;;  %v4787_v31 = vadd.f32 %v4786_v20, %v3536_v28  ;;  %v3553_v21 = vmax.f32 %v3032_v6, 0.0  ;;  %v3552_v33 = vmax.f32 %v2681_v30, 0.0  ;;  %v3034_v35 = vpop.f32.mrb[163].mxu1  ;;  %9128 = vmatprep.subr.bf16.mxu1 %v10522_v7  ;;  %v10538_v28 = vld [vmem:[%s14000_s2 + $0x328] ss:$16 sps:$4 sm:$0xff]  }
 0x420   :  { %v4861_v40 = vadd.f32 %v4860_v4, %v3538_v13  ;;  %v4751_v56 = vadd.f32 %v4750_v16, %v3551_v37  ;;  %v3554_v24 = vmax.f32 %v3034_v35, 0.0  ;;  %v10543_v12 = vld [vmem:[%s14000_s2 + $0x344] ss:$16 sps:$4 sm:$0xff]   ;;  %v10541_v6 = vld [vmem:[%s14000_s2 + $0x340] ss:$16 sps:$4 sm:$0xff]  }
 0x421   :  { %v4825_v32 = vadd.f32 %v4824_v18, %v3553_v21  ;;  %v4788_v23 = vadd.f32 %v4787_v31, %v3552_v33  ;;  %8801 = vmatpush1.bf16.msra.mxu0 %v10517_v11  ;;  %v10535_v11 = vld [vmem:[%s14000_s2 + $0x320] ss:$16 sps:$4 sm:$0xff]   ;;  %v10544_v21 = vld [vmem:[%s14000_s2 + $0x348] ss:$16 sps:$4 sm:$0xff]  }
 0x422   :  { %v4862_v44 = vadd.f32 %v4861_v40, %v3554_v24  ;;  %9129 = vmatpush1.bf16.msra.mxu1 %v10520_v14  ;;  %8802 = vmatprep.subr.bf16.mxu0 %v10525_v9  ;;  %v10546_v14 = vld [vmem:[%s14000_s2 + $0x34c] ss:$16 sps:$4 sm:$0xff]   ;;  %v10549_v24 = vld [vmem:[%s14000_s2 + $0x364] ss:$16 sps:$4 sm:$0xff]  }
 0x423   :  { %v2685_v26 = vpop.f32.mrb[164].mxu0  ;;  %9130 = vmatprep.subr.bf16.mxu1 %v10528_v43 }
 0x424   :  { %v3567_v27 = vmax.f32 %v2685_v26, 0.0  ;;  %v3038_v19 = vpop.f32.mrb[164].mxu1  ;;  %v2687_v34 = vpop.f32.mrb[165].mxu0 }
 0x425   :  { %v3569_v48 = vmax.f32 %v3038_v19, 0.0  ;;  %v3568_v54 = vmax.f32 %v2687_v34, 0.0  ;;  %v3040_v22 = vpop.f32.mrb[165].mxu1  ;;  %8803 = vmatpush1.bf16.msra.mxu0 %v10523_v41  ;;  %v2689_v57 = vpop.f32.mrb[166].mxu0 }
 0x426   :  { %v4752_v55 = vadd.f32 %v4751_v56, %v3567_v27  ;;  %v3570_v17 = vmax.f32 %v3040_v22, 0.0  ;;  %9131 = vmatpush1.bf16.msra.mxu1 %v10526_v46  ;;  %v3583_v50 = vmax.f32 %v2689_v57, 0.0  ;;  %v3042_v61 = vpop.f32.mrb[166].mxu1  ;;  %v2691_v62 = vpop.f32.mrb[167].mxu0  ;;  %8804 = vmatprep.subr.bf16.mxu0 %v10531_v47  ;;  %v10552_v47 = vld [vmem:[%s14000_s2 + $0x36c] ss:$16 sps:$4 sm:$0xff]  }
 0x427   :  { %v4826_v0 = vadd.f32 %v4825_v32, %v3569_v48  ;;  %v4789_v20 = vadd.f32 %v4788_v23, %v3568_v54  ;;  %v3585_v3 = vmax.f32 %v3042_v61, 0.0  ;;  %v3584_v4 = vmax.f32 %v2691_v62, 0.0  ;;  %v3044_v59 = vpop.f32.mrb[167].mxu1  ;;  %9132 = vmatprep.subr.bf16.mxu1 %v10534_v45  ;;  %v10550_v54 = vld [vmem:[%s14000_s2 + $0x368] ss:$16 sps:$4 sm:$0xff]  }
 0x428   :  { %v4863_v49 = vadd.f32 %v4862_v44, %v3570_v17  ;;  %v4753_v7 = vadd.f32 %v4752_v55, %v3583_v50  ;;  %v3586_v8 = vmax.f32 %v3044_v59, 0.0  ;;  %v10555_v22 = vld [vmem:[%s14000_s2 + $0x384] ss:$16 sps:$4 sm:$0xff]   ;;  %v10553_v61 = vld [vmem:[%s14000_s2 + $0x380] ss:$16 sps:$4 sm:$0xff]  }
 0x429   :  { %v4827_v10 = vadd.f32 %v4826_v0, %v3585_v3  ;;  %v4790_v2 = vadd.f32 %v4789_v20, %v3584_v4  ;;  %8805 = vmatpush1.bf16.msra.mxu0 %v10529_v52  ;;  %v10547_v52 = vld [vmem:[%s14000_s2 + $0x360] ss:$16 sps:$4 sm:$0xff]   ;;  %v10556_v3 = vld [vmem:[%s14000_s2 + $0x388] ss:$16 sps:$4 sm:$0xff]  }
 0x42a   :  { %v4864_v39 = vadd.f32 %v4863_v49, %v3586_v8  ;;  %9133 = vmatpush1.bf16.msra.mxu1 %v10532_v58  ;;  %8806 = vmatprep.subr.bf16.mxu0 %v10537_v63  ;;  %v10558_v58 = vld [vmem:[%s14000_s2 + $0x38c] ss:$16 sps:$4 sm:$0xff]   ;;  %v10561_v8 = vld [vmem:[%s14000_s2 + $0x3a4] ss:$16 sps:$4 sm:$0xff]  }
 0x42b   :  { %v2695_v25 = vpop.f32.mrb[168].mxu0  ;;  %9134 = vmatprep.subr.bf16.mxu1 %v10540_v36 }
 0x42c   :  { %v3599_v16 = vmax.f32 %v2695_v25, 0.0  ;;  %v3048_v13 = vpop.f32.mrb[168].mxu1  ;;  %v2697_v37 = vpop.f32.mrb[169].mxu0 }
 0x42d   :  { %v3601_v30 = vmax.f32 %v3048_v13, 0.0  ;;  %v3600_v9 = vmax.f32 %v2697_v37, 0.0  ;;  %v3050_v18 = vpop.f32.mrb[169].mxu1  ;;  %8807 = vmatpush1.bf16.msra.mxu0 %v10535_v11  ;;  %v2699_v31 = vpop.f32.mrb[170].mxu0 }
 0x42e   :  { %v4754_v33 = vadd.f32 %v4753_v7, %v3599_v16  ;;  %v3602_v35 = vmax.f32 %v3050_v18, 0.0  ;;  %9135 = vmatpush1.bf16.msra.mxu1 %v10538_v28  ;;  %v3615_v43 = vmax.f32 %v2699_v31, 0.0  ;;  %v3052_v40 = vpop.f32.mrb[170].mxu1  ;;  %v2701_v56 = vpop.f32.mrb[171].mxu0  ;;  %8808 = vmatprep.subr.bf16.mxu0 %v10543_v12  ;;  %v10564_v12 = vld [vmem:[%s14000_s2 + $0x3ac] ss:$16 sps:$4 sm:$0xff]  }
 0x42f   :  { %v4828_v32 = vadd.f32 %v4827_v10, %v3601_v30  ;;  %v4791_v23 = vadd.f32 %v4790_v2, %v3600_v9  ;;  %v3617_v41 = vmax.f32 %v3052_v40, 0.0  ;;  %v3616_v44 = vmax.f32 %v2701_v56, 0.0  ;;  %v3054_v46 = vpop.f32.mrb[171].mxu1  ;;  %9136 = vmatprep.subr.bf16.mxu1 %v10546_v14  ;;  %v10562_v9 = vld [vmem:[%s14000_s2 + $0x3a8] ss:$16 sps:$4 sm:$0xff]  }
 0x430   :  { %v4865_v26 = vadd.f32 %v4864_v39, %v3602_v35  ;;  %v4755_v45 = vadd.f32 %v4754_v33, %v3615_v43  ;;  %v3618_v27 = vmax.f32 %v3054_v46, 0.0  ;;  %v10567_v18 = vld [vmem:[%s14000_s2 + $0x3c4] ss:$16 sps:$4 sm:$0xff]   ;;  %v10565_v40 = vld [vmem:[%s14000_s2 + $0x3c0] ss:$16 sps:$4 sm:$0xff]  }
 0x431   :  { %v4829_v19 = vadd.f32 %v4828_v32, %v3617_v41  ;;  %v4792_v34 = vadd.f32 %v4791_v23, %v3616_v44  ;;  %8809 = vmatpush1.bf16.msra.mxu0 %v10541_v6  ;;  %v10559_v6 = vld [vmem:[%s14000_s2 + $0x3a0] ss:$16 sps:$4 sm:$0xff]   ;;  %v10568_v41 = vld [vmem:[%s14000_s2 + $0x3c8] ss:$16 sps:$4 sm:$0xff]  }
 0x432   :  { %v4866_v48 = vadd.f32 %v4865_v26, %v3618_v27  ;;  %9137 = vmatpush1.bf16.msra.mxu1 %v10544_v21  ;;  %8810 = vmatprep.subr.bf16.mxu0 %v10549_v24  ;;  %v10570_v21 = vld [vmem:[%s14000_s2 + $0x3cc] ss:$16 sps:$4 sm:$0xff]   ;;  %v10573_v27 = vld [vmem:[%s14000_s2 + $0x3e4] ss:$16 sps:$4 sm:$0xff]  }
 0x433   :  { %v2705_v57 = vpop.f32.mrb[172].mxu0  ;;  %9138 = vmatprep.subr.bf16.mxu1 %v10552_v47 }
 0x434   :  { %v3631_v55 = vmax.f32 %v2705_v57, 0.0  ;;  %v3058_v17 = vpop.f32.mrb[172].mxu1  ;;  %v2707_v50 = vpop.f32.mrb[173].mxu0 }
 0x435   :  { %v3633_v62 = vmax.f32 %v3058_v17, 0.0  ;;  %v3632_v63 = vmax.f32 %v2707_v50, 0.0  ;;  %v3060_v0 = vpop.f32.mrb[173].mxu1  ;;  %8811 = vmatpush1.bf16.msra.mxu0 %v10547_v52  ;;  %v2709_v20 = vpop.f32.mrb[174].mxu0 }
 0x436   :  { %v4756_v4 = vadd.f32 %v4755_v45, %v3631_v55  ;;  %v3634_v59 = vmax.f32 %v3060_v0, 0.0  ;;  %9139 = vmatpush1.bf16.msra.mxu1 %v10550_v54  ;;  %v3647_v36 = vmax.f32 %v2709_v20, 0.0  ;;  %v3062_v49 = vpop.f32.mrb[174].mxu1  ;;  %v2711_v7 = vpop.f32.mrb[175].mxu0  ;;  %8812 = vmatprep.subr.bf16.mxu0 %v10555_v22  ;;  %v10576_v22 = vld [vmem:[%s14000_s2 + $0x3ec] ss:$16 sps:$4 sm:$0xff]  }
 0x437   :  { %v4830_v10 = vadd.f32 %v4829_v19, %v3633_v62  ;;  %v4793_v2 = vadd.f32 %v4792_v34, %v3632_v63  ;;  %v3649_v11 = vmax.f32 %v3062_v49, 0.0  ;;  %v3648_v39 = vmax.f32 %v2711_v7, 0.0  ;;  %v3064_v28 = vpop.f32.mrb[175].mxu1  ;;  %9140 = vmatprep.subr.bf16.mxu1 %v10558_v58  ;;  %v10574_v63 = vld [vmem:[%s14000_s2 + $0x3e8] ss:$16 sps:$4 sm:$0xff]  }
 0x438   :  { %v4867_v25 = vadd.f32 %v4866_v48, %v3634_v59  ;;  %v4757_v14 = vadd.f32 %v4756_v4, %v3647_v36  ;;  %v3650_v16 = vmax.f32 %v3064_v28, 0.0  ;;  %v10579_v0 = vld [vmem:[%s14000_s2 + $0x404] ss:$16 sps:$4 sm:$0xff]  }
 0x439   :  { %v4831_v13 = vadd.f32 %v4830_v10, %v3649_v11  ;;  %v4794_v37 = vadd.f32 %v4793_v2, %v3648_v39  ;;  %8813 = vmatpush1.bf16.msra.mxu0 %v10553_v61  ;;  %v10571_v61 = vld [vmem:[%s14000_s2 + $0x3e0] ss:$16 sps:$4 sm:$0xff]   ;;  %v6157_v11 = vpack.c.b16 %v11825_v15, %v11825_v15  ;;  %v10585_v15 = vld [vmem:[%s14000_s2 + $0x424] ss:$16 sps:$4 sm:$0xff]  }
 0x43a   :  { %v4868_v30 = vadd.f32 %v4867_v25, %v3650_v16  ;;  %9141 = vmatpush1.bf16.msra.mxu1 %v10556_v3  ;;  %8814 = vmatprep.subr.bf16.mxu0 %v10561_v8  ;;  %v10582_v3 = vld [vmem:[%s14000_s2 + $0x40c] ss:$16 sps:$4 sm:$0xff]   ;;  %v10577_v2 = vld [vmem:[%s14000_s2 + $0x400] ss:$16 sps:$4 sm:$0xff]   ;;  %v10580_v16 = vld [vmem:[%s14000_s2 + $0x408] ss:$16 sps:$4 sm:$0xff]  }
 0x43b   :  { %v2715_v31 = vpop.f32.mrb[176].mxu0  ;;  %9142 = vmatprep.subr.bf16.mxu1 %v10564_v12 }
 0x43c   :  { %v3663_v33 = vmax.f32 %v2715_v31, 0.0  ;;  %v3068_v35 = vpop.f32.mrb[176].mxu1  ;;  %v2717_v43 = vpop.f32.mrb[177].mxu0 }
 0x43d   :  { %v3665_v56 = vmax.f32 %v3068_v35, 0.0  ;;  %v3664_v24 = vmax.f32 %v2717_v43, 0.0  ;;  %v3070_v32 = vpop.f32.mrb[177].mxu1  ;;  %8815 = vmatpush1.bf16.msra.mxu0 %v10559_v6  ;;  %v2719_v23 = vpop.f32.mrb[178].mxu0  ;;  %v10588_v35 = vld [vmem:[%s14000_s2 + $0x42c] ss:$16 sps:$4 sm:$0xff]  }
 0x43e   :  { %v4758_v44 = vadd.f32 %v4757_v14, %v3663_v33  ;;  %v3666_v46 = vmax.f32 %v3070_v32, 0.0  ;;  %9143 = vmatpush1.bf16.msra.mxu1 %v10562_v9  ;;  %v3679_v47 = vmax.f32 %v2719_v23, 0.0  ;;  %v3072_v26 = vpop.f32.mrb[178].mxu1  ;;  %v2721_v45 = vpop.f32.mrb[179].mxu0  ;;  %8816 = vmatprep.subr.bf16.mxu0 %v10567_v18  ;;  %v6160_v33 = vpack.c.b16 %v12111_v60, %v12111_v60  ;;  %v10586_v32 = vld [vmem:[%s14000_s2 + $0x428] ss:$16 sps:$4 sm:$0xff]  }
 0x43f   :  { %v4832_v19 = vadd.f32 %v4831_v13, %v3665_v56  ;;  %v4795_v34 = vadd.f32 %v4794_v37, %v3664_v24  ;;  %v3681_v52 = vmax.f32 %v3072_v26, 0.0  ;;  %v3680_v48 = vmax.f32 %v2721_v45, 0.0  ;;  %v3074_v54 = vpop.f32.mrb[179].mxu1  ;;  %9144 = vmatprep.subr.bf16.mxu1 %v10570_v21  ;;  %v10583_v56 = vld [vmem:[%s14000_s2 + $0x420] ss:$16 sps:$4 sm:$0xff]  }
 0x440   :  { %v4869_v57 = vadd.f32 %v4868_v30, %v3666_v46  ;;  %v4759_v58 = vadd.f32 %v4758_v44, %v3679_v47  ;;  %v3682_v55 = vmax.f32 %v3074_v54, 0.0  ;;  %v10591_v60 = vld [vmem:[%s14000_s2 + $0x444] ss:$16 sps:$4 sm:$0xff]   ;;  %v10589_v26 = vld [vmem:[%s14000_s2 + $0x440] ss:$16 sps:$4 sm:$0xff]  }
 0x441   :  { %v4833_v17 = vadd.f32 %v4832_v19, %v3681_v52  ;;  %v4796_v50 = vadd.f32 %v4795_v34, %v3680_v48  ;;  %8817 = vmatpush1.bf16.msra.mxu0 %v10565_v40  ;;  %v10592_v52 = vld [vmem:[%s14000_s2 + $0x448] ss:$16 sps:$4 sm:$0xff]  }
 0x442   :  { %v4870_v62 = vadd.f32 %v4869_v57, %v3682_v55  ;;  %9145 = vmatpush1.bf16.msra.mxu1 %v10568_v41  ;;  %8818 = vmatprep.subr.bf16.mxu0 %v10573_v27  ;;  %v10594_v41 = vld [vmem:[%s14000_s2 + $0x44c] ss:$16 sps:$4 sm:$0xff]   ;;  %v10597_v55 = vld [vmem:[%s14000_s2 + $0x464] ss:$16 sps:$4 sm:$0xff]  }
 0x443   :  { %v2725_v20 = vpop.f32.mrb[180].mxu0  ;;  %9146 = vmatprep.subr.bf16.mxu1 %v10576_v22 }
 0x444   :  { %v3695_v4 = vmax.f32 %v2725_v20, 0.0  ;;  %v3078_v59 = vpop.f32.mrb[180].mxu1  ;;  %v2727_v36 = vpop.f32.mrb[181].mxu0 }
 0x445   :  { %v3697_v49 = vmax.f32 %v3078_v59, 0.0  ;;  %v3696_v7 = vmax.f32 %v2727_v36, 0.0  ;;  %v3080_v8 = vpop.f32.mrb[181].mxu1  ;;  %8819 = vmatpush1.bf16.msra.mxu0 %v10571_v61  ;;  %v2729_v10 = vpop.f32.mrb[182].mxu0 }
 0x446   :  { %v4760_v39 = vadd.f32 %v4759_v58, %v3695_v4  ;;  %v3698_v28 = vmax.f32 %v3080_v8, 0.0  ;;  %9147 = vmatpush1.bf16.msra.mxu1 %v10574_v63  ;;  %v3711_v12 = vmax.f32 %v2729_v10, 0.0  ;;  %v3082_v25 = vpop.f32.mrb[182].mxu1  ;;  %v2731_v14 = vpop.f32.mrb[183].mxu0  ;;  %8829 = vmatprep.subr.bf16.mxu0 %v10579_v0  ;;  %v10600_v0 = vld [vmem:[%s14000_s2 + $0x46c] ss:$16 sps:$4 sm:$0xff]  }
 0x447   :  { %v4834_v13 = vadd.f32 %v4833_v17, %v3697_v49  ;;  %v4797_v37 = vadd.f32 %v4796_v50, %v3696_v7  ;;  %v3713_v6 = vmax.f32 %v3082_v25, 0.0  ;;  %v3712_v30 = vmax.f32 %v2731_v14, 0.0  ;;  %v3084_v9 = vpop.f32.mrb[183].mxu1  ;;  %9157 = vmatprep.subr.bf16.mxu1 %v10582_v3  ;;  %v10595_v49 = vld [vmem:[%s14000_s2 + $0x460] ss:$16 sps:$4 sm:$0xff]  }
 0x448   :  { %v4871_v18 = vadd.f32 %v4870_v62, %v3698_v28  ;;  %v4761_v31 = vadd.f32 %v4760_v39, %v3711_v12  ;;  %v3714_v21 = vmax.f32 %v3084_v9, 0.0  ;;  %8821 = vmatmul.mubr.bf16.vlgmr.msra.gmra.mrb[0].mxu0 %v6157_v11  ;;  %v10598_v8 = vld [vmem:[%s14000_s2 + $0x468] ss:$16 sps:$4 sm:$0xff]   ;;  %v10603_v10 = vld [vmem:[%s14000_s2 + $0x484] ss:$16 sps:$4 sm:$0xff]  }
 0x449   :  { %v4835_v43 = vadd.f32 %v4834_v13, %v3713_v6  ;;  %v4798_v40 = vadd.f32 %v4797_v37, %v3712_v30  ;;  %9149 = vmatmul.mubr.bf16.vlgmr.msra.gmra.mrb[0].mxu1 %v6157_v11  ;;  %8830 = vmatpush1.bf16.msra.mxu0 %v10577_v2  ;;  %v10606_v11 = vld [vmem:[%s14000_s2 + $0x48c] ss:$16 sps:$4 sm:$0xff]   ;;  %v10601_v25 = vld [vmem:[%s14000_s2 + $0x480] ss:$16 sps:$4 sm:$0xff]   ;;  %v10604_v6 = vld [vmem:[%s14000_s2 + $0x488] ss:$16 sps:$4 sm:$0xff]  }
 0x44a   :  { %v4872_v24 = vadd.f32 %v4871_v18, %v3714_v21  ;;  %8861 = vmatprep.mubr.bf16.mxu0 %v6160_v33  ;;  %9158 = vmatpush1.bf16.msra.mxu1 %v10580_v16  ;;  %v10609_v21 = vld [vmem:[%s14000_s2 + $0x4a4] ss:$16 sps:$4 sm:$0xff]  }
 0x44b   :  { %9189 = vmatprep.mubr.bf16.mxu1 %v6160_v33  ;;  %v2735_v23 = vpop.f32.mrb[184].mxu0  ;;  %8831 = vmatprep.subr.bf16.mxu0 %v10585_v15 }
 0x44c   :  { %v3727_v44 = vmax.f32 %v2735_v23, 0.0  ;;  %v3088_v46 = vpop.f32.mrb[184].mxu1  ;;  %9159 = vmatprep.subr.bf16.mxu1 %v10588_v35  ;;  %v2737_v47 = vpop.f32.mrb[185].mxu0 }
 0x44d   :  { %v3729_v45 = vmax.f32 %v3088_v46, 0.0  ;;  %v3728_v27 = vmax.f32 %v2737_v47, 0.0  ;;  %v3090_v19 = vpop.f32.mrb[185].mxu1  ;;  %8832 = vmatpush1.bf16.msra.mxu0 %v10583_v56  ;;  %v2739_v34 = vpop.f32.mrb[186].mxu0  ;;  %v10607_v46 = vld [vmem:[%s14000_s2 + $0x4a0] ss:$16 sps:$4 sm:$0xff]  }
 0x44e   :  { %v4762_v48 = vadd.f32 %v4761_v31, %v3727_v44  ;;  %v3730_v54 = vmax.f32 %v3090_v19, 0.0  ;;  %9160 = vmatpush1.bf16.msra.mxu1 %v10586_v32  ;;  %v3743_v22 = vmax.f32 %v2739_v34, 0.0  ;;  %v3092_v57 = vpop.f32.mrb[186].mxu1  ;;  %v2741_v58 = vpop.f32.mrb[187].mxu0  ;;  %8833 = vmatprep.subr.bf16.mxu0 %v10591_v60  ;;  %v10618_v19 = vld [vmem:[%s14000_s2 + $0x4cc] ss:$16 sps:$4 sm:$0xff]  }
 0x44f   :  { %v4836_v17 = vadd.f32 %v4835_v43, %v3729_v45  ;;  %v4799_v50 = vadd.f32 %v4798_v40, %v3728_v27  ;;  %v3745_v61 = vmax.f32 %v3092_v57, 0.0  ;;  %v3744_v62 = vmax.f32 %v2741_v58, 0.0  ;;  %v3094_v63 = vpop.f32.mrb[187].mxu1  ;;  %9161 = vmatprep.subr.bf16.mxu1 %v10594_v41  ;;  %v10615_v45 = vld [vmem:[%s14000_s2 + $0x4c4] ss:$16 sps:$4 sm:$0xff]  }
 0x450   :  { %v4873_v20 = vadd.f32 %v4872_v24, %v3730_v54  ;;  %v4763_v3 = vadd.f32 %v4762_v48, %v3743_v22  ;;  %v3746_v4 = vmax.f32 %v3094_v63, 0.0  ;;  %v10612_v24 = vld [vmem:[%s14000_s2 + $0x4ac] ss:$16 sps:$4 sm:$0xff]   ;;  %v10613_v48 = vld [vmem:[%s14000_s2 + $0x4c0] ss:$16 sps:$4 sm:$0xff]  }
 0x451   :  { %v4837_v59 = vadd.f32 %v4836_v17, %v3745_v61  ;;  %v4800_v36 = vadd.f32 %v4799_v50, %v3744_v62  ;;  %8834 = vmatpush1.bf16.msra.mxu0 %v10589_v26  ;;  %v10610_v26 = vld [vmem:[%s14000_s2 + $0x4a8] ss:$16 sps:$4 sm:$0xff]  }
 0x452   :  { %v4874_v7 = vadd.f32 %v4873_v20, %v3746_v4  ;;  %9162 = vmatpush1.bf16.msra.mxu1 %v10592_v52  ;;  %8835 = vmatprep.subr.bf16.mxu0 %v10597_v55  ;;  %v10616_v54 = vld [vmem:[%s14000_s2 + $0x4c8] ss:$16 sps:$4 sm:$0xff]   ;;  %v10621_v55 = vld [vmem:[%s14000_s2 + $0x4e4] ss:$16 sps:$4 sm:$0xff]  }
 0x453   :  { %v2745_v2 = vpop.f32.mrb[188].mxu0  ;;  %9163 = vmatprep.subr.bf16.mxu1 %v10600_v0 }
 0x454   :  { %v3759_v39 = vmax.f32 %v2745_v2, 0.0  ;;  %v3098_v28 = vpop.f32.mrb[188].mxu1  ;;  %v2747_v12 = vpop.f32.mrb[189].mxu0 }
 0x455   :  { %v3761_v14 = vmax.f32 %v3098_v28, 0.0  ;;  %v3760_v16 = vmax.f32 %v2747_v12, 0.0  ;;  %v3100_v13 = vpop.f32.mrb[189].mxu1  ;;  %8836 = vmatpush1.bf16.msra.mxu0 %v10595_v49  ;;  %v2749_v37 = vpop.f32.mrb[190].mxu0  ;;  %v10630_v12 = vld [vmem:[%s14000_s2 + $0x50c] ss:$16 sps:$4 sm:$0xff]  }
 0x456   :  { %v4764_v30 = vadd.f32 %v4763_v3, %v3759_v39  ;;  %v3762_v9 = vmax.f32 %v3100_v13, 0.0  ;;  %9164 = vmatpush1.bf16.msra.mxu1 %v10598_v8  ;;  %v3775_v15 = vmax.f32 %v2749_v37, 0.0  ;;  %v3102_v18 = vpop.f32.mrb[190].mxu1  ;;  %v2751_v31 = vpop.f32.mrb[191].mxu0  ;;  %8837 = vmatprep.subr.bf16.mxu0 %v10603_v10  ;;  %v10619_v10 = vld [vmem:[%s14000_s2 + $0x4e0] ss:$16 sps:$4 sm:$0xff]  }
 0x457   :  { %v4838_v33 = vadd.f32 %v4837_v59, %v3761_v14  ;;  %v4801_v35 = vadd.f32 %v4800_v36, %v3760_v16  ;;  %v3777_v43 = vmax.f32 %v3102_v18, 0.0  ;;  %v3776_v40 = vmax.f32 %v2751_v31, 0.0  ;;  %v3104_v56 = vpop.f32.mrb[191].mxu1  ;;  %9165 = vmatprep.subr.bf16.mxu1 %v10606_v11  ;;  %v10624_v59 = vld [vmem:[%s14000_s2 + $0x4ec] ss:$16 sps:$4 sm:$0xff]  }
 0x458   :  { %v4875_v32 = vadd.f32 %v4874_v7, %v3762_v9  ;;  %v12850_v60 = vadd.f32 %v4764_v30, %v3775_v15  ;;  %v3778_v23 = vmax.f32 %v3104_v56, 0.0  ;;  %v10622_v11 = vld [vmem:[%s14000_s2 + $0x4e8] ss:$16 sps:$4 sm:$0xff]   ;;  %v10627_v39 = vld [vmem:[%s14000_s2 + $0x504] ss:$16 sps:$4 sm:$0xff]  }
 0x459   :  { %v12852_v41 = vadd.f32 %v4838_v33, %v3777_v43  ;;  %v12854_v44 = vadd.f32 %v4801_v35, %v3776_v40  ;;  %8838 = vmatpush1.bf16.msra.mxu0 %v10601_v25  ;;  %v10625_v13 = vld [vmem:[%s14000_s2 + $0x500] ss:$16 sps:$4 sm:$0xff]   ;;  %v10628_v15 = vld [vmem:[%s14000_s2 + $0x508] ss:$16 sps:$4 sm:$0xff]   ;;  %v10633_v35 = vld [vmem:[%s14000_s2 + $0x524] ss:$16 sps:$4 sm:$0xff]  }
 0x45a   :  { %v12859_v47 = vadd.f32 %v4875_v32, %v3778_v23  ;;  %9166 = vmatpush1.bf16.msra.mxu1 %v10604_v6  ;;  %8839 = vmatprep.subr.bf16.mxu0 %v10609_v21 }
 0x45b   :  { %v2755_v27 = vpop.f32.mrb[192].mxu0  ;;  %9167 = vmatprep.subr.bf16.mxu1 %v10612_v24  ;;  %v10636_v24 = vld [vmem:[%s14000_s2 + $0x52c] ss:$16 sps:$4 sm:$0xff]  }
 0x45c   :  { %v2757_v34 = vpop.f32.mrb[193].mxu0  ;;  %v3108_v52 = vpop.f32.mrb[192].mxu1  ;;  %v3791_v17 = vmax.f32 %v2755_v27, 0.0  ;;  %v10631_v27 = vld [vmem:[%s14000_s2 + $0x520] ss:$16 sps:$4 sm:$0xff]  }
 0x45d   :  { %v3793_v22 = vmax.f32 %v3108_v52, 0.0  ;;  %8840 = vmatpush1.bf16.msra.mxu0 %v10607_v46  ;;  %v2759_v57 = vpop.f32.mrb[194].mxu0  ;;  %v3110_v58 = vpop.f32.mrb[193].mxu1  ;;  %v3792_v0 = vmax.f32 %v2757_v34, 0.0  ;;  %v10634_v34 = vld [vmem:[%s14000_s2 + $0x528] ss:$16 sps:$4 sm:$0xff]  }
 0x45e   :  { %9168 = vmatpush1.bf16.msra.mxu1 %v10610_v26  ;;  %v3807_v50 = vmax.f32 %v2759_v57, 0.0  ;;  %v3794_v61 = vmax.f32 %v3110_v58, 0.0  ;;  %v2761_v62 = vpop.f32.mrb[195].mxu0  ;;  %v3112_v63 = vpop.f32.mrb[194].mxu1  ;;  %8841 = vmatprep.subr.bf16.mxu0 %v10615_v45  ;;  %v10639_v52 = vld [vmem:[%s14000_s2 + $0x544] ss:$16 sps:$4 sm:$0xff]  }
 0x45f   :  { %v3808_v20 = vmax.f32 %v2761_v62, 0.0  ;;  %v3809_v3 = vmax.f32 %v3112_v63, 0.0  ;;  %v3114_v4 = vpop.f32.mrb[195].mxu1  ;;  %9169 = vmatprep.subr.bf16.mxu1 %v10618_v19  ;;  %v10642_v58 = vld [vmem:[%s14000_s2 + $0x54c] ss:$16 sps:$4 sm:$0xff]  }
 0x460   :  { %v5327_v36 = vadd.f32 %v3807_v50, %v3791_v17  ;;  %v3810_v49 = vmax.f32 %v3114_v4, 0.0 }
 0x461   :  { %v5364_v7 = vadd.f32 %v3808_v20, %v3792_v0  ;;  %v5401_v8 = vadd.f32 %v3809_v3, %v3793_v22  ;;  %8842 = vmatpush1.bf16.msra.mxu0 %v10613_v48  ;;  %v10640_v3 = vld [vmem:[%s14000_s2 + $0x548] ss:$16 sps:$4 sm:$0xff]  }
 0x462   :  { %v5438_v2 = vadd.f32 %v3810_v49, %v3794_v61  ;;  %9170 = vmatpush1.bf16.msra.mxu1 %v10616_v54  ;;  %8843 = vmatprep.subr.bf16.mxu0 %v10621_v55  ;;  %v10637_v61 = vld [vmem:[%s14000_s2 + $0x540] ss:$16 sps:$4 sm:$0xff]  }
 0x463   :  { %v2765_v28 = vpop.f32.mrb[196].mxu0  ;;  %9171 = vmatprep.subr.bf16.mxu1 %v10624_v59 }
 0x464   :  { %v3823_v25 = vmax.f32 %v2765_v28, 0.0  ;;  %v3118_v14 = vpop.f32.mrb[196].mxu1  ;;  %v2767_v16 = vpop.f32.mrb[197].mxu0 }
 0x465   :  { %v3825_v37 = vmax.f32 %v3118_v14, 0.0  ;;  %v3824_v6 = vmax.f32 %v2767_v16, 0.0  ;;  %v3120_v30 = vpop.f32.mrb[197].mxu1  ;;  %8844 = vmatpush1.bf16.msra.mxu0 %v10619_v10  ;;  %v2769_v9 = vpop.f32.mrb[198].mxu0 }
 0x466   :  { %v5328_v18 = vadd.f32 %v5327_v36, %v3823_v25  ;;  %v3826_v31 = vmax.f32 %v3120_v30, 0.0  ;;  %9172 = vmatpush1.bf16.msra.mxu1 %v10622_v11  ;;  %v3122_v21 = vpop.f32.mrb[198].mxu1  ;;  %v2771_v33 = vpop.f32.mrb[199].mxu0  ;;  %8845 = vmatprep.subr.bf16.mxu0 %v10627_v39  ;;  %v3839_v23 = vmax.f32 %v2769_v9, 0.0  ;;  %v10646_v9 = vld [vmem:[%s14000_s2 + $0x568] ss:$16 sps:$4 sm:$0xff]  }
 0x467   :  { %v5402_v43 = vadd.f32 %v5401_v8, %v3825_v37  ;;  %v5365_v40 = vadd.f32 %v5364_v7, %v3824_v6  ;;  %v3124_v56 = vpop.f32.mrb[199].mxu1  ;;  %9173 = vmatprep.subr.bf16.mxu1 %v10630_v12  ;;  %v3841_v46 = vmax.f32 %v3122_v21, 0.0  ;;  %v3840_v26 = vmax.f32 %v2771_v33, 0.0  ;;  %v10645_v8 = vld [vmem:[%s14000_s2 + $0x564] ss:$16 sps:$4 sm:$0xff]  }
 0x468   :  { %v5439_v32 = vadd.f32 %v5438_v2, %v3826_v31  ;;  %v3842_v45 = vmax.f32 %v3124_v56, 0.0  ;;  %v5329_v19 = vadd.f32 %v5328_v18, %v3839_v23  ;;  %v10648_v12 = vld [vmem:[%s14000_s2 + $0x56c] ss:$16 sps:$4 sm:$0xff]   ;;  %v10643_v6 = vld [vmem:[%s14000_s2 + $0x560] ss:$16 sps:$4 sm:$0xff]  }
 0x469   :  { %8846 = vmatpush1.bf16.msra.mxu0 %v10625_v13  ;;  %v5403_v48 = vadd.f32 %v5402_v43, %v3841_v46  ;;  %v5366_v54 = vadd.f32 %v5365_v40, %v3840_v26  ;;  %v10654_v31 = vld [vmem:[%s14000_s2 + $0x58c] ss:$16 sps:$4 sm:$0xff]   ;;  %v10649_v43 = vld [vmem:[%s14000_s2 + $0x580] ss:$16 sps:$4 sm:$0xff]   ;;  %v10652_v23 = vld [vmem:[%s14000_s2 + $0x588] ss:$16 sps:$4 sm:$0xff]  }
 0x46a   :  { %9174 = vmatpush1.bf16.msra.mxu1 %v10628_v15  ;;  %8847 = vmatprep.subr.bf16.mxu0 %v10633_v35  ;;  %v5440_v22 = vadd.f32 %v5439_v32, %v3842_v45  ;;  %v10651_v15 = vld [vmem:[%s14000_s2 + $0x584] ss:$16 sps:$4 sm:$0xff]  }
 0x46b   :  { %v2775_v57 = vpop.f32.mrb[200].mxu0  ;;  %9175 = vmatprep.subr.bf16.mxu1 %v10636_v24 }
 0x46c   :  { %v3855_v55 = vmax.f32 %v2775_v57, 0.0  ;;  %v3128_v17 = vpop.f32.mrb[200].mxu1  ;;  %v2777_v50 = vpop.f32.mrb[201].mxu0 }
 0x46d   :  { %v3857_v62 = vmax.f32 %v3128_v17, 0.0  ;;  %v3856_v63 = vmax.f32 %v2777_v50, 0.0  ;;  %v3130_v0 = vpop.f32.mrb[201].mxu1  ;;  %8848 = vmatpush1.bf16.msra.mxu0 %v10631_v27  ;;  %v2779_v20 = vpop.f32.mrb[202].mxu0 }
 0x46e   :  { %v5330_v4 = vadd.f32 %v5329_v19, %v3855_v55  ;;  %v3858_v59 = vmax.f32 %v3130_v0, 0.0  ;;  %9176 = vmatpush1.bf16.msra.mxu1 %v10634_v34  ;;  %v3871_v36 = vmax.f32 %v2779_v20, 0.0  ;;  %v3132_v49 = vpop.f32.mrb[202].mxu1  ;;  %v2781_v7 = vpop.f32.mrb[203].mxu0  ;;  %8849 = vmatprep.subr.bf16.mxu0 %v10639_v52  ;;  %v10657_v34 = vld [vmem:[%s14000_s2 + $0x5a4] ss:$16 sps:$4 sm:$0xff]  }
 0x46f   :  { %v5404_v10 = vadd.f32 %v5403_v48, %v3857_v62  ;;  %v5367_v2 = vadd.f32 %v5366_v54, %v3856_v63  ;;  %v3873_v11 = vmax.f32 %v3132_v49, 0.0  ;;  %v3872_v39 = vmax.f32 %v2781_v7, 0.0  ;;  %v3134_v28 = vpop.f32.mrb[203].mxu1  ;;  %9177 = vmatprep.subr.bf16.mxu1 %v10642_v58  ;;  %v10660_v58 = vld [vmem:[%s14000_s2 + $0x5ac] ss:$16 sps:$4 sm:$0xff]  }
 0x470   :  { %v5441_v25 = vadd.f32 %v5440_v22, %v3858_v59  ;;  %v5331_v14 = vadd.f32 %v5330_v4, %v3871_v36  ;;  %v3874_v16 = vmax.f32 %v3134_v28, 0.0  ;;  %v10655_v63 = vld [vmem:[%s14000_s2 + $0x5a0] ss:$16 sps:$4 sm:$0xff]   ;;  %v10658_v20 = vld [vmem:[%s14000_s2 + $0x5a8] ss:$16 sps:$4 sm:$0xff]  }
 0x471   :  { %v5405_v13 = vadd.f32 %v5404_v10, %v3873_v11  ;;  %v5368_v37 = vadd.f32 %v5367_v2, %v3872_v39  ;;  %8850 = vmatpush1.bf16.msra.mxu0 %v10637_v61  ;;  %v10666_v59 = vld [vmem:[%s14000_s2 + $0x5cc] ss:$16 sps:$4 sm:$0xff]   ;;  %v10664_v28 = vld [vmem:[%s14000_s2 + $0x5c8] ss:$16 sps:$4 sm:$0xff]  }
 0x472   :  { %v5442_v30 = vadd.f32 %v5441_v25, %v3874_v16  ;;  %9178 = vmatpush1.bf16.msra.mxu1 %v10640_v3  ;;  %8851 = vmatprep.subr.bf16.mxu0 %v10645_v8  ;;  %v10663_v3 = vld [vmem:[%s14000_s2 + $0x5c4] ss:$16 sps:$4 sm:$0xff]   ;;  %v10661_v8 = vld [vmem:[%s14000_s2 + $0x5c0] ss:$16 sps:$4 sm:$0xff]  }
 0x473   :  { %v2785_v18 = vpop.f32.mrb[204].mxu0  ;;  %9179 = vmatprep.subr.bf16.mxu1 %v10648_v12 }
 0x474   :  { %v3887_v21 = vmax.f32 %v2785_v18, 0.0  ;;  %v3138_v33 = vpop.f32.mrb[204].mxu1  ;;  %v2787_v35 = vpop.f32.mrb[205].mxu0 }
 0x475   :  { %v3889_v40 = vmax.f32 %v3138_v33, 0.0  ;;  %v3888_v56 = vmax.f32 %v2787_v35, 0.0  ;;  %v3140_v24 = vpop.f32.mrb[205].mxu1  ;;  %8852 = vmatpush1.bf16.msra.mxu0 %v10643_v6  ;;  %v2789_v32 = vpop.f32.mrb[206].mxu0 }
 0x476   :  { %v5332_v46 = vadd.f32 %v5331_v14, %v3887_v21  ;;  %v3890_v26 = vmax.f32 %v3140_v24, 0.0  ;;  %9180 = vmatpush1.bf16.msra.mxu1 %v10646_v9  ;;  %v3903_v45 = vmax.f32 %v2789_v32, 0.0  ;;  %v3142_v27 = vpop.f32.mrb[206].mxu1  ;;  %v2791_v19 = vpop.f32.mrb[207].mxu0  ;;  %8853 = vmatprep.subr.bf16.mxu0 %v10651_v15  ;;  %v10670_v32 = vld [vmem:[%s14000_s2 + $0x5e8] ss:$16 sps:$4 sm:$0xff]  }
 0x477   :  { %v5406_v52 = vadd.f32 %v5405_v13, %v3889_v40  ;;  %v5369_v48 = vadd.f32 %v5368_v37, %v3888_v56  ;;  %v3905_v54 = vmax.f32 %v3142_v27, 0.0  ;;  %v3904_v22 = vmax.f32 %v2791_v19, 0.0  ;;  %v3144_v57 = vpop.f32.mrb[207].mxu1  ;;  %9181 = vmatprep.subr.bf16.mxu1 %v10654_v31  ;;  %v10669_v37 = vld [vmem:[%s14000_s2 + $0x5e4] ss:$16 sps:$4 sm:$0xff]  }
 0x478   :  { %v5443_v55 = vadd.f32 %v5442_v30, %v3890_v26  ;;  %v5333_v17 = vadd.f32 %v5332_v46, %v3903_v45  ;;  %v3906_v50 = vmax.f32 %v3144_v57, 0.0  ;;  %v10672_v31 = vld [vmem:[%s14000_s2 + $0x5ec] ss:$16 sps:$4 sm:$0xff]   ;;  %v10667_v56 = vld [vmem:[%s14000_s2 + $0x5e0] ss:$16 sps:$4 sm:$0xff]   ;;  %v6159_v57 = vpack.c.b16 %v12098_v29, %v12098_v29 }
 0x479   :  { %v5407_v61 = vadd.f32 %v5406_v52, %v3905_v54  ;;  %v5370_v62 = vadd.f32 %v5369_v48, %v3904_v22  ;;  %8854 = vmatpush1.bf16.msra.mxu0 %v10649_v43  ;;  %v10678_v26 = vld [vmem:[%s14000_s2 + $0x60c] ss:$16 sps:$4 sm:$0xff]   ;;  %v10673_v22 = vld [vmem:[%s14000_s2 + $0x600] ss:$16 sps:$4 sm:$0xff]   ;;  %v10681_v29 = vld [vmem:[%s14000_s2 + $0x624] ss:$16 sps:$4 sm:$0xff]  }
 0x47a   :  { %v5444_v0 = vadd.f32 %v5443_v55, %v3906_v50  ;;  %9182 = vmatpush1.bf16.msra.mxu1 %v10652_v23  ;;  %8855 = vmatprep.subr.bf16.mxu0 %v10657_v34  ;;  %v10675_v23 = vld [vmem:[%s14000_s2 + $0x604] ss:$16 sps:$4 sm:$0xff]  }
 0x47b   :  { %v2795_v4 = vpop.f32.mrb[208].mxu0  ;;  %9183 = vmatprep.subr.bf16.mxu1 %v10660_v58 }
 0x47c   :  { %v3919_v36 = vmax.f32 %v2795_v4, 0.0  ;;  %v3148_v49 = vpop.f32.mrb[208].mxu1  ;;  %v2797_v7 = vpop.f32.mrb[209].mxu0 }
 0x47d   :  { %v3921_v10 = vmax.f32 %v3148_v49, 0.0  ;;  %v3920_v2 = vmax.f32 %v2797_v7, 0.0  ;;  %v3150_v11 = vpop.f32.mrb[209].mxu1  ;;  %8856 = vmatpush1.bf16.msra.mxu0 %v10655_v63  ;;  %v2799_v39 = vpop.f32.mrb[210].mxu0  ;;  %v6162_v7 = vpack.c.b16 %v12114_v5, %v12114_v5  ;;  %v10687_v5 = vld [vmem:[%s14000_s2 + $0x644] ss:$16 sps:$4 sm:$0xff]  }
 0x47e   :  { %v5334_v12 = vadd.f32 %v5333_v17, %v3919_v36  ;;  %v3922_v25 = vmax.f32 %v3150_v11, 0.0  ;;  %9184 = vmatpush1.bf16.msra.mxu1 %v10658_v20  ;;  %v3935_v14 = vmax.f32 %v2799_v39, 0.0  ;;  %v3152_v16 = vpop.f32.mrb[210].mxu1  ;;  %v2801_v13 = vpop.f32.mrb[211].mxu0  ;;  %8857 = vmatprep.subr.bf16.mxu0 %v10663_v3  ;;  %v10679_v11 = vld [vmem:[%s14000_s2 + $0x620] ss:$16 sps:$4 sm:$0xff]  }
 0x47f   :  { %v5408_v6 = vadd.f32 %v5407_v61, %v3921_v10  ;;  %v5371_v30 = vadd.f32 %v5370_v62, %v3920_v2  ;;  %v3937_v9 = vmax.f32 %v3152_v16, 0.0  ;;  %v3936_v15 = vmax.f32 %v2801_v13, 0.0  ;;  %v3154_v18 = vpop.f32.mrb[211].mxu1  ;;  %9185 = vmatprep.subr.bf16.mxu1 %v10666_v59  ;;  %v10676_v62 = vld [vmem:[%s14000_s2 + $0x608] ss:$16 sps:$4 sm:$0xff]  }
 0x480   :  { %v5445_v21 = vadd.f32 %v5444_v0, %v3922_v25  ;;  %v5335_v33 = vadd.f32 %v5334_v12, %v3935_v14  ;;  %v3938_v35 = vmax.f32 %v3154_v18, 0.0  ;;  %v10690_v25 = vld [vmem:[%s14000_s2 + $0x64c] ss:$16 sps:$4 sm:$0xff]   ;;  %v10688_v18 = vld [vmem:[%s14000_s2 + $0x648] ss:$16 sps:$4 sm:$0xff]  }
 0x481   :  { %v5409_v43 = vadd.f32 %v5408_v6, %v3937_v9  ;;  %v5372_v40 = vadd.f32 %v5371_v30, %v3936_v15  ;;  %8858 = vmatpush1.bf16.msra.mxu0 %v10661_v8  ;;  %v10684_v8 = vld [vmem:[%s14000_s2 + $0x62c] ss:$16 sps:$4 sm:$0xff]  }
 0x482   :  { %v5446_v24 = vadd.f32 %v5445_v21, %v3938_v35  ;;  %9186 = vmatpush1.bf16.msra.mxu1 %v10664_v28  ;;  %8859 = vmatprep.subr.bf16.mxu0 %v10669_v37  ;;  %v10682_v28 = vld [vmem:[%s14000_s2 + $0x628] ss:$16 sps:$4 sm:$0xff]   ;;  %v10685_v37 = vld [vmem:[%s14000_s2 + $0x640] ss:$16 sps:$4 sm:$0xff]  }
 0x483   :  { %v2805_v46 = vpop.f32.mrb[212].mxu0  ;;  %9187 = vmatprep.subr.bf16.mxu1 %v10672_v31 }
 0x484   :  { %v3951_v45 = vmax.f32 %v2805_v46, 0.0  ;;  %v3158_v27 = vpop.f32.mrb[212].mxu1  ;;  %v2807_v19 = vpop.f32.mrb[213].mxu0 }
 0x485   :  { %v3953_v34 = vmax.f32 %v3158_v27, 0.0  ;;  %v3952_v52 = vmax.f32 %v2807_v19, 0.0  ;;  %v3160_v48 = vpop.f32.mrb[213].mxu1  ;;  %8860 = vmatpush1.bf16.msra.mxu0 %v10667_v56  ;;  %v2809_v54 = vpop.f32.mrb[214].mxu0 }
 0x486   :  { %v5336_v58 = vadd.f32 %v5335_v33, %v3951_v45  ;;  %v3954_v55 = vmax.f32 %v3160_v48, 0.0  ;;  %9188 = vmatpush1.bf16.msra.mxu1 %v10670_v32  ;;  %v3967_v17 = vmax.f32 %v2809_v54, 0.0  ;;  %v3162_v50 = vpop.f32.mrb[214].mxu1  ;;  %v2811_v61 = vpop.f32.mrb[215].mxu0  ;;  %8870 = vmatprep.subr.bf16.mxu0 %v10675_v23  ;;  %v10691_v48 = vld [vmem:[%s14000_s2 + $0x660] ss:$16 sps:$4 sm:$0xff]  }
 0x487   :  { %v5410_v63 = vadd.f32 %v5409_v43, %v3953_v34  ;;  %v5373_v0 = vadd.f32 %v5372_v40, %v3952_v52  ;;  %v3969_v20 = vmax.f32 %v3162_v50, 0.0  ;;  %v3968_v3 = vmax.f32 %v2811_v61, 0.0  ;;  %v3164_v4 = vpop.f32.mrb[215].mxu1  ;;  %9198 = vmatprep.subr.bf16.mxu1 %v10678_v26  ;;  %v10693_v40 = vld [vmem:[%s14000_s2 + $0x664] ss:$16 sps:$4 sm:$0xff]  }
 0x488   :  { %v5447_v59 = vadd.f32 %v5446_v24, %v3954_v55  ;;  %v5337_v36 = vadd.f32 %v5336_v58, %v3967_v17  ;;  %v3970_v49 = vmax.f32 %v3164_v4, 0.0  ;;  %8862 = vmatmul.mubr.bf16.vlgmr.msra.gmra.mrb[0].mxu0 %v6159_v57  ;;  %v10696_v26 = vld [vmem:[%s14000_s2 + $0x66c] ss:$16 sps:$4 sm:$0xff]   ;;  %v10700_v4 = vld [vmem:[%s14000_s2 + $0x688] ss:$16 sps:$4 sm:$0xff]  }
 0x489   :  { %v5411_v10 = vadd.f32 %v5410_v63, %v3969_v20  ;;  %v5374_v2 = vadd.f32 %v5373_v0, %v3968_v3  ;;  %9190 = vmatmul.mubr.bf16.vlgmr.msra.gmra.mrb[0].mxu1 %v6159_v57  ;;  %8871 = vmatpush1.bf16.msra.mxu0 %v10673_v22  ;;  %v10694_v22 = vld [vmem:[%s14000_s2 + $0x668] ss:$16 sps:$4 sm:$0xff]   ;;  %v10699_v57 = vld [vmem:[%s14000_s2 + $0x684] ss:$16 sps:$4 sm:$0xff]   ;;  %v10702_v55 = vld [vmem:[%s14000_s2 + $0x68c] ss:$16 sps:$4 sm:$0xff]  }
 0x48a   :  { %v5448_v39 = vadd.f32 %v5447_v59, %v3970_v49  ;;  %8902 = vmatprep.mubr.bf16.mxu0 %v6162_v7  ;;  %9199 = vmatpush1.bf16.msra.mxu1 %v10676_v62  ;;  %v10697_v62 = vld [vmem:[%s14000_s2 + $0x680] ss:$16 sps:$4 sm:$0xff]  }
 0x48b   :  { %9230 = vmatprep.mubr.bf16.mxu1 %v6162_v7  ;;  %v2815_v12 = vpop.f32.mrb[216].mxu0  ;;  %8872 = vmatprep.subr.bf16.mxu0 %v10681_v29 }
 0x48c   :  { %v3983_v14 = vmax.f32 %v2815_v12, 0.0  ;;  %v3168_v16 = vpop.f32.mrb[216].mxu1  ;;  %9200 = vmatprep.subr.bf16.mxu1 %v10684_v8  ;;  %v2817_v13 = vpop.f32.mrb[217].mxu0  ;;  %v10705_v8 = vld [vmem:[%s14000_s2 + $0x6a4] ss:$16 sps:$4 sm:$0xff]  }
 0x48d   :  { %v3985_v6 = vmax.f32 %v3168_v16, 0.0  ;;  %v3984_v30 = vmax.f32 %v2817_v13, 0.0  ;;  %v3170_v9 = vpop.f32.mrb[217].mxu1  ;;  %8873 = vmatpush1.bf16.msra.mxu0 %v10679_v11  ;;  %v2819_v15 = vpop.f32.mrb[218].mxu0 }
 0x48e   :  { %v5338_v31 = vadd.f32 %v5337_v36, %v3983_v14  ;;  %v3986_v21 = vmax.f32 %v3170_v9, 0.0  ;;  %9201 = vmatpush1.bf16.msra.mxu1 %v10682_v28  ;;  %v3999_v33 = vmax.f32 %v2819_v15, 0.0  ;;  %v3172_v35 = vpop.f32.mrb[218].mxu1  ;;  %v2821_v43 = vpop.f32.mrb[219].mxu0  ;;  %8874 = vmatprep.subr.bf16.mxu0 %v10687_v5  ;;  %v10708_v5 = vld [vmem:[%s14000_s2 + $0x6ac] ss:$16 sps:$4 sm:$0xff]  }
 0x48f   :  { %v5412_v56 = vadd.f32 %v5411_v10, %v3985_v6  ;;  %v5375_v24 = vadd.f32 %v5374_v2, %v3984_v30  ;;  %v4001_v32 = vmax.f32 %v3172_v35, 0.0  ;;  %v4000_v23 = vmax.f32 %v2821_v43, 0.0  ;;  %v3174_v46 = vpop.f32.mrb[219].mxu1  ;;  %9202 = vmatprep.subr.bf16.mxu1 %v10690_v25  ;;  %v10706_v30 = vld [vmem:[%s14000_s2 + $0x6a8] ss:$16 sps:$4 sm:$0xff]  }
 0x490   :  { %v5449_v45 = vadd.f32 %v5448_v39, %v3986_v21  ;;  %v5339_v27 = vadd.f32 %v5338_v31, %v3999_v33  ;;  %v4002_v19 = vmax.f32 %v3174_v46, 0.0  ;;  %v10711_v9 = vld [vmem:[%s14000_s2 + $0x6c4] ss:$16 sps:$4 sm:$0xff]   ;;  %v10709_v35 = vld [vmem:[%s14000_s2 + $0x6c0] ss:$16 sps:$4 sm:$0xff]  }
 0x491   :  { %v5413_v34 = vadd.f32 %v5412_v56, %v4001_v32  ;;  %v5376_v52 = vadd.f32 %v5375_v24, %v4000_v23  ;;  %8875 = vmatpush1.bf16.msra.mxu0 %v10685_v37  ;;  %v10703_v37 = vld [vmem:[%s14000_s2 + $0x6a0] ss:$16 sps:$4 sm:$0xff]   ;;  %v10712_v32 = vld [vmem:[%s14000_s2 + $0x6c8] ss:$16 sps:$4 sm:$0xff]  }
 0x492   :  { %v5450_v54 = vadd.f32 %v5449_v45, %v4002_v19  ;;  %9203 = vmatpush1.bf16.msra.mxu1 %v10688_v18  ;;  %8876 = vmatprep.subr.bf16.mxu0 %v10693_v40  ;;  %v10714_v18 = vld [vmem:[%s14000_s2 + $0x6cc] ss:$16 sps:$4 sm:$0xff]   ;;  %v10717_v19 = vld [vmem:[%s14000_s2 + $0x6e4] ss:$16 sps:$4 sm:$0xff]  }
 0x493   :  { %v2825_v58 = vpop.f32.mrb[220].mxu0  ;;  %9204 = vmatprep.subr.bf16.mxu1 %v10696_v26 }
 0x494   :  { %v4015_v17 = vmax.f32 %v2825_v58, 0.0  ;;  %v3178_v50 = vpop.f32.mrb[220].mxu1  ;;  %v2827_v61 = vpop.f32.mrb[221].mxu0 }
 0x495   :  { %v4017_v63 = vmax.f32 %v3178_v50, 0.0  ;;  %v4016_v0 = vmax.f32 %v2827_v61, 0.0  ;;  %v3180_v20 = vpop.f32.mrb[221].mxu1  ;;  %8877 = vmatpush1.bf16.msra.mxu0 %v10691_v48  ;;  %v2829_v3 = vpop.f32.mrb[222].mxu0 }
 0x496   :  { %v5340_v29 = vadd.f32 %v5339_v27, %v4015_v17  ;;  %v4018_v59 = vmax.f32 %v3180_v20, 0.0  ;;  %9205 = vmatpush1.bf16.msra.mxu1 %v10694_v22  ;;  %v4031_v36 = vmax.f32 %v2829_v3, 0.0  ;;  %v3182_v49 = vpop.f32.mrb[222].mxu1  ;;  %v2831_v7 = vpop.f32.mrb[223].mxu0  ;;  %8878 = vmatprep.subr.bf16.mxu0 %v10699_v57  ;;  %v10720_v57 = vld [vmem:[%s14000_s2 + $0x6ec] ss:$16 sps:$4 sm:$0xff]  }
 0x497   :  { %v5414_v10 = vadd.f32 %v5413_v34, %v4017_v63  ;;  %v5377_v2 = vadd.f32 %v5376_v52, %v4016_v0  ;;  %v4033_v11 = vmax.f32 %v3182_v49, 0.0  ;;  %v4032_v39 = vmax.f32 %v2831_v7, 0.0  ;;  %v3184_v28 = vpop.f32.mrb[223].mxu1  ;;  %9206 = vmatprep.subr.bf16.mxu1 %v10702_v55  ;;  %v10718_v0 = vld [vmem:[%s14000_s2 + $0x6e8] ss:$16 sps:$4 sm:$0xff]  }
 0x498   :  { %v5451_v12 = vadd.f32 %v5450_v54, %v4018_v59  ;;  %v5341_v25 = vadd.f32 %v5340_v29, %v4031_v36  ;;  %v4034_v14 = vmax.f32 %v3184_v28, 0.0  ;;  %v10723_v20 = vld [vmem:[%s14000_s2 + $0x704] ss:$16 sps:$4 sm:$0xff]   ;;  %v10721_v49 = vld [vmem:[%s14000_s2 + $0x700] ss:$16 sps:$4 sm:$0xff]  }
 0x499   :  { %v5415_v16 = vadd.f32 %v5414_v10, %v4033_v11  ;;  %v5378_v13 = vadd.f32 %v5377_v2, %v4032_v39  ;;  %8879 = vmatpush1.bf16.msra.mxu0 %v10697_v62  ;;  %v10715_v62 = vld [vmem:[%s14000_s2 + $0x6e0] ss:$16 sps:$4 sm:$0xff]   ;;  %v10724_v11 = vld [vmem:[%s14000_s2 + $0x708] ss:$16 sps:$4 sm:$0xff]  }
 0x49a   :  { %v5452_v6 = vadd.f32 %v5451_v12, %v4034_v14  ;;  %9207 = vmatpush1.bf16.msra.mxu1 %v10700_v4  ;;  %8880 = vmatprep.subr.bf16.mxu0 %v10705_v8  ;;  %v10726_v4 = vld [vmem:[%s14000_s2 + $0x70c] ss:$16 sps:$4 sm:$0xff]   ;;  %v10729_v14 = vld [vmem:[%s14000_s2 + $0x724] ss:$16 sps:$4 sm:$0xff]  }
 0x49b   :  { %v2835_v15 = vpop.f32.mrb[224].mxu0  ;;  %9208 = vmatprep.subr.bf16.mxu1 %v10708_v5 }
 0x49c   :  { %v4047_v31 = vmax.f32 %v2835_v15, 0.0  ;;  %v3188_v21 = vpop.f32.mrb[224].mxu1  ;;  %v2837_v33 = vpop.f32.mrb[225].mxu0 }
 0x49d   :  { %v4049_v43 = vmax.f32 %v3188_v21, 0.0  ;;  %v4048_v40 = vmax.f32 %v2837_v33, 0.0  ;;  %v3190_v56 = vpop.f32.mrb[225].mxu1  ;;  %8881 = vmatpush1.bf16.msra.mxu0 %v10703_v37  ;;  %v2839_v24 = vpop.f32.mrb[226].mxu0 }
 0x49e   :  { %v5342_v23 = vadd.f32 %v5341_v25, %v4047_v31  ;;  %v4050_v46 = vmax.f32 %v3190_v56, 0.0  ;;  %9209 = vmatpush1.bf16.msra.mxu1 %v10706_v30  ;;  %v4063_v26 = vmax.f32 %v2839_v24, 0.0  ;;  %v3192_v45 = vpop.f32.mrb[226].mxu1  ;;  %v2841_v27 = vpop.f32.mrb[227].mxu0  ;;  %8882 = vmatprep.subr.bf16.mxu0 %v10711_v9  ;;  %v10732_v9 = vld [vmem:[%s14000_s2 + $0x72c] ss:$16 sps:$4 sm:$0xff]  }
 0x49f   :  { %v5416_v34 = vadd.f32 %v5415_v16, %v4049_v43  ;;  %v5379_v52 = vadd.f32 %v5378_v13, %v4048_v40  ;;  %v4065_v48 = vmax.f32 %v3192_v45, 0.0  ;;  %v4064_v54 = vmax.f32 %v2841_v27, 0.0  ;;  %v3194_v22 = vpop.f32.mrb[227].mxu1  ;;  %9210 = vmatprep.subr.bf16.mxu1 %v10714_v18  ;;  %v10730_v40 = vld [vmem:[%s14000_s2 + $0x728] ss:$16 sps:$4 sm:$0xff]  }
 0x4a0   :  { %v5453_v58 = vadd.f32 %v5452_v6, %v4050_v46  ;;  %v5343_v55 = vadd.f32 %v5342_v23, %v4063_v26  ;;  %v4066_v17 = vmax.f32 %v3194_v22, 0.0  ;;  %v10735_v56 = vld [vmem:[%s14000_s2 + $0x744] ss:$16 sps:$4 sm:$0xff]   ;;  %v10733_v45 = vld [vmem:[%s14000_s2 + $0x740] ss:$16 sps:$4 sm:$0xff]  }
 0x4a1   :  { %v5417_v50 = vadd.f32 %v5416_v34, %v4065_v48  ;;  %v5380_v61 = vadd.f32 %v5379_v52, %v4064_v54  ;;  %8883 = vmatpush1.bf16.msra.mxu0 %v10709_v35  ;;  %v10727_v35 = vld [vmem:[%s14000_s2 + $0x720] ss:$16 sps:$4 sm:$0xff]   ;;  %v10736_v48 = vld [vmem:[%s14000_s2 + $0x748] ss:$16 sps:$4 sm:$0xff]  }
 0x4a2   :  { %v5454_v63 = vadd.f32 %v5453_v58, %v4066_v17  ;;  %9211 = vmatpush1.bf16.msra.mxu1 %v10712_v32  ;;  %8884 = vmatprep.subr.bf16.mxu0 %v10717_v19  ;;  %v10738_v32 = vld [vmem:[%s14000_s2 + $0x74c] ss:$16 sps:$4 sm:$0xff]   ;;  %v10741_v17 = vld [vmem:[%s14000_s2 + $0x764] ss:$16 sps:$4 sm:$0xff]  }
 0x4a3   :  { %v2845_v3 = vpop.f32.mrb[228].mxu0  ;;  %9212 = vmatprep.subr.bf16.mxu1 %v10720_v57 }
 0x4a4   :  { %v4079_v29 = vmax.f32 %v2845_v3, 0.0  ;;  %v3198_v59 = vpop.f32.mrb[228].mxu1  ;;  %v2847_v36 = vpop.f32.mrb[229].mxu0 }
 0x4a5   :  { %v4081_v7 = vmax.f32 %v3198_v59, 0.0  ;;  %v4080_v8 = vmax.f32 %v2847_v36, 0.0  ;;  %v3200_v10 = vpop.f32.mrb[229].mxu1  ;;  %8885 = vmatpush1.bf16.msra.mxu0 %v10715_v62  ;;  %v2849_v2 = vpop.f32.mrb[230].mxu0 }
 0x4a6   :  { %v5344_v39 = vadd.f32 %v5343_v55, %v4079_v29  ;;  %v4082_v28 = vmax.f32 %v3200_v10, 0.0  ;;  %9213 = vmatpush1.bf16.msra.mxu1 %v10718_v0  ;;  %v4095_v5 = vmax.f32 %v2849_v2, 0.0  ;;  %v3202_v12 = vpop.f32.mrb[230].mxu1  ;;  %v2851_v25 = vpop.f32.mrb[231].mxu0  ;;  %8886 = vmatprep.subr.bf16.mxu0 %v10723_v20  ;;  %v10744_v20 = vld [vmem:[%s14000_s2 + $0x76c] ss:$16 sps:$4 sm:$0xff]  }
 0x4a7   :  { %v5418_v16 = vadd.f32 %v5417_v50, %v4081_v7  ;;  %v5381_v13 = vadd.f32 %v5380_v61, %v4080_v8  ;;  %v4097_v37 = vmax.f32 %v3202_v12, 0.0  ;;  %v4096_v6 = vmax.f32 %v2851_v25, 0.0  ;;  %v3204_v30 = vpop.f32.mrb[231].mxu1  ;;  %9214 = vmatprep.subr.bf16.mxu1 %v10726_v4  ;;  %v10742_v8 = vld [vmem:[%s14000_s2 + $0x768] ss:$16 sps:$4 sm:$0xff]  }
 0x4a8   :  { %v5455_v15 = vadd.f32 %v5454_v63, %v4082_v28  ;;  %v5345_v18 = vadd.f32 %v5344_v39, %v4095_v5  ;;  %v4098_v31 = vmax.f32 %v3204_v30, 0.0  ;;  %v10747_v10 = vld [vmem:[%s14000_s2 + $0x784] ss:$16 sps:$4 sm:$0xff]   ;;  %v10745_v12 = vld [vmem:[%s14000_s2 + $0x780] ss:$16 sps:$4 sm:$0xff]  }
 0x4a9   :  { %v5419_v21 = vadd.f32 %v5418_v16, %v4097_v37  ;;  %v5382_v33 = vadd.f32 %v5381_v13, %v4096_v6  ;;  %8887 = vmatpush1.bf16.msra.mxu0 %v10721_v49  ;;  %v10739_v49 = vld [vmem:[%s14000_s2 + $0x760] ss:$16 sps:$4 sm:$0xff]   ;;  %v10748_v37 = vld [vmem:[%s14000_s2 + $0x788] ss:$16 sps:$4 sm:$0xff]  }
 0x4aa   :  { %v5456_v43 = vadd.f32 %v5455_v15, %v4098_v31  ;;  %9215 = vmatpush1.bf16.msra.mxu1 %v10724_v11  ;;  %8888 = vmatprep.subr.bf16.mxu0 %v10729_v14  ;;  %v10750_v11 = vld [vmem:[%s14000_s2 + $0x78c] ss:$16 sps:$4 sm:$0xff]   ;;  %v10753_v31 = vld [vmem:[%s14000_s2 + $0x7a4] ss:$16 sps:$4 sm:$0xff]  }
 0x4ab   :  { %v2855_v24 = vpop.f32.mrb[232].mxu0  ;;  %9216 = vmatprep.subr.bf16.mxu1 %v10732_v9 }
 0x4ac   :  { %v4111_v23 = vmax.f32 %v2855_v24, 0.0  ;;  %v3208_v46 = vpop.f32.mrb[232].mxu1  ;;  %v2857_v26 = vpop.f32.mrb[233].mxu0 }
 0x4ad   :  { %v4113_v27 = vmax.f32 %v3208_v46, 0.0  ;;  %v4112_v19 = vmax.f32 %v2857_v26, 0.0  ;;  %v3210_v34 = vpop.f32.mrb[233].mxu1  ;;  %8889 = vmatpush1.bf16.msra.mxu0 %v10727_v35  ;;  %v2859_v52 = vpop.f32.mrb[234].mxu0 }
 0x4ae   :  { %v5346_v54 = vadd.f32 %v5345_v18, %v4111_v23  ;;  %v4114_v22 = vmax.f32 %v3210_v34, 0.0  ;;  %9217 = vmatpush1.bf16.msra.mxu1 %v10730_v40  ;;  %v4127_v57 = vmax.f32 %v2859_v52, 0.0  ;;  %v3212_v58 = vpop.f32.mrb[234].mxu1  ;;  %v2861_v55 = vpop.f32.mrb[235].mxu0  ;;  %8890 = vmatprep.subr.bf16.mxu0 %v10735_v56  ;;  %v10756_v56 = vld [vmem:[%s14000_s2 + $0x7ac] ss:$16 sps:$4 sm:$0xff]  }
 0x4af   :  { %v5420_v50 = vadd.f32 %v5419_v21, %v4113_v27  ;;  %v5383_v61 = vadd.f32 %v5382_v33, %v4112_v19  ;;  %v4129_v62 = vmax.f32 %v3212_v58, 0.0  ;;  %v4128_v63 = vmax.f32 %v2861_v55, 0.0  ;;  %v3214_v0 = vpop.f32.mrb[235].mxu1  ;;  %9218 = vmatprep.subr.bf16.mxu1 %v10738_v32  ;;  %v10754_v19 = vld [vmem:[%s14000_s2 + $0x7a8] ss:$16 sps:$4 sm:$0xff]  }
 0x4b0   :  { %v5457_v3 = vadd.f32 %v5456_v43, %v4114_v22  ;;  %v5347_v4 = vadd.f32 %v5346_v54, %v4127_v57  ;;  %v4130_v29 = vmax.f32 %v3214_v0, 0.0  ;;  %v10759_v34 = vld [vmem:[%s14000_s2 + $0x7c4] ss:$16 sps:$4 sm:$0xff]   ;;  %v10757_v58 = vld [vmem:[%s14000_s2 + $0x7c0] ss:$16 sps:$4 sm:$0xff]  }
 0x4b1   :  { %v5421_v59 = vadd.f32 %v5420_v50, %v4129_v62  ;;  %v5384_v36 = vadd.f32 %v5383_v61, %v4128_v63  ;;  %8891 = vmatpush1.bf16.msra.mxu0 %v10733_v45  ;;  %v10751_v45 = vld [vmem:[%s14000_s2 + $0x7a0] ss:$16 sps:$4 sm:$0xff]   ;;  %v10760_v62 = vld [vmem:[%s14000_s2 + $0x7c8] ss:$16 sps:$4 sm:$0xff]  }
 0x4b2   :  { %v5458_v7 = vadd.f32 %v5457_v3, %v4130_v29  ;;  %9219 = vmatpush1.bf16.msra.mxu1 %v10736_v48  ;;  %8892 = vmatprep.subr.bf16.mxu0 %v10741_v17  ;;  %v10762_v48 = vld [vmem:[%s14000_s2 + $0x7cc] ss:$16 sps:$4 sm:$0xff]   ;;  %v10765_v29 = vld [vmem:[%s14000_s2 + $0x7e4] ss:$16 sps:$4 sm:$0xff]  }
 0x4b3   :  { %v2865_v2 = vpop.f32.mrb[236].mxu0  ;;  %9220 = vmatprep.subr.bf16.mxu1 %v10744_v20 }
 0x4b4   :  { %v4143_v39 = vmax.f32 %v2865_v2, 0.0  ;;  %v3218_v28 = vpop.f32.mrb[236].mxu1  ;;  %v2867_v5 = vpop.f32.mrb[237].mxu0 }
 0x4b5   :  { %v4145_v25 = vmax.f32 %v3218_v28, 0.0  ;;  %v4144_v14 = vmax.f32 %v2867_v5, 0.0  ;;  %v3220_v16 = vpop.f32.mrb[237].mxu1  ;;  %8893 = vmatpush1.bf16.msra.mxu0 %v10739_v49  ;;  %v2869_v13 = vpop.f32.mrb[238].mxu0 }
 0x4b6   :  { %v5348_v6 = vadd.f32 %v5347_v4, %v4143_v39  ;;  %v4146_v30 = vmax.f32 %v3220_v16, 0.0  ;;  %9221 = vmatpush1.bf16.msra.mxu1 %v10742_v8  ;;  %v4159_v9 = vmax.f32 %v2869_v13, 0.0  ;;  %v3222_v15 = vpop.f32.mrb[238].mxu1  ;;  %v2871_v18 = vpop.f32.mrb[239].mxu0  ;;  %8894 = vmatprep.subr.bf16.mxu0 %v10747_v10  ;;  %v10768_v10 = vld [vmem:[%s14000_s2 + $0x7ec] ss:$16 sps:$4 sm:$0xff]  }
 0x4b7   :  { %v5422_v21 = vadd.f32 %v5421_v59, %v4145_v25  ;;  %v5385_v33 = vadd.f32 %v5384_v36, %v4144_v14  ;;  %v4161_v35 = vmax.f32 %v3222_v15, 0.0  ;;  %v4160_v43 = vmax.f32 %v2871_v18, 0.0  ;;  %v3224_v40 = vpop.f32.mrb[239].mxu1  ;;  %9222 = vmatprep.subr.bf16.mxu1 %v10750_v11  ;;  %v10766_v14 = vld [vmem:[%s14000_s2 + $0x7e8] ss:$16 sps:$4 sm:$0xff]  }
 0x4b8   :  { %v5459_v24 = vadd.f32 %v5458_v7, %v4146_v30  ;;  %v5349_v32 = vadd.f32 %v5348_v6, %v4159_v9  ;;  %v4162_v23 = vmax.f32 %v3224_v40, 0.0  ;;  %v10771_v16 = vld [vmem:[%s14000_s2 + $0x804] ss:$16 sps:$4 sm:$0xff]  }
 0x4b9   :  { %v5423_v46 = vadd.f32 %v5422_v21, %v4161_v35  ;;  %v5386_v26 = vadd.f32 %v5385_v33, %v4160_v43  ;;  %8895 = vmatpush1.bf16.msra.mxu0 %v10745_v12  ;;  %v10763_v12 = vld [vmem:[%s14000_s2 + $0x7e0] ss:$16 sps:$4 sm:$0xff]   ;;  %v6161_v35 = vpack.c.b16 %v12101_v42, %v12101_v42  ;;  %v10777_v42 = vld [vmem:[%s14000_s2 + $0x824] ss:$16 sps:$4 sm:$0xff]  }
 0x4ba   :  { %v5460_v27 = vadd.f32 %v5459_v24, %v4162_v23  ;;  %9223 = vmatpush1.bf16.msra.mxu1 %v10748_v37  ;;  %8896 = vmatprep.subr.bf16.mxu0 %v10753_v31  ;;  %v10774_v37 = vld [vmem:[%s14000_s2 + $0x80c] ss:$16 sps:$4 sm:$0xff]   ;;  %v10769_v33 = vld [vmem:[%s14000_s2 + $0x800] ss:$16 sps:$4 sm:$0xff]   ;;  %v10772_v23 = vld [vmem:[%s14000_s2 + $0x808] ss:$16 sps:$4 sm:$0xff]  }
 0x4bb   :  { %v2875_v52 = vpop.f32.mrb[240].mxu0  ;;  %9224 = vmatprep.subr.bf16.mxu1 %v10756_v56 }
 0x4bc   :  { %v4175_v54 = vmax.f32 %v2875_v52, 0.0  ;;  %v3228_v22 = vpop.f32.mrb[240].mxu1  ;;  %v2877_v57 = vpop.f32.mrb[241].mxu0 }
 0x4bd   :  { %v4177_v55 = vmax.f32 %v3228_v22, 0.0  ;;  %v4176_v17 = vmax.f32 %v2877_v57, 0.0  ;;  %v3230_v50 = vpop.f32.mrb[241].mxu1  ;;  %8897 = vmatpush1.bf16.msra.mxu0 %v10751_v45  ;;  %v2879_v61 = vpop.f32.mrb[242].mxu0  ;;  %v10780_v22 = vld [vmem:[%s14000_s2 + $0x82c] ss:$16 sps:$4 sm:$0xff]  }
 0x4be   :  { %v5350_v63 = vadd.f32 %v5349_v32, %v4175_v54  ;;  %v4178_v0 = vmax.f32 %v3230_v50, 0.0  ;;  %9225 = vmatpush1.bf16.msra.mxu1 %v10754_v19  ;;  %v4191_v20 = vmax.f32 %v2879_v61, 0.0  ;;  %v3232_v3 = vpop.f32.mrb[242].mxu1  ;;  %v2881_v4 = vpop.f32.mrb[243].mxu0  ;;  %8898 = vmatprep.subr.bf16.mxu0 %v10759_v34  ;;  %v6164_v54 = vpack.c.b16 %v12568_v1, %v12568_v1  ;;  %v10775_v50 = vld [vmem:[%s14000_s2 + $0x820] ss:$16 sps:$4 sm:$0xff]  }
 0x4bf   :  { %v5424_v59 = vadd.f32 %v5423_v46, %v4177_v55  ;;  %v5387_v36 = vadd.f32 %v5386_v26, %v4176_v17  ;;  %v4193_v49 = vmax.f32 %v3232_v3, 0.0  ;;  %v4192_v7 = vmax.f32 %v2881_v4, 0.0  ;;  %v3234_v8 = vpop.f32.mrb[243].mxu1  ;;  %9226 = vmatprep.subr.bf16.mxu1 %v10762_v48  ;;  %v10778_v1 = vld [vmem:[%s14000_s2 + $0x828] ss:$16 sps:$4 sm:$0xff]  }
 0x4c0   :  { %v5461_v2 = vadd.f32 %v5460_v27, %v4178_v0  ;;  %v5351_v11 = vadd.f32 %v5350_v63, %v4191_v20  ;;  %v4194_v39 = vmax.f32 %v3234_v8, 0.0  ;;  %v4766_v57 = vrot.slane %v12850_v60, 4  ;;  %v10783_v63 = vld [vmem:[%s14000_s2 + $0x844] ss:$16 sps:$4 sm:$0xff]   ;;  %v10786_v20 = vld [vmem:[%s14000_s2 + $0x84c] ss:$16 sps:$4 sm:$0xff]  }
 0x4c1   :  { %v5425_v28 = vadd.f32 %v5424_v59, %v4193_v49  ;;  %v5388_v5 = vadd.f32 %v5387_v36, %v4192_v7  ;;  %8899 = vmatpush1.bf16.msra.mxu0 %v10757_v58  ;;  %v4840_v58 = vrot.slane %v12852_v41, 4  ;;  %v4803_v61 = vrot.slane %v12854_v44, 4  ;;  %v10781_v36 = vld [vmem:[%s14000_s2 + $0x840] ss:$16 sps:$4 sm:$0xff]  }
 0x4c2   :  { %v5462_v25 = vadd.f32 %v5461_v2, %v4194_v39  ;;  %9227 = vmatpush1.bf16.msra.mxu1 %v10760_v62  ;;  %8900 = vmatprep.subr.bf16.mxu0 %v10765_v29  ;;  %v4877_v3 = vrot.slane %v12859_v47, 4  ;;  %v4767_v49 = vadd.f32 %v4766_v57, %v12850_v60  ;;  %v10784_v39 = vld [vmem:[%s14000_s2 + $0x848] ss:$16 sps:$4 sm:$0xff]   ;;  %v10789_v60 = vld [vmem:[%s14000_s2 + $0x864] ss:$16 sps:$4 sm:$0xff]  }
 0x4c3   :  { %v2885_v13 = vpop.f32.mrb[244].mxu0  ;;  %9228 = vmatprep.subr.bf16.mxu1 %v10768_v10  ;;  %v4841_v7 = vadd.f32 %v4840_v58, %v12852_v41  ;;  %v10796_v58 = vld [vmem:[%s14000_s2 + $0x888] ss:$16 sps:$4 sm:$0xff]  }
 0x4c4   :  { %v4207_v6 = vmax.f32 %v2885_v13, 0.0  ;;  %v3238_v30 = vpop.f32.mrb[244].mxu1  ;;  %v2887_v9 = vpop.f32.mrb[245].mxu0 }
 0x4c5   :  { %v4209_v15 = vmax.f32 %v3238_v30, 0.0  ;;  %v4208_v18 = vmax.f32 %v2887_v9, 0.0  ;;  %v3240_v31 = vpop.f32.mrb[245].mxu1  ;;  %8901 = vmatpush1.bf16.msra.mxu0 %v10763_v12  ;;  %v2889_v21 = vpop.f32.mrb[246].mxu0  ;;  %v4878_v9 = vadd.f32 %v4877_v3, %v12859_v47  ;;  %v10790_v47 = vld [vmem:[%s14000_s2 + $0x868] ss:$16 sps:$4 sm:$0xff]  }
 0x4c6   :  { %v5352_v43 = vadd.f32 %v5351_v11, %v4207_v6  ;;  %v4210_v40 = vmax.f32 %v3240_v31, 0.0  ;;  %9229 = vmatpush1.bf16.msra.mxu1 %v10766_v14  ;;  %v4223_v56 = vmax.f32 %v2889_v21, 0.0  ;;  %v3242_v24 = vpop.f32.mrb[246].mxu1  ;;  %v2891_v32 = vpop.f32.mrb[247].mxu0  ;;  %8911 = vmatprep.subr.bf16.mxu0 %v10771_v16  ;;  %v4768_v21 = vrot.slane %v4767_v49, 2 }
 0x4c7   :  { %v5426_v46 = vadd.f32 %v5425_v28, %v4209_v15  ;;  %v5389_v26 = vadd.f32 %v5388_v5, %v4208_v18  ;;  %v4225_v45 = vmax.f32 %v3242_v24, 0.0  ;;  %v4224_v27 = vmax.f32 %v2891_v32, 0.0  ;;  %v3244_v19 = vpop.f32.mrb[247].mxu1  ;;  %9239 = vmatprep.subr.bf16.mxu1 %v10774_v37  ;;  %v10795_v32 = vld [vmem:[%s14000_s2 + $0x884] ss:$16 sps:$4 sm:$0xff]  }
 0x4c8   :  { %v5463_v34 = vadd.f32 %v5462_v25, %v4210_v40  ;;  %v5353_v52 = vadd.f32 %v5352_v43, %v4223_v56  ;;  %v4226_v48 = vmax.f32 %v3244_v19, 0.0  ;;  %8903 = vmatmul.mubr.bf16.vlgmr.msra.gmra.mrb[0].mxu0 %v6161_v35  ;;  %v4804_v28 = vadd.f32 %v4803_v61, %v12854_v44  ;;  %v10792_v44 = vld [vmem:[%s14000_s2 + $0x86c] ss:$16 sps:$4 sm:$0xff]   ;;  %v10787_v40 = vld [vmem:[%s14000_s2 + $0x860] ss:$16 sps:$4 sm:$0xff]  }
 0x4c9   :  { %v5427_v55 = vadd.f32 %v5426_v46, %v4225_v45  ;;  %v5390_v17 = vadd.f32 %v5389_v26, %v4224_v27  ;;  %9231 = vmatmul.mubr.bf16.vlgmr.msra.gmra.mrb[0].mxu1 %v6161_v35  ;;  %8912 = vmatpush1.bf16.msra.mxu0 %v10769_v33  ;;  %v4842_v33 = vrot.slane %v4841_v7, 2  ;;  %v10798_v46 = vld [vmem:[%s14000_s2 + $0x88c] ss:$16 sps:$4 sm:$0xff]   ;;  %v4879_v26 = vrot.slane %v4878_v9, 2 }
 0x4ca   :  { %v5464_v62 = vadd.f32 %v5463_v34, %v4226_v48  ;;  %8943 = vmatprep.mubr.bf16.mxu0 %v6164_v54  ;;  %9240 = vmatpush1.bf16.msra.mxu1 %v10772_v23  ;;  %v4805_v56 = vrot.slane %v4804_v28, 2  ;;  %v4769_v34 = vadd.f32 %v4768_v21, %v4767_v49 }
 0x4cb   :  { %9271 = vmatprep.mubr.bf16.mxu1 %v6164_v54  ;;  %v2895_v0 = vpop.f32.mrb[248].mxu0  ;;  %8913 = vmatprep.subr.bf16.mxu0 %v10777_v42  ;;  %v10793_v42 = vld [vmem:[%s14000_s2 + $0x880] ss:$16 sps:$4 sm:$0xff]  }
 0x4cc   :  { %v4239_v4 = vmax.f32 %v2895_v0, 0.0  ;;  %v3248_v29 = vpop.f32.mrb[248].mxu1  ;;  %9241 = vmatprep.subr.bf16.mxu1 %v10780_v22  ;;  %v2897_v59 = vpop.f32.mrb[249].mxu0 }
 0x4cd   :  { %v4241_v8 = vmax.f32 %v3248_v29, 0.0  ;;  %v4240_v10 = vmax.f32 %v2897_v59, 0.0  ;;  %v3250_v2 = vpop.f32.mrb[249].mxu1  ;;  %8914 = vmatpush1.bf16.msra.mxu0 %v10775_v50  ;;  %v2899_v11 = vpop.f32.mrb[250].mxu0  ;;  %v10804_v59 = vld [vmem:[%s14000_s2 + $0x8ac] ss:$16 sps:$4 sm:$0xff]  }
 0x4ce   :  { %v5354_v5 = vadd.f32 %v5353_v52, %v4239_v4  ;;  %v4242_v12 = vmax.f32 %v3250_v2, 0.0  ;;  %9242 = vmatpush1.bf16.msra.mxu1 %v10778_v1  ;;  %v4255_v25 = vmax.f32 %v2899_v11, 0.0  ;;  %v3252_v14 = vpop.f32.mrb[250].mxu1  ;;  %v2901_v16 = vpop.f32.mrb[251].mxu0  ;;  %8915 = vmatprep.subr.bf16.mxu0 %v10783_v63  ;;  %v4843_v52 = vadd.f32 %v4842_v33, %v4841_v7  ;;  %v10801_v63 = vld [vmem:[%s14000_s2 + $0x8a4] ss:$16 sps:$4 sm:$0xff]  }
 0x4cf   :  { %v5428_v41 = vadd.f32 %v5427_v55, %v4241_v8  ;;  %v5391_v13 = vadd.f32 %v5390_v17, %v4240_v10  ;;  %v4257_v37 = vmax.f32 %v3252_v14, 0.0  ;;  %v4256_v6 = vmax.f32 %v2901_v16, 0.0  ;;  %v3254_v30 = vpop.f32.mrb[251].mxu1  ;;  %9243 = vmatprep.subr.bf16.mxu1 %v10786_v20  ;;  %v10799_v11 = vld [vmem:[%s14000_s2 + $0x8a0] ss:$16 sps:$4 sm:$0xff]  }
 0x4d0   :  { %v5465_v15 = vadd.f32 %v5464_v62, %v4242_v12  ;;  %v5355_v18 = vadd.f32 %v5354_v5, %v4255_v25  ;;  %v4258_v31 = vmax.f32 %v3254_v30, 0.0  ;;  %v4806_v55 = vadd.f32 %v4805_v56, %v4804_v28  ;;  %v10802_v12 = vld [vmem:[%s14000_s2 + $0x8a8] ss:$16 sps:$4 sm:$0xff]   ;;  %v10807_v25 = vld [vmem:[%s14000_s2 + $0x8c4] ss:$16 sps:$4 sm:$0xff]  }
 0x4d1   :  { %v5429_v35 = vadd.f32 %v5428_v41, %v4257_v37  ;;  %v5392_v43 = vadd.f32 %v5391_v13, %v4256_v6  ;;  %8916 = vmatpush1.bf16.msra.mxu0 %v10781_v36  ;;  %v4880_v36 = vadd.f32 %v4879_v26, %v4878_v9  ;;  %v4844_v14 = vrot.slane %v4843_v52, 1  ;;  %v10810_v13 = vld [vmem:[%s14000_s2 + $0x8cc] ss:$16 sps:$4 sm:$0xff]   ;;  %v10808_v33 = vld [vmem:[%s14000_s2 + $0x8c8] ss:$16 sps:$4 sm:$0xff]  }
 0x4d2   :  { %v5466_v24 = vadd.f32 %v5465_v15, %v4258_v31  ;;  %9244 = vmatpush1.bf16.msra.mxu1 %v10784_v39  ;;  %8917 = vmatprep.subr.bf16.mxu0 %v10789_v60  ;;  %v4770_v39 = vrot.slane %v4769_v34, 1  ;;  %v4807_v16 = vrot.slane %v4806_v55, 1  ;;  %v10805_v15 = vld [vmem:[%s14000_s2 + $0x8c0] ss:$16 sps:$4 sm:$0xff]  }
 0x4d3   :  { %v2905_v23 = vpop.f32.mrb[252].mxu0  ;;  %9245 = vmatprep.subr.bf16.mxu1 %v10792_v44  ;;  %v4881_v37 = vrot.slane %v4880_v36, 1 }
 0x4d4   :  { %v4271_v45 = vmax.f32 %v2905_v23, 0.0  ;;  %v3258_v27 = vpop.f32.mrb[252].mxu1  ;;  %v2907_v19 = vpop.f32.mrb[253].mxu0 }
 0x4d5   :  { %v4273_v48 = vmax.f32 %v3258_v27, 0.0  ;;  %v4272_v54 = vmax.f32 %v2907_v19, 0.0  ;;  %v3260_v22 = vpop.f32.mrb[253].mxu1  ;;  %8918 = vmatpush1.bf16.msra.mxu0 %v10787_v40  ;;  %v2909_v57 = vpop.f32.mrb[254].mxu0  ;;  %v4808_v40 = vadd.f32 %v4807_v16, %v4806_v55  ;;  %v10811_v27 = vld [vmem:[%s14000_s2 + $0x8e0] ss:$16 sps:$4 sm:$0xff]  }
 0x4d6   :  { %v5356_v17 = vadd.f32 %v5355_v18, %v4271_v45  ;;  %v4274_v50 = vmax.f32 %v3260_v22, 0.0  ;;  %9246 = vmatpush1.bf16.msra.mxu1 %v10790_v47  ;;  %v4287_v61 = vmax.f32 %v2909_v57, 0.0  ;;  %v3262_v62 = vpop.f32.mrb[254].mxu1  ;;  %v2911_v1 = vpop.f32.mrb[255].mxu0  ;;  %8919 = vmatprep.subr.bf16.mxu0 %v10795_v32  ;;  %v4771_v18 = vadd.f32 %v4770_v39, %v4769_v34  ;;  %v10816_v47 = vld [vmem:[%s14000_s2 + $0x8ec] ss:$16 sps:$4 sm:$0xff]  }
 0x4d7   :  { %v5430_v0 = vadd.f32 %v5429_v35, %v4273_v48  ;;  %v5393_v20 = vadd.f32 %v5392_v43, %v4272_v54  ;;  %v4289_v3 = vmax.f32 %v3262_v62, 0.0  ;;  %v4288_v4 = vmax.f32 %v2911_v1, 0.0  ;;  %v3264_v29 = vpop.f32.mrb[255].mxu1  ;;  %9247 = vmatprep.subr.bf16.mxu1 %v10798_v46  ;;  %v10813_v35 = vld [vmem:[%s14000_s2 + $0x8e4] ss:$16 sps:$4 sm:$0xff]  }
 0x4d8   :  { %v5467_v49 = vadd.f32 %v5466_v24, %v4274_v50  ;;  %v5357_v7 = vadd.f32 %v5356_v17, %v4287_v61  ;;  %v4290_v8 = vmax.f32 %v3264_v29, 0.0  ;;  %v4845_v43 = vadd.f32 %v4844_v14, %v4843_v52  ;;  %v10814_v52 = vld [vmem:[%s14000_s2 + $0x8e8] ss:$16 sps:$4 sm:$0xff]   ;;  %v10819_v48 = vld [vmem:[%s14000_s2 + $0x904] ss:$16 sps:$4 sm:$0xff]  }
 0x4d9   :  { %v5431_v10 = vadd.f32 %v5430_v0, %v4289_v3  ;;  %v5394_v2 = vadd.f32 %v5393_v20, %v4288_v4  ;;  %8920 = vmatpush1.bf16.msra.mxu0 %v10793_v42  ;;  %v4882_v32 = vadd.f32 %v4881_v37, %v4880_v36  ;;  %v5488_v19 = vmul.f32 0.00390625, %v4771_v18  ;;  %v10822_v55 = vld [vmem:[%s14000_s2 + $0x90c] ss:$16 sps:$4 sm:$0xff]   ;;  %v10820_v4 = vld [vmem:[%s14000_s2 + $0x908] ss:$16 sps:$4 sm:$0xff]  }
 0x4da   :  { %v5358_v28 = vrot.slane %v5357_v7, 4  ;;  %v5468_v5 = vadd.f32 %v5467_v49, %v4290_v8  ;;  %9248 = vmatpush1.bf16.msra.mxu1 %v10796_v58  ;;  %8921 = vmatprep.subr.bf16.mxu0 %v10801_v63  ;;  %v5490_v54 = vmul.f32 0.00390625, %v4845_v43  ;;  %v5489_v22 = vmul.f32 0.00390625, %v4808_v40  ;;  %v10817_v63 = vld [vmem:[%s14000_s2 + $0x900] ss:$16 sps:$4 sm:$0xff]  }
 0x4db   :  { %v5432_v60 = vrot.slane %v5431_v10, 4  ;;  %v5395_v41 = vrot.slane %v5394_v2, 4  ;;  %9249 = vmatprep.subr.bf16.mxu1 %v10804_v59  ;;  %v5491_v17 = vmul.f32 0.00390625, %v4882_v32  ;;  %v5520_v0 = vpack.c.bf16 %v5488_v19, %v5488_v19  ;;  %v10825_v29 = vld [vmem:[%s14000_s2 + $0x924] ss:$16 sps:$4 sm:$0xff]  }
 0x4dc   :  { %v5359_v6 = vadd.f32 %v5358_v28, %v5357_v7  ;;  %v5469_v30 = vrot.slane %v5468_v5, 4  ;;  %v5522_v59 = vpack.c.bf16 %v5490_v54, %v5490_v54  ;;  %v10828_v7 = vld [vmem:[%s14000_s2 + $0x92c] ss:$16 sps:$4 sm:$0xff]   ;;  %v5521_v8 = vpack.c.bf16 %v5489_v22, %v5489_v22  ;;  %v10823_v28 = vld [vmem:[%s14000_s2 + $0x920] ss:$16 sps:$4 sm:$0xff]  }
 0x4dd   :  { %v5433_v44 = vadd.f32 %v5432_v60, %v5431_v10  ;;  %v5396_v9 = vadd.f32 %v5395_v41, %v5394_v2  ;;  %8922 = vmatpush1.bf16.msra.mxu0 %v10799_v11  ;;  %v5523_v11 = vpack.c.bf16 %v5491_v17, %v5491_v17  ;;  %v10826_v14 = vld [vmem:[%s14000_s2 + $0x928] ss:$16 sps:$4 sm:$0xff]   ;;  %v10831_v16 = vld [vmem:[%s14000_s2 + $0x944] ss:$16 sps:$4 sm:$0xff]   ;;  %v10834_v37 = vld [vmem:[%s14000_s2 + $0x94c] ss:$16 sps:$4 sm:$0xff]  }
 0x4de   :  { %v5360_v31 = vrot.slane %v5359_v6, 2  ;;  %v5470_v21 = vadd.f32 %v5469_v30, %v5468_v5  ;;  %9250 = vmatpush1.bf16.msra.mxu1 %v10802_v12  ;;  %8923 = vmatprep.subr.bf16.mxu0 %v10807_v25  ;;  %v6118_v12 = vunpack.c.l.b16 %v5520_v0  ;;  %v6120_v41 = vunpack.c.l.b16 %v5522_v59  ;;  %v10840_v40 = vld [vmem:[%s14000_s2 + $0x96c] ss:$16 sps:$4 sm:$0xff]   ;;  %v10850_v19 = vld [vmem:[%s14000_s2 + $0x9a8] ss:$16 sps:$4 sm:$0xff]  }
 0x4df   :  { %v5434_v56 = vrot.slane %v5433_v44, 2  ;;  %v5397_v24 = vrot.slane %v5396_v9, 2  ;;  %9251 = vmatprep.subr.bf16.mxu1 %v10810_v13  ;;  %v10846_v32 = vld [vmem:[%s14000_s2 + $0x98c] ss:$16 sps:$4 sm:$0xff]   ;;  %v10861_v54 = vld [vmem:[%s14000_s2 + $0x9e4] ss:$16 sps:$4 sm:$0xff]  }
 0x4e0   :  { %v5361_v23 = vadd.f32 %v5360_v31, %v5359_v6  ;;  %v5471_v46 = vrot.slane %v5470_v21, 2  ;;  %v6119_v6 = vunpack.c.l.b16 %v5521_v8  ;;  %v10829_v31 = vld [vmem:[%s14000_s2 + $0x940] ss:$16 sps:$4 sm:$0xff]   ;;  %v10864_v22 = vld [vmem:[%s14000_s2 + $0x9ec] ss:$16 sps:$4 sm:$0xff]  }
 0x4e1   :  { %v5435_v26 = vadd.f32 %v5434_v56, %v5433_v44  ;;  %v5398_v45 = vadd.f32 %v5397_v24, %v5396_v9  ;;  %8924 = vmatpush1.bf16.msra.mxu0 %v10805_v15  ;;  %v6121_v9 = vunpack.c.l.b16 %v5523_v11  ;;  %v10835_v56 = vld [vmem:[%s14000_s2 + $0x960] ss:$16 sps:$4 sm:$0xff]   ;;  %v10838_v24 = vld [vmem:[%s14000_s2 + $0x968] ss:$16 sps:$4 sm:$0xff]   ;;  %v10870_v17 = vld [vmem:[%s14000_s2 + $0xa0c] ss:$16 sps:$4 sm:$0xff]  }
 0x4e2   :  { %v5362_v42 = vrot.slane %v5361_v23, 1  ;;  %v5472_v34 = vadd.f32 %v5471_v46, %v5470_v21  ;;  %9252 = vmatpush1.bf16.msra.mxu1 %v10808_v33  ;;  %8925 = vmatprep.subr.bf16.mxu0 %v10813_v35  ;;  %v10832_v33 = vld [vmem:[%s14000_s2 + $0x948] ss:$16 sps:$4 sm:$0xff]   ;;  %v10837_v35 = vld [vmem:[%s14000_s2 + $0x964] ss:$16 sps:$4 sm:$0xff]  }
 0x4e3   :  { %v5436_v57 = vrot.slane %v5435_v26, 1  ;;  %v5399_v58 = vrot.slane %v5398_v45, 1  ;;  %9253 = vmatprep.subr.bf16.mxu1 %v10816_v47  ;;  %v10843_v47 = vld [vmem:[%s14000_s2 + $0x984] ss:$16 sps:$4 sm:$0xff]   ;;  %v10844_v46 = vld [vmem:[%s14000_s2 + $0x988] ss:$16 sps:$4 sm:$0xff]  }
 0x4e4   :  { %v5363_v50 = vadd.f32 %v5362_v42, %v5361_v23  ;;  %v5473_v61 = vrot.slane %v5472_v34, 1  ;;  %v10841_v23 = vld [vmem:[%s14000_s2 + $0x980] ss:$16 sps:$4 sm:$0xff]   ;;  %v10855_v42 = vld [vmem:[%s14000_s2 + $0x9c4] ss:$16 sps:$4 sm:$0xff]  }
 0x4e5   :  { %v5437_v62 = vadd.f32 %v5436_v57, %v5435_v26  ;;  %v5400_v1 = vadd.f32 %v5399_v58, %v5398_v45  ;;  %8926 = vmatpush1.bf16.msra.mxu0 %v10811_v27  ;;  %v10849_v26 = vld [vmem:[%s14000_s2 + $0x9a4] ss:$16 sps:$4 sm:$0xff]   ;;  %v10852_v45 = vld [vmem:[%s14000_s2 + $0x9ac] ss:$16 sps:$4 sm:$0xff]   ;;  %v10847_v27 = vld [vmem:[%s14000_s2 + $0x9a0] ss:$16 sps:$4 sm:$0xff]  }
 0x4e6   :  { %v5504_v20 = vmul.f32 0.00390625, %v5363_v50  ;;  %v5474_v3 = vadd.f32 %v5473_v61, %v5472_v34  ;;  %9254 = vmatpush1.bf16.msra.mxu1 %v10814_v52  ;;  %8927 = vmatprep.subr.bf16.mxu0 %v10819_v48  ;;  %v10858_v34 = vld [vmem:[%s14000_s2 + $0x9cc] ss:$16 sps:$4 sm:$0xff]   ;;  %v10853_v52 = vld [vmem:[%s14000_s2 + $0x9c0] ss:$16 sps:$4 sm:$0xff]   ;;  %v6163_v61 = vpack.c.b16 %v12558_v53, %v12558_v53 }
 0x4e7   :  { %v5506_v36 = vmul.f32 0.00390625, %v5437_v62  ;;  %v5505_v49 = vmul.f32 0.00390625, %v5400_v1  ;;  %9255 = vmatprep.subr.bf16.mxu1 %v10822_v55  ;;  %v10856_v48 = vld [vmem:[%s14000_s2 + $0x9c8] ss:$16 sps:$4 sm:$0xff]   ;;  %v10859_v57 = vld [vmem:[%s14000_s2 + $0x9e0] ss:$16 sps:$4 sm:$0xff]  }
 0x4e8   :  { %v5536_v10 = vpack.c.bf16 %v5504_v20, %v5504_v20  ;;  %v5507_v2 = vmul.f32 0.00390625, %v5474_v3  ;;  %v10862_v58 = vld [vmem:[%s14000_s2 + $0x9e8] ss:$16 sps:$4 sm:$0xff]   ;;  %v10867_v55 = vld [vmem:[%s14000_s2 + $0xa04] ss:$16 sps:$4 sm:$0xff]  }
 0x4e9   :  { %v5538_v39 = vpack.c.bf16 %v5506_v36, %v5506_v36  ;;  %8928 = vmatpush1.bf16.msra.mxu0 %v10817_v63  ;;  %v5537_v5 = vpack.c.bf16 %v5505_v49, %v5505_v49  ;;  %v10865_v50 = vld [vmem:[%s14000_s2 + $0xa00] ss:$16 sps:$4 sm:$0xff]   ;;  %v10868_v62 = vld [vmem:[%s14000_s2 + $0xa08] ss:$16 sps:$4 sm:$0xff]   ;;  %v10873_v1 = vld [vmem:[%s14000_s2 + $0xa24] ss:$16 sps:$4 sm:$0xff]   ;;  %v6166_v63 = vpack.c.b16 %v12574_v38, %v12574_v38 }
 0x4ea   :  { %v6134_v25 = vunpack.c.l.b16 %v5536_v10  ;;  %9256 = vmatpush1.bf16.msra.mxu1 %v10820_v4  ;;  %8929 = vmatprep.subr.bf16.mxu0 %v10825_v29  ;;  %v5539_v60 = vpack.c.bf16 %v5507_v2, %v5507_v2  ;;  %v10876_v0 = vld [vmem:[%s14000_s2 + $0xa2c] ss:$16 sps:$4 sm:$0xff]   ;;  %v10871_v53 = vld [vmem:[%s14000_s2 + $0xa20] ss:$16 sps:$4 sm:$0xff]   ;;  %v10874_v20 = vld [vmem:[%s14000_s2 + $0xa28] ss:$16 sps:$4 sm:$0xff]  }
 0x4eb   :  { %v6136_v13 = vunpack.c.l.b16 %v5538_v39  ;;  %9257 = vmatprep.subr.bf16.mxu1 %v10828_v7  ;;  %v6135_v30 = vunpack.c.l.b16 %v5537_v5  ;;  %v10879_v38 = vld [vmem:[%s14000_s2 + $0xa44] ss:$16 sps:$4 sm:$0xff]   ;;  %v10882_v3 = vld [vmem:[%s14000_s2 + $0xa4c] ss:$16 sps:$4 sm:$0xff]   ;;  %v10877_v4 = vld [vmem:[%s14000_s2 + $0xa40] ss:$16 sps:$4 sm:$0xff]  }
 0x4ec   :  { %v13319_v44 = vsel %vm6138_vm2, %v6134_v25, %v6118_v12  ;;  %v6137_v15 = vunpack.c.l.b16 %v5539_v60  ;;  %v10880_v29 = vld [vmem:[%s14000_s2 + $0xa48] ss:$16 sps:$4 sm:$0xff]   ;;  %v10885_v59 = vld [vmem:[%s14000_s2 + $0xa64] ss:$16 sps:$4 sm:$0xff]   ;;  %v10888_v36 = vld [vmem:[%s14000_s2 + $0xa6c] ss:$16 sps:$4 sm:$0xff]  }
 0x4ed   :  { %v13322_v18 = vsel %vm6138_vm2, %v6136_v13, %v6120_v41  ;;  %8930 = vmatpush1.bf16.msra.mxu0 %v10823_v28  ;;  %v13328_v21 = vsel %vm6138_vm2, %v6135_v30, %v6119_v6  ;;  %v10883_v49 = vld [vmem:[%s14000_s2 + $0xa60] ss:$16 sps:$4 sm:$0xff]   ;;  %v10886_v7 = vld [vmem:[%s14000_s2 + $0xa68] ss:$16 sps:$4 sm:$0xff]   ;;  %v10891_v8 = vld [vmem:[%s14000_s2 + $0xa84] ss:$16 sps:$4 sm:$0xff]  }
 0x4ee   :  { %9258 = vmatpush1.bf16.msra.mxu1 %v10826_v14  ;;  %8931 = vmatprep.subr.bf16.mxu0 %v10831_v16  ;;  %v13337_v43 = vsel %vm6138_vm2, %v6137_v15, %v6121_v9  ;;  %v10894_v10 = vld [vmem:[%s14000_s2 + $0xa8c] ss:$16 sps:$4 sm:$0xff]   ;;  %v10889_v2 = vld [vmem:[%s14000_s2 + $0xa80] ss:$16 sps:$4 sm:$0xff]   ;;  %v10892_v11 = vld [vmem:[%s14000_s2 + $0xa88] ss:$16 sps:$4 sm:$0xff]  }
 0x4ef   :  { %9259 = vmatprep.subr.bf16.mxu1 %v10834_v37  ;;  %v10897_v39 = vld [vmem:[%s14000_s2 + $0xaa4] ss:$16 sps:$4 sm:$0xff]   ;;  %v10900_v28 = vld [vmem:[%s14000_s2 + $0xaac] ss:$16 sps:$4 sm:$0xff]   ;;  %v10895_v5 = vld [vmem:[%s14000_s2 + $0xaa0] ss:$16 sps:$4 sm:$0xff]  }
 0x4f0   :  { %v10898_v12 = vld [vmem:[%s14000_s2 + $0xaa8] ss:$16 sps:$4 sm:$0xff]   ;;  %v10903_v25 = vld [vmem:[%s14000_s2 + $0xac4] ss:$16 sps:$4 sm:$0xff]   ;;  %v10906_v14 = vld [vmem:[%s14000_s2 + $0xacc] ss:$16 sps:$4 sm:$0xff]  }
 0x4f1   :  { %8932 = vmatpush1.bf16.msra.mxu0 %v10829_v31  ;;  %v10901_v16 = vld [vmem:[%s14000_s2 + $0xac0] ss:$16 sps:$4 sm:$0xff]   ;;  %v10904_v60 = vld [vmem:[%s14000_s2 + $0xac8] ss:$16 sps:$4 sm:$0xff]   ;;  %v10909_v41 = vld [vmem:[%s14000_s2 + $0xae4] ss:$16 sps:$4 sm:$0xff]  }
 0x4f2   :  { %9260 = vmatpush1.bf16.msra.mxu1 %v10832_v33  ;;  %8933 = vmatprep.subr.bf16.mxu0 %v10837_v35  ;;  %v10912_v13 = vld [vmem:[%s14000_s2 + $0xaec] ss:$16 sps:$4 sm:$0xff]   ;;  %v10907_v37 = vld [vmem:[%s14000_s2 + $0xae0] ss:$16 sps:$4 sm:$0xff]   ;;  %v10910_v6 = vld [vmem:[%s14000_s2 + $0xae8] ss:$16 sps:$4 sm:$0xff]  }
 0x4f3   :  { %9261 = vmatprep.subr.bf16.mxu1 %v10840_v40  ;;  %v10915_v30 = vld [vmem:[%s14000_s2 + $0xb04] ss:$16 sps:$4 sm:$0xff]   ;;  %v10918_v9 = vld [vmem:[%s14000_s2 + $0xb0c] ss:$16 sps:$4 sm:$0xff]   ;;  %v10913_v15 = vld [vmem:[%s14000_s2 + $0xb00] ss:$16 sps:$4 sm:$0xff]  }
 0x4f4   :  { %v10916_v31 = vld [vmem:[%s14000_s2 + $0xb08] ss:$16 sps:$4 sm:$0xff]   ;;  %v10921_v33 = vld [vmem:[%s14000_s2 + $0xb24] ss:$16 sps:$4 sm:$0xff]   ;;  %v10924_v35 = vld [vmem:[%s14000_s2 + $0xb2c] ss:$16 sps:$4 sm:$0xff]  }
 0x4f5   :  { %8934 = vmatpush1.bf16.msra.mxu0 %v10835_v56  ;;  %v10919_v40 = vld [vmem:[%s14000_s2 + $0xb20] ss:$16 sps:$4 sm:$0xff]   ;;  %v10922_v56 = vld [vmem:[%s14000_s2 + $0xb28] ss:$16 sps:$4 sm:$0xff]  }
 0x4f6   :  { %9262 = vmatpush1.bf16.msra.mxu1 %v10838_v24  ;;  %8935 = vmatprep.subr.bf16.mxu0 %v10843_v47  ;;  %v10927_v24 = vld [vmem:[%s14000_s2 + $0xb44] ss:$16 sps:$4 sm:$0xff]   ;;  %v10930_v47 = vld [vmem:[%s14000_s2 + $0xb4c] ss:$16 sps:$4 sm:$0xff]  }
 0x4f7   :  { %9263 = vmatprep.subr.bf16.mxu1 %v10846_v32  ;;  %v10925_v32 = vld [vmem:[%s14000_s2 + $0xb40] ss:$16 sps:$4 sm:$0xff]  }
 0x4f9   :  { %8936 = vmatpush1.bf16.msra.mxu0 %v10841_v23  ;;  %v10928_v23 = vld [vmem:[%s14000_s2 + $0xb48] ss:$16 sps:$4 sm:$0xff]  }
 0x4fa   :  { %9264 = vmatpush1.bf16.msra.mxu1 %v10844_v46  ;;  %8937 = vmatprep.subr.bf16.mxu0 %v10849_v26  ;;  %v10933_v46 = vld [vmem:[%s14000_s2 + $0xb64] ss:$16 sps:$4 sm:$0xff]   ;;  %v10936_v26 = vld [vmem:[%s14000_s2 + $0xb6c] ss:$16 sps:$4 sm:$0xff]  }
 0x4fb   :  { %9265 = vmatprep.subr.bf16.mxu1 %v10852_v45  ;;  %v10931_v45 = vld [vmem:[%s14000_s2 + $0xb60] ss:$16 sps:$4 sm:$0xff]  }
 0x4fd   :  { %8938 = vmatpush1.bf16.msra.mxu0 %v10847_v27  ;;  %v10934_v27 = vld [vmem:[%s14000_s2 + $0xb68] ss:$16 sps:$4 sm:$0xff]  }
 0x4fe   :  { %9266 = vmatpush1.bf16.msra.mxu1 %v10850_v19  ;;  %8939 = vmatprep.subr.bf16.mxu0 %v10855_v42  ;;  %v10939_v19 = vld [vmem:[%s14000_s2 + $0xb84] ss:$16 sps:$4 sm:$0xff]   ;;  %v10942_v42 = vld [vmem:[%s14000_s2 + $0xb8c] ss:$16 sps:$4 sm:$0xff]  }
 0x4ff   :  { %9267 = vmatprep.subr.bf16.mxu1 %v10858_v34  ;;  %v10937_v34 = vld [vmem:[%s14000_s2 + $0xb80] ss:$16 sps:$4 sm:$0xff]  }
 0x501   :  { %8940 = vmatpush1.bf16.msra.mxu0 %v10853_v52  ;;  %v10940_v52 = vld [vmem:[%s14000_s2 + $0xb88] ss:$16 sps:$4 sm:$0xff]  }
 0x502   :  { %9268 = vmatpush1.bf16.msra.mxu1 %v10856_v48  ;;  %8941 = vmatprep.subr.bf16.mxu0 %v10861_v54  ;;  %v10945_v48 = vld [vmem:[%s14000_s2 + $0xba4] ss:$16 sps:$4 sm:$0xff]   ;;  %v10948_v54 = vld [vmem:[%s14000_s2 + $0xbac] ss:$16 sps:$4 sm:$0xff]  }
 0x503   :  { %9269 = vmatprep.subr.bf16.mxu1 %v10864_v22  ;;  %v10943_v22 = vld [vmem:[%s14000_s2 + $0xba0] ss:$16 sps:$4 sm:$0xff]  }
 0x505   :  { %8942 = vmatpush1.bf16.msra.mxu0 %v10859_v57  ;;  %v10946_v57 = vld [vmem:[%s14000_s2 + $0xba8] ss:$16 sps:$4 sm:$0xff]  }
 0x506   :  { %9270 = vmatpush1.bf16.msra.mxu1 %v10862_v58  ;;  %8952 = vmatprep.subr.bf16.mxu0 %v10867_v55  ;;  %v10951_v58 = vld [vmem:[%s14000_s2 + $0xbc4] ss:$16 sps:$4 sm:$0xff]   ;;  %v10954_v55 = vld [vmem:[%s14000_s2 + $0xbcc] ss:$16 sps:$4 sm:$0xff]  }
 0x507   :  { %9280 = vmatprep.subr.bf16.mxu1 %v10870_v17  ;;  %v10949_v17 = vld [vmem:[%s14000_s2 + $0xbc0] ss:$16 sps:$4 sm:$0xff]  }
 0x508   :  { %8944 = vmatmul.mubr.bf16.vlgmr.msra.gmra.mrb[0].mxu0 %v6163_v61 }
 0x509   :  { %9272 = vmatmul.mubr.bf16.vlgmr.msra.gmra.mrb[0].mxu1 %v6163_v61  ;;  %8953 = vmatpush1.bf16.msra.mxu0 %v10865_v50  ;;  %v10952_v50 = vld [vmem:[%s14000_s2 + $0xbc8] ss:$16 sps:$4 sm:$0xff]   ;;  %v10957_v61 = vld [vmem:[%s14000_s2 + $0xbe4] ss:$16 sps:$4 sm:$0xff]  }
 0x50a   :  { %8984 = vmatprep.mubr.bf16.mxu0 %v6166_v63  ;;  %9281 = vmatpush1.bf16.msra.mxu1 %v10868_v62  ;;  %v10960_v62 = vld [vmem:[%s14000_s2 + $0xbec] ss:$16 sps:$4 sm:$0xff]  }
 0x50b   :  { %9312 = vmatprep.mubr.bf16.mxu1 %v6166_v63  ;;  %8954 = vmatprep.subr.bf16.mxu0 %v10873_v1  ;;  %v10955_v1 = vld [vmem:[%s14000_s2 + $0xbe0] ss:$16 sps:$4 sm:$0xff]   ;;  %v10958_v63 = vld [vmem:[%s14000_s2 + $0xbe8] ss:$16 sps:$4 sm:$0xff]  }
 0x50c   :  { %9282 = vmatprep.subr.bf16.mxu1 %v10876_v0  ;;  %v10963_v0 = vld [vmem:[%s14000_s2 + $0xc04] ss:$16 sps:$4 sm:$0xff]  }
 0x50d   :  { %8955 = vmatpush1.bf16.msra.mxu0 %v10871_v53  ;;  %v10966_v53 = vld [vmem:[%s14000_s2 + $0xc0c] ss:$16 sps:$4 sm:$0xff]  }
 0x50e   :  { %9283 = vmatpush1.bf16.msra.mxu1 %v10874_v20  ;;  %8956 = vmatprep.subr.bf16.mxu0 %v10879_v38  ;;  %v10961_v20 = vld [vmem:[%s14000_s2 + $0xc00] ss:$16 sps:$4 sm:$0xff]   ;;  %v6165_v38 = vpack.c.b16 %v12561_v51, %v12561_v51 }
 0x50f   :  { %9284 = vmatprep.subr.bf16.mxu1 %v10882_v3  ;;  %v10964_v3 = vld [vmem:[%s14000_s2 + $0xc08] ss:$16 sps:$4 sm:$0xff]   ;;  %v10967_v51 = vld [vmem:[%s14000_s2 + $0xc20] ss:$16 sps:$4 sm:$0xff]  }
 0x511   :  { %8957 = vmatpush1.bf16.msra.mxu0 %v10877_v4  ;;  %v10969_v4 = vld [vmem:[%s14000_s2 + $0xc24] ss:$16 sps:$4 sm:$0xff]  }
 0x512   :  { %9285 = vmatpush1.bf16.msra.mxu1 %v10880_v29  ;;  %8958 = vmatprep.subr.bf16.mxu0 %v10885_v59  ;;  %v6168_v29 = vpack.c.b16 %v13328_v21, %v13328_v21  ;;  %v10972_v59 = vld [vmem:[%s14000_s2 + $0xc2c] ss:$16 sps:$4 sm:$0xff]   ;;  %v10975_v21 = vld [vmem:[%s14000_s2 + $0xc44] ss:$16 sps:$4 sm:$0xff]  }
 0x513   :  { %9286 = vmatprep.subr.bf16.mxu1 %v10888_v36  ;;  %v10970_v36 = vld [vmem:[%s14000_s2 + $0xc28] ss:$16 sps:$4 sm:$0xff]  }
 0x515   :  { %8959 = vmatpush1.bf16.msra.mxu0 %v10883_v49  ;;  %v10978_v49 = vld [vmem:[%s14000_s2 + $0xc4c] ss:$16 sps:$4 sm:$0xff]  }
 0x516   :  { %9287 = vmatpush1.bf16.msra.mxu1 %v10886_v7  ;;  %8960 = vmatprep.subr.bf16.mxu0 %v10891_v8  ;;  %v10973_v7 = vld [vmem:[%s14000_s2 + $0xc40] ss:$16 sps:$4 sm:$0xff]   ;;  %v10976_v8 = vld [vmem:[%s14000_s2 + $0xc48] ss:$16 sps:$4 sm:$0xff]  }
 0x517   :  { %9288 = vmatprep.subr.bf16.mxu1 %v10894_v10  ;;  %v10981_v10 = vld [vmem:[%s14000_s2 + $0xc64] ss:$16 sps:$4 sm:$0xff]  }
 0x519   :  { %8961 = vmatpush1.bf16.msra.mxu0 %v10889_v2  ;;  %v10984_v2 = vld [vmem:[%s14000_s2 + $0xc6c] ss:$16 sps:$4 sm:$0xff]  }
 0x51a   :  { %9289 = vmatpush1.bf16.msra.mxu1 %v10892_v11  ;;  %8962 = vmatprep.subr.bf16.mxu0 %v10897_v39  ;;  %v10979_v11 = vld [vmem:[%s14000_s2 + $0xc60] ss:$16 sps:$4 sm:$0xff]   ;;  %v10982_v39 = vld [vmem:[%s14000_s2 + $0xc68] ss:$16 sps:$4 sm:$0xff]  }
 0x51b   :  { %9290 = vmatprep.subr.bf16.mxu1 %v10900_v28  ;;  %v10987_v28 = vld [vmem:[%s14000_s2 + $0xc84] ss:$16 sps:$4 sm:$0xff]  }
 0x51d   :  { %8963 = vmatpush1.bf16.msra.mxu0 %v10895_v5  ;;  %v10990_v5 = vld [vmem:[%s14000_s2 + $0xc8c] ss:$16 sps:$4 sm:$0xff]  }
 0x51e   :  { %9291 = vmatpush1.bf16.msra.mxu1 %v10898_v12  ;;  %8964 = vmatprep.subr.bf16.mxu0 %v10903_v25  ;;  %v10985_v12 = vld [vmem:[%s14000_s2 + $0xc80] ss:$16 sps:$4 sm:$0xff]   ;;  %v10988_v25 = vld [vmem:[%s14000_s2 + $0xc88] ss:$16 sps:$4 sm:$0xff]  }
 0x51f   :  { %9292 = vmatprep.subr.bf16.mxu1 %v10906_v14  ;;  %v10993_v14 = vld [vmem:[%s14000_s2 + $0xca4] ss:$16 sps:$4 sm:$0xff]  }
 0x521   :  { %8965 = vmatpush1.bf16.msra.mxu0 %v10901_v16  ;;  %v10996_v16 = vld [vmem:[%s14000_s2 + $0xcac] ss:$16 sps:$4 sm:$0xff]  }
 0x522   :  { %9293 = vmatpush1.bf16.msra.mxu1 %v10904_v60  ;;  %8966 = vmatprep.subr.bf16.mxu0 %v10909_v41  ;;  %v10991_v60 = vld [vmem:[%s14000_s2 + $0xca0] ss:$16 sps:$4 sm:$0xff]   ;;  %v10994_v41 = vld [vmem:[%s14000_s2 + $0xca8] ss:$16 sps:$4 sm:$0xff]  }
 0x523   :  { %9294 = vmatprep.subr.bf16.mxu1 %v10912_v13  ;;  %v10999_v13 = vld [vmem:[%s14000_s2 + $0xcc4] ss:$16 sps:$4 sm:$0xff]  }
 0x525   :  { %8967 = vmatpush1.bf16.msra.mxu0 %v10907_v37  ;;  %v11002_v37 = vld [vmem:[%s14000_s2 + $0xccc] ss:$16 sps:$4 sm:$0xff]  }
 0x526   :  { %9295 = vmatpush1.bf16.msra.mxu1 %v10910_v6  ;;  %8968 = vmatprep.subr.bf16.mxu0 %v10915_v30  ;;  %v10997_v6 = vld [vmem:[%s14000_s2 + $0xcc0] ss:$16 sps:$4 sm:$0xff]   ;;  %v11000_v30 = vld [vmem:[%s14000_s2 + $0xcc8] ss:$16 sps:$4 sm:$0xff]  }
 0x527   :  { %9296 = vmatprep.subr.bf16.mxu1 %v10918_v9  ;;  %v11005_v9 = vld [vmem:[%s14000_s2 + $0xce4] ss:$16 sps:$4 sm:$0xff]  }
 0x529   :  { %8969 = vmatpush1.bf16.msra.mxu0 %v10913_v15  ;;  %v11008_v15 = vld [vmem:[%s14000_s2 + $0xcec] ss:$16 sps:$4 sm:$0xff]  }
 0x52a   :  { %9297 = vmatpush1.bf16.msra.mxu1 %v10916_v31  ;;  %8970 = vmatprep.subr.bf16.mxu0 %v10921_v33  ;;  %v11003_v31 = vld [vmem:[%s14000_s2 + $0xce0] ss:$16 sps:$4 sm:$0xff]   ;;  %v11006_v33 = vld [vmem:[%s14000_s2 + $0xce8] ss:$16 sps:$4 sm:$0xff]  }
 0x52b   :  { %9298 = vmatprep.subr.bf16.mxu1 %v10924_v35  ;;  %v11011_v35 = vld [vmem:[%s14000_s2 + $0xd04] ss:$16 sps:$4 sm:$0xff]  }
 0x52d   :  { %8971 = vmatpush1.bf16.msra.mxu0 %v10919_v40  ;;  %v11014_v40 = vld [vmem:[%s14000_s2 + $0xd0c] ss:$16 sps:$4 sm:$0xff]  }
 0x52e   :  { %9299 = vmatpush1.bf16.msra.mxu1 %v10922_v56  ;;  %8972 = vmatprep.subr.bf16.mxu0 %v10927_v24  ;;  %v11009_v56 = vld [vmem:[%s14000_s2 + $0xd00] ss:$16 sps:$4 sm:$0xff]   ;;  %v11012_v24 = vld [vmem:[%s14000_s2 + $0xd08] ss:$16 sps:$4 sm:$0xff]  }
 0x52f   :  { %9300 = vmatprep.subr.bf16.mxu1 %v10930_v47  ;;  %v11017_v47 = vld [vmem:[%s14000_s2 + $0xd24] ss:$16 sps:$4 sm:$0xff]  }
 0x531   :  { %8973 = vmatpush1.bf16.msra.mxu0 %v10925_v32  ;;  %v11020_v32 = vld [vmem:[%s14000_s2 + $0xd2c] ss:$16 sps:$4 sm:$0xff]  }
 0x532   :  { %9301 = vmatpush1.bf16.msra.mxu1 %v10928_v23  ;;  %8974 = vmatprep.subr.bf16.mxu0 %v10933_v46  ;;  %v11015_v23 = vld [vmem:[%s14000_s2 + $0xd20] ss:$16 sps:$4 sm:$0xff]   ;;  %v11018_v46 = vld [vmem:[%s14000_s2 + $0xd28] ss:$16 sps:$4 sm:$0xff]  }
 0x533   :  { %9302 = vmatprep.subr.bf16.mxu1 %v10936_v26  ;;  %v11023_v26 = vld [vmem:[%s14000_s2 + $0xd44] ss:$16 sps:$4 sm:$0xff]  }
 0x535   :  { %8975 = vmatpush1.bf16.msra.mxu0 %v10931_v45  ;;  %v11026_v45 = vld [vmem:[%s14000_s2 + $0xd4c] ss:$16 sps:$4 sm:$0xff]  }
 0x536   :  { %9303 = vmatpush1.bf16.msra.mxu1 %v10934_v27  ;;  %8976 = vmatprep.subr.bf16.mxu0 %v10939_v19  ;;  %v11021_v27 = vld [vmem:[%s14000_s2 + $0xd40] ss:$16 sps:$4 sm:$0xff]   ;;  %v11024_v19 = vld [vmem:[%s14000_s2 + $0xd48] ss:$16 sps:$4 sm:$0xff]  }
 0x537   :  { %9304 = vmatprep.subr.bf16.mxu1 %v10942_v42  ;;  %v11029_v42 = vld [vmem:[%s14000_s2 + $0xd64] ss:$16 sps:$4 sm:$0xff]  }
 0x539   :  { %8977 = vmatpush1.bf16.msra.mxu0 %v10937_v34  ;;  %v11032_v34 = vld [vmem:[%s14000_s2 + $0xd6c] ss:$16 sps:$4 sm:$0xff]  }
 0x53a   :  { %9305 = vmatpush1.bf16.msra.mxu1 %v10940_v52  ;;  %8978 = vmatprep.subr.bf16.mxu0 %v10945_v48  ;;  %v11027_v52 = vld [vmem:[%s14000_s2 + $0xd60] ss:$16 sps:$4 sm:$0xff]   ;;  %v11030_v48 = vld [vmem:[%s14000_s2 + $0xd68] ss:$16 sps:$4 sm:$0xff]  }
 0x53b   :  { %9306 = vmatprep.subr.bf16.mxu1 %v10948_v54  ;;  %v11035_v54 = vld [vmem:[%s14000_s2 + $0xd84] ss:$16 sps:$4 sm:$0xff]  }
 0x53d   :  { %8979 = vmatpush1.bf16.msra.mxu0 %v10943_v22  ;;  %v11038_v22 = vld [vmem:[%s14000_s2 + $0xd8c] ss:$16 sps:$4 sm:$0xff]  }
 0x53e   :  { %9307 = vmatpush1.bf16.msra.mxu1 %v10946_v57  ;;  %8980 = vmatprep.subr.bf16.mxu0 %v10951_v58  ;;  %v11033_v57 = vld [vmem:[%s14000_s2 + $0xd80] ss:$16 sps:$4 sm:$0xff]   ;;  %v11036_v58 = vld [vmem:[%s14000_s2 + $0xd88] ss:$16 sps:$4 sm:$0xff]  }
 0x53f   :  { %9308 = vmatprep.subr.bf16.mxu1 %v10954_v55  ;;  %v11041_v55 = vld [vmem:[%s14000_s2 + $0xda4] ss:$16 sps:$4 sm:$0xff]  }
 0x541   :  { %8981 = vmatpush1.bf16.msra.mxu0 %v10949_v17  ;;  %v11044_v17 = vld [vmem:[%s14000_s2 + $0xdac] ss:$16 sps:$4 sm:$0xff]  }
 0x542   :  { %9309 = vmatpush1.bf16.msra.mxu1 %v10952_v50  ;;  %8982 = vmatprep.subr.bf16.mxu0 %v10957_v61  ;;  %v11039_v50 = vld [vmem:[%s14000_s2 + $0xda0] ss:$16 sps:$4 sm:$0xff]   ;;  %v11042_v61 = vld [vmem:[%s14000_s2 + $0xda8] ss:$16 sps:$4 sm:$0xff]  }
 0x543   :  { %9310 = vmatprep.subr.bf16.mxu1 %v10960_v62  ;;  %v11047_v62 = vld [vmem:[%s14000_s2 + $0xdc4] ss:$16 sps:$4 sm:$0xff]  }
 0x545   :  { %8983 = vmatpush1.bf16.msra.mxu0 %v10955_v1  ;;  %v11050_v1 = vld [vmem:[%s14000_s2 + $0xdcc] ss:$16 sps:$4 sm:$0xff]  }
 0x546   :  { %9311 = vmatpush1.bf16.msra.mxu1 %v10958_v63  ;;  %8993 = vmatprep.subr.bf16.mxu0 %v10963_v0  ;;  %v11045_v63 = vld [vmem:[%s14000_s2 + $0xdc0] ss:$16 sps:$4 sm:$0xff]   ;;  %v11048_v0 = vld [vmem:[%s14000_s2 + $0xdc8] ss:$16 sps:$4 sm:$0xff]  }
 0x547   :  { %9321 = vmatprep.subr.bf16.mxu1 %v10966_v53  ;;  %v11053_v53 = vld [vmem:[%s14000_s2 + $0xde4] ss:$16 sps:$4 sm:$0xff]  }
 0x548   :  { %8985 = vmatmul.mubr.bf16.vlgmr.msra.gmra.mrb[0].mxu0 %v6165_v38 }
 0x549   :  { %9313 = vmatmul.mubr.bf16.vlgmr.msra.gmra.mrb[0].mxu1 %v6165_v38  ;;  %8994 = vmatpush1.bf16.msra.mxu0 %v10961_v20  ;;  %v11056_v20 = vld [vmem:[%s14000_s2 + $0xdec] ss:$16 sps:$4 sm:$0xff]   ;;  %v11051_v38 = vld [vmem:[%s14000_s2 + $0xde0] ss:$16 sps:$4 sm:$0xff]  }
 0x54a   :  { %9025 = vmatprep.mubr.bf16.mxu0 %v6168_v29  ;;  %9322 = vmatpush1.bf16.msra.mxu1 %v10964_v3  ;;  %v11054_v3 = vld [vmem:[%s14000_s2 + $0xde8] ss:$16 sps:$4 sm:$0xff]  }
 0x54b   :  { %9353 = vmatprep.mubr.bf16.mxu1 %v6168_v29  ;;  %8995 = vmatprep.subr.bf16.mxu0 %v10969_v4  ;;  %v11059_v4 = vld [vmem:[%s14000_s2 + $0xe04] ss:$16 sps:$4 sm:$0xff]   ;;  %v11062_v29 = vld [vmem:[%s14000_s2 + $0xe0c] ss:$16 sps:$4 sm:$0xff]  }
 0x54c   :  { %9323 = vmatprep.subr.bf16.mxu1 %v10972_v59  ;;  %v11057_v59 = vld [vmem:[%s14000_s2 + $0xe00] ss:$16 sps:$4 sm:$0xff]  }
 0x54d   :  { %8996 = vmatpush1.bf16.msra.mxu0 %v10967_v51  ;;  %v6167_v51 = vpack.c.b16 %v13319_v44, %v13319_v44  ;;  %v11063_v44 = vld [vmem:[%s14000_s2 + $0xe20] ss:$16 sps:$4 sm:$0xff]  }
 0x54e   :  { %9324 = vmatpush1.bf16.msra.mxu1 %v10970_v36  ;;  %8997 = vmatprep.subr.bf16.mxu0 %v10975_v21  ;;  %v11060_v36 = vld [vmem:[%s14000_s2 + $0xe08] ss:$16 sps:$4 sm:$0xff]   ;;  %v11065_v21 = vld [vmem:[%s14000_s2 + $0xe24] ss:$16 sps:$4 sm:$0xff]  }
 0x54f   :  { %9325 = vmatprep.subr.bf16.mxu1 %v10978_v49  ;;  %v6170_v49 = vpack.c.b16 %v13337_v43, %v13337_v43  ;;  %v11071_v43 = vld [vmem:[%s14000_s2 + $0xe44] ss:$16 sps:$4 sm:$0xff]  }
 0x551   :  { %8998 = vmatpush1.bf16.msra.mxu0 %v10973_v7  ;;  %v11068_v7 = vld [vmem:[%s14000_s2 + $0xe2c] ss:$16 sps:$4 sm:$0xff]  }
 0x552   :  { %9326 = vmatpush1.bf16.msra.mxu1 %v10976_v8  ;;  %8999 = vmatprep.subr.bf16.mxu0 %v10981_v10  ;;  %v11066_v8 = vld [vmem:[%s14000_s2 + $0xe28] ss:$16 sps:$4 sm:$0xff]   ;;  %v11074_v10 = vld [vmem:[%s14000_s2 + $0xe4c] ss:$16 sps:$4 sm:$0xff]  }
 0x553   :  { %9327 = vmatprep.subr.bf16.mxu1 %v10984_v2  ;;  %v11069_v2 = vld [vmem:[%s14000_s2 + $0xe40] ss:$16 sps:$4 sm:$0xff]  }
 0x555   :  { %9000 = vmatpush1.bf16.msra.mxu0 %v10979_v11  ;;  %v11072_v11 = vld [vmem:[%s14000_s2 + $0xe48] ss:$16 sps:$4 sm:$0xff]  }
 0x556   :  { %9328 = vmatpush1.bf16.msra.mxu1 %v10982_v39  ;;  %9001 = vmatprep.subr.bf16.mxu0 %v10987_v28  ;;  %v11077_v39 = vld [vmem:[%s14000_s2 + $0xe64] ss:$16 sps:$4 sm:$0xff]   ;;  %v11080_v28 = vld [vmem:[%s14000_s2 + $0xe6c] ss:$16 sps:$4 sm:$0xff]  }
 0x557   :  { %9329 = vmatprep.subr.bf16.mxu1 %v10990_v5  ;;  %v11075_v5 = vld [vmem:[%s14000_s2 + $0xe60] ss:$16 sps:$4 sm:$0xff]  }
 0x559   :  { %9002 = vmatpush1.bf16.msra.mxu0 %v10985_v12  ;;  %v11078_v12 = vld [vmem:[%s14000_s2 + $0xe68] ss:$16 sps:$4 sm:$0xff]  }
 0x55a   :  { %9330 = vmatpush1.bf16.msra.mxu1 %v10988_v25  ;;  %9003 = vmatprep.subr.bf16.mxu0 %v10993_v14  ;;  %v11083_v25 = vld [vmem:[%s14000_s2 + $0xe84] ss:$16 sps:$4 sm:$0xff]   ;;  %v11086_v14 = vld [vmem:[%s14000_s2 + $0xe8c] ss:$16 sps:$4 sm:$0xff]  }
 0x55b   :  { %9331 = vmatprep.subr.bf16.mxu1 %v10996_v16  ;;  %v11081_v16 = vld [vmem:[%s14000_s2 + $0xe80] ss:$16 sps:$4 sm:$0xff]  }
 0x55d   :  { %9004 = vmatpush1.bf16.msra.mxu0 %v10991_v60  ;;  %v11084_v60 = vld [vmem:[%s14000_s2 + $0xe88] ss:$16 sps:$4 sm:$0xff]  }
 0x55e   :  { %9332 = vmatpush1.bf16.msra.mxu1 %v10994_v41  ;;  %9005 = vmatprep.subr.bf16.mxu0 %v10999_v13  ;;  %v11089_v41 = vld [vmem:[%s14000_s2 + $0xea4] ss:$16 sps:$4 sm:$0xff]   ;;  %v11092_v13 = vld [vmem:[%s14000_s2 + $0xeac] ss:$16 sps:$4 sm:$0xff]  }
 0x55f   :  { %9333 = vmatprep.subr.bf16.mxu1 %v11002_v37  ;;  %v11087_v37 = vld [vmem:[%s14000_s2 + $0xea0] ss:$16 sps:$4 sm:$0xff]  }
 0x561   :  { %9006 = vmatpush1.bf16.msra.mxu0 %v10997_v6  ;;  %v11090_v6 = vld [vmem:[%s14000_s2 + $0xea8] ss:$16 sps:$4 sm:$0xff]  }
 0x562   :  { %9334 = vmatpush1.bf16.msra.mxu1 %v11000_v30  ;;  %9007 = vmatprep.subr.bf16.mxu0 %v11005_v9  ;;  %v11095_v30 = vld [vmem:[%s14000_s2 + $0xec4] ss:$16 sps:$4 sm:$0xff]   ;;  %v11098_v9 = vld [vmem:[%s14000_s2 + $0xecc] ss:$16 sps:$4 sm:$0xff]  }
 0x563   :  { %9335 = vmatprep.subr.bf16.mxu1 %v11008_v15  ;;  %v11093_v15 = vld [vmem:[%s14000_s2 + $0xec0] ss:$16 sps:$4 sm:$0xff]  }
 0x565   :  { %9008 = vmatpush1.bf16.msra.mxu0 %v11003_v31  ;;  %v11096_v31 = vld [vmem:[%s14000_s2 + $0xec8] ss:$16 sps:$4 sm:$0xff]  }
 0x566   :  { %9336 = vmatpush1.bf16.msra.mxu1 %v11006_v33  ;;  %9009 = vmatprep.subr.bf16.mxu0 %v11011_v35  ;;  %v11101_v33 = vld [vmem:[%s14000_s2 + $0xee4] ss:$16 sps:$4 sm:$0xff]   ;;  %v11104_v35 = vld [vmem:[%s14000_s2 + $0xeec] ss:$16 sps:$4 sm:$0xff]  }
 0x567   :  { %9337 = vmatprep.subr.bf16.mxu1 %v11014_v40  ;;  %v11099_v40 = vld [vmem:[%s14000_s2 + $0xee0] ss:$16 sps:$4 sm:$0xff]  }
 0x569   :  { %9010 = vmatpush1.bf16.msra.mxu0 %v11009_v56  ;;  %v11102_v56 = vld [vmem:[%s14000_s2 + $0xee8] ss:$16 sps:$4 sm:$0xff]  }
 0x56a   :  { %9338 = vmatpush1.bf16.msra.mxu1 %v11012_v24  ;;  %9011 = vmatprep.subr.bf16.mxu0 %v11017_v47  ;;  %v11107_v24 = vld [vmem:[%s14000_s2 + $0xf04] ss:$16 sps:$4 sm:$0xff]   ;;  %v11110_v47 = vld [vmem:[%s14000_s2 + $0xf0c] ss:$16 sps:$4 sm:$0xff]  }
 0x56b   :  { %9339 = vmatprep.subr.bf16.mxu1 %v11020_v32  ;;  %v11105_v32 = vld [vmem:[%s14000_s2 + $0xf00] ss:$16 sps:$4 sm:$0xff]  }
 0x56d   :  { %9012 = vmatpush1.bf16.msra.mxu0 %v11015_v23  ;;  %v11108_v23 = vld [vmem:[%s14000_s2 + $0xf08] ss:$16 sps:$4 sm:$0xff]  }
 0x56e   :  { %9340 = vmatpush1.bf16.msra.mxu1 %v11018_v46  ;;  %9013 = vmatprep.subr.bf16.mxu0 %v11023_v26  ;;  %v11113_v46 = vld [vmem:[%s14000_s2 + $0xf24] ss:$16 sps:$4 sm:$0xff]   ;;  %v11116_v26 = vld [vmem:[%s14000_s2 + $0xf2c] ss:$16 sps:$4 sm:$0xff]  }
 0x56f   :  { %9341 = vmatprep.subr.bf16.mxu1 %v11026_v45  ;;  %v11111_v45 = vld [vmem:[%s14000_s2 + $0xf20] ss:$16 sps:$4 sm:$0xff]  }
 0x571   :  { %9014 = vmatpush1.bf16.msra.mxu0 %v11021_v27  ;;  %v11114_v27 = vld [vmem:[%s14000_s2 + $0xf28] ss:$16 sps:$4 sm:$0xff]  }
 0x572   :  { %9342 = vmatpush1.bf16.msra.mxu1 %v11024_v19  ;;  %9015 = vmatprep.subr.bf16.mxu0 %v11029_v42  ;;  %v11119_v19 = vld [vmem:[%s14000_s2 + $0xf44] ss:$16 sps:$4 sm:$0xff]   ;;  %v11122_v42 = vld [vmem:[%s14000_s2 + $0xf4c] ss:$16 sps:$4 sm:$0xff]  }
 0x573   :  { %9343 = vmatprep.subr.bf16.mxu1 %v11032_v34  ;;  %v11117_v34 = vld [vmem:[%s14000_s2 + $0xf40] ss:$16 sps:$4 sm:$0xff]  }
 0x575   :  { %9016 = vmatpush1.bf16.msra.mxu0 %v11027_v52  ;;  %v11120_v52 = vld [vmem:[%s14000_s2 + $0xf48] ss:$16 sps:$4 sm:$0xff]  }
 0x576   :  { %9344 = vmatpush1.bf16.msra.mxu1 %v11030_v48  ;;  %9017 = vmatprep.subr.bf16.mxu0 %v11035_v54  ;;  %v11125_v48 = vld [vmem:[%s14000_s2 + $0xf64] ss:$16 sps:$4 sm:$0xff]   ;;  %v11128_v54 = vld [vmem:[%s14000_s2 + $0xf6c] ss:$16 sps:$4 sm:$0xff]  }
 0x577   :  { %9345 = vmatprep.subr.bf16.mxu1 %v11038_v22  ;;  %v11123_v22 = vld [vmem:[%s14000_s2 + $0xf60] ss:$16 sps:$4 sm:$0xff]  }
 0x579   :  { %9018 = vmatpush1.bf16.msra.mxu0 %v11033_v57  ;;  %v11126_v57 = vld [vmem:[%s14000_s2 + $0xf68] ss:$16 sps:$4 sm:$0xff]  }
 0x57a   :  { %9346 = vmatpush1.bf16.msra.mxu1 %v11036_v58  ;;  %9019 = vmatprep.subr.bf16.mxu0 %v11041_v55  ;;  %v11131_v58 = vld [vmem:[%s14000_s2 + $0xf84] ss:$16 sps:$4 sm:$0xff]   ;;  %v11134_v55 = vld [vmem:[%s14000_s2 + $0xf8c] ss:$16 sps:$4 sm:$0xff]  }
 0x57b   :  { %9347 = vmatprep.subr.bf16.mxu1 %v11044_v17  ;;  %v11129_v17 = vld [vmem:[%s14000_s2 + $0xf80] ss:$16 sps:$4 sm:$0xff]  }
 0x57d   :  { %9020 = vmatpush1.bf16.msra.mxu0 %v11039_v50  ;;  %v11132_v50 = vld [vmem:[%s14000_s2 + $0xf88] ss:$16 sps:$4 sm:$0xff]  }
 0x57e   :  { %9348 = vmatpush1.bf16.msra.mxu1 %v11042_v61  ;;  %9021 = vmatprep.subr.bf16.mxu0 %v11047_v62  ;;  %v11137_v61 = vld [vmem:[%s14000_s2 + $0xfa4] ss:$16 sps:$4 sm:$0xff]   ;;  %v11140_v62 = vld [vmem:[%s14000_s2 + $0xfac] ss:$16 sps:$4 sm:$0xff]  }
 0x57f   :  { %9349 = vmatprep.subr.bf16.mxu1 %v11050_v1  ;;  %v11135_v1 = vld [vmem:[%s14000_s2 + $0xfa0] ss:$16 sps:$4 sm:$0xff]  }
 0x581   :  { %9022 = vmatpush1.bf16.msra.mxu0 %v11045_v63  ;;  %v11138_v63 = vld [vmem:[%s14000_s2 + $0xfa8] ss:$16 sps:$4 sm:$0xff]  }
 0x582   :  { %9350 = vmatpush1.bf16.msra.mxu1 %v11048_v0  ;;  %9023 = vmatprep.subr.bf16.mxu0 %v11053_v53  ;;  %v11143_v0 = vld [vmem:[%s14000_s2 + $0xfc4] ss:$16 sps:$4 sm:$0xff]   ;;  %v11146_v53 = vld [vmem:[%s14000_s2 + $0xfcc] ss:$16 sps:$4 sm:$0xff]  }
 0x583   :  { %9351 = vmatprep.subr.bf16.mxu1 %v11056_v20  ;;  %v11141_v20 = vld [vmem:[%s14000_s2 + $0xfc0] ss:$16 sps:$4 sm:$0xff]  }
 0x585   :  { %9024 = vmatpush1.bf16.msra.mxu0 %v11051_v38  ;;  %v11144_v38 = vld [vmem:[%s14000_s2 + $0xfc8] ss:$16 sps:$4 sm:$0xff]  }
 0x586   :  { %9352 = vmatpush1.bf16.msra.mxu1 %v11054_v3  ;;  %9034 = vmatprep.subr.bf16.mxu0 %v11059_v4  ;;  %v11149_v3 = vld [vmem:[%s14000_s2 + $0xfe4] ss:$16 sps:$4 sm:$0xff]   ;;  %v11152_v4 = vld [vmem:[%s14000_s2 + $0xfec] ss:$16 sps:$4 sm:$0xff]  }
 0x587   :  { %9362 = vmatprep.subr.bf16.mxu1 %v11062_v29  ;;  %v11147_v29 = vld [vmem:[%s14000_s2 + $0xfe0] ss:$16 sps:$4 sm:$0xff]  }
 0x588   :  { %9026 = vmatmul.mubr.bf16.vlgmr.msra.gmra.mrb[0].mxu0 %v6167_v51 }
 0x589   :  { %9354 = vmatmul.mubr.bf16.vlgmr.msra.gmra.mrb[0].mxu1 %v6167_v51  ;;  %9035 = vmatpush1.bf16.msra.mxu0 %v11057_v59  ;;  %v11150_v59 = vld [vmem:[%s14000_s2 + $0xfe8] ss:$16 sps:$4 sm:$0xff]   ;;  %v6169_v51 = vpack.c.b16 %v13322_v18, %v13322_v18 }
 0x58a   :  { %9066 = vmatprep.mubr.bf16.mxu0 %v6170_v49  ;;  %9363 = vmatpush1.bf16.msra.mxu1 %v11060_v36  ;;  %v6054_v36 = vlaneseq }
 0x58b   :  { %9394 = vmatprep.mubr.bf16.mxu1 %v6170_v49  ;;  %9036 = vmatprep.subr.bf16.mxu0 %v11065_v21 }
 0x58c   :  { %9364 = vmatprep.subr.bf16.mxu1 %v11068_v7  ;;  %v6055_v21 = vshrl.u32 %v6054_v36, 7  ;;  %v6052_v7 = vld [vmem:[%s14001_s3] sm:$0xf] }
 0x58d   :  { %9037 = vmatpush1.bf16.msra.mxu0 %v11063_v44 }
 0x58e   :  { %9365 = vmatpush1.bf16.msra.mxu1 %v11066_v8  ;;  %9038 = vmatprep.subr.bf16.mxu0 %v11071_v43  ;;  %v6056_v49 = vsub.s32 0, %v6055_v21  ;;  %v6064_v44 = vsub.s32 2, %v6055_v21  ;;  %v6060_v8 = vsub.s32 1, %v6055_v21  ;;  %v6068_v43 = vsub.s32 3, %v6055_v21 }
 0x58f   :  { %9366 = vmatprep.subr.bf16.mxu1 %v11074_v10 }
 0x590   :  { %v6057_v10 = vrot.slane %v6052_v7, %v6056_v49  ;;  %v6061_v18 = vrot.slane %v6052_v7, %v6060_v8 }
 0x591   :  { %9039 = vmatpush1.bf16.msra.mxu0 %v11069_v2  ;;  %v9407_v2 = vld [vmem:[%s14002_s4] sm:$0xf] }
 0x592   :  { %9367 = vmatpush1.bf16.msra.mxu1 %v11072_v11  ;;  %9040 = vmatprep.subr.bf16.mxu0 %v11077_v39  ;;  %v6065_v11 = vrot.slane %v6052_v7, %v6064_v44  ;;  %v6069_v39 = vrot.slane %v6052_v7, %v6068_v43 }
 0x593   :  { %9368 = vmatprep.subr.bf16.mxu1 %v11080_v28 }
 0x595   :  { %9041 = vmatpush1.bf16.msra.mxu0 %v11075_v5 }
 0x596   :  { %9369 = vmatpush1.bf16.msra.mxu1 %v11078_v12  ;;  %9042 = vmatprep.subr.bf16.mxu0 %v11083_v25  ;;  %v9412_v12 = vrot.slane %v9407_v2, %v6056_v49 }
 0x597   :  { %9370 = vmatprep.subr.bf16.mxu1 %v11086_v14 }
 0x599   :  { %9043 = vmatpush1.bf16.msra.mxu0 %v11081_v16 }
 0x59a   :  { %9371 = vmatpush1.bf16.msra.mxu1 %v11084_v60  ;;  %9044 = vmatprep.subr.bf16.mxu0 %v11089_v41  ;;  %v9420_v60 = vrot.slane %v9407_v2, %v6064_v44 }
 0x59b   :  { %9372 = vmatprep.subr.bf16.mxu1 %v11092_v13  ;;  %v9416_v13 = vrot.slane %v9407_v2, %v6060_v8 }
 0x59d   :  { %9045 = vmatpush1.bf16.msra.mxu0 %v11087_v37 }
 0x59e   :  { %9373 = vmatpush1.bf16.msra.mxu1 %v11090_v6  ;;  %9046 = vmatprep.subr.bf16.mxu0 %v11095_v30 }
 0x59f   :  { %9374 = vmatprep.subr.bf16.mxu1 %v11098_v9 }
 0x5a1   :  { %9047 = vmatpush1.bf16.msra.mxu0 %v11093_v15 }
 0x5a2   :  { %9375 = vmatpush1.bf16.msra.mxu1 %v11096_v31  ;;  %9048 = vmatprep.subr.bf16.mxu0 %v11101_v33 }
 0x5a3   :  { %9376 = vmatprep.subr.bf16.mxu1 %v11104_v35 }
 0x5a5   :  { %9049 = vmatpush1.bf16.msra.mxu0 %v11099_v40 }
 0x5a6   :  { %9377 = vmatpush1.bf16.msra.mxu1 %v11102_v56  ;;  %9050 = vmatprep.subr.bf16.mxu0 %v11107_v24  ;;  %v9424_v56 = vrot.slane %v9407_v2, %v6068_v43 }
 0x5a7   :  { %9378 = vmatprep.subr.bf16.mxu1 %v11110_v47 }
 0x5a9   :  { %9051 = vmatpush1.bf16.msra.mxu0 %v11105_v32 }
 0x5aa   :  { %9379 = vmatpush1.bf16.msra.mxu1 %v11108_v23  ;;  %9052 = vmatprep.subr.bf16.mxu0 %v11113_v46 }
 0x5ab   :  { %9380 = vmatprep.subr.bf16.mxu1 %v11116_v26 }
 0x5ad   :  { %9053 = vmatpush1.bf16.msra.mxu0 %v11111_v45 }
 0x5ae   :  { %9381 = vmatpush1.bf16.msra.mxu1 %v11114_v27  ;;  %9054 = vmatprep.subr.bf16.mxu0 %v11119_v19 }
 0x5af   :  { %9382 = vmatprep.subr.bf16.mxu1 %v11122_v42 }
 0x5b1   :  { %9055 = vmatpush1.bf16.msra.mxu0 %v11117_v34 }
 0x5b2   :  { %9383 = vmatpush1.bf16.msra.mxu1 %v11120_v52  ;;  %9056 = vmatprep.subr.bf16.mxu0 %v11125_v48  ;;  %v9444_v48 = vstv %s14003_s5 }
 0x5b3   :  { %9384 = vmatprep.subr.bf16.mxu1 %v11128_v54 }
 0x5b5   :  { %9057 = vmatpush1.bf16.msra.mxu0 %v11123_v22 }
 0x5b6   :  { %9385 = vmatpush1.bf16.msra.mxu1 %v11126_v57  ;;  %9058 = vmatprep.subr.bf16.mxu0 %v11131_v58 }
 0x5b7   :  { %9386 = vmatprep.subr.bf16.mxu1 %v11134_v55 }
 0x5b9   :  { %9059 = vmatpush1.bf16.msra.mxu0 %v11129_v17 }
 0x5ba   :  { %9387 = vmatpush1.bf16.msra.mxu1 %v11132_v50  ;;  %9060 = vmatprep.subr.bf16.mxu0 %v11137_v61 }
 0x5bb   :  { %9388 = vmatprep.subr.bf16.mxu1 %v11140_v62 }
 0x5bd   :  { %9061 = vmatpush1.bf16.msra.mxu0 %v11135_v1 }
 0x5be   :  { %9389 = vmatpush1.bf16.msra.mxu1 %v11138_v63  ;;  %9062 = vmatprep.subr.bf16.mxu0 %v11143_v0 }
 0x5bf   :  { %9390 = vmatprep.subr.bf16.mxu1 %v11146_v53 }
 0x5c1   :  { %9063 = vmatpush1.bf16.msra.mxu0 %v11141_v20 }
 0x5c2   :  { %9391 = vmatpush1.bf16.msra.mxu1 %v11144_v38  ;;  %9064 = vmatprep.subr.bf16.mxu0 %v11149_v3 }
 0x5c3   :  { %9392 = vmatprep.subr.bf16.mxu1 %v11152_v4 }
 0x5c5   :  { %9065 = vmatpush1.bf16.msra.mxu0 %v11147_v29 }
 0x5c6   :  { %9393 = vmatpush1.bf16.msra.mxu1 %v11150_v59 }
 0x5c8   :  { %9067 = vmatmul.mubr.bf16.vlgmr.msra.gmra.mrb[0].mxu0 %v6169_v51 }
 0x5c9   :  { %9395 = vmatmul.mubr.bf16.vlgmr.msra.gmra.mrb[0].mxu1 %v6169_v51 }
 0x69b   :  { %v9068_v28 = vpop.f32.mrb[0].mxu0 }
 0x69c   :  { %v10276_v5 = vadd.f32 %v9068_v28, %v6057_v10  ;;  %v9396_v25 = vpop.f32.mrb[0].mxu1  ;;  %v9070_v14 = vpop.f32.mrb[1].mxu0 }
 0x69d   :  { %v10278_v16 = vadd.f32 %v9396_v25, %v6065_v11  ;;  %v10277_v41 = vadd.f32 %v9070_v14, %v6061_v18  ;;  %v9398_v37 = vpop.f32.mrb[1].mxu1  ;;  %v9072_v6 = vpop.f32.mrb[2].mxu0 }
 0x69e   :  { %v9403_v30 = vmax.f32 %v10276_v5, 0.0  ;;  %v10279_v9 = vadd.f32 %v9398_v37, %v6069_v39  ;;  %v9400_v15 = vpop.f32.mrb[2].mxu1  ;;  %v9073_v31 = vpop.f32.mrb[3].mxu0 }
 0x69f   :  { %v9405_v33 = vmax.f32 %v10278_v16, 0.0  ;;  %v9404_v35 = vmax.f32 %v10277_v41, 0.0  ;;  %v9401_v40 = vpop.f32.mrb[3].mxu1 }
 0x6a0   :  { %v9429_v24 = vmul.f32 %v9412_v12, %v9403_v30  ;;  %v9406_v47 = vmax.f32 %v10279_v9, 0.0 }
 0x6a1   :  { %v9431_v32 = vmul.f32 %v9420_v60, %v9405_v33  ;;  %v9430_v23 = vmul.f32 %v9416_v13, %v9404_v35 }
 0x6a2   :  { %v9434_v46 = vsel %vm9433_vm3, %v9429_v24, 0.0  ;;  %v9432_v26 = vmul.f32 %v9424_v56, %v9406_v47 }
 0x6a3   :  { %v9435_v45 = vsel %vm9433_vm3, %v9430_v23, 0.0  ;;  %v9437_v19 = vsel %vm9433_vm3, %v9431_v32, 0.0 }
 0x6a4   :  { %v9436_v27 = vadd.f32 %v9435_v45, %v9434_v46  ;;  %v9439_v34 = vsel %vm9433_vm3, %v9432_v26, 0.0 }
 0x6a6   :  { %v9438_v42 = vadd.f32 %v9437_v19, %v9436_v27 }
 0x6a8   :  { %v9440_v52 = vadd.f32 %v9439_v34, %v9438_v42 }
 0x6aa   :  { %9441 = vadd.xlane.f32.xlu0 %v9440_v52 }
 0x737   :  { %v9442_v54 = vpop.xlane.xlu0 %9441 }
 0x738   :  { %v9445_v22 = vadd.f32 %v9444_v48, %v9442_v54 }
 0x73a   :  { %9447 = vst.msk [vmem:[%s14004_s6] sm:$0x3] %vm9446_vm4, %v9445_v22 }

</bundles_post_ra>
